<compile_context>
chip_gen: v7x
topology: tpu7x:2x2x1
jax: 0.10.0
libtpu: 0.0.40
codegen_flags: <defaults>
</compile_context>

<pallas_src>
import math

import jax
import jax.numpy as jnp
from jax.experimental import pallas as pl
from jax.experimental.pallas import tpu as pltpu


# ---------------------------------------------------------------------------
# Static 1-D align_corners=True bilinear taps (computed at trace time).
# ---------------------------------------------------------------------------
def _lerp_taps(n_in, n_out):
    taps = []
    scale = (n_in - 1) / (n_out - 1) if n_out > 1 else 0.0
    for o in range(n_out):
        src = o * scale
        i0 = min(int(math.floor(src)), n_in - 1)
        i1 = min(i0 + 1, n_in - 1)
        taps.append((i0, i1, float(src - i0)))
    return taps


# ---------------------------------------------------------------------------
# Fused kernel factory: upsample -> conv3x3+BN+ReLU -> conv3x3+BN+ReLU for
# one image.  Everything stays resident in VMEM.
# ---------------------------------------------------------------------------
def _make_fused_kernel(H, W, C, C1, C2, h_taps, w_taps, fold):
    Ho, Wo = 2 * H, 2 * W
    HWo = Ho * Wo

    def kernel(x_ref, w1_ref, b1_ref, w2_ref, b2_ref, o_ref,
               pad_ref, col_ref, xh_ref):
        # x_ref  : (1, H, W, C)      one input image, NHWC, C = 128, f32
        # w1_ref : (9*C, C1) bf16    conv1 weights, rows ordered (kh, kw, cin)
        # b1_ref : (1, C1)   f32     conv1 bias (BN folded)
        # w2_ref : (9*C1, C2) bf16   conv2 weights
        # b2_ref : (1, C2)   f32     conv2 bias (BN folded)
        # o_ref  : (1, HWo/fold, C2*fold)  lane-dense output slab, f32
        # pad_ref: (Ho+2, Wo+2, C) f32   zero-padded activations (reused)
        # col_ref: (Ho+2, Wo, 3*C) bf16  kw-only im2col scratch (reused)
        # xh_ref : (Ho, W, C) f32        height-upsampled intermediate

        # ---- separable x2 bilinear upsample (align_corners=True) ----------
        # Height: static 2-tap lerp per output row -> xh scratch.
        x3 = x_ref[0]                                        # (H, W, C) f32
        for ho, (i0, i1, f) in enumerate(h_taps):
            top = x3[i0:i0 + 1]
            row = top if f == 0.0 else top + (x3[i1:i1 + 1] - top) * f
            xh_ref[ho:ho + 1, :, :] = row

        # Zero only the 1-px border of the padded buffer (4 thin strips); the
        # interior is fully overwritten below.  Done every grid step because
        # under "parallel" semantics each TensorCore owns its own scratch.
        zr = jnp.zeros((1, Wo + 2, C), jnp.float32)
        pad_ref[0:1, :, :] = zr
        pad_ref[Ho + 1:Ho + 2, :, :] = zr
        zc = jnp.zeros((Ho + 2, 1, C), jnp.float32)
        pad_ref[:, 0:1, :] = zc
        pad_ref[:, Wo + 1:Wo + 2, :] = zc

        # Width: static 2-tap lerp per output column, written straight into
        # the padded buffer's interior.
        for wo, (i0, i1, f) in enumerate(w_taps):
            left = xh_ref[:, i0:i0 + 1, :]
            colv = (left if f == 0.0
                    else left + (xh_ref[:, i1:i1 + 1, :] - left) * f)
            pad_ref[1:Ho + 1, 1 + wo:2 + wo, :] = colv

        def conv3x3(w_ref, b_ref, cin):
            # kw-only (3-tap) im2col over the FULL padded height; for each kh
            # the LHS is a contiguous (HWo, 3*cin) view of col_ref, so each
            # conv is 3 accumulating K=3*cin MXU matmuls with bf16 operands
            # and f32 accumulation (replaces 9 shifted copies + one K=9*cin).
            for kw in range(3):
                col_ref[:, :, kw * cin:(kw + 1) * cin] = (
                    pad_ref[:, kw:kw + Wo, :].astype(col_ref.dtype))
            acc = None
            for kh in range(3):
                lhs = col_ref[kh:kh + Ho, :, :].reshape(HWo, 3 * cin)
                part = jnp.dot(lhs,
                               w_ref[kh * 3 * cin:(kh + 1) * 3 * cin, :],
                               preferred_element_type=jnp.float32)
                acc = part if acc is None else acc + part
            return jnp.maximum(acc + b_ref[...], 0.0)        # folded-BN + ReLU

        # conv1 (C -> C1): result goes back into the padded buffer interior
        # (border stays zero), so conv2 reuses the same scratch.  Requires
        # C1 == C (asserted in the wrapper).
        y1 = conv3x3(w1_ref, b1_ref, C)                      # (HWo, C1) f32
        pad_ref[1:Ho + 1, 1:Wo + 1, :] = y1.reshape(Ho, Wo, C1)

        # conv2 (C1 -> C2), emitted lane-dense: fold `fold` row blocks of the
        # (HWo, C2) result into the lane dim (C2*fold == 128) so the output
        # stores / DMA move full-width, unmasked vregs.
        y2 = conv3x3(w2_ref, b2_ref, C1)                     # (HWo, C2) f32
        if fold > 1:
            rows = HWo // fold
            y2 = jnp.concatenate(
                [y2[i * rows:(i + 1) * rows, :] for i in range(fold)], axis=1)
        o_ref[0] = y2.astype(o_ref.dtype)

    return kernel


# ---------------------------------------------------------------------------
# Public forward: NCHW in, NCHW out (matches the PyTorch module interface)
# ---------------------------------------------------------------------------
def base24_forward(x_nchw, params):
    w1f, b1f, w2f, b2f = params
    N, C, H, W = x_nchw.shape
    Ho, Wo = 2 * H, 2 * W
    C1, C2 = w1f.shape[-1], w2f.shape[-1]
    assert C == 128 and C1 == C, "module fixes in/mid channels at 128"

    # Lane-dense output folding factor (C2=64 -> fold=2 -> 128-lane slab).
    fold = 128 // C2 if (C2 < 128 and 128 % C2 == 0
                         and (Ho * Wo) % (128 // C2) == 0) else 1
    out_rows, out_cols = (Ho * Wo) // fold, C2 * fold

    # TODO(synk): at real resolutions keep the surrounding net in NHWC; these
    # two transposes are full HBM round-trips outside the kernel.
    x_nhwc = jnp.transpose(x_nchw, (0, 2, 3, 1)).astype(jnp.float32)

    h_taps = _lerp_taps(H, Ho)
    w_taps = _lerp_taps(W, Wo)
    kernel = _make_fused_kernel(H, W, C, C1, C2, h_taps, w_taps, fold)

    out_slab = pl.pallas_call(
        kernel,
        out_shape=jax.ShapeDtypeStruct((N, out_rows, out_cols), jnp.float32),
        grid_spec=pltpu.PrefetchScalarGridSpec(
            num_scalar_prefetch=0,
            grid=(N,),
            in_specs=[
                pl.BlockSpec((1, H, W, C), lambda n: (n, 0, 0, 0)),
                pl.BlockSpec((9 * C, C1), lambda n: (0, 0)),
                pl.BlockSpec((1, C1), lambda n: (0, 0)),
                pl.BlockSpec((9 * C1, C2), lambda n: (0, 0)),
                pl.BlockSpec((1, C2), lambda n: (0, 0)),
            ],
            out_specs=pl.BlockSpec((1, out_rows, out_cols),
                                   lambda n: (n, 0, 0)),
            scratch_shapes=[
                pltpu.VMEM((Ho + 2, Wo + 2, C), jnp.float32),   # padded acts
                pltpu.VMEM((Ho + 2, Wo, 3 * C), jnp.bfloat16),  # 3-tap im2col
                pltpu.VMEM((Ho, W, C), jnp.float32),            # height-upsampled
            ],
        ),
        compiler_params=pltpu.CompilerParams(
            dimension_semantics=("parallel",)),   # batch axis across TCs
    )(x_nhwc, w1f, b1f.reshape(1, C1), w2f, b2f.reshape(1, C2))

    # Unfold the lane-dense slab back to (N, Ho*Wo, C2), then NHWC -> NCHW.
    if fold > 1:
        out_flat = jnp.concatenate(
            [out_slab[:, :, i * C2:(i + 1) * C2] for i in range(fold)], axis=1)
    else:
        out_flat = out_slab
    out = out_flat.reshape(N, Ho, Wo, C2)
    return jnp.transpose(out, (0, 3, 1, 2))


# ---------------------------------------------------------------------------
# Parameters (deterministic, matching the PyTorch __init__; BN folded).
# Weights are stored bf16 (MXU operands); biases stay f32.
# ---------------------------------------------------------------------------
def make_params(key):
    k1, k2 = jax.random.split(key)
    eps = 1e-5
    bn_scale = 1.0 / jnp.sqrt(1.0 + eps)   # gamma=1, var=1, mean=0, beta=0

    w1 = jax.random.normal(k1, (3, 3, 128, 128), jnp.float32) * 0.01  # HWIO
    w2 = jax.random.normal(k2, (3, 3, 128, 64), jnp.float32) * 0.01
    b1 = jnp.zeros((128,), jnp.float32)
    b2 = jnp.zeros((64,), jnp.float32)

    w1f = (w1 * bn_scale).reshape(9 * 128, 128).astype(jnp.bfloat16)
    w2f = (w2 * bn_scale).reshape(9 * 128, 64).astype(jnp.bfloat16)
    b1f = b1 * bn_scale
    b2f = b2 * bn_scale
    return (w1f, b1f, w2f, b2f)


# ---------------------------------------------------------------------------
# Pure-JAX (XLA) reference.  It mirrors the kernel's mixed precision: conv
# operands in bf16, accumulation / bias / ReLU / upsample in f32.
# ---------------------------------------------------------------------------
def upsample2x_bilinear_align_corners(x_nhwc):
    N, H, W, C = x_nhwc.shape
    Ho, Wo = 2 * H, 2 * W

    def coords(n_in, n_out):
        src = jnp.arange(n_out, dtype=jnp.float32) * (n_in - 1) / (n_out - 1)
        i0 = jnp.clip(jnp.floor(src).astype(jnp.int32), 0, n_in - 1)
        i1 = jnp.minimum(i0 + 1, n_in - 1)
        return i0, i1, src - i0.astype(jnp.float32)

    y0, y1, fy = coords(H, Ho)
    x0, x1, fx = coords(W, Wo)
    top, bot = x_nhwc[:, y0, :, :], x_nhwc[:, y1, :, :]
    xh = top + (bot - top) * fy[None, :, None, None]
    left, right = xh[:, :, x0, :], xh[:, :, x1, :]
    return left + (right - left) * fx[None, None, :, None]


def base24_reference(x_nchw, params):
    w1f, b1f, w2f, b2f = params

    def conv_bn_relu(x, wflat, b):
        cin, cout = x.shape[-1], wflat.shape[-1]
        w = wflat.reshape(3, 3, cin, cout)                     # bf16
        y = jax.lax.conv_general_dilated(
            x.astype(jnp.bfloat16), w, window_strides=(1, 1), padding="SAME",
            dimension_numbers=("NHWC", "HWIO", "NHWC"),
            preferred_element_type=jnp.float32)
        return jnp.maximum(y + b, 0.0)

    x = jnp.transpose(x_nchw, (0, 2, 3, 1)).astype(jnp.float32)
    x = upsample2x_bilinear_align_corners(x)
    x = conv_bn_relu(x, w1f, b1f)
    x = conv_bn_relu(x, w2f, b2f)
    return jnp.transpose(x, (0, 3, 1, 2))


if __name__ == "__main__":
    key = jax.random.PRNGKey(0)
    kp, kx = jax.random.split(key)

    N, Cin, H, W = 2, 128, 8, 8          # channels fixed at 128 by the module
    params = make_params(kp)
    x_nchw = jax.random.normal(kx, (N, Cin, H, W), jnp.float32)

    fwd = jax.jit(lambda x: base24_forward(x, params))
    out = fwd(x_nchw)
    jax.block_until_ready(out)
    assert out.shape == (N, 64, 2 * H, 2 * W), out.shape

    ref = base24_reference(x_nchw, params)
    jax.block_until_ready(ref)
    err = float(jnp.max(jnp.abs(out - ref)))
    assert jnp.allclose(out, ref, rtol=1e-3, atol=1e-3), err

    print("KERNEL_OK")
</pallas_src>

<mosaic_0001>
module attributes {stable_mosaic.version = 11 : i64} {
  func.func @kernel(%arg0: i32, %arg1: memref<1x8x8x128xf32, #tpu.memory_space<vmem>>, %arg2: memref<1152x128xbf16, #tpu.memory_space<vmem>>, %arg3: memref<1x128xf32, #tpu.memory_space<vmem>>, %arg4: memref<1152x64xbf16, #tpu.memory_space<vmem>>, %arg5: memref<1x64xf32, #tpu.memory_space<vmem>>, %arg6: memref<1x128x128xf32, #tpu.memory_space<vmem>>, %arg7: memref<18x18x128xf32, #tpu.memory_space<vmem>>, %arg8: memref<18x16x384xbf16, #tpu.memory_space<vmem>>, %arg9: memref<16x8x128xf32, #tpu.memory_space<vmem>>) attributes {dimension_semantics = [#tpu.dimension_semantics<parallel>], iteration_bounds = array<i64: 2>, scalar_prefetch = 0 : i64, scratch_operands = 3 : i64, tpu.core_type = #tpu.core_type<tc>, window_params = [{transform_indices = @transform_0, window_bounds = array<i64: 1, 8, 8, 128>}, {pipeline_mode = #tpu.pipeline_mode<synchronous>, transform_indices = @transform_1, window_bounds = array<i64: 1152, 128>}, {pipeline_mode = #tpu.pipeline_mode<synchronous>, transform_indices = @transform_2, window_bounds = array<i64: 1, 128>}, {pipeline_mode = #tpu.pipeline_mode<synchronous>, transform_indices = @transform_3, window_bounds = array<i64: 1152, 64>}, {pipeline_mode = #tpu.pipeline_mode<synchronous>, transform_indices = @transform_4, window_bounds = array<i64: 1, 64>}, {transform_indices = @transform_5, window_bounds = array<i64: 1, 128, 128>}]} {
    %c0 = arith.constant 0 : index
    %c0_0 = arith.constant 0 : index
    %c0_1 = arith.constant 0 : index
    %c0_2 = arith.constant 0 : index
    %0 = vector.load %arg1[%c0, %c0_0, %c0_1, %c0_2] : memref<1x8x8x128xf32, #tpu.memory_space<vmem>>, vector<1x8x8x128xf32>
    %1 = vector.shape_cast %0 : vector<1x8x8x128xf32> to vector<8x8x128xf32>
    %2 = vector.extract_strided_slice %1 {offsets = [0, 0, 0], sizes = [1, 8, 128], strides = [1, 1, 1]} : vector<8x8x128xf32> to vector<1x8x128xf32>
    %c0_3 = arith.constant 0 : index
    %c0_4 = arith.constant 0 : index
    %c0_5 = arith.constant 0 : index
    %3 = vector.load %arg9[%c0_3, %c0_4, %c0_5] : memref<16x8x128xf32, #tpu.memory_space<vmem>>, vector<1x8x128xf32>
    tpu.vector_store %arg9[%c0_3, %c0_4, %c0_5], %2 {strides = array<i32>} : memref<16x8x128xf32, #tpu.memory_space<vmem>>, vector<1x8x128xf32>,
    %4 = vector.extract_strided_slice %1 {offsets = [0, 0, 0], sizes = [1, 8, 128], strides = [1, 1, 1]} : vector<8x8x128xf32> to vector<1x8x128xf32>
    %5 = vector.extract_strided_slice %1 {offsets = [1, 0, 0], sizes = [1, 8, 128], strides = [1, 1, 1]} : vector<8x8x128xf32> to vector<1x8x128xf32>
    %6 = arith.subf %5, %4 : vector<1x8x128xf32>
    %cst = arith.constant 0.466666669 : f32
    %7 = vector.broadcast %cst : f32 to vector<1x8x128xf32>
    %8 = arith.mulf %6, %7 : vector<1x8x128xf32>
    %9 = arith.addf %4, %8 : vector<1x8x128xf32>
    %c1 = arith.constant 1 : index
    %c0_6 = arith.constant 0 : index
    %c0_7 = arith.constant 0 : index
    %10 = vector.load %arg9[%c1, %c0_6, %c0_7] : memref<16x8x128xf32, #tpu.memory_space<vmem>>, vector<1x8x128xf32>
    tpu.vector_store %arg9[%c1, %c0_6, %c0_7], %9 {strides = array<i32>} : memref<16x8x128xf32, #tpu.memory_space<vmem>>, vector<1x8x128xf32>,
    %11 = vector.extract_strided_slice %1 {offsets = [0, 0, 0], sizes = [1, 8, 128], strides = [1, 1, 1]} : vector<8x8x128xf32> to vector<1x8x128xf32>
    %12 = vector.extract_strided_slice %1 {offsets = [1, 0, 0], sizes = [1, 8, 128], strides = [1, 1, 1]} : vector<8x8x128xf32> to vector<1x8x128xf32>
    %13 = arith.subf %12, %11 : vector<1x8x128xf32>
    %cst_8 = arith.constant 0.933333337 : f32
    %14 = vector.broadcast %cst_8 : f32 to vector<1x8x128xf32>
    %15 = arith.mulf %13, %14 : vector<1x8x128xf32>
    %16 = arith.addf %11, %15 : vector<1x8x128xf32>
    %c2 = arith.constant 2 : index
    %c0_9 = arith.constant 0 : index
    %c0_10 = arith.constant 0 : index
    %17 = vector.load %arg9[%c2, %c0_9, %c0_10] : memref<16x8x128xf32, #tpu.memory_space<vmem>>, vector<1x8x128xf32>
    tpu.vector_store %arg9[%c2, %c0_9, %c0_10], %16 {strides = array<i32>} : memref<16x8x128xf32, #tpu.memory_space<vmem>>, vector<1x8x128xf32>,
    %18 = vector.extract_strided_slice %1 {offsets = [1, 0, 0], sizes = [1, 8, 128], strides = [1, 1, 1]} : vector<8x8x128xf32> to vector<1x8x128xf32>
    %19 = vector.extract_strided_slice %1 {offsets = [2, 0, 0], sizes = [1, 8, 128], strides = [1, 1, 1]} : vector<8x8x128xf32> to vector<1x8x128xf32>
    %20 = arith.subf %19, %18 : vector<1x8x128xf32>
    %cst_11 = arith.constant 4.000000e-01 : f32
    %21 = vector.broadcast %cst_11 : f32 to vector<1x8x128xf32>
    %22 = arith.mulf %20, %21 : vector<1x8x128xf32>
    %23 = arith.addf %18, %22 : vector<1x8x128xf32>
    %c3 = arith.constant 3 : index
    %c0_12 = arith.constant 0 : index
    %c0_13 = arith.constant 0 : index
    %24 = vector.load %arg9[%c3, %c0_12, %c0_13] : memref<16x8x128xf32, #tpu.memory_space<vmem>>, vector<1x8x128xf32>
    tpu.vector_store %arg9[%c3, %c0_12, %c0_13], %23 {strides = array<i32>} : memref<16x8x128xf32, #tpu.memory_space<vmem>>, vector<1x8x128xf32>,
    %25 = vector.extract_strided_slice %1 {offsets = [1, 0, 0], sizes = [1, 8, 128], strides = [1, 1, 1]} : vector<8x8x128xf32> to vector<1x8x128xf32>
    %26 = vector.extract_strided_slice %1 {offsets = [2, 0, 0], sizes = [1, 8, 128], strides = [1, 1, 1]} : vector<8x8x128xf32> to vector<1x8x128xf32>
    %27 = arith.subf %26, %25 : vector<1x8x128xf32>
    %cst_14 = arith.constant 0.866666674 : f32
    %28 = vector.broadcast %cst_14 : f32 to vector<1x8x128xf32>
    %29 = arith.mulf %27, %28 : vector<1x8x128xf32>
    %30 = arith.addf %25, %29 : vector<1x8x128xf32>
    %c4 = arith.constant 4 : index
    %c0_15 = arith.constant 0 : index
    %c0_16 = arith.constant 0 : index
    %31 = vector.load %arg9[%c4, %c0_15, %c0_16] : memref<16x8x128xf32, #tpu.memory_space<vmem>>, vector<1x8x128xf32>
    tpu.vector_store %arg9[%c4, %c0_15, %c0_16], %30 {strides = array<i32>} : memref<16x8x128xf32, #tpu.memory_space<vmem>>, vector<1x8x128xf32>,
    %32 = vector.extract_strided_slice %1 {offsets = [2, 0, 0], sizes = [1, 8, 128], strides = [1, 1, 1]} : vector<8x8x128xf32> to vector<1x8x128xf32>
    %33 = vector.extract_strided_slice %1 {offsets = [3, 0, 0], sizes = [1, 8, 128], strides = [1, 1, 1]} : vector<8x8x128xf32> to vector<1x8x128xf32>
    %34 = arith.subf %33, %32 : vector<1x8x128xf32>
    %cst_17 = arith.constant 0.333333343 : f32
    %35 = vector.broadcast %cst_17 : f32 to vector<1x8x128xf32>
    %36 = arith.mulf %34, %35 : vector<1x8x128xf32>
    %37 = arith.addf %32, %36 : vector<1x8x128xf32>
    %c5 = arith.constant 5 : index
    %c0_18 = arith.constant 0 : index
    %c0_19 = arith.constant 0 : index
    %38 = vector.load %arg9[%c5, %c0_18, %c0_19] : memref<16x8x128xf32, #tpu.memory_space<vmem>>, vector<1x8x128xf32>
    tpu.vector_store %arg9[%c5, %c0_18, %c0_19], %37 {strides = array<i32>} : memref<16x8x128xf32, #tpu.memory_space<vmem>>, vector<1x8x128xf32>,
    %39 = vector.extract_strided_slice %1 {offsets = [2, 0, 0], sizes = [1, 8, 128], strides = [1, 1, 1]} : vector<8x8x128xf32> to vector<1x8x128xf32>
    %40 = vector.extract_strided_slice %1 {offsets = [3, 0, 0], sizes = [1, 8, 128], strides = [1, 1, 1]} : vector<8x8x128xf32> to vector<1x8x128xf32>
    %41 = arith.subf %40, %39 : vector<1x8x128xf32>
    %cst_20 = arith.constant 8.000000e-01 : f32
    %42 = vector.broadcast %cst_20 : f32 to vector<1x8x128xf32>
    %43 = arith.mulf %41, %42 : vector<1x8x128xf32>
    %44 = arith.addf %39, %43 : vector<1x8x128xf32>
    %c6 = arith.constant 6 : index
    %c0_21 = arith.constant 0 : index
    %c0_22 = arith.constant 0 : index
    %45 = vector.load %arg9[%c6, %c0_21, %c0_22] : memref<16x8x128xf32, #tpu.memory_space<vmem>>, vector<1x8x128xf32>
    tpu.vector_store %arg9[%c6, %c0_21, %c0_22], %44 {strides = array<i32>} : memref<16x8x128xf32, #tpu.memory_space<vmem>>, vector<1x8x128xf32>,
    %46 = vector.extract_strided_slice %1 {offsets = [3, 0, 0], sizes = [1, 8, 128], strides = [1, 1, 1]} : vector<8x8x128xf32> to vector<1x8x128xf32>
    %47 = vector.extract_strided_slice %1 {offsets = [4, 0, 0], sizes = [1, 8, 128], strides = [1, 1, 1]} : vector<8x8x128xf32> to vector<1x8x128xf32>
    %48 = arith.subf %47, %46 : vector<1x8x128xf32>
    %cst_23 = arith.constant 0.266666681 : f32
    %49 = vector.broadcast %cst_23 : f32 to vector<1x8x128xf32>
    %50 = arith.mulf %48, %49 : vector<1x8x128xf32>
    %51 = arith.addf %46, %50 : vector<1x8x128xf32>
    %c7 = arith.constant 7 : index
    %c0_24 = arith.constant 0 : index
    %c0_25 = arith.constant 0 : index
    %52 = vector.load %arg9[%c7, %c0_24, %c0_25] : memref<16x8x128xf32, #tpu.memory_space<vmem>>, vector<1x8x128xf32>
    tpu.vector_store %arg9[%c7, %c0_24, %c0_25], %51 {strides = array<i32>} : memref<16x8x128xf32, #tpu.memory_space<vmem>>, vector<1x8x128xf32>,
    %53 = vector.extract_strided_slice %1 {offsets = [3, 0, 0], sizes = [1, 8, 128], strides = [1, 1, 1]} : vector<8x8x128xf32> to vector<1x8x128xf32>
    %54 = vector.extract_strided_slice %1 {offsets = [4, 0, 0], sizes = [1, 8, 128], strides = [1, 1, 1]} : vector<8x8x128xf32> to vector<1x8x128xf32>
    %55 = arith.subf %54, %53 : vector<1x8x128xf32>
    %cst_26 = arith.constant 0.733333349 : f32
    %56 = vector.broadcast %cst_26 : f32 to vector<1x8x128xf32>
    %57 = arith.mulf %55, %56 : vector<1x8x128xf32>
    %58 = arith.addf %53, %57 : vector<1x8x128xf32>
    %c8 = arith.constant 8 : index
    %c0_27 = arith.constant 0 : index
    %c0_28 = arith.constant 0 : index
    %59 = vector.load %arg9[%c8, %c0_27, %c0_28] : memref<16x8x128xf32, #tpu.memory_space<vmem>>, vector<1x8x128xf32>
    tpu.vector_store %arg9[%c8, %c0_27, %c0_28], %58 {strides = array<i32>} : memref<16x8x128xf32, #tpu.memory_space<vmem>>, vector<1x8x128xf32>,
    %60 = vector.extract_strided_slice %1 {offsets = [4, 0, 0], sizes = [1, 8, 128], strides = [1, 1, 1]} : vector<8x8x128xf32> to vector<1x8x128xf32>
    %61 = vector.extract_strided_slice %1 {offsets = [5, 0, 0], sizes = [1, 8, 128], strides = [1, 1, 1]} : vector<8x8x128xf32> to vector<1x8x128xf32>
    %62 = arith.subf %61, %60 : vector<1x8x128xf32>
    %cst_29 = arith.constant 2.000000e-01 : f32
    %63 = vector.broadcast %cst_29 : f32 to vector<1x8x128xf32>
    %64 = arith.mulf %62, %63 : vector<1x8x128xf32>
    %65 = arith.addf %60, %64 : vector<1x8x128xf32>
    %c9 = arith.constant 9 : index
    %c0_30 = arith.constant 0 : index
    %c0_31 = arith.constant 0 : index
    %66 = vector.load %arg9[%c9, %c0_30, %c0_31] : memref<16x8x128xf32, #tpu.memory_space<vmem>>, vector<1x8x128xf32>
    tpu.vector_store %arg9[%c9, %c0_30, %c0_31], %65 {strides = array<i32>} : memref<16x8x128xf32, #tpu.memory_space<vmem>>, vector<1x8x128xf32>,
    %67 = vector.extract_strided_slice %1 {offsets = [4, 0, 0], sizes = [1, 8, 128], strides = [1, 1, 1]} : vector<8x8x128xf32> to vector<1x8x128xf32>
    %68 = vector.extract_strided_slice %1 {offsets = [5, 0, 0], sizes = [1, 8, 128], strides = [1, 1, 1]} : vector<8x8x128xf32> to vector<1x8x128xf32>
    %69 = arith.subf %68, %67 : vector<1x8x128xf32>
    %cst_32 = arith.constant 0.666666686 : f32
    %70 = vector.broadcast %cst_32 : f32 to vector<1x8x128xf32>
    %71 = arith.mulf %69, %70 : vector<1x8x128xf32>
    %72 = arith.addf %67, %71 : vector<1x8x128xf32>
    %c10 = arith.constant 10 : index
    %c0_33 = arith.constant 0 : index
    %c0_34 = arith.constant 0 : index
    %73 = vector.load %arg9[%c10, %c0_33, %c0_34] : memref<16x8x128xf32, #tpu.memory_space<vmem>>, vector<1x8x128xf32>
    tpu.vector_store %arg9[%c10, %c0_33, %c0_34], %72 {strides = array<i32>} : memref<16x8x128xf32, #tpu.memory_space<vmem>>, vector<1x8x128xf32>,
    %74 = vector.extract_strided_slice %1 {offsets = [5, 0, 0], sizes = [1, 8, 128], strides = [1, 1, 1]} : vector<8x8x128xf32> to vector<1x8x128xf32>
    %75 = vector.extract_strided_slice %1 {offsets = [6, 0, 0], sizes = [1, 8, 128], strides = [1, 1, 1]} : vector<8x8x128xf32> to vector<1x8x128xf32>
    %76 = arith.subf %75, %74 : vector<1x8x128xf32>
    %cst_35 = arith.constant 0.13333334 : f32
    %77 = vector.broadcast %cst_35 : f32 to vector<1x8x128xf32>
    %78 = arith.mulf %76, %77 : vector<1x8x128xf32>
    %79 = arith.addf %74, %78 : vector<1x8x128xf32>
    %c11 = arith.constant 11 : index
    %c0_36 = arith.constant 0 : index
    %c0_37 = arith.constant 0 : index
    %80 = vector.load %arg9[%c11, %c0_36, %c0_37] : memref<16x8x128xf32, #tpu.memory_space<vmem>>, vector<1x8x128xf32>
    tpu.vector_store %arg9[%c11, %c0_36, %c0_37], %79 {strides = array<i32>} : memref<16x8x128xf32, #tpu.memory_space<vmem>>, vector<1x8x128xf32>,
    %81 = vector.extract_strided_slice %1 {offsets = [5, 0, 0], sizes = [1, 8, 128], strides = [1, 1, 1]} : vector<8x8x128xf32> to vector<1x8x128xf32>
    %82 = vector.extract_strided_slice %1 {offsets = [6, 0, 0], sizes = [1, 8, 128], strides = [1, 1, 1]} : vector<8x8x128xf32> to vector<1x8x128xf32>
    %83 = arith.subf %82, %81 : vector<1x8x128xf32>
    %cst_38 = arith.constant 6.000000e-01 : f32
    %84 = vector.broadcast %cst_38 : f32 to vector<1x8x128xf32>
    %85 = arith.mulf %83, %84 : vector<1x8x128xf32>
    %86 = arith.addf %81, %85 : vector<1x8x128xf32>
    %c12 = arith.constant 12 : index
    %c0_39 = arith.constant 0 : index
    %c0_40 = arith.constant 0 : index
    %87 = vector.load %arg9[%c12, %c0_39, %c0_40] : memref<16x8x128xf32, #tpu.memory_space<vmem>>, vector<1x8x128xf32>
    tpu.vector_store %arg9[%c12, %c0_39, %c0_40], %86 {strides = array<i32>} : memref<16x8x128xf32, #tpu.memory_space<vmem>>, vector<1x8x128xf32>,
    %88 = vector.extract_strided_slice %1 {offsets = [6, 0, 0], sizes = [1, 8, 128], strides = [1, 1, 1]} : vector<8x8x128xf32> to vector<1x8x128xf32>
    %89 = vector.extract_strided_slice %1 {offsets = [7, 0, 0], sizes = [1, 8, 128], strides = [1, 1, 1]} : vector<8x8x128xf32> to vector<1x8x128xf32>
    %90 = arith.subf %89, %88 : vector<1x8x128xf32>
    %cst_41 = arith.constant 0.0666666701 : f32
    %91 = vector.broadcast %cst_41 : f32 to vector<1x8x128xf32>
    %92 = arith.mulf %90, %91 : vector<1x8x128xf32>
    %93 = arith.addf %88, %92 : vector<1x8x128xf32>
    %c13 = arith.constant 13 : index
    %c0_42 = arith.constant 0 : index
    %c0_43 = arith.constant 0 : index
    %94 = vector.load %arg9[%c13, %c0_42, %c0_43] : memref<16x8x128xf32, #tpu.memory_space<vmem>>, vector<1x8x128xf32>
    tpu.vector_store %arg9[%c13, %c0_42, %c0_43], %93 {strides = array<i32>} : memref<16x8x128xf32, #tpu.memory_space<vmem>>, vector<1x8x128xf32>,
    %95 = vector.extract_strided_slice %1 {offsets = [6, 0, 0], sizes = [1, 8, 128], strides = [1, 1, 1]} : vector<8x8x128xf32> to vector<1x8x128xf32>
    %96 = vector.extract_strided_slice %1 {offsets = [7, 0, 0], sizes = [1, 8, 128], strides = [1, 1, 1]} : vector<8x8x128xf32> to vector<1x8x128xf32>
    %97 = arith.subf %96, %95 : vector<1x8x128xf32>
    %cst_44 = arith.constant 0.533333361 : f32
    %98 = vector.broadcast %cst_44 : f32 to vector<1x8x128xf32>
    %99 = arith.mulf %97, %98 : vector<1x8x128xf32>
    %100 = arith.addf %95, %99 : vector<1x8x128xf32>
    %c14 = arith.constant 14 : index
    %c0_45 = arith.constant 0 : index
    %c0_46 = arith.constant 0 : index
    %101 = vector.load %arg9[%c14, %c0_45, %c0_46] : memref<16x8x128xf32, #tpu.memory_space<vmem>>, vector<1x8x128xf32>
    tpu.vector_store %arg9[%c14, %c0_45, %c0_46], %100 {strides = array<i32>} : memref<16x8x128xf32, #tpu.memory_space<vmem>>, vector<1x8x128xf32>,
    %102 = vector.extract_strided_slice %1 {offsets = [7, 0, 0], sizes = [1, 8, 128], strides = [1, 1, 1]} : vector<8x8x128xf32> to vector<1x8x128xf32>
    %c15 = arith.constant 15 : index
    %c0_47 = arith.constant 0 : index
    %c0_48 = arith.constant 0 : index
    %103 = vector.load %arg9[%c15, %c0_47, %c0_48] : memref<16x8x128xf32, #tpu.memory_space<vmem>>, vector<1x8x128xf32>
    tpu.vector_store %arg9[%c15, %c0_47, %c0_48], %102 {strides = array<i32>} : memref<16x8x128xf32, #tpu.memory_space<vmem>>, vector<1x8x128xf32>,
    %cst_49 = arith.constant 0.000000e+00 : f32
    %104 = vector.broadcast %cst_49 : f32 to vector<1x18x128xf32>
    %c0_50 = arith.constant 0 : index
    %c0_51 = arith.constant 0 : index
    %c0_52 = arith.constant 0 : index
    %105 = vector.load %arg7[%c0_50, %c0_51, %c0_52] : memref<18x18x128xf32, #tpu.memory_space<vmem>>, vector<1x18x128xf32>
    tpu.vector_store %arg7[%c0_50, %c0_51, %c0_52], %104 {strides = array<i32>} : memref<18x18x128xf32, #tpu.memory_space<vmem>>, vector<1x18x128xf32>,
    %c17 = arith.constant 17 : index
    %c0_53 = arith.constant 0 : index
    %c0_54 = arith.constant 0 : index
    %106 = vector.load %arg7[%c17, %c0_53, %c0_54] : memref<18x18x128xf32, #tpu.memory_space<vmem>>, vector<1x18x128xf32>
    tpu.vector_store %arg7[%c17, %c0_53, %c0_54], %104 {strides = array<i32>} : memref<18x18x128xf32, #tpu.memory_space<vmem>>, vector<1x18x128xf32>,
    %cst_55 = arith.constant 0.000000e+00 : f32
    %107 = vector.broadcast %cst_55 : f32 to vector<18x1x128xf32>
    %c0_56 = arith.constant 0 : index
    %c0_57 = arith.constant 0 : index
    %c0_58 = arith.constant 0 : index
    %108 = vector.load %arg7[%c0_56, %c0_57, %c0_58] : memref<18x18x128xf32, #tpu.memory_space<vmem>>, vector<18x1x128xf32>
    tpu.vector_store %arg7[%c0_56, %c0_57, %c0_58], %107 {strides = array<i32>} : memref<18x18x128xf32, #tpu.memory_space<vmem>>, vector<18x1x128xf32>,
    %c0_59 = arith.constant 0 : index
    %c17_60 = arith.constant 17 : index
    %c0_61 = arith.constant 0 : index
    %109 = vector.load %arg7[%c0_59, %c17_60, %c0_61] : memref<18x18x128xf32, #tpu.memory_space<vmem>>, vector<18x1x128xf32>
    tpu.vector_store %arg7[%c0_59, %c17_60, %c0_61], %107 {strides = array<i32>} : memref<18x18x128xf32, #tpu.memory_space<vmem>>, vector<18x1x128xf32>,
    %c0_62 = arith.constant 0 : index
    %c0_63 = arith.constant 0 : index
    %c0_64 = arith.constant 0 : index
    %110 = vector.load %arg9[%c0_62, %c0_63, %c0_64] : memref<16x8x128xf32, #tpu.memory_space<vmem>>, vector<16x1x128xf32>
    %c1_65 = arith.constant 1 : index
    %c1_66 = arith.constant 1 : index
    %c0_67 = arith.constant 0 : index
    %111 = vector.load %arg7[%c1_65, %c1_66, %c0_67] : memref<18x18x128xf32, #tpu.memory_space<vmem>>, vector<16x1x128xf32>
    tpu.vector_store %arg7[%c1_65, %c1_66, %c0_67], %110 {strides = array<i32>} : memref<18x18x128xf32, #tpu.memory_space<vmem>>, vector<16x1x128xf32>,
    %c0_68 = arith.constant 0 : index
    %c0_69 = arith.constant 0 : index
    %c0_70 = arith.constant 0 : index
    %112 = vector.load %arg9[%c0_68, %c0_69, %c0_70] : memref<16x8x128xf32, #tpu.memory_space<vmem>>, vector<16x1x128xf32>
    %c0_71 = arith.constant 0 : index
    %c1_72 = arith.constant 1 : index
    %c0_73 = arith.constant 0 : index
    %113 = vector.load %arg9[%c0_71, %c1_72, %c0_73] : memref<16x8x128xf32, #tpu.memory_space<vmem>>, vector<16x1x128xf32>
    %114 = arith.subf %113, %112 : vector<16x1x128xf32>
    %cst_74 = arith.constant 0.466666669 : f32
    %115 = vector.broadcast %cst_74 : f32 to vector<16x1x128xf32>
    %116 = arith.mulf %114, %115 : vector<16x1x128xf32>
    %117 = arith.addf %112, %116 : vector<16x1x128xf32>
    %c1_75 = arith.constant 1 : index
    %c2_76 = arith.constant 2 : index
    %c0_77 = arith.constant 0 : index
    %118 = vector.load %arg7[%c1_75, %c2_76, %c0_77] : memref<18x18x128xf32, #tpu.memory_space<vmem>>, vector<16x1x128xf32>
    tpu.vector_store %arg7[%c1_75, %c2_76, %c0_77], %117 {strides = array<i32>} : memref<18x18x128xf32, #tpu.memory_space<vmem>>, vector<16x1x128xf32>,
    %c0_78 = arith.constant 0 : index
    %c0_79 = arith.constant 0 : index
    %c0_80 = arith.constant 0 : index
    %119 = vector.load %arg9[%c0_78, %c0_79, %c0_80] : memref<16x8x128xf32, #tpu.memory_space<vmem>>, vector<16x1x128xf32>
    %c0_81 = arith.constant 0 : index
    %c1_82 = arith.constant 1 : index
    %c0_83 = arith.constant 0 : index
    %120 = vector.load %arg9[%c0_81, %c1_82, %c0_83] : memref<16x8x128xf32, #tpu.memory_space<vmem>>, vector<16x1x128xf32>
    %121 = arith.subf %120, %119 : vector<16x1x128xf32>
    %cst_84 = arith.constant 0.933333337 : f32
    %122 = vector.broadcast %cst_84 : f32 to vector<16x1x128xf32>
    %123 = arith.mulf %121, %122 : vector<16x1x128xf32>
    %124 = arith.addf %119, %123 : vector<16x1x128xf32>
    %c1_85 = arith.constant 1 : index
    %c3_86 = arith.constant 3 : index
    %c0_87 = arith.constant 0 : index
    %125 = vector.load %arg7[%c1_85, %c3_86, %c0_87] : memref<18x18x128xf32, #tpu.memory_space<vmem>>, vector<16x1x128xf32>
    tpu.vector_store %arg7[%c1_85, %c3_86, %c0_87], %124 {strides = array<i32>} : memref<18x18x128xf32, #tpu.memory_space<vmem>>, vector<16x1x128xf32>,
    %c0_88 = arith.constant 0 : index
    %c1_89 = arith.constant 1 : index
    %c0_90 = arith.constant 0 : index
    %126 = vector.load %arg9[%c0_88, %c1_89, %c0_90] : memref<16x8x128xf32, #tpu.memory_space<vmem>>, vector<16x1x128xf32>
    %c0_91 = arith.constant 0 : index
    %c2_92 = arith.constant 2 : index
    %c0_93 = arith.constant 0 : index
    %127 = vector.load %arg9[%c0_91, %c2_92, %c0_93] : memref<16x8x128xf32, #tpu.memory_space<vmem>>, vector<16x1x128xf32>
    %128 = arith.subf %127, %126 : vector<16x1x128xf32>
    %cst_94 = arith.constant 4.000000e-01 : f32
    %129 = vector.broadcast %cst_94 : f32 to vector<16x1x128xf32>
    %130 = arith.mulf %128, %129 : vector<16x1x128xf32>
    %131 = arith.addf %126, %130 : vector<16x1x128xf32>
    %c1_95 = arith.constant 1 : index
    %c4_96 = arith.constant 4 : index
    %c0_97 = arith.constant 0 : index
    %132 = vector.load %arg7[%c1_95, %c4_96, %c0_97] : memref<18x18x128xf32, #tpu.memory_space<vmem>>, vector<16x1x128xf32>
    tpu.vector_store %arg7[%c1_95, %c4_96, %c0_97], %131 {strides = array<i32>} : memref<18x18x128xf32, #tpu.memory_space<vmem>>, vector<16x1x128xf32>,
    %c0_98 = arith.constant 0 : index
    %c1_99 = arith.constant 1 : index
    %c0_100 = arith.constant 0 : index
    %133 = vector.load %arg9[%c0_98, %c1_99, %c0_100] : memref<16x8x128xf32, #tpu.memory_space<vmem>>, vector<16x1x128xf32>
    %c0_101 = arith.constant 0 : index
    %c2_102 = arith.constant 2 : index
    %c0_103 = arith.constant 0 : index
    %134 = vector.load %arg9[%c0_101, %c2_102, %c0_103] : memref<16x8x128xf32, #tpu.memory_space<vmem>>, vector<16x1x128xf32>
    %135 = arith.subf %134, %133 : vector<16x1x128xf32>
    %cst_104 = arith.constant 0.866666674 : f32
    %136 = vector.broadcast %cst_104 : f32 to vector<16x1x128xf32>
    %137 = arith.mulf %135, %136 : vector<16x1x128xf32>
    %138 = arith.addf %133, %137 : vector<16x1x128xf32>
    %c1_105 = arith.constant 1 : index
    %c5_106 = arith.constant 5 : index
    %c0_107 = arith.constant 0 : index
    %139 = vector.load %arg7[%c1_105, %c5_106, %c0_107] : memref<18x18x128xf32, #tpu.memory_space<vmem>>, vector<16x1x128xf32>
    tpu.vector_store %arg7[%c1_105, %c5_106, %c0_107], %138 {strides = array<i32>} : memref<18x18x128xf32, #tpu.memory_space<vmem>>, vector<16x1x128xf32>,
    %c0_108 = arith.constant 0 : index
    %c2_109 = arith.constant 2 : index
    %c0_110 = arith.constant 0 : index
    %140 = vector.load %arg9[%c0_108, %c2_109, %c0_110] : memref<16x8x128xf32, #tpu.memory_space<vmem>>, vector<16x1x128xf32>
    %c0_111 = arith.constant 0 : index
    %c3_112 = arith.constant 3 : index
    %c0_113 = arith.constant 0 : index
    %141 = vector.load %arg9[%c0_111, %c3_112, %c0_113] : memref<16x8x128xf32, #tpu.memory_space<vmem>>, vector<16x1x128xf32>
    %142 = arith.subf %141, %140 : vector<16x1x128xf32>
    %cst_114 = arith.constant 0.333333343 : f32
    %143 = vector.broadcast %cst_114 : f32 to vector<16x1x128xf32>
    %144 = arith.mulf %142, %143 : vector<16x1x128xf32>
    %145 = arith.addf %140, %144 : vector<16x1x128xf32>
    %c1_115 = arith.constant 1 : index
    %c6_116 = arith.constant 6 : index
    %c0_117 = arith.constant 0 : index
    %146 = vector.load %arg7[%c1_115, %c6_116, %c0_117] : memref<18x18x128xf32, #tpu.memory_space<vmem>>, vector<16x1x128xf32>
    tpu.vector_store %arg7[%c1_115, %c6_116, %c0_117], %145 {strides = array<i32>} : memref<18x18x128xf32, #tpu.memory_space<vmem>>, vector<16x1x128xf32>,
    %c0_118 = arith.constant 0 : index
    %c2_119 = arith.constant 2 : index
    %c0_120 = arith.constant 0 : index
    %147 = vector.load %arg9[%c0_118, %c2_119, %c0_120] : memref<16x8x128xf32, #tpu.memory_space<vmem>>, vector<16x1x128xf32>
    %c0_121 = arith.constant 0 : index
    %c3_122 = arith.constant 3 : index
    %c0_123 = arith.constant 0 : index
    %148 = vector.load %arg9[%c0_121, %c3_122, %c0_123] : memref<16x8x128xf32, #tpu.memory_space<vmem>>, vector<16x1x128xf32>
    %149 = arith.subf %148, %147 : vector<16x1x128xf32>
    %cst_124 = arith.constant 8.000000e-01 : f32
    %150 = vector.broadcast %cst_124 : f32 to vector<16x1x128xf32>
    %151 = arith.mulf %149, %150 : vector<16x1x128xf32>
    %152 = arith.addf %147, %151 : vector<16x1x128xf32>
    %c1_125 = arith.constant 1 : index
    %c7_126 = arith.constant 7 : index
    %c0_127 = arith.constant 0 : index
    %153 = vector.load %arg7[%c1_125, %c7_126, %c0_127] : memref<18x18x128xf32, #tpu.memory_space<vmem>>, vector<16x1x128xf32>
    tpu.vector_store %arg7[%c1_125, %c7_126, %c0_127], %152 {strides = array<i32>} : memref<18x18x128xf32, #tpu.memory_space<vmem>>, vector<16x1x128xf32>,
    %c0_128 = arith.constant 0 : index
    %c3_129 = arith.constant 3 : index
    %c0_130 = arith.constant 0 : index
    %154 = vector.load %arg9[%c0_128, %c3_129, %c0_130] : memref<16x8x128xf32, #tpu.memory_space<vmem>>, vector<16x1x128xf32>
    %c0_131 = arith.constant 0 : index
    %c4_132 = arith.constant 4 : index
    %c0_133 = arith.constant 0 : index
    %155 = vector.load %arg9[%c0_131, %c4_132, %c0_133] : memref<16x8x128xf32, #tpu.memory_space<vmem>>, vector<16x1x128xf32>
    %156 = arith.subf %155, %154 : vector<16x1x128xf32>
    %cst_134 = arith.constant 0.266666681 : f32
    %157 = vector.broadcast %cst_134 : f32 to vector<16x1x128xf32>
    %158 = arith.mulf %156, %157 : vector<16x1x128xf32>
    %159 = arith.addf %154, %158 : vector<16x1x128xf32>
    %c1_135 = arith.constant 1 : index
    %c8_136 = arith.constant 8 : index
    %c0_137 = arith.constant 0 : index
    %160 = vector.load %arg7[%c1_135, %c8_136, %c0_137] : memref<18x18x128xf32, #tpu.memory_space<vmem>>, vector<16x1x128xf32>
    tpu.vector_store %arg7[%c1_135, %c8_136, %c0_137], %159 {strides = array<i32>} : memref<18x18x128xf32, #tpu.memory_space<vmem>>, vector<16x1x128xf32>,
    %c0_138 = arith.constant 0 : index
    %c3_139 = arith.constant 3 : index
    %c0_140 = arith.constant 0 : index
    %161 = vector.load %arg9[%c0_138, %c3_139, %c0_140] : memref<16x8x128xf32, #tpu.memory_space<vmem>>, vector<16x1x128xf32>
    %c0_141 = arith.constant 0 : index
    %c4_142 = arith.constant 4 : index
    %c0_143 = arith.constant 0 : index
    %162 = vector.load %arg9[%c0_141, %c4_142, %c0_143] : memref<16x8x128xf32, #tpu.memory_space<vmem>>, vector<16x1x128xf32>
    %163 = arith.subf %162, %161 : vector<16x1x128xf32>
    %cst_144 = arith.constant 0.733333349 : f32
    %164 = vector.broadcast %cst_144 : f32 to vector<16x1x128xf32>
    %165 = arith.mulf %163, %164 : vector<16x1x128xf32>
    %166 = arith.addf %161, %165 : vector<16x1x128xf32>
    %c1_145 = arith.constant 1 : index
    %c9_146 = arith.constant 9 : index
    %c0_147 = arith.constant 0 : index
    %167 = vector.load %arg7[%c1_145, %c9_146, %c0_147] : memref<18x18x128xf32, #tpu.memory_space<vmem>>, vector<16x1x128xf32>
    tpu.vector_store %arg7[%c1_145, %c9_146, %c0_147], %166 {strides = array<i32>} : memref<18x18x128xf32, #tpu.memory_space<vmem>>, vector<16x1x128xf32>,
    %c0_148 = arith.constant 0 : index
    %c4_149 = arith.constant 4 : index
    %c0_150 = arith.constant 0 : index
    %168 = vector.load %arg9[%c0_148, %c4_149, %c0_150] : memref<16x8x128xf32, #tpu.memory_space<vmem>>, vector<16x1x128xf32>
    %c0_151 = arith.constant 0 : index
    %c5_152 = arith.constant 5 : index
    %c0_153 = arith.constant 0 : index
    %169 = vector.load %arg9[%c0_151, %c5_152, %c0_153] : memref<16x8x128xf32, #tpu.memory_space<vmem>>, vector<16x1x128xf32>
    %170 = arith.subf %169, %168 : vector<16x1x128xf32>
    %cst_154 = arith.constant 2.000000e-01 : f32
    %171 = vector.broadcast %cst_154 : f32 to vector<16x1x128xf32>
    %172 = arith.mulf %170, %171 : vector<16x1x128xf32>
    %173 = arith.addf %168, %172 : vector<16x1x128xf32>
    %c1_155 = arith.constant 1 : index
    %c10_156 = arith.constant 10 : index
    %c0_157 = arith.constant 0 : index
    %174 = vector.load %arg7[%c1_155, %c10_156, %c0_157] : memref<18x18x128xf32, #tpu.memory_space<vmem>>, vector<16x1x128xf32>
    tpu.vector_store %arg7[%c1_155, %c10_156, %c0_157], %173 {strides = array<i32>} : memref<18x18x128xf32, #tpu.memory_space<vmem>>, vector<16x1x128xf32>,
    %c0_158 = arith.constant 0 : index
    %c4_159 = arith.constant 4 : index
    %c0_160 = arith.constant 0 : index
    %175 = vector.load %arg9[%c0_158, %c4_159, %c0_160] : memref<16x8x128xf32, #tpu.memory_space<vmem>>, vector<16x1x128xf32>
    %c0_161 = arith.constant 0 : index
    %c5_162 = arith.constant 5 : index
    %c0_163 = arith.constant 0 : index
    %176 = vector.load %arg9[%c0_161, %c5_162, %c0_163] : memref<16x8x128xf32, #tpu.memory_space<vmem>>, vector<16x1x128xf32>
    %177 = arith.subf %176, %175 : vector<16x1x128xf32>
    %cst_164 = arith.constant 0.666666686 : f32
    %178 = vector.broadcast %cst_164 : f32 to vector<16x1x128xf32>
    %179 = arith.mulf %177, %178 : vector<16x1x128xf32>
    %180 = arith.addf %175, %179 : vector<16x1x128xf32>
    %c1_165 = arith.constant 1 : index
    %c11_166 = arith.constant 11 : index
    %c0_167 = arith.constant 0 : index
    %181 = vector.load %arg7[%c1_165, %c11_166, %c0_167] : memref<18x18x128xf32, #tpu.memory_space<vmem>>, vector<16x1x128xf32>
    tpu.vector_store %arg7[%c1_165, %c11_166, %c0_167], %180 {strides = array<i32>} : memref<18x18x128xf32, #tpu.memory_space<vmem>>, vector<16x1x128xf32>,
    %c0_168 = arith.constant 0 : index
    %c5_169 = arith.constant 5 : index
    %c0_170 = arith.constant 0 : index
    %182 = vector.load %arg9[%c0_168, %c5_169, %c0_170] : memref<16x8x128xf32, #tpu.memory_space<vmem>>, vector<16x1x128xf32>
    %c0_171 = arith.constant 0 : index
    %c6_172 = arith.constant 6 : index
    %c0_173 = arith.constant 0 : index
    %183 = vector.load %arg9[%c0_171, %c6_172, %c0_173] : memref<16x8x128xf32, #tpu.memory_space<vmem>>, vector<16x1x128xf32>
    %184 = arith.subf %183, %182 : vector<16x1x128xf32>
    %cst_174 = arith.constant 0.13333334 : f32
    %185 = vector.broadcast %cst_174 : f32 to vector<16x1x128xf32>
    %186 = arith.mulf %184, %185 : vector<16x1x128xf32>
    %187 = arith.addf %182, %186 : vector<16x1x128xf32>
    %c1_175 = arith.constant 1 : index
    %c12_176 = arith.constant 12 : index
    %c0_177 = arith.constant 0 : index
    %188 = vector.load %arg7[%c1_175, %c12_176, %c0_177] : memref<18x18x128xf32, #tpu.memory_space<vmem>>, vector<16x1x128xf32>
    tpu.vector_store %arg7[%c1_175, %c12_176, %c0_177], %187 {strides = array<i32>} : memref<18x18x128xf32, #tpu.memory_space<vmem>>, vector<16x1x128xf32>,
    %c0_178 = arith.constant 0 : index
    %c5_179 = arith.constant 5 : index
    %c0_180 = arith.constant 0 : index
    %189 = vector.load %arg9[%c0_178, %c5_179, %c0_180] : memref<16x8x128xf32, #tpu.memory_space<vmem>>, vector<16x1x128xf32>
    %c0_181 = arith.constant 0 : index
    %c6_182 = arith.constant 6 : index
    %c0_183 = arith.constant 0 : index
    %190 = vector.load %arg9[%c0_181, %c6_182, %c0_183] : memref<16x8x128xf32, #tpu.memory_space<vmem>>, vector<16x1x128xf32>
    %191 = arith.subf %190, %189 : vector<16x1x128xf32>
    %cst_184 = arith.constant 6.000000e-01 : f32
    %192 = vector.broadcast %cst_184 : f32 to vector<16x1x128xf32>
    %193 = arith.mulf %191, %192 : vector<16x1x128xf32>
    %194 = arith.addf %189, %193 : vector<16x1x128xf32>
    %c1_185 = arith.constant 1 : index
    %c13_186 = arith.constant 13 : index
    %c0_187 = arith.constant 0 : index
    %195 = vector.load %arg7[%c1_185, %c13_186, %c0_187] : memref<18x18x128xf32, #tpu.memory_space<vmem>>, vector<16x1x128xf32>
    tpu.vector_store %arg7[%c1_185, %c13_186, %c0_187], %194 {strides = array<i32>} : memref<18x18x128xf32, #tpu.memory_space<vmem>>, vector<16x1x128xf32>,
    %c0_188 = arith.constant 0 : index
    %c6_189 = arith.constant 6 : index
    %c0_190 = arith.constant 0 : index
    %196 = vector.load %arg9[%c0_188, %c6_189, %c0_190] : memref<16x8x128xf32, #tpu.memory_space<vmem>>, vector<16x1x128xf32>
    %c0_191 = arith.constant 0 : index
    %c7_192 = arith.constant 7 : index
    %c0_193 = arith.constant 0 : index
    %197 = vector.load %arg9[%c0_191, %c7_192, %c0_193] : memref<16x8x128xf32, #tpu.memory_space<vmem>>, vector<16x1x128xf32>
    %198 = arith.subf %197, %196 : vector<16x1x128xf32>
    %cst_194 = arith.constant 0.0666666701 : f32
    %199 = vector.broadcast %cst_194 : f32 to vector<16x1x128xf32>
    %200 = arith.mulf %198, %199 : vector<16x1x128xf32>
    %201 = arith.addf %196, %200 : vector<16x1x128xf32>
    %c1_195 = arith.constant 1 : index
    %c14_196 = arith.constant 14 : index
    %c0_197 = arith.constant 0 : index
    %202 = vector.load %arg7[%c1_195, %c14_196, %c0_197] : memref<18x18x128xf32, #tpu.memory_space<vmem>>, vector<16x1x128xf32>
    tpu.vector_store %arg7[%c1_195, %c14_196, %c0_197], %201 {strides = array<i32>} : memref<18x18x128xf32, #tpu.memory_space<vmem>>, vector<16x1x128xf32>,
    %c0_198 = arith.constant 0 : index
    %c6_199 = arith.constant 6 : index
    %c0_200 = arith.constant 0 : index
    %203 = vector.load %arg9[%c0_198, %c6_199, %c0_200] : memref<16x8x128xf32, #tpu.memory_space<vmem>>, vector<16x1x128xf32>
    %c0_201 = arith.constant 0 : index
    %c7_202 = arith.constant 7 : index
    %c0_203 = arith.constant 0 : index
    %204 = vector.load %arg9[%c0_201, %c7_202, %c0_203] : memref<16x8x128xf32, #tpu.memory_space<vmem>>, vector<16x1x128xf32>
    %205 = arith.subf %204, %203 : vector<16x1x128xf32>
    %cst_204 = arith.constant 0.533333361 : f32
    %206 = vector.broadcast %cst_204 : f32 to vector<16x1x128xf32>
    %207 = arith.mulf %205, %206 : vector<16x1x128xf32>
    %208 = arith.addf %203, %207 : vector<16x1x128xf32>
    %c1_205 = arith.constant 1 : index
    %c15_206 = arith.constant 15 : index
    %c0_207 = arith.constant 0 : index
    %209 = vector.load %arg7[%c1_205, %c15_206, %c0_207] : memref<18x18x128xf32, #tpu.memory_space<vmem>>, vector<16x1x128xf32>
    tpu.vector_store %arg7[%c1_205, %c15_206, %c0_207], %208 {strides = array<i32>} : memref<18x18x128xf32, #tpu.memory_space<vmem>>, vector<16x1x128xf32>,
    %c0_208 = arith.constant 0 : index
    %c7_209 = arith.constant 7 : index
    %c0_210 = arith.constant 0 : index
    %210 = vector.load %arg9[%c0_208, %c7_209, %c0_210] : memref<16x8x128xf32, #tpu.memory_space<vmem>>, vector<16x1x128xf32>
    %c1_211 = arith.constant 1 : index
    %c16 = arith.constant 16 : index
    %c0_212 = arith.constant 0 : index
    %211 = vector.load %arg7[%c1_211, %c16, %c0_212] : memref<18x18x128xf32, #tpu.memory_space<vmem>>, vector<16x1x128xf32>
    tpu.vector_store %arg7[%c1_211, %c16, %c0_212], %210 {strides = array<i32>} : memref<18x18x128xf32, #tpu.memory_space<vmem>>, vector<16x1x128xf32>,
    %c0_213 = arith.constant 0 : index
    %c0_214 = arith.constant 0 : index
    %c0_215 = arith.constant 0 : index
    %212 = vector.load %arg7[%c0_213, %c0_214, %c0_215] : memref<18x18x128xf32, #tpu.memory_space<vmem>>, vector<18x16x128xf32>
    %213 = arith.truncf %212 : vector<18x16x128xf32> to vector<18x16x128xbf16>
    %c0_216 = arith.constant 0 : index
    %c0_217 = arith.constant 0 : index
    %c0_218 = arith.constant 0 : index
    %214 = vector.load %arg8[%c0_216, %c0_217, %c0_218] : memref<18x16x384xbf16, #tpu.memory_space<vmem>>, vector<18x16x128xbf16>
    tpu.vector_store %arg8[%c0_216, %c0_217, %c0_218], %213 {strides = array<i32>} : memref<18x16x384xbf16, #tpu.memory_space<vmem>>, vector<18x16x128xbf16>,
    %c0_219 = arith.constant 0 : index
    %c1_220 = arith.constant 1 : index
    %c0_221 = arith.constant 0 : index
    %215 = vector.load %arg7[%c0_219, %c1_220, %c0_221] : memref<18x18x128xf32, #tpu.memory_space<vmem>>, vector<18x16x128xf32>
    %216 = arith.truncf %215 : vector<18x16x128xf32> to vector<18x16x128xbf16>
    %c0_222 = arith.constant 0 : index
    %c0_223 = arith.constant 0 : index
    %c128 = arith.constant 128 : index
    %217 = vector.load %arg8[%c0_222, %c0_223, %c128] : memref<18x16x384xbf16, #tpu.memory_space<vmem>>, vector<18x16x128xbf16>
    tpu.vector_store %arg8[%c0_222, %c0_223, %c128], %216 {strides = array<i32>} : memref<18x16x384xbf16, #tpu.memory_space<vmem>>, vector<18x16x128xbf16>,
    %c0_224 = arith.constant 0 : index
    %c2_225 = arith.constant 2 : index
    %c0_226 = arith.constant 0 : index
    %218 = vector.load %arg7[%c0_224, %c2_225, %c0_226] : memref<18x18x128xf32, #tpu.memory_space<vmem>>, vector<18x16x128xf32>
    %219 = arith.truncf %218 : vector<18x16x128xf32> to vector<18x16x128xbf16>
    %c0_227 = arith.constant 0 : index
    %c0_228 = arith.constant 0 : index
    %c256 = arith.constant 256 : index
    %220 = vector.load %arg8[%c0_227, %c0_228, %c256] : memref<18x16x384xbf16, #tpu.memory_space<vmem>>, vector<18x16x128xbf16>
    tpu.vector_store %arg8[%c0_227, %c0_228, %c256], %219 {strides = array<i32>} : memref<18x16x384xbf16, #tpu.memory_space<vmem>>, vector<18x16x128xbf16>,
    %c0_229 = arith.constant 0 : index
    %c0_230 = arith.constant 0 : index
    %c0_231 = arith.constant 0 : index
    %221 = vector.load %arg8[%c0_229, %c0_230, %c0_231] : memref<18x16x384xbf16, #tpu.memory_space<vmem>>, vector<16x16x384xbf16>
    %222 = vector.shape_cast %221 : vector<16x16x384xbf16> to vector<256x384xbf16>
    %c0_232 = arith.constant 0 : index
    %c0_233 = arith.constant 0 : index
    %223 = vector.load %arg2[%c0_232, %c0_233] : memref<1152x128xbf16, #tpu.memory_space<vmem>>, vector<384x128xbf16>
    %cst_234 = arith.constant dense<0.000000e+00> : vector<256x128xf32>
    %224 = tpu.matmul %222, %223, %cst_234 {dimension_numbers = #tpu.dot_dimension_numbers<[1], [0], [0], [1], [0, 0, 1, 1], [], []>} : vector<256x384xbf16>, vector<384x128xbf16>, vector<256x128xf32> -> vector<256x128xf32>
    %c1_235 = arith.constant 1 : index
    %c0_236 = arith.constant 0 : index
    %c0_237 = arith.constant 0 : index
    %225 = vector.load %arg8[%c1_235, %c0_236, %c0_237] : memref<18x16x384xbf16, #tpu.memory_space<vmem>>, vector<16x16x384xbf16>
    %226 = vector.shape_cast %225 : vector<16x16x384xbf16> to vector<256x384xbf16>
    %c384 = arith.constant 384 : index
    %c0_238 = arith.constant 0 : index
    %227 = vector.load %arg2[%c384, %c0_238] : memref<1152x128xbf16, #tpu.memory_space<vmem>>, vector<384x128xbf16>
    %cst_239 = arith.constant dense<0.000000e+00> : vector<256x128xf32>
    %228 = tpu.matmul %226, %227, %cst_239 {dimension_numbers = #tpu.dot_dimension_numbers<[1], [0], [0], [1], [0, 0, 1, 1], [], []>} : vector<256x384xbf16>, vector<384x128xbf16>, vector<256x128xf32> -> vector<256x128xf32>
    %229 = arith.addf %224, %228 : vector<256x128xf32>
    %c2_240 = arith.constant 2 : index
    %c0_241 = arith.constant 0 : index
    %c0_242 = arith.constant 0 : index
    %230 = vector.load %arg8[%c2_240, %c0_241, %c0_242] : memref<18x16x384xbf16, #tpu.memory_space<vmem>>, vector<16x16x384xbf16>
    %231 = vector.shape_cast %230 : vector<16x16x384xbf16> to vector<256x384xbf16>
    %c768 = arith.constant 768 : index
    %c0_243 = arith.constant 0 : index
    %232 = vector.load %arg2[%c768, %c0_243] : memref<1152x128xbf16, #tpu.memory_space<vmem>>, vector<384x128xbf16>
    %cst_244 = arith.constant dense<0.000000e+00> : vector<256x128xf32>
    %233 = tpu.matmul %231, %232, %cst_244 {dimension_numbers = #tpu.dot_dimension_numbers<[1], [0], [0], [1], [0, 0, 1, 1], [], []>} : vector<256x384xbf16>, vector<384x128xbf16>, vector<256x128xf32> -> vector<256x128xf32>
    %234 = arith.addf %229, %233 : vector<256x128xf32>
    %c0_245 = arith.constant 0 : index
    %c0_246 = arith.constant 0 : index
    %235 = vector.load %arg3[%c0_245, %c0_246] : memref<1x128xf32, #tpu.memory_space<vmem>>, vector<1x128xf32>
    %236 = vector.broadcast %235 : vector<1x128xf32> to vector<256x128xf32>
    %237 = arith.addf %234, %236 : vector<256x128xf32>
    %cst_247 = arith.constant 0.000000e+00 : f32
    %238 = vector.broadcast %cst_247 : f32 to vector<256x128xf32>
    %239 = arith.maximumf %237, %238 : vector<256x128xf32>
    %240 = vector.shape_cast %239 : vector<256x128xf32> to vector<16x16x128xf32>
    %c1_248 = arith.constant 1 : index
    %c1_249 = arith.constant 1 : index
    %c0_250 = arith.constant 0 : index
    %241 = vector.load %arg7[%c1_248, %c1_249, %c0_250] : memref<18x18x128xf32, #tpu.memory_space<vmem>>, vector<16x16x128xf32>
    tpu.vector_store %arg7[%c1_248, %c1_249, %c0_250], %240 {strides = array<i32>} : memref<18x18x128xf32, #tpu.memory_space<vmem>>, vector<16x16x128xf32>,
    %c0_251 = arith.constant 0 : index
    %c0_252 = arith.constant 0 : index
    %c0_253 = arith.constant 0 : index
    %242 = vector.load %arg7[%c0_251, %c0_252, %c0_253] : memref<18x18x128xf32, #tpu.memory_space<vmem>>, vector<18x16x128xf32>
    %243 = arith.truncf %242 : vector<18x16x128xf32> to vector<18x16x128xbf16>
    %c0_254 = arith.constant 0 : index
    %c0_255 = arith.constant 0 : index
    %c0_256 = arith.constant 0 : index
    %244 = vector.load %arg8[%c0_254, %c0_255, %c0_256] : memref<18x16x384xbf16, #tpu.memory_space<vmem>>, vector<18x16x128xbf16>
    tpu.vector_store %arg8[%c0_254, %c0_255, %c0_256], %243 {strides = array<i32>} : memref<18x16x384xbf16, #tpu.memory_space<vmem>>, vector<18x16x128xbf16>,
    %c0_257 = arith.constant 0 : index
    %c1_258 = arith.constant 1 : index
    %c0_259 = arith.constant 0 : index
    %245 = vector.load %arg7[%c0_257, %c1_258, %c0_259] : memref<18x18x128xf32, #tpu.memory_space<vmem>>, vector<18x16x128xf32>
    %246 = arith.truncf %245 : vector<18x16x128xf32> to vector<18x16x128xbf16>
    %c0_260 = arith.constant 0 : index
    %c0_261 = arith.constant 0 : index
    %c128_262 = arith.constant 128 : index
    %247 = vector.load %arg8[%c0_260, %c0_261, %c128_262] : memref<18x16x384xbf16, #tpu.memory_space<vmem>>, vector<18x16x128xbf16>
    tpu.vector_store %arg8[%c0_260, %c0_261, %c128_262], %246 {strides = array<i32>} : memref<18x16x384xbf16, #tpu.memory_space<vmem>>, vector<18x16x128xbf16>,
    %c0_263 = arith.constant 0 : index
    %c2_264 = arith.constant 2 : index
    %c0_265 = arith.constant 0 : index
    %248 = vector.load %arg7[%c0_263, %c2_264, %c0_265] : memref<18x18x128xf32, #tpu.memory_space<vmem>>, vector<18x16x128xf32>
    %249 = arith.truncf %248 : vector<18x16x128xf32> to vector<18x16x128xbf16>
    %c0_266 = arith.constant 0 : index
    %c0_267 = arith.constant 0 : index
    %c256_268 = arith.constant 256 : index
    %250 = vector.load %arg8[%c0_266, %c0_267, %c256_268] : memref<18x16x384xbf16, #tpu.memory_space<vmem>>, vector<18x16x128xbf16>
    tpu.vector_store %arg8[%c0_266, %c0_267, %c256_268], %249 {strides = array<i32>} : memref<18x16x384xbf16, #tpu.memory_space<vmem>>, vector<18x16x128xbf16>,
    %c0_269 = arith.constant 0 : index
    %c0_270 = arith.constant 0 : index
    %c0_271 = arith.constant 0 : index
    %251 = vector.load %arg8[%c0_269, %c0_270, %c0_271] : memref<18x16x384xbf16, #tpu.memory_space<vmem>>, vector<16x16x384xbf16>
    %252 = vector.shape_cast %251 : vector<16x16x384xbf16> to vector<256x384xbf16>
    %c0_272 = arith.constant 0 : index
    %c0_273 = arith.constant 0 : index
    %253 = vector.load %arg4[%c0_272, %c0_273] : memref<1152x64xbf16, #tpu.memory_space<vmem>>, vector<384x64xbf16>
    %cst_274 = arith.constant dense<0.000000e+00> : vector<256x64xf32>
    %254 = tpu.matmul %252, %253, %cst_274 {dimension_numbers = #tpu.dot_dimension_numbers<[1], [0], [0], [1], [0, 0, 1, 1], [], []>} : vector<256x384xbf16>, vector<384x64xbf16>, vector<256x64xf32> -> vector<256x64xf32>
    %c1_275 = arith.constant 1 : index
    %c0_276 = arith.constant 0 : index
    %c0_277 = arith.constant 0 : index
    %255 = vector.load %arg8[%c1_275, %c0_276, %c0_277] : memref<18x16x384xbf16, #tpu.memory_space<vmem>>, vector<16x16x384xbf16>
    %256 = vector.shape_cast %255 : vector<16x16x384xbf16> to vector<256x384xbf16>
    %c384_278 = arith.constant 384 : index
    %c0_279 = arith.constant 0 : index
    %257 = vector.load %arg4[%c384_278, %c0_279] : memref<1152x64xbf16, #tpu.memory_space<vmem>>, vector<384x64xbf16>
    %cst_280 = arith.constant dense<0.000000e+00> : vector<256x64xf32>
    %258 = tpu.matmul %256, %257, %cst_280 {dimension_numbers = #tpu.dot_dimension_numbers<[1], [0], [0], [1], [0, 0, 1, 1], [], []>} : vector<256x384xbf16>, vector<384x64xbf16>, vector<256x64xf32> -> vector<256x64xf32>
    %259 = arith.addf %254, %258 : vector<256x64xf32>
    %c2_281 = arith.constant 2 : index
    %c0_282 = arith.constant 0 : index
    %c0_283 = arith.constant 0 : index
    %260 = vector.load %arg8[%c2_281, %c0_282, %c0_283] : memref<18x16x384xbf16, #tpu.memory_space<vmem>>, vector<16x16x384xbf16>
    %261 = vector.shape_cast %260 : vector<16x16x384xbf16> to vector<256x384xbf16>
    %c768_284 = arith.constant 768 : index
    %c0_285 = arith.constant 0 : index
    %262 = vector.load %arg4[%c768_284, %c0_285] : memref<1152x64xbf16, #tpu.memory_space<vmem>>, vector<384x64xbf16>
    %cst_286 = arith.constant dense<0.000000e+00> : vector<256x64xf32>
    %263 = tpu.matmul %261, %262, %cst_286 {dimension_numbers = #tpu.dot_dimension_numbers<[1], [0], [0], [1], [0, 0, 1, 1], [], []>} : vector<256x384xbf16>, vector<384x64xbf16>, vector<256x64xf32> -> vector<256x64xf32>
    %264 = arith.addf %259, %263 : vector<256x64xf32>
    %c0_287 = arith.constant 0 : index
    %c0_288 = arith.constant 0 : index
    %265 = vector.load %arg5[%c0_287, %c0_288] : memref<1x64xf32, #tpu.memory_space<vmem>>, vector<1x64xf32>
    %266 = vector.broadcast %265 : vector<1x64xf32> to vector<256x64xf32>
    %267 = arith.addf %264, %266 : vector<256x64xf32>
    %cst_289 = arith.constant 0.000000e+00 : f32
    %268 = vector.broadcast %cst_289 : f32 to vector<256x64xf32>
    %269 = arith.maximumf %267, %268 : vector<256x64xf32>
    %270 = vector.extract_strided_slice %269 {offsets = [0, 0], sizes = [128, 64], strides = [1, 1]} : vector<256x64xf32> to vector<128x64xf32>
    %271 = vector.extract_strided_slice %269 {offsets = [128, 0], sizes = [128, 64], strides = [1, 1]} : vector<256x64xf32> to vector<128x64xf32>
    %272 = tpu.concatenate %270, %271 in 1 : vector<128x64xf32>, vector<128x64xf32> -> vector<128x128xf32>
    %c0_290 = arith.constant 0 : index
    %c0_291 = arith.constant 0 : index
    %c0_292 = arith.constant 0 : index
    %273 = vector.load %arg6[%c0_290, %c0_291, %c0_292] : memref<1x128x128xf32, #tpu.memory_space<vmem>>, vector<1x128x128xf32>
    %274 = vector.shape_cast %273 : vector<1x128x128xf32> to vector<128x128xf32>
    %275 = vector.shape_cast %272 : vector<128x128xf32> to vector<1x128x128xf32>
    tpu.vector_store %arg6[%c0_290, %c0_291, %c0_292], %275 {strides = array<i32>} : memref<1x128x128xf32, #tpu.memory_space<vmem>>, vector<1x128x128xf32>,
    return
  }
  func.func @transform_0(%arg0: i32) -> (i32, i32, i32, i32) {
    %c0_i32 = arith.constant 0 : i32
    %c0_i32_0 = arith.constant 0 : i32
    %c0_i32_1 = arith.constant 0 : i32
    %c0_i32_2 = arith.constant 0 : i32
    return %arg0, %c0_i32, %c0_i32_0, %c0_i32_1 : i32, i32, i32, i32
  }
  func.func @transform_1(%arg0: i32) -> (i32, i32) {
    %c0_i32 = arith.constant 0 : i32
    %c0_i32_0 = arith.constant 0 : i32
    %c0_i32_1 = arith.constant 0 : i32
    return %c0_i32, %c0_i32_0 : i32, i32
  }
  func.func @transform_2(%arg0: i32) -> (i32, i32) {
    %c0_i32 = arith.constant 0 : i32
    %c0_i32_0 = arith.constant 0 : i32
    %c0_i32_1 = arith.constant 0 : i32
    return %c0_i32, %c0_i32_0 : i32, i32
  }
  func.func @transform_3(%arg0: i32) -> (i32, i32) {
    %c0_i32 = arith.constant 0 : i32
    %c0_i32_0 = arith.constant 0 : i32
    %c0_i32_1 = arith.constant 0 : i32
    return %c0_i32, %c0_i32_0 : i32, i32
  }
  func.func @transform_4(%arg0: i32) -> (i32, i32) {
    %c0_i32 = arith.constant 0 : i32
    %c0_i32_0 = arith.constant 0 : i32
    %c0_i32_1 = arith.constant 0 : i32
    return %c0_i32, %c0_i32_0 : i32, i32
  }
  func.func @transform_5(%arg0: i32) -> (i32, i32, i32) {
    %c0_i32 = arith.constant 0 : i32
    %c0_i32_0 = arith.constant 0 : i32
    %c0_i32_1 = arith.constant 0 : i32
    return %arg0, %c0_i32, %c0_i32_0 : i32, i32, i32
  }
}

</mosaic_0001>

<bundles_post_ra>
// kernel: _lambda_.1
= control target key start
LH: loop header
LB: loop body
LE: loop exit
PB: predicated region body
PF: predicated region fallthrough
CT: control target
= control target key end

     0   :  { %10 = vsyncpa [#allocation6], 0  ;;  %s9568_s0 = inlined_call_operand.hbm [shape: f32[2,8,8,128], index: 0, kind: input, shape index: {}]   ;;  %s9569_s1 = inlined_call_operand.hbm [shape: bf16[1152,128], index: 1, kind: input, shape index: {}]   ;;  %s9570_s2 = inlined_call_operand.vmem [shape: f32[1,128], index: 2, kind: input, shape index: {}]   ;;  %s9571_s3 = inlined_call_operand.hbm [shape: bf16[1152,64], index: 3, kind: input, shape index: {}]   ;;  %s9572_s4 = inlined_call_operand.vmem [shape: f32[1,64], index: 4, kind: input, shape index: {}]   ;;  %s9573_s5 = inlined_call_operand.vmem [shape: f32[2,128,128], index: 5, kind: output, shape index: {}]  }
   0x1   :  { %12 = vsyncpa [#allocation6 + $0x1], 0 }
   0x2   :  { %13 = vsyncpa [#allocation8], 0  ;;  %s7995_s18 = smov 0   ;;  %s7997_s19 = smov 0  }
   0x3   :  { %s7999_s20 = smov 0   ;;  %s8001_s21 = smov 0  }
   0x4 LB: > { %s8014_s22 = sadd.s32 4294967295, %s7954_s21   ;;  %p39_p0 = scmp.ne.s32.totalorder %s7946_s19, %s7942_s18  ;;  %s7954_s21 = sphi %s8001_s21, %s9664_s21   ;;  %s7950_s20 = sphi %s7999_s20, %s9663_s20   ;;  %s7946_s19 = sphi %s7997_s19, %s9662_s19   ;;  %s7942_s18 = sphi %s7995_s18, %s9661_s18  }
   0x5   : > { %p9574_p1 = scmp.eq.s32.totalorder %s8014_s22, 0  ;;  %p6029_p2 = scmp.ge.s32.totalorder %s7954_s21, 1 }
   0x6   : > { %p160_p3 = scmp.lt.s32.totalorder %s7954_s21, 3  ;;  %s7956_s25 = smov [#allocation7]  }
   0x7   : > { %p8022_p4 = por %p9574_p1, %p39_p0  ;;  %s172_s26 = sshll.u32 %s7956_s25, 4  ;;  %s173_s26 = int_to_ptr.vmem [resolvable:$true] %s172_s26 }
   0x8   : > { %p8026_p5 = pnand %p6029_p2, %p160_p3  ;;  %s7957_s28 = smov [#allocation9]  }
   0x9   : > { %s9597_s23 = scalar_select %p8022_p4, 1, 0 }
   0xa   : > { %s9598_s24 = scalar_select %p8026_p5, 1, 0 }
   0xb   : > { %p7626_p6 = pneg %p8026_p5  ;;  %s188_s29 = sshll.u32 %s7957_s28, 4  ;;  %s8038_s29 = int_to_ptr.vmem [resolvable:$true] %s188_s29 }
   0xc   : > { %s7830_s7 = scalar_lea.hbm %s9569_s1, 9216 }
   0xd   : > { %p8034_p7 = pnand %p7626_p6, %p9574_p1  ;;  %p7831_p8 = scmp.ne.s32.totalorder %s9569_s1, %s7830_s7 }
   0xe   : > { %p7837_p12 = scmp.lt.u32.totalorder %s7830_s7, %s9569_s1 }
   0xf   : > { %p7832_p9 = pneg %p8034_p7 }
  0x11   : > { %p7833_p10 = pnand %p7832_p9, %p7831_p8 }
  0x13   : > { %p7834_p11 = pneg %p7833_p10 }
  0x15   : > { %p7839_p13 = pnand %p7837_p12, %p7834_p11 }
  0x17   : > { %7842 = shalt.err (!%p7839_p13)
}
  0x18   : > { %s7843_s12 = scalar_lea.vmem %s173_s26, 9216  ;;  %p7851_p6 = scmp.lt.s32.totalorder %s173_s26, %s173_s26 }
  0x19   : > { %p7844_p0 = scmp.ne.s32.totalorder %s173_s26, %s7843_s12  ;;  %p7852_p1 = scmp.lt.s32.totalorder %s7843_s12, %s7843_s12 }
  0x1b   : > { %p7846_p2 = pnand %p7844_p0, %p7832_p9  ;;  %p7853_p4 = por %p7852_p1, %p7851_p6 }
  0x1d   : > { %p7847_p3 = pneg %p7846_p2 }
  0x1f   : > { %p7854_p5 = pnand %p7853_p4, %p7847_p3 }
  0x21   : > { %7857 = shalt.err (!%p7854_p5)
}
  0x22   : > { %s7958_s13 = smov 64   ;;  %s7959_s14 = smov 4  }
  0x23   : > { %7629 = dma.hbm_to_vmem [thread:$0]  (!%p8034_p7), %s9569_s1, 9216, %s173_s26, [#allocation8], %s7958_s13, %s7958_s13, %s7959_s14  }
  0x24   : > { %s7858_s25 = scalar_lea.hbm %s9571_s3, 9216 }
  0x25   : > { %p7859_p8 = scmp.ne.s32.totalorder %s9571_s3, %s7858_s25  ;;  %p7865_p5 = scmp.lt.u32.totalorder %s7858_s25, %s9571_s3 }
  0x27   : > { %p7861_p1 = pnand %p7859_p8, %p7832_p9 }
  0x29   : > { %p7862_p4 = pneg %p7861_p1 }
  0x2b   : > { %p7867_p10 = pnand %p7865_p5, %p7862_p4 }
  0x2d   : > { %7870 = shalt.err (!%p7867_p10)
}
  0x2e   : > { %s7871_s26 = scalar_lea.vmem %s8038_s29, 9216  ;;  %p7879_p0 = scmp.lt.s32.totalorder %s8038_s29, %s8038_s29 }
  0x2f   : > { %p7872_p11 = scmp.ne.s32.totalorder %s8038_s29, %s7871_s26  ;;  %p7880_p2 = scmp.lt.s32.totalorder %s7871_s26, %s7871_s26 }
  0x31   : > { %p7874_p12 = pnand %p7872_p11, %p7832_p9  ;;  %p7881_p3 = por %p7880_p2, %p7879_p0 }
  0x33   : > { %p7875_p13 = pneg %p7874_p12 }
  0x35   : > { %p7882_p6 = pnand %p7881_p3, %p7875_p13 }
  0x37   : > { %7885 = shalt.err (!%p7882_p6)
}
  0x38   : > { %7632 = dma.hbm_to_vmem [thread:$0]  (!%p8034_p7), %s9571_s3, 9216, %s8038_s29, [#allocation8], %s7958_s13, %s7958_s13, %s7959_s14  }
  0x39   : > { %s8088_s10 = sadd.s32 1, %s7954_s21   ;;  %s26_s11 = sadd.s32 1, %s7950_s20 }
  0x3a   : > { %s23_s27 = ssub.s32 %s7954_s21, %s8088_s10  ;;  %p33_p9 = scmp.ne.s32.totalorder %s7950_s20, %s7946_s19 }
  0x3b   : > { %p24_p8 = scmp.eq.s32.totalorder %s23_s27, 0  ;;  %p34_p1 = scmp.eq.s32.totalorder %s7954_s21, 0 }
  0x3c   : > { %p7639_p4 = scmp.lt.s32.totalorder %s7954_s21, 2  ;;  %s205_s12 = sand.u32 1, %s7950_s20  }
  0x3d   : > { %s8099_s15 = scalar_select %p24_p8, %s7950_s20, %s26_s11  }
  0x3e   : > { %p35_p5 = por %p34_p1, %p33_p9  ;;  %s6033_s16 = sshll.u32 %s205_s12, 6 }
  0x3f   : > { %s6190_s17 = sshll.u32 %s7954_s21, 10  ;;  %s209_s29 = scalar_lea.vmem [#allocation5], %s6033_s16 }
  0x40   : > { %s8105_s28 = scalar_lea.hbm %s9568_s0, %s6190_s17  ;;  %s216_s13 = sshll.u32 %s209_s29, 4  ;;  %s8111_s13 = int_to_ptr.vmem [resolvable:$true] %s216_s13 }
  0x41   : > { %p8107_p7 = pnand %p7639_p4, %p35_p5  ;;  %s8113_s21 = scalar_lea.sflag [#allocation6], %s205_s12 }
  0x42   : > { %s7886_s30 = scalar_lea.hbm %s8105_s28, 1024  ;;  %s7891_s26 = scalar_lea.hbm %s9568_s0, 2048 }
  0x43   : > { %p7887_p10 = scmp.ne.s32.totalorder %s8105_s28, %s7886_s30  ;;  %p7888_p11 = pneg %p8107_p7 }
  0x44   : > { %p7892_p0 = scmp.lt.u32.totalorder %s8105_s28, %s9568_s0  ;;  %p7893_p2 = scmp.lt.u32.totalorder %s7891_s26, %s7886_s30 }
  0x45   : > { %p7889_p12 = pnand %p7888_p11, %p7887_p10  ;;  %p7895_p6 = scmp.lt.u32.totalorder %s7886_s30, %s8105_s28 }
  0x46   : > { %p7894_p3 = por %p7893_p2, %p7892_p0 }
  0x47   : > { %p7890_p13 = pneg %p7889_p12 }
  0x48   : > { %p7896_p9 = por %p7895_p6, %p7894_p3 }
  0x4a   : > { %p7897_p8 = pnand %p7896_p9, %p7890_p13 }
  0x4c   : > { %7900 = shalt.err (!%p7897_p8)
}
  0x4d   : > { %s7901_s11 = scalar_lea.vmem %s8111_s13, 1024  ;;  %s7960_s27 = smov [#allocation5]  }
  0x4e   : > { %p7902_p1 = scmp.ne.s32.totalorder %s8111_s13, %s7901_s11  ;;  %s7906_s12 = sshll.u32 %s7960_s27, 4  ;;  %s7907_s12 = int_to_ptr.vmem [resolvable:$false] %s7906_s12 }
  0x4f   : > { %s7908_s16 = scalar_lea.vmem %s7907_s12, 2048  ;;  %p7909_p10 = scmp.lt.s32.totalorder %s8111_s13, %s7907_s12 }
  0x50   : > { %p7904_p4 = pnand %p7902_p1, %p7888_p11  ;;  %p7910_p12 = scmp.lt.s32.totalorder %s7908_s16, %s7901_s11 }
  0x52   : > { %p7905_p5 = pneg %p7904_p4  ;;  %p7911_p0 = por %p7910_p12, %p7909_p10 }
  0x54   : > { %p7912_p2 = pnand %p7911_p0, %p7905_p5 }
  0x56   : > { %7915 = shalt.err (!%p7912_p2)
}
  0x57   : > { %s7961_s17 = smov 128   ;;  %s7962_s18 = smov 8  }
  0x58   : > { %7636 = dma.hbm_to_vmem [thread:$0]  (!%p8107_p7), %s8105_s28, 1024, %s8111_s13, %s8113_s21, %s7961_s17, %s7961_s17, %s7962_s18  }
  0x59   : > { %p9601_p11 = scmp.ne.s32.totalorder %s9598_s24, 0 }
  0x5b   : > { %228 = sbr.rel (%p9601_p11) target bundleno = 1524 (0x5f4), region = 40 }
  0x62   : > { %s230_s25 = sand.u32 1, %s7946_s19   ;;  %p9602_p13 = scmp.ne.s32.totalorder %s9597_s23, 0 }
  0x63   : > { %s6037_s29 = sshll.u32 %s230_s25, 6  ;;  %s231_s30 = scalar_lea.sflag [#allocation6], %s230_s25 }
  0x64   : > { %s8144_s6 = scalar_lea.vmem [#allocation5], %s6037_s29 }
  0x65   : > { %7933 = dma.done.wait (%p9602_p13), %s231_s30, 1024  }
  0x66   : > { %7935 = vsyncadd (%p9602_p13), %s231_s30, 4294966272  ;;  %p9603_p3 = scmp.eq.s32.totalorder %s8014_s22, 0 }
  0x68   : > { %7937 = dma.done.wait (%p9603_p3), [#allocation8], 18432   ;;  %p9604_p7 = pmov %p9603_p3 }
  0x69   : > { %v7963_v0 = vmov 0.0   ;;  %v7682_v1 = vld [vmem:[#allocation7 + $0x100] sm:$0xff]   ;;  %v7686_v5 = vld [vmem:[#allocation7 + $0x108] sm:$0xff]   ;;  %v7690_v9 = vld [vmem:[#allocation7 + $0x110] sm:$0xff]   ;;  %s7964_s14 = smov 64   ;;  %p269_p6 = scmp.lt.s32.totalorder %s8014_s22, 1 }
  0x6a   : > { %7939 = vsyncadd (%p9604_p7), [#allocation8], 4294948864  ;;  %357 = vst [vmem:[#allocation2 + $0x18] sm:$0x1] %v7963_v0  ;;  %v7683_v2 = vld [vmem:[#allocation7 + $0xc0] sm:$0xff]   ;;  %6192 = vmatprep.subr.bf16.mxu0 %v7682_v1  ;;  %v7687_v6 = vld [vmem:[#allocation7 + $0xc8] sm:$0xff]  }
  0x6b   : > { %349 = vst [vmem:[#allocation2] sm:$0xff] %v7963_v0  ;;  %350 = vst [vmem:[#allocation2 + $0x8] sm:$0xff] %v7963_v0  ;;  %v7684_v3 = vld [vmem:[#allocation7 + $0x40] sm:$0xff]   ;;  %6193 = vmatpush3.bf16.msra.mxu0 %v7683_v2  ;;  %v7688_v7 = vld [vmem:[#allocation7 + $0x48] sm:$0xff]   ;;  %s9666_s22 = smov (!%p269_p6, %s8014_s22), 1  ;;  %vm5909_vm0 = vcmask 523264  }
  0x6c   : > { %351 = vst [vmem:[#allocation2 + $0x10] sm:$0x3] %v7963_v0  ;;  %353 = vst [vmem:[#allocation2 + $0x198] sm:$0xff] %v7963_v0  ;;  %v7685_v4 = vld [vmem:[#allocation7] sm:$0xff]   ;;  %6328 = vmatprep.subr.bf16.mxu1 %v7684_v3  ;;  %6194 = vmatprep.subr.bf16.mxu0 %v7686_v5  ;;  %v7689_v8 = vld [vmem:[#allocation7 + $0x8] sm:$0xff]   ;;  %s6191_s21 = sshll.u32 %s9666_s22, 7 }
  0x6d   : > { %354 = vst [vmem:[#allocation2 + $0x1a0] sm:$0xff] %v7963_v0  ;;  %355 = vst [vmem:[#allocation2 + $0x1a8] sm:$0x3] %v7963_v0  ;;  %6329 = vmatpush3.bf16.msra.mxu1 %v7685_v4  ;;  %v7691_v10 = vld [vmem:[#allocation7 + $0xd0] sm:$0xff]   ;;  %v7694_v13 = vld [vmem:[#allocation7 + $0x118] sm:$0xff]   ;;  %s9506_s8 = scalar_lea.vmem %s9573_s5, %s6191_s21 }
  0x6e   : > { %358 = vst [vmem:[#allocation2 + $0x30] sm:$0x1] %v7963_v0  ;;  %359 = vst [vmem:[#allocation2 + $0x48] sm:$0x1] %v7963_v0  ;;  %6330 = vmatprep.subr.bf16.mxu1 %v7688_v7  ;;  %v7692_v11 = vld [vmem:[#allocation7 + $0x50] sm:$0xff]   ;;  %v7695_v14 = vld [vmem:[#allocation7 + $0xd8] sm:$0xff]  }
  0x6f   : > { %360 = vst [vmem:[#allocation2 + $0x60] sm:$0x1] %v7963_v0  ;;  %361 = vst [vmem:[#allocation2 + $0x78] sm:$0x1] %v7963_v0  ;;  %6195 = vmatpush3.bf16.msra.mxu0 %v7687_v6  ;;  %v7693_v12 = vld [vmem:[#allocation7 + $0x10] sm:$0xff]   ;;  %v7696_v15 = vld [vmem:[#allocation7 + $0x58] sm:$0xff]  }
  0x70   : > { %362 = vst [vmem:[#allocation2 + $0x90] sm:$0x1] %v7963_v0  ;;  %363 = vst [vmem:[#allocation2 + $0xa8] sm:$0x1] %v7963_v0  ;;  %6196 = vmatprep.subr.bf16.mxu0 %v7690_v9  ;;  %v7697_v16 = vld [vmem:[#allocation7 + $0x18] sm:$0xff]   ;;  %v7698_v17 = vld [vmem:[#allocation7 + $0x120] sm:$0xff]  }
  0x71   : > { %364 = vst [vmem:[#allocation2 + $0xc0] sm:$0x1] %v7963_v0  ;;  %365 = vst [vmem:[#allocation2 + $0xd8] sm:$0x1] %v7963_v0  ;;  %6331 = vmatpush3.bf16.msra.mxu1 %v7689_v8  ;;  %v7699_v18 = vld [vmem:[#allocation7 + $0xe0] sm:$0xff]   ;;  %v7702_v21 = vld [vmem:[#allocation7 + $0x128] sm:$0xff]  }
  0x72   : > { %366 = vst [vmem:[#allocation2 + $0xf0] sm:$0x1] %v7963_v0  ;;  %367 = vst [vmem:[#allocation2 + $0x108] sm:$0x1] %v7963_v0  ;;  %6332 = vmatprep.subr.bf16.mxu1 %v7692_v11  ;;  %v7700_v19 = vld [vmem:[#allocation7 + $0x60] sm:$0xff]   ;;  %v7703_v22 = vld [vmem:[#allocation7 + $0xe8] sm:$0xff]  }
  0x73   : > { %368 = vst [vmem:[#allocation2 + $0x120] sm:$0x1] %v7963_v0  ;;  %369 = vst [vmem:[#allocation2 + $0x138] sm:$0x1] %v7963_v0  ;;  %6197 = vmatpush3.bf16.msra.mxu0 %v7691_v10  ;;  %v7701_v20 = vld [vmem:[#allocation7 + $0x20] sm:$0xff]   ;;  %v7704_v23 = vld [vmem:[#allocation7 + $0x68] sm:$0xff]  }
  0x74   : > { %370 = vst [vmem:[#allocation2 + $0x150] sm:$0x1] %v7963_v0  ;;  %371 = vst [vmem:[#allocation2 + $0x168] sm:$0x1] %v7963_v0  ;;  %6198 = vmatprep.subr.bf16.mxu0 %v7694_v13  ;;  %v7705_v24 = vld [vmem:[#allocation7 + $0x28] sm:$0xff]   ;;  %v7706_v25 = vld [vmem:[#allocation7 + $0x130] sm:$0xff]  }
  0x75   : > { %372 = vst [vmem:[#allocation2 + $0x180] sm:$0x1] %v7963_v0  ;;  %375 = vst [vmem:[#allocation2 + $0x29] sm:$0x1] %v7963_v0  ;;  %6333 = vmatpush3.bf16.msra.mxu1 %v7693_v12  ;;  %v7707_v26 = vld [vmem:[#allocation7 + $0xf0] sm:$0xff]   ;;  %v7710_v29 = vld [vmem:[#allocation7 + $0x138] sm:$0xff]  }
  0x76   : > { %376 = vst [vmem:[#allocation2 + $0x41] sm:$0x1] %v7963_v0  ;;  %377 = vst [vmem:[#allocation2 + $0x59] sm:$0x1] %v7963_v0  ;;  %6334 = vmatprep.subr.bf16.mxu1 %v7696_v15  ;;  %v7708_v27 = vld [vmem:[#allocation7 + $0x70] sm:$0xff]   ;;  %v7711_v30 = vld [vmem:[#allocation7 + $0xf8] sm:$0xff]  }
  0x77   : > { %378 = vst [vmem:[#allocation2 + $0x71] sm:$0x1] %v7963_v0  ;;  %379 = vst [vmem:[#allocation2 + $0x89] sm:$0x1] %v7963_v0  ;;  %6199 = vmatpush3.bf16.msra.mxu0 %v7695_v14  ;;  %v7709_v28 = vld [vmem:[#allocation7 + $0x30] sm:$0xff]   ;;  %v7712_v31 = vld [vmem:[#allocation7 + $0x78] sm:$0xff]  }
  0x78   : > { %380 = vst [vmem:[#allocation2 + $0xa1] sm:$0x1] %v7963_v0  ;;  %381 = vst [vmem:[#allocation2 + $0xb9] sm:$0x1] %v7963_v0  ;;  %6200 = vmatprep.subr.bf16.mxu0 %v7698_v17  ;;  %v7713_v32 = vld [vmem:[#allocation7 + $0x38] sm:$0xff]   ;;  %v275_v33 = vld [vmem:[%s8144_s6] sm:$0xff] }
  0x79   : > { %382 = vst [vmem:[#allocation2 + $0xd1] sm:$0x1] %v7963_v0  ;;  %383 = vst [vmem:[#allocation2 + $0xe9] sm:$0x1] %v7963_v0  ;;  %6335 = vmatpush3.bf16.msra.mxu1 %v7697_v16  ;;  %v276_v34 = vld [vmem:[%s8144_s6 + $0x8] sm:$0xff]  ;;  %v8198_v36 = vld [vmem:[#allocation7 + $0x140] sm:$0xff]  }
  0x7a   : > { %384 = vst [vmem:[#allocation2 + $0x101] sm:$0x1] %v7963_v0  ;;  %385 = vst [vmem:[#allocation2 + $0x119] sm:$0x1] %v7963_v0  ;;  %6336 = vmatprep.subr.bf16.mxu1 %v7700_v19  ;;  %v284_v35 = vsub.f32 %v276_v34, %v275_v33  ;;  %v1873_v37 = vld [vmem:[#allocation2 + $0x1] sm:$0xff]  ;;  %v1874_v38 = vld [vmem:[#allocation2 + $0x9] sm:$0xff] }
  0x7b   : > { %386 = vst [vmem:[#allocation2 + $0x131] sm:$0x1] %v7963_v0  ;;  %387 = vst [vmem:[#allocation2 + $0x149] sm:$0x1] %v7963_v0  ;;  %6201 = vmatpush3.bf16.msra.mxu0 %v7699_v18  ;;  %v1909_v40 = vpack.c.bf16 %v1874_v38, %v1873_v37  ;;  %v8203_v44 = vld [vmem:[%s8144_s6 + $0x10] sm:$0xff] }
  0x7c   : > { %388 = vst [vmem:[#allocation2 + $0x161] sm:$0x1] %v7963_v0  ;;  %389 = vst [vmem:[#allocation2 + $0x179] sm:$0x1] %v7963_v0  ;;  %6202 = vmatprep.subr.bf16.mxu0 %v7702_v21  ;;  %v285_v42 = vmul.f32 0.46666667, %v284_v35  ;;  %v293_v47 = vsub.f32 %v8203_v44, %v276_v34 }
  0x7d   : > { %390 = vst [vmem:[#allocation2 + $0x191] sm:$0x1] %v7963_v0  ;;  %356 = vst [vmem:[#allocation2] sm:$0x1] %v7963_v0  ;;  %6337 = vmatpush3.bf16.msra.mxu1 %v7701_v20  ;;  %v289_v43 = vmul.f32 0.93333334, %v284_v35  ;;  %2852 = vmatprep.mubr.bf16.mxu1 %v1909_v40 }
  0x7e   : > { %373 = vst [vmem:[#allocation2 + $0x198] sm:$0x1] %v7963_v0  ;;  %374 = vst [vmem:[#allocation2 + $0x11] sm:$0x1] %v7963_v0  ;;  %6338 = vmatprep.subr.bf16.mxu1 %v7704_v23  ;;  %v286_v45 = vadd.f32 %v285_v42, %v275_v33  ;;  %v294_v48 = vmul.f32 0.4, %v293_v47 }
  0x7f   : > { %391 = vst [vmem:[#allocation2 + $0x1a9] sm:$0x1] %v7963_v0  ;;  %6203 = vmatpush3.bf16.msra.mxu0 %v7703_v22  ;;  %283 = vst [vmem:[#allocation4] sm:$0xff] %v275_v33  ;;  %v290_v46 = vadd.f32 %v289_v43, %v275_v33  ;;  %v298_v49 = vmul.f32 0.8666667, %v293_v47 }
  0x80   : > { %6204 = vmatprep.subr.bf16.mxu0 %v7706_v25  ;;  %288 = vst [vmem:[#allocation4 + $0x8] sm:$0xff] %v286_v45  ;;  %v295_v57 = vadd.f32 %v294_v48, %v276_v34 }
  0x81   : > { %6339 = vmatpush3.bf16.msra.mxu1 %v7705_v24  ;;  %292 = vst [vmem:[#allocation4 + $0x10] sm:$0xff] %v290_v46  ;;  %v299_v58 = vadd.f32 %v298_v49, %v276_v34 }
  0x82   : > { %6340 = vmatprep.subr.bf16.mxu1 %v7708_v27  ;;  %297 = vst [vmem:[#allocation4 + $0x18] sm:$0xff] %v295_v57 }
  0x83   : > { %6205 = vmatpush3.bf16.msra.mxu0 %v7707_v26  ;;  %301 = vst [vmem:[#allocation4 + $0x20] sm:$0xff] %v299_v58 }
  0x84   : > { %6206 = vmatprep.subr.bf16.mxu0 %v7710_v29  ;;  %v1801_v39 = vld [vmem:[#allocation2] sm:$0xff] }
  0x85   : > { %6341 = vmatpush3.bf16.msra.mxu1 %v7709_v28  ;;  %v1837_v41 = vpack.c.bf16 %v7963_v0, %v1801_v39 }
  0x86   : > { %6342 = vmatprep.subr.bf16.mxu1 %v7712_v31  ;;  %v392_v50 = vld [vmem:[#allocation4] sm:$0x1]  ;;  %v441_v52 = vld [vmem:[#allocation4 + $0x1] sm:$0x1]  ;;  %v633_v60 = vld [vmem:[#allocation4 + $0x2] sm:$0x1] }
  0x87   : > { %6207 = vmatpush3.bf16.msra.mxu0 %v7711_v30  ;;  %v425_v51 = vld [vmem:[#allocation4] sm:$0x1]  ;;  %409 = vst [vmem:[#allocation2 + $0x19] sm:$0x1] %v392_v50  ;;  %v537_v55 = vld [vmem:[#allocation4 + $0x1] sm:$0x1] }
  0x88   : > { %7008 = vmatprep.subr.bf16.mxu0 %v8198_v36  ;;  %v457_v53 = vsub.f32 %v441_v52, %v425_v51  ;;  %v521_v54 = vld [vmem:[#allocation4] sm:$0x1]  ;;  %v617_v56 = vld [vmem:[#allocation4 + $0x1] sm:$0x1]  ;;  %v729_v62 = vld [vmem:[#allocation4 + $0x2] sm:$0x1] }
  0x89   : > { %6343 = vmatpush3.bf16.msra.mxu1 %v7713_v32  ;;  %v553_v59 = vsub.f32 %v537_v55, %v521_v54  ;;  %v713_v61 = vld [vmem:[#allocation4 + $0x1] sm:$0x1]  ;;  %v649_v0 = vsub.f32 %v633_v60, %v617_v56  ;;  %v809_v2 = vld [vmem:[#allocation4 + $0x2] sm:$0x1]  ;;  %v825_v3 = vld [vmem:[#allocation4 + $0x3] sm:$0x1] }
  0x8a   : > { %v473_v63 = vmul.f32 0.46666667, %v457_v53  ;;  %v745_v1 = vsub.f32 %v729_v62, %v713_v61  ;;  %v841_v5 = vsub.f32 %v825_v3, %v809_v2  ;;  %v905_v6 = vld [vmem:[#allocation4 + $0x2] sm:$0x1]  ;;  %v921_v7 = vld [vmem:[#allocation4 + $0x3] sm:$0x1] }
  0x8b   : > { %v569_v4 = vmul.f32 0.93333334, %v553_v59  ;;  %v665_v9 = vmul.f32 0.4, %v649_v0  ;;  %v937_v11 = vsub.f32 %v921_v7, %v905_v6  ;;  %v1001_v12 = vld [vmem:[#allocation4 + $0x3] sm:$0x1] }
  0x8c   : > { %2853 = vmatmul.mubr.bf16.vlgmr.msra.gmra.mrb[0].mxu1 %v1837_v41  ;;  %v489_v8 = vadd.f32 %v473_v63, %v425_v51  ;;  %v761_v10 = vmul.f32 0.8666667, %v745_v1  ;;  %v857_v14 = vmul.f32 0.33333334, %v841_v5  ;;  %v1017_v15 = vld [vmem:[#allocation4 + $0x4] sm:$0x1] }
  0x8d   : > { %v585_v13 = vadd.f32 %v569_v4, %v521_v54  ;;  %v1097_v16 = vld [vmem:[#allocation4 + $0x3] sm:$0x1]  ;;  %v681_v17 = vadd.f32 %v665_v9, %v617_v56  ;;  %v953_v19 = vmul.f32 0.8, %v937_v11  ;;  %v1033_v20 = vsub.f32 %v1017_v15, %v1001_v12  ;;  %v1113_v21 = vld [vmem:[#allocation4 + $0x4] sm:$0x1] }
  0x8e   : > { %505 = vst [vmem:[#allocation2 + $0x1a] sm:$0x1] %v489_v8  ;;  %v777_v18 = vadd.f32 %v761_v10, %v713_v61  ;;  %v1193_v22 = vld [vmem:[#allocation4 + $0x4] sm:$0x1]  ;;  %v873_v23 = vadd.f32 %v857_v14, %v809_v2  ;;  %v1129_v24 = vsub.f32 %v1113_v21, %v1097_v16  ;;  %v1209_v25 = vld [vmem:[#allocation4 + $0x5] sm:$0x1] }
  0x8f   : > { %601 = vst [vmem:[#allocation2 + $0x1b] sm:$0x1] %v585_v13  ;;  %v1289_v26 = vld [vmem:[#allocation4 + $0x4] sm:$0x1]  ;;  %v1305_v27 = vld [vmem:[#allocation4 + $0x5] sm:$0x1]  ;;  %v969_v28 = vadd.f32 %v953_v19, %v905_v6  ;;  %v1225_v30 = vsub.f32 %v1209_v25, %v1193_v22 }
  0x90   : > { %697 = vst [vmem:[#allocation2 + $0x1c] sm:$0x1] %v681_v17  ;;  %793 = vst [vmem:[#allocation2 + $0x1d] sm:$0x1] %v777_v18  ;;  %v1049_v29 = vmul.f32 0.26666668, %v1033_v20  ;;  %v1321_v31 = vsub.f32 %v1305_v27, %v1289_v26 }
  0x91   : > { %v1385_v32 = vld [vmem:[#allocation4 + $0x5] sm:$0x1]  ;;  %v1401_v33 = vld [vmem:[#allocation4 + $0x6] sm:$0x1]  ;;  %889 = vst [vmem:[#allocation2 + $0x1e] sm:$0x1] %v873_v23 }
  0x92   : > { %v1145_v34 = vmul.f32 0.73333335, %v1129_v24  ;;  %v1417_v35 = vsub.f32 %v1401_v33, %v1385_v32  ;;  %v1481_v37 = vld [vmem:[#allocation4 + $0x5] sm:$0x1]  ;;  %v1497_v38 = vld [vmem:[#allocation4 + $0x6] sm:$0x1]  ;;  %v1065_v39 = vadd.f32 %v1049_v29, %v1001_v12 }
  0x93   : > { %985 = vst [vmem:[#allocation2 + $0x1f] sm:$0x1] %v969_v28  ;;  %v1241_v40 = vmul.f32 0.2, %v1225_v30  ;;  %v1337_v41 = vmul.f32 0.6666667, %v1321_v31  ;;  %v1513_v42 = vsub.f32 %v1497_v38, %v1481_v37 }
  0x94   : > { %v1577_v43 = vld [vmem:[#allocation4 + $0x6] sm:$0x1]  ;;  %v1161_v45 = vadd.f32 %v1145_v34, %v1097_v16  ;;  %v1433_v46 = vmul.f32 0.13333334, %v1417_v35  ;;  %v1593_v47 = vld [vmem:[#allocation4 + $0x7] sm:$0x1] }
  0x95   : > { %v1673_v48 = vld [vmem:[#allocation4 + $0x6] sm:$0x1]  ;;  %1081 = vst [vmem:[#allocation2 + $0x20] sm:$0x1] %v1065_v39  ;;  %v1257_v49 = vadd.f32 %v1241_v40, %v1193_v22  ;;  %v1353_v50 = vadd.f32 %v1337_v41, %v1289_v26  ;;  %v1529_v51 = vmul.f32 0.6, %v1513_v42  ;;  %v1609_v52 = vsub.f32 %v1593_v47, %v1577_v43 }
  0x96   : > { %v1689_v53 = vld [vmem:[#allocation4 + $0x7] sm:$0x1]  ;;  %1177 = vst [vmem:[#allocation2 + $0x21] sm:$0x1] %v1161_v45  ;;  %v1449_v55 = vadd.f32 %v1433_v46, %v1385_v32  ;;  %v393_v57 = vld [vmem:[#allocation4 + $0x8] sm:$0x1] }
  0x97   : > { %v1769_v54 = vld [vmem:[#allocation4 + $0x7] sm:$0x1]  ;;  %v1705_v56 = vsub.f32 %v1689_v53, %v1673_v48  ;;  %v426_v58 = vld [vmem:[#allocation4 + $0x8] sm:$0x1]  ;;  %v442_v59 = vld [vmem:[#allocation4 + $0x9] sm:$0x1]  ;;  %v1545_v60 = vadd.f32 %v1529_v51, %v1481_v37 }
  0x98   : > { %1785 = vst [vmem:[#allocation2 + $0x28] sm:$0x1] %v1769_v54  ;;  %1273 = vst [vmem:[#allocation2 + $0x22] sm:$0x1] %v1257_v49  ;;  %v1625_v61 = vmul.f32 0.06666667, %v1609_v52  ;;  %v458_v62 = vsub.f32 %v442_v59, %v426_v58 }
  0x99   : > { %1369 = vst [vmem:[#allocation2 + $0x23] sm:$0x1] %v1353_v50  ;;  %410 = vst [vmem:[#allocation2 + $0x31] sm:$0x1] %v393_v57  ;;  %v522_v63 = vld [vmem:[#allocation4 + $0x8] sm:$0x1] }
  0x9a   : > { %v538_v0 = vld [vmem:[#allocation4 + $0x9] sm:$0x1]  ;;  %1465 = vst [vmem:[#allocation2 + $0x24] sm:$0x1] %v1449_v55  ;;  %v1721_v1 = vmul.f32 0.53333336, %v1705_v56  ;;  %v1641_v5 = vadd.f32 %v1625_v61, %v1577_v43 }
  0x9b   : > { %v554_v2 = vsub.f32 %v538_v0, %v522_v63  ;;  %v618_v3 = vld [vmem:[#allocation4 + $0x9] sm:$0x1]  ;;  %v634_v4 = vld [vmem:[#allocation4 + $0xa] sm:$0x1]  ;;  %1561 = vst [vmem:[#allocation2 + $0x25] sm:$0x1] %v1545_v60 }
  0x9c   : > { %v474_v6 = vmul.f32 0.46666667, %v458_v62  ;;  %v650_v7 = vsub.f32 %v634_v4, %v618_v3  ;;  %v714_v8 = vld [vmem:[#allocation4 + $0x9] sm:$0x1]  ;;  %v730_v9 = vld [vmem:[#allocation4 + $0xa] sm:$0x1]  ;;  %v1737_v10 = vadd.f32 %v1721_v1, %v1673_v48 }
  0x9d   : > { %v570_v11 = vmul.f32 0.93333334, %v554_v2  ;;  %v746_v12 = vsub.f32 %v730_v9, %v714_v8  ;;  %v810_v13 = vld [vmem:[#allocation4 + $0xa] sm:$0x1]  ;;  %1657 = vst [vmem:[#allocation2 + $0x26] sm:$0x1] %v1641_v5 }
  0x9e   : > { %v490_v14 = vadd.f32 %v474_v6, %v426_v58  ;;  %v666_v15 = vmul.f32 0.4, %v650_v7  ;;  %v826_v16 = vld [vmem:[#allocation4 + $0xb] sm:$0x1]  ;;  %v906_v17 = vld [vmem:[#allocation4 + $0xa] sm:$0x1] }
  0x9f   : > { %1753 = vst [vmem:[#allocation2 + $0x27] sm:$0x1] %v1737_v10  ;;  %v586_v18 = vadd.f32 %v570_v11, %v522_v63  ;;  %v762_v19 = vmul.f32 0.8666667, %v746_v12  ;;  %v842_v20 = vsub.f32 %v826_v16, %v810_v13  ;;  %v922_v21 = vld [vmem:[#allocation4 + $0xb] sm:$0x1] }
  0xa0   : > { %506 = vst [vmem:[#allocation2 + $0x32] sm:$0x1] %v490_v14  ;;  %v682_v22 = vadd.f32 %v666_v15, %v618_v3  ;;  %v938_v23 = vsub.f32 %v922_v21, %v906_v17  ;;  %v1002_v24 = vld [vmem:[#allocation4 + $0xb] sm:$0x1]  ;;  %v1018_v25 = vld [vmem:[#allocation4 + $0xc] sm:$0x1] }
  0xa1   : > { %v1098_v26 = vld [vmem:[#allocation4 + $0xb] sm:$0x1]  ;;  %602 = vst [vmem:[#allocation2 + $0x33] sm:$0x1] %v586_v18  ;;  %v778_v27 = vadd.f32 %v762_v19, %v714_v8  ;;  %v858_v28 = vmul.f32 0.33333334, %v842_v20  ;;  %v1034_v29 = vsub.f32 %v1018_v25, %v1002_v24 }
  0xa2   : > { %v1114_v30 = vld [vmem:[#allocation4 + $0xc] sm:$0x1]  ;;  %698 = vst [vmem:[#allocation2 + $0x34] sm:$0x1] %v682_v22  ;;  %v954_v34 = vmul.f32 0.8, %v938_v23 }
  0xa3   : > { %v1194_v31 = vld [vmem:[#allocation4 + $0xc] sm:$0x1]  ;;  %v1130_v35 = vsub.f32 %v1114_v30, %v1098_v26  ;;  %v1210_v37 = vld [vmem:[#allocation4 + $0xd] sm:$0x1]  ;;  %794 = vst [vmem:[#allocation2 + $0x35] sm:$0x1] %v778_v27  ;;  %v874_v39 = vadd.f32 %v858_v28, %v810_v13 }
  0xa4   : > { %v1875_v32 = vld [vmem:[#allocation2 + $0x19] sm:$0xff]  ;;  %v1050_v40 = vmul.f32 0.26666668, %v1034_v29  ;;  %v1226_v41 = vsub.f32 %v1210_v37, %v1194_v31  ;;  %v970_v45 = vadd.f32 %v954_v34, %v906_v17  ;;  %v443_v12 = vld [vmem:[#allocation4 + $0x11] sm:$0x1]  ;;  %v7717_v37 = vld [vmem:[#allocation7 + $0x158] sm:$0xff]  }
  0xa5   : > { %v1803_v33 = vld [vmem:[#allocation2 + $0x18] sm:$0xff]  ;;  %v1146_v46 = vmul.f32 0.73333335, %v1130_v35  ;;  %890 = vst [vmem:[#allocation2 + $0x36] sm:$0x1] %v874_v39  ;;  %v7716_v19 = vld [vmem:[#allocation7 + $0x150] sm:$0xff]  }
  0xa6   : > { %v1290_v38 = vld [vmem:[#allocation4 + $0xc] sm:$0x1]  ;;  %v1306_v42 = vld [vmem:[#allocation4 + $0xd] sm:$0x1]  ;;  %v1402_v48 = vld [vmem:[#allocation4 + $0xe] sm:$0x1]  ;;  %v1066_v50 = vadd.f32 %v1050_v40, %v1002_v24 }
  0xa7   : > { %v1386_v43 = vld [vmem:[#allocation4 + $0xd] sm:$0x1]  ;;  %v1322_v47 = vsub.f32 %v1306_v42, %v1290_v38  ;;  %v1242_v51 = vmul.f32 0.2, %v1226_v41  ;;  %v1498_v53 = vld [vmem:[#allocation4 + $0xe] sm:$0x1]  ;;  %v1162_v57 = vadd.f32 %v1146_v46, %v1098_v26 }
  0xa8   : > { %v1482_v49 = vld [vmem:[#allocation4 + $0xd] sm:$0x1]  ;;  %v1418_v52 = vsub.f32 %v1402_v48, %v1386_v43  ;;  %v1578_v54 = vld [vmem:[#allocation4 + $0xe] sm:$0x1]  ;;  %v1876_v55 = vld [vmem:[#allocation2 + $0x21] sm:$0xff] }
  0xa9   : > { %v1804_v56 = vld [vmem:[#allocation2 + $0x20] sm:$0xff]  ;;  %986 = vst [vmem:[#allocation2 + $0x37] sm:$0x1] %v970_v45  ;;  %v1338_v58 = vmul.f32 0.6666667, %v1322_v47  ;;  %v1514_v59 = vsub.f32 %v1498_v53, %v1482_v49  ;;  %v7715_v61 = vld [vmem:[#allocation7 + $0x148] sm:$0xff]   ;;  %v1910_v62 = vpack.c.bf16 %v1876_v55, %v1875_v32  ;;  %v1258_v0 = vadd.f32 %v1242_v51, %v1194_v31 }
  0xaa   : > { %v1594_v60 = vld [vmem:[#allocation4 + $0xf] sm:$0x1]  ;;  %v1838_v63 = vpack.c.bf16 %v1804_v56, %v1803_v33  ;;  %1082 = vst [vmem:[#allocation2 + $0x38] sm:$0x1] %v1066_v50  ;;  %v1434_v1 = vmul.f32 0.13333334, %v1418_v52 }
  0xab   : > { %v1674_v2 = vld [vmem:[#allocation4 + $0xe] sm:$0x1]  ;;  %v1690_v3 = vld [vmem:[#allocation4 + $0xf] sm:$0x1]  ;;  %1178 = vst [vmem:[#allocation2 + $0x39] sm:$0x1] %v1162_v57  ;;  %v1354_v4 = vadd.f32 %v1338_v58, %v1290_v38  ;;  %v1610_v6 = vsub.f32 %v1594_v60, %v1578_v54  ;;  %2386 = vmatprep.mubr.bf16.mxu0 %v1910_v62  ;;  %2860 = vmatprep.mubr.bf16.mxu1 %v1910_v62 }
  0xac   : > { %v1530_v5 = vmul.f32 0.6, %v1514_v59  ;;  %v1706_v7 = vsub.f32 %v1690_v3, %v1674_v2  ;;  %v1770_v8 = vld [vmem:[#allocation4 + $0xf] sm:$0x1]  ;;  %v394_v9 = vld [vmem:[#allocation4 + $0x10] sm:$0x1]  ;;  %v1450_v10 = vadd.f32 %v1434_v1, %v1386_v43  ;;  %2387 = vmatmul.mubr.bf16.vlgmr.msra.gmra.mrb[0].mxu0 %v1838_v63  ;;  %2861 = vmatmul.mubr.bf16.gmra.mrb[4].mxu1 %v1838_v63 }
  0xad   : > { %1274 = vst [vmem:[#allocation2 + $0x3a] sm:$0x1] %v1258_v0  ;;  %1786 = vst [vmem:[#allocation2 + $0x40] sm:$0x1] %v1770_v8  ;;  %v427_v11 = vld [vmem:[#allocation4 + $0x10] sm:$0x1]  ;;  %7009 = vmatpush3.bf16.msra.mxu0 %v8198_v36 }
  0xae   : > { %411 = vst [vmem:[#allocation2 + $0x49] sm:$0x1] %v394_v9  ;;  %v523_v13 = vld [vmem:[#allocation4 + $0x10] sm:$0x1]  ;;  %1370 = vst [vmem:[#allocation2 + $0x3b] sm:$0x1] %v1354_v4  ;;  %v1546_v14 = vadd.f32 %v1530_v5, %v1482_v49  ;;  %v459_v17 = vsub.f32 %v443_v12, %v427_v11  ;;  %7010 = vmatprep.subr.bf16.mxu0 %v7715_v61 }
  0xaf   : > { %v1626_v15 = vmul.f32 0.06666667, %v1610_v6  ;;  %v1722_v16 = vmul.f32 0.53333336, %v1706_v7  ;;  %v539_v18 = vld [vmem:[#allocation4 + $0x11] sm:$0x1] }
  0xb0   : > { %1466 = vst [vmem:[#allocation2 + $0x3c] sm:$0x1] %v1450_v10  ;;  %v555_v20 = vsub.f32 %v539_v18, %v523_v13  ;;  %v619_v21 = vld [vmem:[#allocation4 + $0x11] sm:$0x1]  ;;  %v635_v22 = vld [vmem:[#allocation4 + $0x12] sm:$0x1] }
  0xb1   : > { %v715_v23 = vld [vmem:[#allocation4 + $0x11] sm:$0x1]  ;;  %1562 = vst [vmem:[#allocation2 + $0x3d] sm:$0x1] %v1546_v14  ;;  %v1642_v24 = vadd.f32 %v1626_v15, %v1578_v54  ;;  %v1738_v25 = vadd.f32 %v1722_v16, %v1674_v2  ;;  %v475_v26 = vmul.f32 0.46666667, %v459_v17  ;;  %v651_v27 = vsub.f32 %v635_v22, %v619_v21  ;;  %7011 = vmatpush3.bf16.msra.mxu0 %v7715_v61 }
  0xb2   : > { %v731_v28 = vld [vmem:[#allocation4 + $0x12] sm:$0x1]  ;;  %v571_v30 = vmul.f32 0.93333334, %v555_v20  ;;  %v827_v32 = vld [vmem:[#allocation4 + $0x13] sm:$0x1]  ;;  %7012 = vmatprep.subr.bf16.mxu0 %v7716_v19 }
  0xb3   : > { %v811_v29 = vld [vmem:[#allocation4 + $0x12] sm:$0x1]  ;;  %v747_v31 = vsub.f32 %v731_v28, %v715_v23  ;;  %1658 = vst [vmem:[#allocation2 + $0x3e] sm:$0x1] %v1642_v24  ;;  %1754 = vst [vmem:[#allocation2 + $0x3f] sm:$0x1] %v1738_v25  ;;  %v491_v33 = vadd.f32 %v475_v26, %v427_v11 }
  0xb4   : > { %v667_v36 = vmul.f32 0.4, %v651_v27  ;;  %v843_v34 = vsub.f32 %v827_v32, %v811_v29  ;;  %v907_v35 = vld [vmem:[#allocation4 + $0x12] sm:$0x1]  ;;  %v587_v38 = vadd.f32 %v571_v30, %v523_v13  ;;  %v923_v40 = vld [vmem:[#allocation4 + $0x13] sm:$0x1] }
  0xb5   : > { %v763_v39 = vmul.f32 0.8666667, %v747_v31  ;;  %v1003_v41 = vld [vmem:[#allocation4 + $0x13] sm:$0x1]  ;;  %507 = vst [vmem:[#allocation2 + $0x4a] sm:$0x1] %v491_v33  ;;  %v939_v45 = vsub.f32 %v923_v40, %v907_v35  ;;  %7013 = vmatpush3.bf16.msra.mxu0 %v7716_v19 }
  0xb6   : > { %v683_v42 = vadd.f32 %v667_v36, %v619_v21  ;;  %v859_v43 = vmul.f32 0.33333334, %v843_v34  ;;  %v1019_v46 = vld [vmem:[#allocation4 + $0x14] sm:$0x1]  ;;  %v1099_v47 = vld [vmem:[#allocation4 + $0x13] sm:$0x1]  ;;  %7014 = vmatprep.subr.bf16.mxu0 %v7717_v37 }
  0xb7   : > { %v1877_v48 = vld [vmem:[#allocation2 + $0x31] sm:$0xff]  ;;  %603 = vst [vmem:[#allocation2 + $0x4b] sm:$0x1] %v587_v38  ;;  %v779_v50 = vadd.f32 %v763_v39, %v715_v23  ;;  %v1035_v51 = vsub.f32 %v1019_v46, %v1003_v41  ;;  %v1115_v52 = vld [vmem:[#allocation4 + $0x14] sm:$0x1] }
  0xb8   : > { %v1805_v49 = vld [vmem:[#allocation2 + $0x30] sm:$0xff]  ;;  %v1195_v53 = vld [vmem:[#allocation4 + $0x14] sm:$0x1]  ;;  %v1211_v54 = vld [vmem:[#allocation4 + $0x15] sm:$0x1]  ;;  %v875_v55 = vadd.f32 %v859_v43, %v811_v29  ;;  %v1131_v57 = vsub.f32 %v1115_v52, %v1099_v47 }
  0xb9   : > { %699 = vst [vmem:[#allocation2 + $0x4c] sm:$0x1] %v683_v42  ;;  %v955_v56 = vmul.f32 0.8, %v939_v45  ;;  %v1227_v58 = vsub.f32 %v1211_v54, %v1195_v53  ;;  %v1291_v59 = vld [vmem:[#allocation4 + $0x14] sm:$0x1]  ;;  %7015 = vmatpush3.bf16.msra.mxu0 %v7717_v37 }
  0xba   : > { %v1307_v60 = vld [vmem:[#allocation4 + $0x15] sm:$0x1]  ;;  %795 = vst [vmem:[#allocation2 + $0x4d] sm:$0x1] %v779_v50  ;;  %v1051_v61 = vmul.f32 0.26666668, %v1035_v51 }
  0xbb   : > { %v1323_v62 = vsub.f32 %v1307_v60, %v1291_v59  ;;  %v1387_v63 = vld [vmem:[#allocation4 + $0x15] sm:$0x1]  ;;  %v1403_v0 = vld [vmem:[#allocation4 + $0x16] sm:$0x1]  ;;  %891 = vst [vmem:[#allocation2 + $0x4e] sm:$0x1] %v875_v55  ;;  %v971_v1 = vadd.f32 %v955_v56, %v907_v35 }
  0xbc   : > { %v1147_v2 = vmul.f32 0.73333335, %v1131_v57  ;;  %v1243_v3 = vmul.f32 0.2, %v1227_v58  ;;  %v1419_v4 = vsub.f32 %v1403_v0, %v1387_v63  ;;  %v1483_v5 = vld [vmem:[#allocation4 + $0x15] sm:$0x1]  ;;  %v1067_v8 = vadd.f32 %v1051_v61, %v1003_v41 }
  0xbd   : > { %v1878_v6 = vld [vmem:[#allocation2 + $0x39] sm:$0xff]  ;;  %v1339_v9 = vmul.f32 0.6666667, %v1323_v62  ;;  %v1499_v10 = vld [vmem:[#allocation4 + $0x16] sm:$0x1]  ;;  %v7719_v56 = vld [vmem:[#allocation7 + $0x80] sm:$0xff]  }
  0xbe   : > { %v1806_v7 = vld [vmem:[#allocation2 + $0x38] sm:$0xff]  ;;  %v8207_v11 = vpack.c.bf16 %v1878_v6, %v1877_v48  ;;  %987 = vst [vmem:[#allocation2 + $0x4f] sm:$0x1] %v971_v1  ;;  %v1163_v13 = vadd.f32 %v1147_v2, %v1099_v47  ;;  %v1259_v14 = vadd.f32 %v1243_v3, %v1195_v53  ;;  %v1579_v15 = vld [vmem:[#allocation4 + $0x16] sm:$0x1]  ;;  %v1515_v20 = vsub.f32 %v1499_v10, %v1483_v5  ;;  %v7718_v53 = vld [vmem:[#allocation7 + $0x160] sm:$0xff]  }
  0xbf   : > { %v8209_v12 = vpack.c.bf16 %v1806_v7, %v1805_v49  ;;  %v1595_v16 = vld [vmem:[#allocation4 + $0x17] sm:$0x1]  ;;  %v1675_v17 = vld [vmem:[#allocation4 + $0x16] sm:$0x1]  ;;  %1083 = vst [vmem:[#allocation2 + $0x50] sm:$0x1] %v1067_v8  ;;  %v1355_v18 = vadd.f32 %v1339_v9, %v1291_v59  ;;  %7016 = vmatprep.subr.bf16.mxu0 %v7718_v53  ;;  %7056 = vmatprep.subr.bf16.mxu1 %v7719_v56 }
  0xc0   : > { %v1435_v19 = vmul.f32 0.13333334, %v1419_v4  ;;  %v1611_v21 = vsub.f32 %v1595_v16, %v1579_v15  ;;  %v1691_v22 = vld [vmem:[#allocation4 + $0x17] sm:$0x1]  ;;  %2394 = vmatprep.mubr.bf16.mxu0 %v8207_v11  ;;  %1179 = vst [vmem:[#allocation2 + $0x51] sm:$0x1] %v1163_v13  ;;  %2868 = vmatprep.mubr.bf16.mxu1 %v8207_v11 }
  0xc1   : > { %v1771_v23 = vld [vmem:[#allocation4 + $0x17] sm:$0x1]  ;;  %1275 = vst [vmem:[#allocation2 + $0x52] sm:$0x1] %v1259_v14  ;;  %v1707_v24 = vsub.f32 %v1691_v22, %v1675_v17  ;;  %v395_v25 = vld [vmem:[#allocation4 + $0x18] sm:$0x1]  ;;  %2395 = vmatmul.mubr.bf16.gmra.mrb[4].mxu0 %v8209_v12  ;;  %2869 = vmatmul.mubr.bf16.gmra.mrb[8].mxu1 %v8209_v12 }
  0xc2   : > { %1787 = vst [vmem:[#allocation2 + $0x58] sm:$0x1] %v1771_v23  ;;  %v428_v26 = vld [vmem:[#allocation4 + $0x18] sm:$0x1]  ;;  %v444_v27 = vld [vmem:[#allocation4 + $0x19] sm:$0x1]  ;;  %v1451_v28 = vadd.f32 %v1435_v19, %v1387_v63  ;;  %7017 = vmatpush3.bf16.msra.mxu0 %v7718_v53  ;;  %7057 = vmatpush3.bf16.msra.mxu1 %v7719_v56 }
  0xc3   : > { %1371 = vst [vmem:[#allocation2 + $0x53] sm:$0x1] %v1355_v18  ;;  %v1531_v29 = vmul.f32 0.6, %v1515_v20  ;;  %v1627_v30 = vmul.f32 0.06666667, %v1611_v21  ;;  %v460_v31 = vsub.f32 %v444_v27, %v428_v26 }
  0xc4   : > { %412 = vst [vmem:[#allocation2 + $0x61] sm:$0x1] %v395_v25  ;;  %v524_v32 = vld [vmem:[#allocation4 + $0x18] sm:$0x1]  ;;  %v1723_v33 = vmul.f32 0.53333336, %v1707_v24 }
  0xc5   : > { %v540_v36 = vld [vmem:[#allocation4 + $0x19] sm:$0x1]  ;;  %1467 = vst [vmem:[#allocation2 + $0x54] sm:$0x1] %v1451_v28  ;;  %v1547_v35 = vadd.f32 %v1531_v29, %v1483_v5  ;;  %v1643_v37 = vadd.f32 %v1627_v30, %v1579_v15  ;;  %v476_v38 = vmul.f32 0.46666667, %v460_v31 }
  0xc6   : > { %v620_v34 = vld [vmem:[#allocation4 + $0x19] sm:$0x1]  ;;  %v556_v39 = vsub.f32 %v540_v36, %v524_v32  ;;  %v636_v40 = vld [vmem:[#allocation4 + $0x1a] sm:$0x1]  ;;  %v1739_v42 = vadd.f32 %v1723_v33, %v1675_v17  ;;  %v828_v47 = vld [vmem:[#allocation4 + $0x1b] sm:$0x1] }
  0xc7   : > { %v716_v41 = vld [vmem:[#allocation4 + $0x19] sm:$0x1]  ;;  %v652_v43 = vsub.f32 %v636_v40, %v620_v34  ;;  %v732_v45 = vld [vmem:[#allocation4 + $0x1a] sm:$0x1]  ;;  %1563 = vst [vmem:[#allocation2 + $0x55] sm:$0x1] %v1547_v35  ;;  %v492_v48 = vadd.f32 %v476_v38, %v428_v26 }
  0xc8   : > { %v812_v46 = vld [vmem:[#allocation4 + $0x1a] sm:$0x1]  ;;  %1659 = vst [vmem:[#allocation2 + $0x56] sm:$0x1] %v1643_v37  ;;  %v572_v49 = vmul.f32 0.93333334, %v556_v39  ;;  %v748_v50 = vsub.f32 %v732_v45, %v716_v41 }
  0xc9   : > { %v844_v51 = vsub.f32 %v828_v47, %v812_v46  ;;  %v908_v52 = vld [vmem:[#allocation4 + $0x1a] sm:$0x1]  ;;  %1755 = vst [vmem:[#allocation2 + $0x57] sm:$0x1] %v1739_v42  ;;  %v668_v54 = vmul.f32 0.4, %v652_v43 }
  0xca   : > { %v924_v55 = vld [vmem:[#allocation4 + $0x1b] sm:$0x1]  ;;  %508 = vst [vmem:[#allocation2 + $0x62] sm:$0x1] %v492_v48  ;;  %v588_v57 = vadd.f32 %v572_v49, %v524_v32  ;;  %v764_v58 = vmul.f32 0.8666667, %v748_v50 }
  0xcb   : > { %v860_v59 = vmul.f32 0.33333334, %v844_v51  ;;  %v940_v60 = vsub.f32 %v924_v55, %v908_v52  ;;  %v1004_v61 = vld [vmem:[#allocation4 + $0x1b] sm:$0x1]  ;;  %v684_v62 = vadd.f32 %v668_v54, %v620_v34  ;;  %v1020_v63 = vld [vmem:[#allocation4 + $0x1c] sm:$0x1] }
  0xcc   : > { %v1100_v0 = vld [vmem:[#allocation4 + $0x1b] sm:$0x1]  ;;  %v1116_v1 = vld [vmem:[#allocation4 + $0x1c] sm:$0x1]  ;;  %604 = vst [vmem:[#allocation2 + $0x63] sm:$0x1] %v588_v57  ;;  %v780_v4 = vadd.f32 %v764_v58, %v716_v41  ;;  %v1036_v7 = vsub.f32 %v1020_v63, %v1004_v61 }
  0xcd   : > { %v1879_v2 = vld [vmem:[#allocation2 + $0x49] sm:$0xff]  ;;  %v876_v5 = vadd.f32 %v860_v59, %v812_v46  ;;  %v956_v6 = vmul.f32 0.8, %v940_v60  ;;  %700 = vst [vmem:[#allocation2 + $0x64] sm:$0x1] %v684_v62  ;;  %v1132_v10 = vsub.f32 %v1116_v1, %v1100_v0 }
  0xce   : > { %v1807_v3 = vld [vmem:[#allocation2 + $0x48] sm:$0xff]  ;;  %796 = vst [vmem:[#allocation2 + $0x65] sm:$0x1] %v780_v4  ;;  %v1052_v18 = vmul.f32 0.26666668, %v1036_v7 }
  0xcf   : > { %v1196_v8 = vld [vmem:[#allocation4 + $0x1c] sm:$0x1]  ;;  %v1212_v9 = vld [vmem:[#allocation4 + $0x1d] sm:$0x1]  ;;  %892 = vst [vmem:[#allocation2 + $0x66] sm:$0x1] %v876_v5  ;;  %v972_v17 = vadd.f32 %v956_v6, %v908_v52 }
  0xd0   : > { %v1228_v13 = vsub.f32 %v1212_v9, %v1196_v8  ;;  %v1292_v14 = vld [vmem:[#allocation4 + $0x1c] sm:$0x1]  ;;  %v1308_v15 = vld [vmem:[#allocation4 + $0x1d] sm:$0x1]  ;;  %v1404_v20 = vld [vmem:[#allocation4 + $0x1e] sm:$0x1]  ;;  %v1068_v28 = vadd.f32 %v1052_v18, %v1004_v61 }
  0xd1   : > { %v1388_v16 = vld [vmem:[#allocation4 + $0x1d] sm:$0x1]  ;;  %v1324_v19 = vsub.f32 %v1308_v15, %v1292_v14  ;;  %v1148_v22 = vmul.f32 0.73333335, %v1132_v10  ;;  %v1500_v25 = vld [vmem:[#allocation4 + $0x1e] sm:$0x1] }
  0xd2   : > { %v1484_v21 = vld [vmem:[#allocation4 + $0x1d] sm:$0x1]  ;;  %v1244_v23 = vmul.f32 0.2, %v1228_v13  ;;  %v1420_v24 = vsub.f32 %v1404_v20, %v1388_v16  ;;  %v1880_v26 = vld [vmem:[#allocation2 + $0x51] sm:$0xff] }
  0xd3   : > { %v1808_v27 = vld [vmem:[#allocation2 + $0x50] sm:$0xff]  ;;  %988 = vst [vmem:[#allocation2 + $0x67] sm:$0x1] %v972_v17  ;;  %v1340_v29 = vmul.f32 0.6666667, %v1324_v19  ;;  %v1516_v30 = vsub.f32 %v1500_v25, %v1484_v21  ;;  %v8215_v32 = vpack.c.bf16 %v1880_v26, %v1879_v2  ;;  %v1164_v36 = vadd.f32 %v1148_v22, %v1100_v0 }
  0xd4   : > { %v1580_v31 = vld [vmem:[#allocation4 + $0x1e] sm:$0x1]  ;;  %v8217_v33 = vpack.c.bf16 %v1808_v27, %v1807_v3  ;;  %v1260_v34 = vadd.f32 %v1244_v23, %v1196_v8  ;;  %v1596_v35 = vld [vmem:[#allocation4 + $0x1f] sm:$0x1]  ;;  %1084 = vst [vmem:[#allocation2 + $0x68] sm:$0x1] %v1068_v28 }
  0xd5   : > { %v1676_v37 = vld [vmem:[#allocation4 + $0x1e] sm:$0x1]  ;;  %v1692_v38 = vld [vmem:[#allocation4 + $0x1f] sm:$0x1]  ;;  %v1356_v39 = vadd.f32 %v1340_v29, %v1292_v14  ;;  %v1436_v40 = vmul.f32 0.13333334, %v1420_v24  ;;  %v1612_v42 = vsub.f32 %v1596_v35, %v1580_v31  ;;  %2402 = vmatprep.mubr.bf16.mxu0 %v8215_v32  ;;  %2876 = vmatprep.mubr.bf16.mxu1 %v8215_v32 }
  0xd6   : > { %v1532_v41 = vmul.f32 0.6, %v1516_v30  ;;  %v1772_v43 = vld [vmem:[#allocation4 + $0x1f] sm:$0x1]  ;;  %1180 = vst [vmem:[#allocation2 + $0x69] sm:$0x1] %v1164_v36  ;;  %v1708_v45 = vsub.f32 %v1692_v38, %v1676_v37  ;;  %2403 = vmatmul.mubr.bf16.gmra.mrb[8].mxu0 %v8217_v33  ;;  %2877 = vmatmul.mubr.bf16.gmra.mrb[12].mxu1 %v8217_v33 }
  0xd7   : > { %1276 = vst [vmem:[#allocation2 + $0x6a] sm:$0x1] %v1260_v34  ;;  %1788 = vst [vmem:[#allocation2 + $0x70] sm:$0x1] %v1772_v43  ;;  %v396_v46 = vld [vmem:[#allocation4 + $0x20] sm:$0x1]  ;;  %v1452_v49 = vadd.f32 %v1436_v40, %v1388_v16 }
  0xd8   : > { %v429_v47 = vld [vmem:[#allocation4 + $0x20] sm:$0x1]  ;;  %v445_v48 = vld [vmem:[#allocation4 + $0x21] sm:$0x1]  ;;  %1372 = vst [vmem:[#allocation2 + $0x6b] sm:$0x1] %v1356_v39  ;;  %v1548_v50 = vadd.f32 %v1532_v41, %v1484_v21 }
  0xd9   : > { %v1628_v51 = vmul.f32 0.06666667, %v1612_v42  ;;  %413 = vst [vmem:[#allocation2 + $0x79] sm:$0x1] %v396_v46  ;;  %v461_v52 = vsub.f32 %v445_v48, %v429_v47  ;;  %v525_v53 = vld [vmem:[#allocation4 + $0x20] sm:$0x1] }
  0xda   : > { %v541_v54 = vld [vmem:[#allocation4 + $0x21] sm:$0x1]  ;;  %v1724_v55 = vmul.f32 0.53333336, %v1708_v45  ;;  %v637_v58 = vld [vmem:[#allocation4 + $0x22] sm:$0x1] }
  0xdb   : > { %v557_v56 = vsub.f32 %v541_v54, %v525_v53  ;;  %v621_v57 = vld [vmem:[#allocation4 + $0x21] sm:$0x1]  ;;  %1468 = vst [vmem:[#allocation2 + $0x6c] sm:$0x1] %v1452_v49  ;;  %1564 = vst [vmem:[#allocation2 + $0x6d] sm:$0x1] %v1548_v50  ;;  %v1644_v59 = vadd.f32 %v1628_v51, %v1580_v31 }
  0xdc   : > { %v477_v60 = vmul.f32 0.46666667, %v461_v52  ;;  %v653_v61 = vsub.f32 %v637_v58, %v621_v57  ;;  %v717_v62 = vld [vmem:[#allocation4 + $0x21] sm:$0x1]  ;;  %v733_v63 = vld [vmem:[#allocation4 + $0x22] sm:$0x1]  ;;  %v1740_v0 = vadd.f32 %v1724_v55, %v1676_v37 }
  0xdd   : > { %v573_v1 = vmul.f32 0.93333334, %v557_v56  ;;  %v749_v2 = vsub.f32 %v733_v63, %v717_v62  ;;  %v813_v3 = vld [vmem:[#allocation4 + $0x22] sm:$0x1]  ;;  %1660 = vst [vmem:[#allocation2 + $0x6e] sm:$0x1] %v1644_v59 }
  0xde   : > { %v493_v4 = vadd.f32 %v477_v60, %v429_v47  ;;  %v669_v5 = vmul.f32 0.4, %v653_v61  ;;  %v829_v6 = vld [vmem:[#allocation4 + $0x23] sm:$0x1]  ;;  %v909_v7 = vld [vmem:[#allocation4 + $0x22] sm:$0x1] }
  0xdf   : > { %1756 = vst [vmem:[#allocation2 + $0x6f] sm:$0x1] %v1740_v0  ;;  %v589_v8 = vadd.f32 %v573_v1, %v525_v53  ;;  %v765_v9 = vmul.f32 0.8666667, %v749_v2  ;;  %v845_v10 = vsub.f32 %v829_v6, %v813_v3  ;;  %v925_v13 = vld [vmem:[#allocation4 + $0x23] sm:$0x1] }
  0xe0   : > { %v8224_v14 = vld [vmem:[%s8144_s6 + $0x18] sm:$0xff]  ;;  %v8227_v15 = vld [vmem:[%s8144_s6 + $0x20] sm:$0xff]  ;;  %509 = vst [vmem:[#allocation2 + $0x7a] sm:$0x1] %v493_v4  ;;  %v685_v16 = vadd.f32 %v669_v5, %v621_v57  ;;  %v941_v17 = vsub.f32 %v925_v13, %v909_v7  ;;  %v8230_v21 = vld [vmem:[%s8144_s6 + $0x28] sm:$0xff] }
  0xe1   : > { %v1005_v18 = vld [vmem:[#allocation4 + $0x23] sm:$0x1]  ;;  %v1021_v19 = vld [vmem:[#allocation4 + $0x24] sm:$0x1]  ;;  %605 = vst [vmem:[#allocation2 + $0x7b] sm:$0x1] %v589_v8  ;;  %v781_v22 = vadd.f32 %v765_v9, %v717_v62  ;;  %v302_v41 = vsub.f32 %v8224_v14, %v8203_v44  ;;  %v311_v48 = vsub.f32 %v8227_v15, %v8224_v14  ;;  %v320_v54 = vsub.f32 %v8230_v21, %v8227_v15 }
  0xe2   : > { %v1101_v20 = vld [vmem:[#allocation4 + $0x23] sm:$0x1]  ;;  %v861_v23 = vmul.f32 0.33333334, %v845_v10  ;;  %v1037_v24 = vsub.f32 %v1021_v19, %v1005_v18  ;;  %v1117_v25 = vld [vmem:[#allocation4 + $0x24] sm:$0x1] }
  0xe3   : > { %v1197_v26 = vld [vmem:[#allocation4 + $0x24] sm:$0x1]  ;;  %v8233_v27 = vld [vmem:[%s8144_s6 + $0x30] sm:$0xff]  ;;  %701 = vst [vmem:[#allocation2 + $0x7c] sm:$0x1] %v685_v16  ;;  %v1133_v31 = vsub.f32 %v1117_v25, %v1101_v20 }
  0xe4   : > { %v1881_v28 = vld [vmem:[#allocation2 + $0x61] sm:$0xff]  ;;  %v957_v30 = vmul.f32 0.8, %v941_v17  ;;  %v1213_v36 = vld [vmem:[#allocation4 + $0x25] sm:$0x1]  ;;  %v877_v35 = vadd.f32 %v861_v23, %v813_v3  ;;  %v329_v60 = vsub.f32 %v8233_v27, %v8230_v21 }
  0xe5   : > { %v1809_v29 = vld [vmem:[#allocation2 + $0x60] sm:$0xff]  ;;  %v1293_v34 = vld [vmem:[#allocation4 + $0x24] sm:$0x1]  ;;  %797 = vst [vmem:[#allocation2 + $0x7d] sm:$0x1] %v781_v22  ;;  %v1229_v38 = vsub.f32 %v1213_v36, %v1197_v26  ;;  %v7720_v36 = vld [vmem:[#allocation7 + $0x168] sm:$0xff]  }
  0xe6   : > { %v1053_v37 = vmul.f32 0.26666668, %v1037_v24  ;;  %v1309_v39 = vld [vmem:[#allocation4 + $0x25] sm:$0x1]  ;;  %v973_v42 = vadd.f32 %v957_v30, %v909_v7  ;;  %v1149_v43 = vmul.f32 0.73333335, %v1133_v31  ;;  %7018 = vmatprep.subr.bf16.mxu0 %v7720_v36 }
  0xe7   : > { %v1389_v40 = vld [vmem:[#allocation4 + $0x25] sm:$0x1]  ;;  %v1325_v45 = vsub.f32 %v1309_v39, %v1293_v34  ;;  %v1405_v46 = vld [vmem:[#allocation4 + $0x26] sm:$0x1]  ;;  %893 = vst [vmem:[#allocation2 + $0x7e] sm:$0x1] %v877_v35  ;;  %7019 = vmatpush3.bf16.msra.mxu0 %v7720_v36 }
  0xe8   : > { %v1485_v47 = vld [vmem:[#allocation4 + $0x25] sm:$0x1]  ;;  %v1069_v49 = vadd.f32 %v1053_v37, %v1005_v18  ;;  %v1245_v50 = vmul.f32 0.2, %v1229_v38  ;;  %v1421_v51 = vsub.f32 %v1405_v46, %v1389_v40  ;;  %v1501_v52 = vld [vmem:[#allocation4 + $0x26] sm:$0x1]  ;;  %v1165_v44 = vadd.f32 %v1149_v43, %v1101_v20 }
  0xe9   : > { %v1581_v53 = vld [vmem:[#allocation4 + $0x26] sm:$0x1]  ;;  %v1882_v55 = vld [vmem:[#allocation2 + $0x69] sm:$0xff]  ;;  %989 = vst [vmem:[#allocation2 + $0x7f] sm:$0x1] %v973_v42  ;;  %v1517_v58 = vsub.f32 %v1501_v52, %v1485_v47  ;;  %v7826_v20 = vld [vmem:[%s8144_s6 + $0x10] sm:$0xff] }
  0xea   : > { %v1810_v56 = vld [vmem:[#allocation2 + $0x68] sm:$0xff]  ;;  %v1341_v57 = vmul.f32 0.6666667, %v1325_v45  ;;  %v1597_v59 = vld [vmem:[#allocation4 + $0x27] sm:$0x1]  ;;  %v8243_v61 = vpack.c.bf16 %v1882_v55, %v1881_v28  ;;  %v1261_v63 = vadd.f32 %v1245_v50, %v1197_v26  ;;  %v7721_v37 = vld [vmem:[#allocation7 + $0x88] sm:$0xff]  }
  0xeb   : > { %v8245_v62 = vpack.c.bf16 %v1810_v56, %v1809_v29  ;;  %1085 = vst [vmem:[#allocation2 + $0x80] sm:$0x1] %v1069_v49  ;;  %v1437_v0 = vmul.f32 0.13333334, %v1421_v51  ;;  %v1677_v1 = vld [vmem:[#allocation4 + $0x26] sm:$0x1]  ;;  %v1613_v5 = vsub.f32 %v1597_v59, %v1581_v53  ;;  %7058 = vmatprep.subr.bf16.mxu1 %v7721_v37 }
  0xec   : > { %v1693_v2 = vld [vmem:[#allocation4 + $0x27] sm:$0x1]  ;;  %1181 = vst [vmem:[#allocation2 + $0x81] sm:$0x1] %v1165_v44  ;;  %v1357_v3 = vadd.f32 %v1341_v57, %v1293_v34  ;;  %v1533_v4 = vmul.f32 0.6, %v1517_v58  ;;  %2410 = vmatprep.mubr.bf16.mxu0 %v8243_v61  ;;  %2884 = vmatprep.mubr.bf16.mxu1 %v8243_v61 }
  0xed   : > { %v1709_v6 = vsub.f32 %v1693_v2, %v1677_v1  ;;  %v1773_v7 = vld [vmem:[#allocation4 + $0x27] sm:$0x1]  ;;  %1277 = vst [vmem:[#allocation2 + $0x82] sm:$0x1] %v1261_v63  ;;  %v1453_v8 = vadd.f32 %v1437_v0, %v1389_v40  ;;  %v303_v9 = vmul.f32 0.33333334, %v302_v41  ;;  %2411 = vmatmul.mubr.bf16.gmra.mrb[12].mxu0 %v8245_v62  ;;  %2885 = vmatmul.mubr.bf16.gmra.mrb[16].mxu1 %v8245_v62 }
  0xee   : > { %1789 = vst [vmem:[#allocation2 + $0x88] sm:$0x1] %v1773_v7  ;;  %v307_v10 = vmul.f32 0.8, %v302_v41  ;;  %v312_v13 = vmul.f32 0.26666668, %v311_v48  ;;  %v1549_v16 = vadd.f32 %v1533_v4, %v1485_v47  ;;  %7059 = vmatpush3.bf16.msra.mxu1 %v7721_v37 }
  0xef   : > { %1373 = vst [vmem:[#allocation2 + $0x83] sm:$0x1] %v1357_v3  ;;  %v1629_v17 = vmul.f32 0.06666667, %v1613_v5  ;;  %v1725_v18 = vmul.f32 0.53333336, %v1709_v6  ;;  %v304_v22 = vadd.f32 %v7826_v20, %v303_v9 }
  0xf0   : > { %v316_v19 = vmul.f32 0.73333335, %v311_v48  ;;  %1469 = vst [vmem:[#allocation2 + $0x84] sm:$0x1] %v1453_v8  ;;  %v308_v23 = vadd.f32 %v7826_v20, %v307_v10  ;;  %v313_v24 = vadd.f32 %v312_v13, %v8224_v14  ;;  %v321_v25 = vmul.f32 0.2, %v320_v54 }
  0xf1   : > { %1565 = vst [vmem:[#allocation2 + $0x85] sm:$0x1] %v1549_v16  ;;  %v1645_v26 = vadd.f32 %v1629_v17, %v1581_v53  ;;  %v1741_v28 = vadd.f32 %v1725_v18, %v1677_v1  ;;  %v325_v30 = vmul.f32 0.6666667, %v320_v54  ;;  %306 = vst [vmem:[#allocation4 + $0x28] sm:$0xff] %v304_v22  ;;  %v282_v40 = vld [vmem:[%s8144_s6 + $0x38] sm:$0xff] }
  0xf2   : > { %v317_v29 = vadd.f32 %v316_v19, %v8224_v14  ;;  %310 = vst [vmem:[#allocation4 + $0x30] sm:$0xff] %v308_v23  ;;  %315 = vst [vmem:[#allocation4 + $0x38] sm:$0xff] %v313_v24  ;;  %v322_v31 = vadd.f32 %v321_v25, %v8227_v15  ;;  %v330_v34 = vmul.f32 0.13333334, %v329_v60  ;;  %v334_v38 = vmul.f32 0.6, %v329_v60 }
  0xf3   : > { %1661 = vst [vmem:[#allocation2 + $0x86] sm:$0x1] %v1645_v26  ;;  %1757 = vst [vmem:[#allocation2 + $0x87] sm:$0x1] %v1741_v28  ;;  %v326_v35 = vadd.f32 %v325_v30, %v8227_v15  ;;  %v1883_v41 = vld [vmem:[#allocation2 + $0x79] sm:$0xff]  ;;  %v8260_v43 = vsub.f32 %v282_v40, %v8233_v27 }
  0xf4   : > { %319 = vst [vmem:[#allocation4 + $0x40] sm:$0xff] %v317_v29  ;;  %324 = vst [vmem:[#allocation4 + $0x48] sm:$0xff] %v322_v31  ;;  %v331_v14 = vadd.f32 %v330_v34, %v8230_v21  ;;  %v335_v39 = vadd.f32 %v334_v38, %v8230_v21  ;;  %v1811_v42 = vld [vmem:[#allocation2 + $0x78] sm:$0xff] }
  0xf5   : > { %328 = vst [vmem:[#allocation4 + $0x50] sm:$0xff] %v326_v35  ;;  %348 = vst [vmem:[#allocation4 + $0x78] sm:$0xff] %v282_v40  ;;  %v339_v15 = vmul.f32 0.06666667, %v8260_v43 }
  0xf6   : > { %333 = vst [vmem:[#allocation4 + $0x58] sm:$0xff] %v331_v14  ;;  %337 = vst [vmem:[#allocation4 + $0x60] sm:$0xff] %v335_v39 }
  0xf7   : > { %v340_v51 = vadd.f32 %v339_v15, %v8233_v27 }
  0xf8   : > { %v397_v45 = vld [vmem:[#allocation4 + $0x28] sm:$0x1]  ;;  %v446_v47 = vld [vmem:[#allocation4 + $0x29] sm:$0x1]  ;;  %v638_v56 = vld [vmem:[#allocation4 + $0x2a] sm:$0x1] }
  0xf9   : > { %v430_v46 = vld [vmem:[#allocation4 + $0x28] sm:$0x1]  ;;  %414 = vst [vmem:[#allocation2 + $0x91] sm:$0x1] %v397_v45  ;;  %v542_v54 = vld [vmem:[#allocation4 + $0x29] sm:$0x1] }
  0xfa   : > { %v1884_v48 = vld [vmem:[#allocation2 + $0x81] sm:$0xff]  ;;  %v462_v50 = vsub.f32 %v446_v47, %v430_v46  ;;  %v526_v21 = vld [vmem:[#allocation4 + $0x28] sm:$0x1]  ;;  %v622_v55 = vld [vmem:[#allocation4 + $0x29] sm:$0x1]  ;;  %342 = vst [vmem:[#allocation4 + $0x68] sm:$0xff] %v340_v51 }
  0xfb   : > { %v1812_v49 = vld [vmem:[#allocation2 + $0x80] sm:$0xff]  ;;  %v8264_v52 = vpack.c.bf16 %v1884_v48, %v1883_v41  ;;  %v558_v57 = vsub.f32 %v542_v54, %v526_v21  ;;  %v654_v58 = vsub.f32 %v638_v56, %v622_v55  ;;  %v718_v59 = vld [vmem:[#allocation4 + $0x29] sm:$0x1]  ;;  %v734_v60 = vld [vmem:[#allocation4 + $0x2a] sm:$0x1] }
  0xfc   : > { %v8266_v53 = vpack.c.bf16 %v1812_v49, %v1811_v42  ;;  %v478_v44 = vmul.f32 0.46666667, %v462_v50  ;;  %v750_v63 = vsub.f32 %v734_v60, %v718_v59  ;;  %v814_v0 = vld [vmem:[#allocation4 + $0x2a] sm:$0x1]  ;;  %v830_v1 = vld [vmem:[#allocation4 + $0x2b] sm:$0x1] }
  0xfd   : > { %2418 = vmatprep.mubr.bf16.mxu0 %v8264_v52  ;;  %v910_v2 = vld [vmem:[#allocation4 + $0x2a] sm:$0x1]  ;;  %2892 = vmatprep.mubr.bf16.mxu1 %v8264_v52  ;;  %v574_v3 = vmul.f32 0.93333334, %v558_v57  ;;  %v670_v4 = vmul.f32 0.4, %v654_v58  ;;  %v846_v5 = vsub.f32 %v830_v1, %v814_v0 }
  0xfe   : > { %2419 = vmatmul.mubr.bf16.gmra.mrb[16].mxu0 %v8266_v53  ;;  %v494_v27 = vadd.f32 %v478_v44, %v430_v46  ;;  %v926_v6 = vld [vmem:[#allocation4 + $0x2b] sm:$0x1]  ;;  %2893 = vmatmul.mubr.bf16.gmra.mrb[20].mxu1 %v8266_v53  ;;  %v766_v7 = vmul.f32 0.8666667, %v750_v63  ;;  %v1022_v10 = vld [vmem:[#allocation4 + $0x2c] sm:$0x1] }
  0xff   : > { %v942_v8 = vsub.f32 %v926_v6, %v910_v2  ;;  %v1006_v9 = vld [vmem:[#allocation4 + $0x2b] sm:$0x1]  ;;  %v590_v13 = vadd.f32 %v574_v3, %v526_v21  ;;  %v686_v16 = vadd.f32 %v670_v4, %v622_v55  ;;  %v862_v17 = vmul.f32 0.33333334, %v846_v5  ;;  %v1118_v20 = vld [vmem:[#allocation4 + $0x2c] sm:$0x1] }
 0x100   : > { %510 = vst [vmem:[#allocation2 + $0x92] sm:$0x1] %v494_v27  ;;  %v1038_v18 = vsub.f32 %v1022_v10, %v1006_v9  ;;  %v1102_v19 = vld [vmem:[#allocation4 + $0x2b] sm:$0x1]  ;;  %v782_v22 = vadd.f32 %v766_v7, %v718_v59  ;;  %v1198_v25 = vld [vmem:[#allocation4 + $0x2c] sm:$0x1] }
 0x101   : > { %v958_v23 = vmul.f32 0.8, %v942_v8  ;;  %v1134_v24 = vsub.f32 %v1118_v20, %v1102_v19  ;;  %v1214_v26 = vld [vmem:[#allocation4 + $0x2d] sm:$0x1]  ;;  %606 = vst [vmem:[#allocation2 + $0x93] sm:$0x1] %v590_v13  ;;  %v878_v28 = vadd.f32 %v862_v17, %v814_v0 }
 0x102   : > { %702 = vst [vmem:[#allocation2 + $0x94] sm:$0x1] %v686_v16  ;;  %v1054_v29 = vmul.f32 0.26666668, %v1038_v18  ;;  %v1230_v30 = vsub.f32 %v1214_v26, %v1198_v25  ;;  %v1294_v31 = vld [vmem:[#allocation4 + $0x2c] sm:$0x1] }
 0x103   : > { %v1310_v36 = vld [vmem:[#allocation4 + $0x2d] sm:$0x1]  ;;  %798 = vst [vmem:[#allocation2 + $0x95] sm:$0x1] %v782_v22  ;;  %v974_v34 = vadd.f32 %v958_v23, %v910_v2  ;;  %v1150_v35 = vmul.f32 0.73333335, %v1134_v24 }
 0x104   : > { %v1326_v37 = vsub.f32 %v1310_v36, %v1294_v31  ;;  %v1390_v38 = vld [vmem:[#allocation4 + $0x2d] sm:$0x1]  ;;  %v1406_v14 = vld [vmem:[#allocation4 + $0x2e] sm:$0x1]  ;;  %894 = vst [vmem:[#allocation2 + $0x96] sm:$0x1] %v878_v28  ;;  %v1070_v39 = vadd.f32 %v1054_v29, %v1006_v9 }
 0x105   : > { %v1246_v40 = vmul.f32 0.2, %v1230_v30  ;;  %v1422_v41 = vsub.f32 %v1406_v14, %v1390_v38  ;;  %v1486_v42 = vld [vmem:[#allocation4 + $0x2d] sm:$0x1]  ;;  %v1502_v15 = vld [vmem:[#allocation4 + $0x2e] sm:$0x1]  ;;  %v1166_v45 = vadd.f32 %v1150_v35, %v1102_v19 }
 0x106   : > { %990 = vst [vmem:[#allocation2 + $0x97] sm:$0x1] %v974_v34  ;;  %v1342_v46 = vmul.f32 0.6666667, %v1326_v37  ;;  %v1518_v47 = vsub.f32 %v1502_v15, %v1486_v42  ;;  %v1582_v48 = vld [vmem:[#allocation4 + $0x2e] sm:$0x1] }
 0x107   : > { %v1598_v49 = vld [vmem:[#allocation4 + $0x2f] sm:$0x1]  ;;  %1086 = vst [vmem:[#allocation2 + $0x98] sm:$0x1] %v1070_v39  ;;  %v1262_v50 = vadd.f32 %v1246_v40, %v1198_v25  ;;  %v1438_v21 = vmul.f32 0.13333334, %v1422_v41 }
 0x108   : > { %v1614_v51 = vsub.f32 %v1598_v49, %v1582_v48  ;;  %v1678_v54 = vld [vmem:[#allocation4 + $0x2e] sm:$0x1]  ;;  %v1694_v55 = vld [vmem:[#allocation4 + $0x2f] sm:$0x1]  ;;  %1182 = vst [vmem:[#allocation2 + $0x99] sm:$0x1] %v1166_v45  ;;  %v1358_v56 = vadd.f32 %v1342_v46, %v1294_v31 }
 0x109   : > { %v1534_v44 = vmul.f32 0.6, %v1518_v47  ;;  %v1710_v57 = vsub.f32 %v1694_v55, %v1678_v54  ;;  %v1774_v58 = vld [vmem:[#allocation4 + $0x2f] sm:$0x1]  ;;  %v398_v59 = vld [vmem:[#allocation4 + $0x30] sm:$0x1]  ;;  %v1454_v60 = vadd.f32 %v1438_v21, %v1390_v38 }
 0x10a   : > { %1278 = vst [vmem:[#allocation2 + $0x9a] sm:$0x1] %v1262_v50  ;;  %v1630_v63 = vmul.f32 0.06666667, %v1614_v51  ;;  %1790 = vst [vmem:[#allocation2 + $0xa0] sm:$0x1] %v1774_v58 }
 0x10b   : > { %415 = vst [vmem:[#allocation2 + $0xa9] sm:$0x1] %v398_v59  ;;  %v431_v0 = vld [vmem:[#allocation4 + $0x30] sm:$0x1]  ;;  %v447_v1 = vld [vmem:[#allocation4 + $0x31] sm:$0x1]  ;;  %v1550_v2 = vadd.f32 %v1534_v44, %v1486_v42 }
 0x10c   : > { %1374 = vst [vmem:[#allocation2 + $0x9b] sm:$0x1] %v1358_v56  ;;  %v1726_v27 = vmul.f32 0.53333336, %v1710_v57  ;;  %v463_v3 = vsub.f32 %v447_v1, %v431_v0  ;;  %v527_v4 = vld [vmem:[#allocation4 + $0x30] sm:$0x1]  ;;  %v1646_v6 = vadd.f32 %v1630_v63, %v1582_v48 }
 0x10d   : > { %v543_v5 = vld [vmem:[#allocation4 + $0x31] sm:$0x1]  ;;  %1470 = vst [vmem:[#allocation2 + $0x9c] sm:$0x1] %v1454_v60  ;;  %v639_v9 = vld [vmem:[#allocation4 + $0x32] sm:$0x1] }
 0x10e   : > { %v559_v7 = vsub.f32 %v543_v5, %v527_v4  ;;  %v623_v8 = vld [vmem:[#allocation4 + $0x31] sm:$0x1]  ;;  %1566 = vst [vmem:[#allocation2 + $0x9d] sm:$0x1] %v1550_v2  ;;  %v1742_v13 = vadd.f32 %v1726_v27, %v1678_v54  ;;  %v479_v16 = vmul.f32 0.46666667, %v463_v3 }
 0x10f   : > { %v719_v10 = vld [vmem:[#allocation4 + $0x31] sm:$0x1]  ;;  %v655_v17 = vsub.f32 %v639_v9, %v623_v8  ;;  %v735_v18 = vld [vmem:[#allocation4 + $0x32] sm:$0x1]  ;;  %1662 = vst [vmem:[#allocation2 + $0x9e] sm:$0x1] %v1646_v6 }
 0x110   : > { %v815_v19 = vld [vmem:[#allocation4 + $0x32] sm:$0x1]  ;;  %v575_v20 = vmul.f32 0.93333334, %v559_v7  ;;  %v751_v22 = vsub.f32 %v735_v18, %v719_v10  ;;  %v831_v23 = vld [vmem:[#allocation4 + $0x33] sm:$0x1]  ;;  %v495_v25 = vadd.f32 %v479_v16, %v431_v0 }
 0x111   : > { %v7722_v24 = vld [vmem:[#allocation7 + $0x170] sm:$0xff]   ;;  %1758 = vst [vmem:[#allocation2 + $0x9f] sm:$0x1] %v1742_v13  ;;  %v671_v26 = vmul.f32 0.4, %v655_v17  ;;  %v847_v28 = vsub.f32 %v831_v23, %v815_v19  ;;  %v1885_v41 = vld [vmem:[#allocation2 + $0x91] sm:$0xff] }
 0x112   : > { %v911_v29 = vld [vmem:[#allocation4 + $0x32] sm:$0x1]  ;;  %v591_v31 = vadd.f32 %v575_v20, %v527_v4  ;;  %v767_v36 = vmul.f32 0.8666667, %v751_v22  ;;  %v927_v34 = vld [vmem:[#allocation4 + $0x33] sm:$0x1]  ;;  %7020 = vmatprep.subr.bf16.mxu0 %v7722_v24 }
 0x113   : > { %v7723_v30 = vld [vmem:[#allocation7 + $0x90] sm:$0xff]   ;;  %511 = vst [vmem:[#allocation2 + $0xaa] sm:$0x1] %v495_v25  ;;  %v687_v37 = vadd.f32 %v671_v26, %v623_v8  ;;  %v863_v38 = vmul.f32 0.33333334, %v847_v28  ;;  %v943_v14 = vsub.f32 %v927_v34, %v911_v29  ;;  %7021 = vmatpush3.bf16.msra.mxu0 %v7722_v24  ;;  %v1813_v42 = vld [vmem:[#allocation2 + $0x90] sm:$0xff] }
 0x114   : > { %v1007_v35 = vld [vmem:[#allocation4 + $0x33] sm:$0x1]  ;;  %v1023_v39 = vld [vmem:[#allocation4 + $0x34] sm:$0x1]  ;;  %7060 = vmatprep.subr.bf16.mxu1 %v7723_v30  ;;  %607 = vst [vmem:[#allocation2 + $0xab] sm:$0x1] %v591_v31  ;;  %v783_v15 = vadd.f32 %v767_v36, %v719_v10 }
 0x115   : > { %v1103_v40 = vld [vmem:[#allocation4 + $0x33] sm:$0x1]  ;;  %v1039_v45 = vsub.f32 %v1023_v39, %v1007_v35  ;;  %v1119_v46 = vld [vmem:[#allocation4 + $0x34] sm:$0x1]  ;;  %v1215_v48 = vld [vmem:[#allocation4 + $0x35] sm:$0x1]  ;;  %7061 = vmatpush3.bf16.msra.mxu1 %v7723_v30  ;;  %v879_v49 = vadd.f32 %v863_v38, %v815_v19 }
 0x116   : > { %v1199_v47 = vld [vmem:[#allocation4 + $0x34] sm:$0x1]  ;;  %703 = vst [vmem:[#allocation2 + $0xac] sm:$0x1] %v687_v37  ;;  %v959_v50 = vmul.f32 0.8, %v943_v14  ;;  %v1135_v21 = vsub.f32 %v1119_v46, %v1103_v40 }
 0x117   : > { %v1231_v51 = vsub.f32 %v1215_v48, %v1199_v47  ;;  %v1295_v54 = vld [vmem:[#allocation4 + $0x34] sm:$0x1]  ;;  %v1311_v55 = vld [vmem:[#allocation4 + $0x35] sm:$0x1]  ;;  %799 = vst [vmem:[#allocation2 + $0xad] sm:$0x1] %v783_v15 }
 0x118   : > { %v1055_v56 = vmul.f32 0.26666668, %v1039_v45  ;;  %v1327_v44 = vsub.f32 %v1311_v55, %v1295_v54  ;;  %v1391_v57 = vld [vmem:[#allocation4 + $0x35] sm:$0x1]  ;;  %v1407_v58 = vld [vmem:[#allocation4 + $0x36] sm:$0x1]  ;;  %v975_v59 = vadd.f32 %v959_v50, %v911_v29 }
 0x119   : > { %895 = vst [vmem:[#allocation2 + $0xae] sm:$0x1] %v879_v49  ;;  %v1151_v60 = vmul.f32 0.73333335, %v1135_v21  ;;  %v1247_v63 = vmul.f32 0.2, %v1231_v51  ;;  %v1423_v0 = vsub.f32 %v1407_v58, %v1391_v57 }
 0x11a   : > { %v1487_v1 = vld [vmem:[#allocation4 + $0x35] sm:$0x1]  ;;  %v1886_v2 = vld [vmem:[#allocation2 + $0x99] sm:$0xff]  ;;  %v1071_v3 = vadd.f32 %v1055_v56, %v1007_v35  ;;  %v1343_v4 = vmul.f32 0.6666667, %v1327_v44  ;;  %v7724_v56 = vld [vmem:[#allocation7 + $0x98] sm:$0xff]  }
 0x11b   : > { %v1814_v27 = vld [vmem:[#allocation2 + $0x98] sm:$0xff]  ;;  %v1503_v5 = vld [vmem:[#allocation4 + $0x36] sm:$0x1]  ;;  %v8272_v6 = vpack.c.bf16 %v1886_v2, %v1885_v41  ;;  %991 = vst [vmem:[#allocation2 + $0xaf] sm:$0x1] %v975_v59  ;;  %v1167_v8 = vadd.f32 %v1151_v60, %v1103_v40  ;;  %v1263_v9 = vadd.f32 %v1247_v63, %v1199_v47  ;;  %7062 = vmatprep.subr.bf16.mxu1 %v7724_v56 }
 0x11c   : > { %v8274_v7 = vpack.c.bf16 %v1814_v27, %v1813_v42  ;;  %v1583_v10 = vld [vmem:[#allocation4 + $0x36] sm:$0x1]  ;;  %v1599_v13 = vld [vmem:[#allocation4 + $0x37] sm:$0x1]  ;;  %1087 = vst [vmem:[#allocation2 + $0xb0] sm:$0x1] %v1071_v3  ;;  %v1359_v17 = vadd.f32 %v1343_v4, %v1295_v54  ;;  %v1519_v19 = vsub.f32 %v1503_v5, %v1487_v1  ;;  %7063 = vmatpush3.bf16.msra.mxu1 %v7724_v56 }
 0x11d   : > { %v1679_v16 = vld [vmem:[#allocation4 + $0x36] sm:$0x1]  ;;  %v1439_v18 = vmul.f32 0.13333334, %v1423_v0  ;;  %v1615_v20 = vsub.f32 %v1599_v13, %v1583_v10  ;;  %v1695_v22 = vld [vmem:[#allocation4 + $0x37] sm:$0x1]  ;;  %2426 = vmatprep.mubr.bf16.mxu0 %v8272_v6  ;;  %2900 = vmatprep.mubr.bf16.mxu1 %v8272_v6 }
 0x11e   : > { %v1775_v23 = vld [vmem:[#allocation4 + $0x37] sm:$0x1]  ;;  %1183 = vst [vmem:[#allocation2 + $0xb1] sm:$0x1] %v1167_v8  ;;  %1279 = vst [vmem:[#allocation2 + $0xb2] sm:$0x1] %v1263_v9  ;;  %v1711_v24 = vsub.f32 %v1695_v22, %v1679_v16  ;;  %2427 = vmatmul.mubr.bf16.gmra.mrb[20].mxu0 %v8274_v7  ;;  %2901 = vmatmul.mubr.bf16.gmra.mrb[24].mxu1 %v8274_v7 }
 0x11f   : > { %1791 = vst [vmem:[#allocation2 + $0xb8] sm:$0x1] %v1775_v23  ;;  %v399_v25 = vld [vmem:[#allocation4 + $0x38] sm:$0x1]  ;;  %v448_v28 = vld [vmem:[#allocation4 + $0x39] sm:$0x1]  ;;  %v1455_v29 = vadd.f32 %v1439_v18, %v1391_v57 }
 0x120   : > { %v432_v26 = vld [vmem:[#allocation4 + $0x38] sm:$0x1]  ;;  %1375 = vst [vmem:[#allocation2 + $0xb3] sm:$0x1] %v1359_v17  ;;  %v1535_v30 = vmul.f32 0.6, %v1519_v19 }
 0x121   : > { %v1631_v31 = vmul.f32 0.06666667, %v1615_v20  ;;  %416 = vst [vmem:[#allocation2 + $0xc1] sm:$0x1] %v399_v25  ;;  %v464_v36 = vsub.f32 %v448_v28, %v432_v26  ;;  %v528_v34 = vld [vmem:[#allocation4 + $0x38] sm:$0x1] }
 0x122   : > { %v1727_v35 = vmul.f32 0.53333336, %v1711_v24  ;;  %v544_v37 = vld [vmem:[#allocation4 + $0x39] sm:$0x1]  ;;  %1471 = vst [vmem:[#allocation2 + $0xb4] sm:$0x1] %v1455_v29  ;;  %v1551_v14 = vadd.f32 %v1535_v30, %v1487_v1 }
 0x123   : > { %v624_v38 = vld [vmem:[#allocation4 + $0x39] sm:$0x1]  ;;  %v1647_v39 = vadd.f32 %v1631_v31, %v1583_v10  ;;  %v480_v40 = vmul.f32 0.46666667, %v464_v36  ;;  %v560_v41 = vsub.f32 %v544_v37, %v528_v34  ;;  %v640_v42 = vld [vmem:[#allocation4 + $0x3a] sm:$0x1] }
 0x124   : > { %v720_v15 = vld [vmem:[#allocation4 + $0x39] sm:$0x1]  ;;  %v1743_v45 = vadd.f32 %v1727_v35, %v1679_v16  ;;  %v656_v46 = vsub.f32 %v640_v42, %v624_v38  ;;  %v736_v47 = vld [vmem:[#allocation4 + $0x3a] sm:$0x1]  ;;  %v832_v49 = vld [vmem:[#allocation4 + $0x3b] sm:$0x1] }
 0x125   : > { %v816_v48 = vld [vmem:[#allocation4 + $0x3a] sm:$0x1]  ;;  %1567 = vst [vmem:[#allocation2 + $0xb5] sm:$0x1] %v1551_v14  ;;  %1663 = vst [vmem:[#allocation2 + $0xb6] sm:$0x1] %v1647_v39  ;;  %v496_v50 = vadd.f32 %v480_v40, %v432_v26  ;;  %v752_v51 = vsub.f32 %v736_v47, %v720_v15 }
 0x126   : > { %v576_v21 = vmul.f32 0.93333334, %v560_v41  ;;  %v848_v54 = vsub.f32 %v832_v49, %v816_v48  ;;  %v912_v55 = vld [vmem:[#allocation4 + $0x3a] sm:$0x1]  ;;  %1759 = vst [vmem:[#allocation2 + $0xb7] sm:$0x1] %v1743_v45 }
 0x127   : > { %v672_v44 = vmul.f32 0.4, %v656_v46  ;;  %v928_v57 = vld [vmem:[#allocation4 + $0x3b] sm:$0x1]  ;;  %512 = vst [vmem:[#allocation2 + $0xc2] sm:$0x1] %v496_v50 }
 0x128   : > { %v592_v58 = vadd.f32 %v576_v21, %v528_v34  ;;  %v768_v59 = vmul.f32 0.8666667, %v752_v51  ;;  %v864_v60 = vmul.f32 0.33333334, %v848_v54  ;;  %v944_v63 = vsub.f32 %v928_v57, %v912_v55  ;;  %v1008_v0 = vld [vmem:[#allocation4 + $0x3b] sm:$0x1] }
 0x129   : > { %v688_v1 = vadd.f32 %v672_v44, %v624_v38  ;;  %v1024_v2 = vld [vmem:[#allocation4 + $0x3c] sm:$0x1]  ;;  %v1104_v27 = vld [vmem:[#allocation4 + $0x3b] sm:$0x1]  ;;  %v1216_v17 = vld [vmem:[#allocation4 + $0x3d] sm:$0x1] }
 0x12a   : > { %v1120_v3 = vld [vmem:[#allocation4 + $0x3c] sm:$0x1]  ;;  %608 = vst [vmem:[#allocation2 + $0xc3] sm:$0x1] %v592_v58  ;;  %v784_v8 = vadd.f32 %v768_v59, %v720_v15  ;;  %v880_v9 = vadd.f32 %v864_v60, %v816_v48  ;;  %v960_v10 = vmul.f32 0.8, %v944_v63  ;;  %v1040_v13 = vsub.f32 %v1024_v2, %v1008_v0 }
 0x12b   : > { %v1887_v4 = vld [vmem:[#allocation2 + $0xa9] sm:$0xff]  ;;  %704 = vst [vmem:[#allocation2 + $0xc4] sm:$0x1] %v688_v1  ;;  %v1136_v18 = vsub.f32 %v1120_v3, %v1104_v27  ;;  %v449_v57 = vld [vmem:[#allocation4 + $0x41] sm:$0x1] }
 0x12c   : > { %v1815_v5 = vld [vmem:[#allocation2 + $0xa8] sm:$0xff]  ;;  %800 = vst [vmem:[#allocation2 + $0xc5] sm:$0x1] %v784_v8  ;;  %896 = vst [vmem:[#allocation2 + $0xc6] sm:$0x1] %v880_v9  ;;  %v976_v24 = vadd.f32 %v960_v10, %v912_v55 }
 0x12d   : > { %v1200_v16 = vld [vmem:[#allocation4 + $0x3c] sm:$0x1]  ;;  %v1312_v22 = vld [vmem:[#allocation4 + $0x3d] sm:$0x1]  ;;  %v1056_v25 = vmul.f32 0.26666668, %v1040_v13 }
 0x12e   : > { %v1232_v19 = vsub.f32 %v1216_v17, %v1200_v16  ;;  %v1296_v20 = vld [vmem:[#allocation4 + $0x3c] sm:$0x1]  ;;  %v1392_v23 = vld [vmem:[#allocation4 + $0x3d] sm:$0x1]  ;;  %v1408_v28 = vld [vmem:[#allocation4 + $0x3e] sm:$0x1] }
 0x12f   : > { %v1328_v26 = vsub.f32 %v1312_v22, %v1296_v20  ;;  %v1488_v29 = vld [vmem:[#allocation4 + $0x3d] sm:$0x1]  ;;  %v1152_v30 = vmul.f32 0.73333335, %v1136_v18  ;;  %v1424_v36 = vsub.f32 %v1408_v28, %v1392_v23  ;;  %v1504_v34 = vld [vmem:[#allocation4 + $0x3e] sm:$0x1]  ;;  %v1072_v38 = vadd.f32 %v1056_v25, %v1008_v0 }
 0x130   : > { %v1248_v31 = vmul.f32 0.2, %v1232_v19  ;;  %v1888_v35 = vld [vmem:[#allocation2 + $0xb1] sm:$0xff]  ;;  %992 = vst [vmem:[#allocation2 + $0xc7] sm:$0x1] %v976_v24  ;;  %v1520_v39 = vsub.f32 %v1504_v34, %v1488_v29 }
 0x131   : > { %v1816_v37 = vld [vmem:[#allocation2 + $0xb0] sm:$0xff]  ;;  %v1344_v14 = vmul.f32 0.6666667, %v1328_v26  ;;  %v1584_v40 = vld [vmem:[#allocation4 + $0x3e] sm:$0x1]  ;;  %v8280_v41 = vpack.c.bf16 %v1888_v35, %v1887_v4  ;;  %v1168_v15 = vadd.f32 %v1152_v30, %v1104_v27 }
 0x132   : > { %v8282_v42 = vpack.c.bf16 %v1816_v37, %v1815_v5  ;;  %v1264_v45 = vadd.f32 %v1248_v31, %v1200_v16  ;;  %v1600_v46 = vld [vmem:[#allocation4 + $0x3f] sm:$0x1]  ;;  %v1680_v47 = vld [vmem:[#allocation4 + $0x3e] sm:$0x1]  ;;  %1088 = vst [vmem:[#allocation2 + $0xc8] sm:$0x1] %v1072_v38 }
 0x133   : > { %v1696_v48 = vld [vmem:[#allocation4 + $0x3f] sm:$0x1]  ;;  %v1360_v49 = vadd.f32 %v1344_v14, %v1296_v20  ;;  %v1440_v50 = vmul.f32 0.13333334, %v1424_v36  ;;  %v1536_v21 = vmul.f32 0.6, %v1520_v39  ;;  %v1616_v51 = vsub.f32 %v1600_v46, %v1584_v40  ;;  %2434 = vmatprep.mubr.bf16.mxu0 %v8280_v41  ;;  %2908 = vmatprep.mubr.bf16.mxu1 %v8280_v41 }
 0x134   : > { %v1776_v54 = vld [vmem:[#allocation4 + $0x3f] sm:$0x1]  ;;  %1184 = vst [vmem:[#allocation2 + $0xc9] sm:$0x1] %v1168_v15  ;;  %1280 = vst [vmem:[#allocation2 + $0xca] sm:$0x1] %v1264_v45  ;;  %v1712_v55 = vsub.f32 %v1696_v48, %v1680_v47  ;;  %2435 = vmatmul.mubr.bf16.gmra.mrb[24].mxu0 %v8282_v42  ;;  %2909 = vmatmul.mubr.bf16.gmra.mrb[28].mxu1 %v8282_v42 }
 0x135   : > { %1792 = vst [vmem:[#allocation2 + $0xd0] sm:$0x1] %v1776_v54  ;;  %v400_v56 = vld [vmem:[#allocation4 + $0x40] sm:$0x1]  ;;  %1376 = vst [vmem:[#allocation2 + $0xcb] sm:$0x1] %v1360_v49  ;;  %v1456_v58 = vadd.f32 %v1440_v50, %v1392_v23  ;;  %v1552_v59 = vadd.f32 %v1536_v21, %v1488_v29 }
 0x136   : > { %v433_v44 = vld [vmem:[#allocation4 + $0x40] sm:$0x1]  ;;  %v1632_v60 = vmul.f32 0.06666667, %v1616_v51  ;;  %417 = vst [vmem:[#allocation2 + $0xd9] sm:$0x1] %v400_v56 }
 0x137   : > { %v465_v63 = vsub.f32 %v449_v57, %v433_v44  ;;  %v529_v0 = vld [vmem:[#allocation4 + $0x40] sm:$0x1]  ;;  %v545_v1 = vld [vmem:[#allocation4 + $0x41] sm:$0x1]  ;;  %v1728_v2 = vmul.f32 0.53333336, %v1712_v55 }
 0x138   : > { %v561_v27 = vsub.f32 %v545_v1, %v529_v0  ;;  %v625_v3 = vld [vmem:[#allocation4 + $0x41] sm:$0x1]  ;;  %v641_v4 = vld [vmem:[#allocation4 + $0x42] sm:$0x1]  ;;  %1472 = vst [vmem:[#allocation2 + $0xcc] sm:$0x1] %v1456_v58  ;;  %v1648_v5 = vadd.f32 %v1632_v60, %v1584_v40 }
 0x139   : > { %1568 = vst [vmem:[#allocation2 + $0xcd] sm:$0x1] %v1552_v59  ;;  %v481_v8 = vmul.f32 0.46666667, %v465_v63  ;;  %v657_v9 = vsub.f32 %v641_v4, %v625_v3  ;;  %v721_v10 = vld [vmem:[#allocation4 + $0x41] sm:$0x1]  ;;  %v1744_v16 = vadd.f32 %v1728_v2, %v1680_v47 }
 0x13a   : > { %v737_v13 = vld [vmem:[#allocation4 + $0x42] sm:$0x1]  ;;  %v577_v17 = vmul.f32 0.93333334, %v561_v27  ;;  %1664 = vst [vmem:[#allocation2 + $0xce] sm:$0x1] %v1648_v5 }
 0x13b   : > { %v753_v18 = vsub.f32 %v737_v13, %v721_v10  ;;  %v817_v19 = vld [vmem:[#allocation4 + $0x42] sm:$0x1]  ;;  %v497_v20 = vadd.f32 %v481_v8, %v433_v44  ;;  %v673_v22 = vmul.f32 0.4, %v657_v9  ;;  %v833_v23 = vld [vmem:[#allocation4 + $0x43] sm:$0x1] }
 0x13c   : > { %v913_v24 = vld [vmem:[#allocation4 + $0x42] sm:$0x1]  ;;  %1760 = vst [vmem:[#allocation2 + $0xcf] sm:$0x1] %v1744_v16  ;;  %v593_v25 = vadd.f32 %v577_v17, %v529_v0  ;;  %v849_v28 = vsub.f32 %v833_v23, %v817_v19  ;;  %v929_v29 = vld [vmem:[#allocation4 + $0x43] sm:$0x1] }
 0x13d   : > { %v769_v26 = vmul.f32 0.8666667, %v753_v18  ;;  %v7726_v30 = vld [vmem:[#allocation7 + $0xa0] sm:$0xff]   ;;  %513 = vst [vmem:[#allocation2 + $0xda] sm:$0x1] %v497_v20  ;;  %v689_v31 = vadd.f32 %v673_v22, %v625_v3  ;;  %v945_v36 = vsub.f32 %v929_v29, %v913_v24  ;;  %v1889_v45 = vld [vmem:[#allocation2 + $0xc1] sm:$0xff] }
 0x13e   : > { %v1009_v34 = vld [vmem:[#allocation4 + $0x43] sm:$0x1]  ;;  %v1025_v35 = vld [vmem:[#allocation4 + $0x44] sm:$0x1]  ;;  %609 = vst [vmem:[#allocation2 + $0xdb] sm:$0x1] %v593_v25  ;;  %7064 = vmatprep.subr.bf16.mxu1 %v7726_v30 }
 0x13f   : > { %v1105_v37 = vld [vmem:[#allocation4 + $0x43] sm:$0x1]  ;;  %v785_v38 = vadd.f32 %v769_v26, %v721_v10  ;;  %v865_v14 = vmul.f32 0.33333334, %v849_v28  ;;  %v1041_v39 = vsub.f32 %v1025_v35, %v1009_v34  ;;  %v1121_v40 = vld [vmem:[#allocation4 + $0x44] sm:$0x1]  ;;  %7065 = vmatpush3.bf16.msra.mxu1 %v7726_v30 }
 0x140   : > { %v1201_v15 = vld [vmem:[#allocation4 + $0x44] sm:$0x1]  ;;  %v1817_v46 = vld [vmem:[#allocation2 + $0xc0] sm:$0xff]  ;;  %705 = vst [vmem:[#allocation2 + $0xdc] sm:$0x1] %v689_v31  ;;  %v1137_v48 = vsub.f32 %v1121_v40, %v1105_v37 }
 0x141   : > { %v961_v47 = vmul.f32 0.8, %v945_v36  ;;  %v1217_v49 = vld [vmem:[#allocation4 + $0x45] sm:$0x1]  ;;  %v1297_v50 = vld [vmem:[#allocation4 + $0x44] sm:$0x1]  ;;  %v881_v21 = vadd.f32 %v865_v14, %v817_v19 }
 0x142   : > { %801 = vst [vmem:[#allocation2 + $0xdd] sm:$0x1] %v785_v38  ;;  %v1057_v51 = vmul.f32 0.26666668, %v1041_v39  ;;  %v1233_v54 = vsub.f32 %v1217_v49, %v1201_v15  ;;  %v1313_v55 = vld [vmem:[#allocation4 + $0x45] sm:$0x1] }
 0x143   : > { %v1393_v56 = vld [vmem:[#allocation4 + $0x45] sm:$0x1]  ;;  %v977_v44 = vadd.f32 %v961_v47, %v913_v24  ;;  %v1153_v57 = vmul.f32 0.73333335, %v1137_v48  ;;  %v1329_v58 = vsub.f32 %v1313_v55, %v1297_v50  ;;  %v1409_v59 = vld [vmem:[#allocation4 + $0x46] sm:$0x1] }
 0x144   : > { %v1489_v60 = vld [vmem:[#allocation4 + $0x45] sm:$0x1]  ;;  %897 = vst [vmem:[#allocation2 + $0xde] sm:$0x1] %v881_v21  ;;  %v1073_v63 = vadd.f32 %v1057_v51, %v1009_v34  ;;  %v1249_v0 = vmul.f32 0.2, %v1233_v54  ;;  %v1425_v1 = vsub.f32 %v1409_v59, %v1393_v56 }
 0x145   : > { %v1505_v2 = vld [vmem:[#allocation4 + $0x46] sm:$0x1]  ;;  %v1890_v3 = vld [vmem:[#allocation2 + $0xc9] sm:$0xff]  ;;  %993 = vst [vmem:[#allocation2 + $0xdf] sm:$0x1] %v977_v44  ;;  %v1169_v5 = vadd.f32 %v1153_v57, %v1105_v37 }
 0x146   : > { %v1585_v27 = vld [vmem:[#allocation4 + $0x46] sm:$0x1]  ;;  %v1818_v4 = vld [vmem:[#allocation2 + $0xc8] sm:$0xff]  ;;  %v1345_v8 = vmul.f32 0.6666667, %v1329_v58  ;;  %v1521_v9 = vsub.f32 %v1505_v2, %v1489_v60  ;;  %v8288_v13 = vpack.c.bf16 %v1890_v3, %v1889_v45  ;;  %v1265_v17 = vadd.f32 %v1249_v0, %v1201_v15 }
 0x147   : > { %v1601_v10 = vld [vmem:[#allocation4 + $0x47] sm:$0x1]  ;;  %v8290_v16 = vpack.c.bf16 %v1818_v4, %v1817_v46  ;;  %1089 = vst [vmem:[#allocation2 + $0xe0] sm:$0x1] %v1073_v63  ;;  %v1441_v18 = vmul.f32 0.13333334, %v1425_v1 }
 0x148   : > { %v1681_v19 = vld [vmem:[#allocation4 + $0x46] sm:$0x1]  ;;  %v1697_v20 = vld [vmem:[#allocation4 + $0x47] sm:$0x1]  ;;  %1185 = vst [vmem:[#allocation2 + $0xe1] sm:$0x1] %v1169_v5  ;;  %v1361_v22 = vadd.f32 %v1345_v8, %v1297_v50  ;;  %v1617_v24 = vsub.f32 %v1601_v10, %v1585_v27  ;;  %2442 = vmatprep.mubr.bf16.mxu0 %v8288_v13  ;;  %2916 = vmatprep.mubr.bf16.mxu1 %v8288_v13 }
 0x149   : > { %v1537_v23 = vmul.f32 0.6, %v1521_v9  ;;  %v1713_v25 = vsub.f32 %v1697_v20, %v1681_v19  ;;  %v1777_v26 = vld [vmem:[#allocation4 + $0x47] sm:$0x1]  ;;  %v401_v28 = vld [vmem:[#allocation4 + $0x48] sm:$0x1]  ;;  %v1457_v29 = vadd.f32 %v1441_v18, %v1393_v56  ;;  %2443 = vmatmul.mubr.bf16.gmra.mrb[28].mxu0 %v8290_v16  ;;  %2917 = vmatmul.mubr.bf16.gmra.mrb[32].mxu1 %v8290_v16 }
 0x14a   : > { %1281 = vst [vmem:[#allocation2 + $0xe2] sm:$0x1] %v1265_v17  ;;  %1793 = vst [vmem:[#allocation2 + $0xe8] sm:$0x1] %v1777_v26  ;;  %v434_v30 = vld [vmem:[#allocation4 + $0x48] sm:$0x1] }
 0x14b   : > { %418 = vst [vmem:[#allocation2 + $0xf1] sm:$0x1] %v401_v28  ;;  %v450_v31 = vld [vmem:[#allocation4 + $0x49] sm:$0x1]  ;;  %v530_v36 = vld [vmem:[#allocation4 + $0x48] sm:$0x1]  ;;  %v1553_v34 = vadd.f32 %v1537_v23, %v1489_v60 }
 0x14c   : > { %1377 = vst [vmem:[#allocation2 + $0xe3] sm:$0x1] %v1361_v22  ;;  %v1633_v35 = vmul.f32 0.06666667, %v1617_v24  ;;  %v1729_v37 = vmul.f32 0.53333336, %v1713_v25  ;;  %v466_v38 = vsub.f32 %v450_v31, %v434_v30 }
 0x14d   : > { %v546_v14 = vld [vmem:[#allocation4 + $0x49] sm:$0x1]  ;;  %1473 = vst [vmem:[#allocation2 + $0xe4] sm:$0x1] %v1457_v29  ;;  %v642_v15 = vld [vmem:[#allocation4 + $0x4a] sm:$0x1] }
 0x14e   : > { %v562_v39 = vsub.f32 %v546_v14, %v530_v36  ;;  %v626_v40 = vld [vmem:[#allocation4 + $0x49] sm:$0x1]  ;;  %1569 = vst [vmem:[#allocation2 + $0xe5] sm:$0x1] %v1553_v34  ;;  %v1649_v46 = vadd.f32 %v1633_v35, %v1585_v27  ;;  %v1745_v47 = vadd.f32 %v1729_v37, %v1681_v19  ;;  %v482_v48 = vmul.f32 0.46666667, %v466_v38 }
 0x14f   : > { %v722_v45 = vld [vmem:[#allocation4 + $0x49] sm:$0x1]  ;;  %v658_v49 = vsub.f32 %v642_v15, %v626_v40  ;;  %v738_v50 = vld [vmem:[#allocation4 + $0x4a] sm:$0x1]  ;;  %v834_v55 = vld [vmem:[#allocation4 + $0x4b] sm:$0x1] }
 0x150   : > { %v818_v21 = vld [vmem:[#allocation4 + $0x4a] sm:$0x1]  ;;  %v578_v51 = vmul.f32 0.93333334, %v562_v39  ;;  %v754_v54 = vsub.f32 %v738_v50, %v722_v45  ;;  %v7725_v56 = vld [vmem:[#allocation7 + $0x178] sm:$0xff]   ;;  %v498_v44 = vadd.f32 %v482_v48, %v434_v30 }
 0x151   : > { %1665 = vst [vmem:[#allocation2 + $0xe6] sm:$0x1] %v1649_v46  ;;  %1761 = vst [vmem:[#allocation2 + $0xe7] sm:$0x1] %v1745_v47  ;;  %v674_v57 = vmul.f32 0.4, %v658_v49  ;;  %v850_v58 = vsub.f32 %v834_v55, %v818_v21  ;;  %7022 = vmatprep.subr.bf16.mxu0 %v7725_v56 }
 0x152   : > { %v914_v59 = vld [vmem:[#allocation4 + $0x4a] sm:$0x1]  ;;  %v594_v63 = vadd.f32 %v578_v51, %v530_v36  ;;  %v770_v0 = vmul.f32 0.8666667, %v754_v54  ;;  %v930_v1 = vld [vmem:[#allocation4 + $0x4b] sm:$0x1]  ;;  %7023 = vmatpush3.bf16.msra.mxu0 %v7725_v56 }
 0x153   : > { %v7727_v60 = vld [vmem:[#allocation7 + $0xa8] sm:$0xff]   ;;  %514 = vst [vmem:[#allocation2 + $0xf2] sm:$0x1] %v498_v44  ;;  %v690_v27 = vadd.f32 %v674_v57, %v626_v40  ;;  %v866_v3 = vmul.f32 0.33333334, %v850_v58  ;;  %v946_v4 = vsub.f32 %v930_v1, %v914_v59 }
 0x154   : > { %v1010_v2 = vld [vmem:[#allocation4 + $0x4b] sm:$0x1]  ;;  %v1026_v5 = vld [vmem:[#allocation4 + $0x4c] sm:$0x1]  ;;  %7066 = vmatprep.subr.bf16.mxu1 %v7727_v60  ;;  %610 = vst [vmem:[#allocation2 + $0xf3] sm:$0x1] %v594_v63  ;;  %v786_v17 = vadd.f32 %v770_v0, %v722_v45 }
 0x155   : > { %v1106_v8 = vld [vmem:[#allocation4 + $0x4b] sm:$0x1]  ;;  %v1042_v18 = vsub.f32 %v1026_v5, %v1010_v2  ;;  %v1122_v19 = vld [vmem:[#allocation4 + $0x4c] sm:$0x1]  ;;  %v1218_v22 = vld [vmem:[#allocation4 + $0x4d] sm:$0x1]  ;;  %7067 = vmatpush3.bf16.msra.mxu1 %v7727_v60  ;;  %v882_v23 = vadd.f32 %v866_v3, %v818_v21 }
 0x156   : > { %v1891_v9 = vld [vmem:[#allocation2 + $0xd9] sm:$0xff]  ;;  %706 = vst [vmem:[#allocation2 + $0xf4] sm:$0x1] %v690_v27  ;;  %v962_v24 = vmul.f32 0.8, %v946_v4  ;;  %v1138_v25 = vsub.f32 %v1122_v19, %v1106_v8 }
 0x157   : > { %v1819_v10 = vld [vmem:[#allocation2 + $0xd8] sm:$0xff]  ;;  %802 = vst [vmem:[#allocation2 + $0xf5] sm:$0x1] %v786_v17  ;;  %v1058_v30 = vmul.f32 0.26666668, %v1042_v18 }
 0x158   : > { %v1202_v20 = vld [vmem:[#allocation4 + $0x4c] sm:$0x1]  ;;  %v1314_v29 = vld [vmem:[#allocation4 + $0x4d] sm:$0x1]  ;;  %v1410_v34 = vld [vmem:[#allocation4 + $0x4e] sm:$0x1]  ;;  %v978_v35 = vadd.f32 %v962_v24, %v914_v59 }
 0x159   : > { %v1234_v26 = vsub.f32 %v1218_v22, %v1202_v20  ;;  %v1298_v28 = vld [vmem:[#allocation4 + $0x4c] sm:$0x1]  ;;  %v1394_v36 = vld [vmem:[#allocation4 + $0x4d] sm:$0x1]  ;;  %898 = vst [vmem:[#allocation2 + $0xf6] sm:$0x1] %v882_v23  ;;  %v1074_v45 = vadd.f32 %v1058_v30, %v1010_v2 }
 0x15a   : > { %v1330_v31 = vsub.f32 %v1314_v29, %v1298_v28  ;;  %v1154_v37 = vmul.f32 0.73333335, %v1138_v25  ;;  %v1426_v14 = vsub.f32 %v1410_v34, %v1394_v36  ;;  %v1490_v39 = vld [vmem:[#allocation4 + $0x4d] sm:$0x1]  ;;  %v1892_v40 = vld [vmem:[#allocation2 + $0xe1] sm:$0xff] }
 0x15b   : > { %v1250_v38 = vmul.f32 0.2, %v1234_v26  ;;  %v1820_v15 = vld [vmem:[#allocation2 + $0xe0] sm:$0xff]  ;;  %v1506_v47 = vld [vmem:[#allocation4 + $0x4e] sm:$0x1]  ;;  %v8296_v48 = vpack.c.bf16 %v1892_v40, %v1891_v9  ;;  %v7729_v40 = vld [vmem:[#allocation7 + $0xb8] sm:$0xff]  }
 0x15c   : > { %v1346_v46 = vmul.f32 0.6666667, %v1330_v31  ;;  %v8298_v49 = vpack.c.bf16 %v1820_v15, %v1819_v10  ;;  %994 = vst [vmem:[#allocation2 + $0xf7] sm:$0x1] %v978_v35  ;;  %v1170_v50 = vadd.f32 %v1154_v37, %v1106_v8  ;;  %v1586_v51 = vld [vmem:[#allocation4 + $0x4e] sm:$0x1]  ;;  %v1522_v57 = vsub.f32 %v1506_v47, %v1490_v39 }
 0x15d   : > { %v1266_v21 = vadd.f32 %v1250_v38, %v1202_v20  ;;  %v1602_v54 = vld [vmem:[#allocation4 + $0x4f] sm:$0x1]  ;;  %v1682_v55 = vld [vmem:[#allocation4 + $0x4e] sm:$0x1]  ;;  %1090 = vst [vmem:[#allocation2 + $0xf8] sm:$0x1] %v1074_v45  ;;  %2450 = vmatprep.mubr.bf16.mxu0 %v8296_v48  ;;  %2924 = vmatprep.mubr.bf16.mxu1 %v8296_v48 }
 0x15e   : > { %v1362_v56 = vadd.f32 %v1346_v46, %v1298_v28  ;;  %v1442_v44 = vmul.f32 0.13333334, %v1426_v14  ;;  %v1618_v58 = vsub.f32 %v1602_v54, %v1586_v51  ;;  %v1698_v59 = vld [vmem:[#allocation4 + $0x4f] sm:$0x1]  ;;  %1186 = vst [vmem:[#allocation2 + $0xf9] sm:$0x1] %v1170_v50  ;;  %2451 = vmatmul.mubr.bf16.gmra.mrb[32].mxu0 %v8298_v49  ;;  %2925 = vmatmul.mubr.bf16.gmra.mrb[36].mxu1 %v8298_v49 }
 0x15f   : > { %v1778_v60 = vld [vmem:[#allocation4 + $0x4f] sm:$0x1]  ;;  %1282 = vst [vmem:[#allocation2 + $0xfa] sm:$0x1] %v1266_v21  ;;  %v1714_v63 = vsub.f32 %v1698_v59, %v1682_v55  ;;  %v402_v0 = vld [vmem:[#allocation4 + $0x50] sm:$0x1] }
 0x160   : > { %1794 = vst [vmem:[#allocation2 + $0x100] sm:$0x1] %v1778_v60  ;;  %v435_v1 = vld [vmem:[#allocation4 + $0x50] sm:$0x1]  ;;  %v451_v2 = vld [vmem:[#allocation4 + $0x51] sm:$0x1]  ;;  %v1458_v27 = vadd.f32 %v1442_v44, %v1394_v36 }
 0x161   : > { %1378 = vst [vmem:[#allocation2 + $0xfb] sm:$0x1] %v1362_v56  ;;  %v1538_v3 = vmul.f32 0.6, %v1522_v57  ;;  %v1634_v4 = vmul.f32 0.06666667, %v1618_v58  ;;  %v467_v5 = vsub.f32 %v451_v2, %v435_v1 }
 0x162   : > { %419 = vst [vmem:[#allocation2 + $0x109] sm:$0x1] %v402_v0  ;;  %v531_v8 = vld [vmem:[#allocation4 + $0x50] sm:$0x1]  ;;  %v1730_v9 = vmul.f32 0.53333336, %v1714_v63 }
 0x163   : > { %v547_v10 = vld [vmem:[#allocation4 + $0x51] sm:$0x1]  ;;  %1474 = vst [vmem:[#allocation2 + $0xfc] sm:$0x1] %v1458_v27  ;;  %v1554_v18 = vadd.f32 %v1538_v3, %v1490_v39  ;;  %v1650_v19 = vadd.f32 %v1634_v4, %v1586_v51  ;;  %v483_v20 = vmul.f32 0.46666667, %v467_v5 }
 0x164   : > { %v627_v17 = vld [vmem:[#allocation4 + $0x51] sm:$0x1]  ;;  %v563_v22 = vsub.f32 %v547_v10, %v531_v8  ;;  %v643_v23 = vld [vmem:[#allocation4 + $0x52] sm:$0x1]  ;;  %v1746_v25 = vadd.f32 %v1730_v9, %v1682_v55  ;;  %v835_v30 = vld [vmem:[#allocation4 + $0x53] sm:$0x1] }
 0x165   : > { %v723_v24 = vld [vmem:[#allocation4 + $0x51] sm:$0x1]  ;;  %v659_v26 = vsub.f32 %v643_v23, %v627_v17  ;;  %v739_v28 = vld [vmem:[#allocation4 + $0x52] sm:$0x1]  ;;  %1570 = vst [vmem:[#allocation2 + $0xfd] sm:$0x1] %v1554_v18  ;;  %v499_v31 = vadd.f32 %v483_v20, %v435_v1 }
 0x166   : > { %v819_v29 = vld [vmem:[#allocation4 + $0x52] sm:$0x1]  ;;  %1666 = vst [vmem:[#allocation2 + $0xfe] sm:$0x1] %v1650_v19  ;;  %v579_v36 = vmul.f32 0.93333334, %v563_v22  ;;  %v755_v34 = vsub.f32 %v739_v28, %v723_v24 }
 0x167   : > { %v851_v35 = vsub.f32 %v835_v30, %v819_v29  ;;  %v915_v37 = vld [vmem:[#allocation4 + $0x52] sm:$0x1]  ;;  %1762 = vst [vmem:[#allocation2 + $0xff] sm:$0x1] %v1746_v25  ;;  %v675_v14 = vmul.f32 0.4, %v659_v26 }
 0x168   : > { %v7728_v38 = vld [vmem:[#allocation7 + $0xb0] sm:$0xff]   ;;  %515 = vst [vmem:[#allocation2 + $0x10a] sm:$0x1] %v499_v31  ;;  %v595_v15 = vadd.f32 %v579_v36, %v531_v8  ;;  %v771_v45 = vmul.f32 0.8666667, %v755_v34  ;;  %v1893_v56 = vld [vmem:[#allocation2 + $0xf1] sm:$0xff] }
 0x169   : > { %v931_v39 = vld [vmem:[#allocation4 + $0x53] sm:$0x1]  ;;  %v867_v46 = vmul.f32 0.33333334, %v851_v35  ;;  %7068 = vmatprep.subr.bf16.mxu1 %v7728_v38  ;;  %v691_v21 = vadd.f32 %v675_v14, %v627_v17  ;;  %v1027_v51 = vld [vmem:[#allocation4 + $0x54] sm:$0x1] }
 0x16a   : > { %v947_v47 = vsub.f32 %v931_v39, %v915_v37  ;;  %v1011_v50 = vld [vmem:[#allocation4 + $0x53] sm:$0x1]  ;;  %v1123_v55 = vld [vmem:[#allocation4 + $0x54] sm:$0x1]  ;;  %7069 = vmatpush3.bf16.msra.mxu1 %v7728_v38  ;;  %v1821_v44 = vld [vmem:[#allocation2 + $0xf0] sm:$0xff]  ;;  %v787_v57 = vadd.f32 %v771_v45, %v723_v24 }
 0x16b   : > { %v1107_v54 = vld [vmem:[#allocation4 + $0x53] sm:$0x1]  ;;  %611 = vst [vmem:[#allocation2 + $0x10b] sm:$0x1] %v595_v15  ;;  %v883_v58 = vadd.f32 %v867_v46, %v819_v29  ;;  %v1043_v60 = vsub.f32 %v1027_v51, %v1011_v50  ;;  %v1203_v63 = vld [vmem:[#allocation4 + $0x54] sm:$0x1]  ;;  %7070 = vmatprep.subr.bf16.mxu1 %v7729_v40 }
 0x16c   : > { %v963_v59 = vmul.f32 0.8, %v947_v47  ;;  %v1219_v0 = vld [vmem:[#allocation4 + $0x55] sm:$0x1]  ;;  %707 = vst [vmem:[#allocation2 + $0x10c] sm:$0x1] %v691_v21  ;;  %v1139_v1 = vsub.f32 %v1123_v55, %v1107_v54 }
 0x16d   : > { %v1235_v2 = vsub.f32 %v1219_v0, %v1203_v63  ;;  %v1299_v27 = vld [vmem:[#allocation4 + $0x54] sm:$0x1]  ;;  %v1315_v3 = vld [vmem:[#allocation4 + $0x55] sm:$0x1]  ;;  %803 = vst [vmem:[#allocation2 + $0x10d] sm:$0x1] %v787_v57 }
 0x16e   : > { %v1395_v4 = vld [vmem:[#allocation4 + $0x55] sm:$0x1]  ;;  %899 = vst [vmem:[#allocation2 + $0x10e] sm:$0x1] %v883_v58  ;;  %v979_v5 = vadd.f32 %v963_v59, %v915_v37  ;;  %v1059_v8 = vmul.f32 0.26666668, %v1043_v60  ;;  %v1331_v9 = vsub.f32 %v1315_v3, %v1299_v27  ;;  %7071 = vmatpush3.bf16.msra.mxu1 %v7729_v40 }
 0x16f   : > { %v1411_v10 = vld [vmem:[#allocation4 + $0x56] sm:$0x1]  ;;  %v1491_v17 = vld [vmem:[#allocation4 + $0x55] sm:$0x1]  ;;  %v1155_v18 = vmul.f32 0.73333335, %v1139_v1 }
 0x170   : > { %v1251_v19 = vmul.f32 0.2, %v1235_v2  ;;  %v1427_v20 = vsub.f32 %v1411_v10, %v1395_v4  ;;  %v1507_v22 = vld [vmem:[#allocation4 + $0x56] sm:$0x1]  ;;  %v1894_v23 = vld [vmem:[#allocation2 + $0xf9] sm:$0xff]  ;;  %v1075_v25 = vadd.f32 %v1059_v8, %v1011_v50 }
 0x171   : > { %v1822_v24 = vld [vmem:[#allocation2 + $0xf8] sm:$0xff]  ;;  %995 = vst [vmem:[#allocation2 + $0x10f] sm:$0x1] %v979_v5  ;;  %v1347_v26 = vmul.f32 0.6666667, %v1331_v9  ;;  %v1523_v28 = vsub.f32 %v1507_v22, %v1491_v17  ;;  %v8304_v30 = vpack.c.bf16 %v1894_v23, %v1893_v56  ;;  %v1171_v36 = vadd.f32 %v1155_v18, %v1107_v54 }
 0x172   : > { %v1587_v29 = vld [vmem:[#allocation4 + $0x56] sm:$0x1]  ;;  %v8306_v31 = vpack.c.bf16 %v1822_v24, %v1821_v44  ;;  %v1267_v34 = vadd.f32 %v1251_v19, %v1203_v63  ;;  %v1603_v35 = vld [vmem:[#allocation4 + $0x57] sm:$0x1]  ;;  %1091 = vst [vmem:[#allocation2 + $0x110] sm:$0x1] %v1075_v25 }
 0x173   : > { %v1683_v37 = vld [vmem:[#allocation4 + $0x56] sm:$0x1]  ;;  %v1699_v38 = vld [vmem:[#allocation4 + $0x57] sm:$0x1]  ;;  %v1363_v14 = vadd.f32 %v1347_v26, %v1299_v27  ;;  %v1443_v39 = vmul.f32 0.13333334, %v1427_v20  ;;  %v1619_v15 = vsub.f32 %v1603_v35, %v1587_v29  ;;  %2458 = vmatprep.mubr.bf16.mxu0 %v8304_v30  ;;  %2932 = vmatprep.mubr.bf16.mxu1 %v8304_v30 }
 0x174   : > { %v1539_v40 = vmul.f32 0.6, %v1523_v28  ;;  %v1779_v45 = vld [vmem:[#allocation4 + $0x57] sm:$0x1]  ;;  %1187 = vst [vmem:[#allocation2 + $0x111] sm:$0x1] %v1171_v36  ;;  %v1715_v46 = vsub.f32 %v1699_v38, %v1683_v37  ;;  %2459 = vmatmul.mubr.bf16.gmra.mrb[36].mxu0 %v8306_v31  ;;  %2933 = vmatmul.mubr.bf16.gmra.mrb[40].mxu1 %v8306_v31 }
 0x175   : > { %1283 = vst [vmem:[#allocation2 + $0x112] sm:$0x1] %v1267_v34  ;;  %1795 = vst [vmem:[#allocation2 + $0x118] sm:$0x1] %v1779_v45  ;;  %v403_v47 = vld [vmem:[#allocation4 + $0x58] sm:$0x1]  ;;  %v1459_v51 = vadd.f32 %v1443_v39, %v1395_v4 }
 0x176   : > { %v436_v50 = vld [vmem:[#allocation4 + $0x58] sm:$0x1]  ;;  %v452_v21 = vld [vmem:[#allocation4 + $0x59] sm:$0x1]  ;;  %1379 = vst [vmem:[#allocation2 + $0x113] sm:$0x1] %v1363_v14  ;;  %v1555_v54 = vadd.f32 %v1539_v40, %v1491_v17 }
 0x177   : > { %v1635_v55 = vmul.f32 0.06666667, %v1619_v15  ;;  %420 = vst [vmem:[#allocation2 + $0x121] sm:$0x1] %v403_v47  ;;  %v468_v56 = vsub.f32 %v452_v21, %v436_v50  ;;  %v532_v44 = vld [vmem:[#allocation4 + $0x58] sm:$0x1] }
 0x178   : > { %v548_v57 = vld [vmem:[#allocation4 + $0x59] sm:$0x1]  ;;  %v1731_v58 = vmul.f32 0.53333336, %v1715_v46  ;;  %v644_v63 = vld [vmem:[#allocation4 + $0x5a] sm:$0x1] }
 0x179   : > { %v564_v59 = vsub.f32 %v548_v57, %v532_v44  ;;  %v628_v60 = vld [vmem:[#allocation4 + $0x59] sm:$0x1]  ;;  %1475 = vst [vmem:[#allocation2 + $0x114] sm:$0x1] %v1459_v51  ;;  %1571 = vst [vmem:[#allocation2 + $0x115] sm:$0x1] %v1555_v54  ;;  %v1651_v0 = vadd.f32 %v1635_v55, %v1587_v29 }
 0x17a   : > { %v484_v1 = vmul.f32 0.46666667, %v468_v56  ;;  %v660_v2 = vsub.f32 %v644_v63, %v628_v60  ;;  %v724_v27 = vld [vmem:[#allocation4 + $0x59] sm:$0x1]  ;;  %v740_v3 = vld [vmem:[#allocation4 + $0x5a] sm:$0x1]  ;;  %v1747_v4 = vadd.f32 %v1731_v58, %v1683_v37 }
 0x17b   : > { %v580_v5 = vmul.f32 0.93333334, %v564_v59  ;;  %v756_v8 = vsub.f32 %v740_v3, %v724_v27  ;;  %v820_v9 = vld [vmem:[#allocation4 + $0x5a] sm:$0x1]  ;;  %1667 = vst [vmem:[#allocation2 + $0x116] sm:$0x1] %v1651_v0 }
 0x17c   : > { %v500_v10 = vadd.f32 %v484_v1, %v436_v50  ;;  %v676_v17 = vmul.f32 0.4, %v660_v2  ;;  %v836_v18 = vld [vmem:[#allocation4 + $0x5b] sm:$0x1]  ;;  %v916_v19 = vld [vmem:[#allocation4 + $0x5a] sm:$0x1] }
 0x17d   : > { %1763 = vst [vmem:[#allocation2 + $0x117] sm:$0x1] %v1747_v4  ;;  %v596_v20 = vadd.f32 %v580_v5, %v532_v44  ;;  %v772_v22 = vmul.f32 0.8666667, %v756_v8  ;;  %v852_v23 = vsub.f32 %v836_v18, %v820_v9  ;;  %v932_v24 = vld [vmem:[#allocation4 + $0x5b] sm:$0x1] }
 0x17e   : > { %516 = vst [vmem:[#allocation2 + $0x122] sm:$0x1] %v500_v10  ;;  %v692_v25 = vadd.f32 %v676_v17, %v628_v60  ;;  %v948_v26 = vsub.f32 %v932_v24, %v916_v19  ;;  %v1012_v28 = vld [vmem:[#allocation4 + $0x5b] sm:$0x1]  ;;  %v1028_v29 = vld [vmem:[#allocation4 + $0x5c] sm:$0x1] }
 0x17f   : > { %v1108_v36 = vld [vmem:[#allocation4 + $0x5b] sm:$0x1]  ;;  %612 = vst [vmem:[#allocation2 + $0x123] sm:$0x1] %v596_v20  ;;  %v788_v34 = vadd.f32 %v772_v22, %v724_v27  ;;  %v868_v35 = vmul.f32 0.33333334, %v852_v23  ;;  %v1044_v37 = vsub.f32 %v1028_v29, %v1012_v28 }
 0x180   : > { %v1124_v38 = vld [vmem:[#allocation4 + $0x5c] sm:$0x1]  ;;  %708 = vst [vmem:[#allocation2 + $0x124] sm:$0x1] %v692_v25  ;;  %v964_v15 = vmul.f32 0.8, %v948_v26 }
 0x181   : > { %v1204_v14 = vld [vmem:[#allocation4 + $0x5c] sm:$0x1]  ;;  %v1140_v45 = vsub.f32 %v1124_v38, %v1108_v36  ;;  %v1220_v46 = vld [vmem:[#allocation4 + $0x5d] sm:$0x1]  ;;  %804 = vst [vmem:[#allocation2 + $0x125] sm:$0x1] %v788_v34  ;;  %v884_v50 = vadd.f32 %v868_v35, %v820_v9 }
 0x182   : > { %v1895_v39 = vld [vmem:[#allocation2 + $0x109] sm:$0xff]  ;;  %v1060_v21 = vmul.f32 0.26666668, %v1044_v37  ;;  %v1236_v51 = vsub.f32 %v1220_v46, %v1204_v14  ;;  %v980_v56 = vadd.f32 %v964_v15, %v916_v19  ;;  %v453_v35 = vld [vmem:[#allocation4 + $0x61] sm:$0x1] }
 0x183   : > { %v1823_v40 = vld [vmem:[#allocation2 + $0x108] sm:$0xff]  ;;  %v1156_v44 = vmul.f32 0.73333335, %v1140_v45  ;;  %900 = vst [vmem:[#allocation2 + $0x126] sm:$0x1] %v884_v50 }
 0x184   : > { %v1300_v47 = vld [vmem:[#allocation4 + $0x5c] sm:$0x1]  ;;  %v1316_v54 = vld [vmem:[#allocation4 + $0x5d] sm:$0x1]  ;;  %v1412_v58 = vld [vmem:[#allocation4 + $0x5e] sm:$0x1]  ;;  %v1076_v60 = vadd.f32 %v1060_v21, %v1012_v28 }
 0x185   : > { %v1396_v55 = vld [vmem:[#allocation4 + $0x5d] sm:$0x1]  ;;  %v1332_v57 = vsub.f32 %v1316_v54, %v1300_v47  ;;  %v1252_v63 = vmul.f32 0.2, %v1236_v51  ;;  %v1508_v1 = vld [vmem:[#allocation4 + $0x5e] sm:$0x1]  ;;  %v1172_v4 = vadd.f32 %v1156_v44, %v1108_v36 }
 0x186   : > { %v1492_v59 = vld [vmem:[#allocation4 + $0x5d] sm:$0x1]  ;;  %v1428_v0 = vsub.f32 %v1412_v58, %v1396_v55  ;;  %v1588_v2 = vld [vmem:[#allocation4 + $0x5e] sm:$0x1]  ;;  %v1896_v27 = vld [vmem:[#allocation2 + $0x111] sm:$0xff] }
 0x187   : > { %v1824_v3 = vld [vmem:[#allocation2 + $0x110] sm:$0xff]  ;;  %996 = vst [vmem:[#allocation2 + $0x127] sm:$0x1] %v980_v56  ;;  %v1348_v5 = vmul.f32 0.6666667, %v1332_v57  ;;  %v1524_v8 = vsub.f32 %v1508_v1, %v1492_v59  ;;  %v8312_v10 = vpack.c.bf16 %v1896_v27, %v1895_v39  ;;  %v1268_v18 = vadd.f32 %v1252_v63, %v1204_v14 }
 0x188   : > { %v1604_v9 = vld [vmem:[#allocation4 + $0x5f] sm:$0x1]  ;;  %v8314_v17 = vpack.c.bf16 %v1824_v3, %v1823_v40  ;;  %1092 = vst [vmem:[#allocation2 + $0x128] sm:$0x1] %v1076_v60  ;;  %v1444_v19 = vmul.f32 0.13333334, %v1428_v0 }
 0x189   : > { %v1684_v20 = vld [vmem:[#allocation4 + $0x5e] sm:$0x1]  ;;  %v1700_v22 = vld [vmem:[#allocation4 + $0x5f] sm:$0x1]  ;;  %1188 = vst [vmem:[#allocation2 + $0x129] sm:$0x1] %v1172_v4  ;;  %v1364_v23 = vadd.f32 %v1348_v5, %v1300_v47  ;;  %v1620_v25 = vsub.f32 %v1604_v9, %v1588_v2  ;;  %2466 = vmatprep.mubr.bf16.mxu0 %v8312_v10  ;;  %2940 = vmatprep.mubr.bf16.mxu1 %v8312_v10 }
 0x18a   : > { %v1540_v24 = vmul.f32 0.6, %v1524_v8  ;;  %v1716_v26 = vsub.f32 %v1700_v22, %v1684_v20  ;;  %v1780_v28 = vld [vmem:[#allocation4 + $0x5f] sm:$0x1]  ;;  %v404_v29 = vld [vmem:[#allocation4 + $0x60] sm:$0x1]  ;;  %v1460_v36 = vadd.f32 %v1444_v19, %v1396_v55  ;;  %2467 = vmatmul.mubr.bf16.gmra.mrb[40].mxu0 %v8314_v17  ;;  %2941 = vmatmul.mubr.bf16.gmra.mrb[44].mxu1 %v8314_v17 }
 0x18b   : > { %1284 = vst [vmem:[#allocation2 + $0x12a] sm:$0x1] %v1268_v18  ;;  %1796 = vst [vmem:[#allocation2 + $0x130] sm:$0x1] %v1780_v28  ;;  %v437_v34 = vld [vmem:[#allocation4 + $0x60] sm:$0x1] }
 0x18c   : > { %421 = vst [vmem:[#allocation2 + $0x139] sm:$0x1] %v404_v29  ;;  %v533_v37 = vld [vmem:[#allocation4 + $0x60] sm:$0x1]  ;;  %1380 = vst [vmem:[#allocation2 + $0x12b] sm:$0x1] %v1364_v23  ;;  %v1556_v38 = vadd.f32 %v1540_v24, %v1492_v59  ;;  %v469_v40 = vsub.f32 %v453_v35, %v437_v34 }
 0x18d   : > { %v1636_v14 = vmul.f32 0.06666667, %v1620_v25  ;;  %v1732_v39 = vmul.f32 0.53333336, %v1716_v26  ;;  %v549_v15 = vld [vmem:[#allocation4 + $0x61] sm:$0x1] }
 0x18e   : > { %1476 = vst [vmem:[#allocation2 + $0x12c] sm:$0x1] %v1460_v36  ;;  %v565_v45 = vsub.f32 %v549_v15, %v533_v37  ;;  %v629_v46 = vld [vmem:[#allocation4 + $0x61] sm:$0x1]  ;;  %v645_v47 = vld [vmem:[#allocation4 + $0x62] sm:$0x1] }
 0x18f   : > { %v725_v50 = vld [vmem:[#allocation4 + $0x61] sm:$0x1]  ;;  %1572 = vst [vmem:[#allocation2 + $0x12d] sm:$0x1] %v1556_v38  ;;  %v1652_v21 = vadd.f32 %v1636_v14, %v1588_v2  ;;  %v1748_v51 = vadd.f32 %v1732_v39, %v1684_v20  ;;  %v485_v54 = vmul.f32 0.46666667, %v469_v40  ;;  %v661_v55 = vsub.f32 %v645_v47, %v629_v46 }
 0x190   : > { %v741_v56 = vld [vmem:[#allocation4 + $0x62] sm:$0x1]  ;;  %v581_v57 = vmul.f32 0.93333334, %v565_v45  ;;  %v837_v59 = vld [vmem:[#allocation4 + $0x63] sm:$0x1] }
 0x191   : > { %v821_v44 = vld [vmem:[#allocation4 + $0x62] sm:$0x1]  ;;  %v757_v58 = vsub.f32 %v741_v56, %v725_v50  ;;  %1668 = vst [vmem:[#allocation2 + $0x12e] sm:$0x1] %v1652_v21  ;;  %1764 = vst [vmem:[#allocation2 + $0x12f] sm:$0x1] %v1748_v51  ;;  %v501_v60 = vadd.f32 %v485_v54, %v437_v34 }
 0x192   : > { %v677_v63 = vmul.f32 0.4, %v661_v55  ;;  %v853_v0 = vsub.f32 %v837_v59, %v821_v44  ;;  %v917_v1 = vld [vmem:[#allocation4 + $0x62] sm:$0x1]  ;;  %v597_v27 = vadd.f32 %v581_v57, %v533_v37  ;;  %v933_v4 = vld [vmem:[#allocation4 + $0x63] sm:$0x1] }
 0x193   : > { %v773_v3 = vmul.f32 0.8666667, %v757_v58  ;;  %v1013_v5 = vld [vmem:[#allocation4 + $0x63] sm:$0x1]  ;;  %517 = vst [vmem:[#allocation2 + $0x13a] sm:$0x1] %v501_v60  ;;  %v949_v9 = vsub.f32 %v933_v4, %v917_v1 }
 0x194   : > { %v693_v2 = vadd.f32 %v677_v63, %v629_v46  ;;  %v869_v8 = vmul.f32 0.33333334, %v853_v0  ;;  %v1029_v18 = vld [vmem:[#allocation4 + $0x64] sm:$0x1]  ;;  %v1109_v19 = vld [vmem:[#allocation4 + $0x63] sm:$0x1] }
 0x195   : > { %v1897_v20 = vld [vmem:[#allocation2 + $0x121] sm:$0xff]  ;;  %613 = vst [vmem:[#allocation2 + $0x13b] sm:$0x1] %v597_v27  ;;  %v789_v23 = vadd.f32 %v773_v3, %v725_v50  ;;  %v1045_v24 = vsub.f32 %v1029_v18, %v1013_v5  ;;  %v1125_v25 = vld [vmem:[#allocation4 + $0x64] sm:$0x1] }
 0x196   : > { %v1825_v22 = vld [vmem:[#allocation2 + $0x120] sm:$0xff]  ;;  %v1205_v26 = vld [vmem:[#allocation4 + $0x64] sm:$0x1]  ;;  %v1221_v28 = vld [vmem:[#allocation4 + $0x65] sm:$0x1]  ;;  %v885_v29 = vadd.f32 %v869_v8, %v821_v44  ;;  %v1141_v34 = vsub.f32 %v1125_v25, %v1109_v19 }
 0x197   : > { %709 = vst [vmem:[#allocation2 + $0x13c] sm:$0x1] %v693_v2  ;;  %v965_v36 = vmul.f32 0.8, %v949_v9  ;;  %v1237_v35 = vsub.f32 %v1221_v28, %v1205_v26  ;;  %v1301_v37 = vld [vmem:[#allocation4 + $0x64] sm:$0x1] }
 0x198   : > { %v1317_v38 = vld [vmem:[#allocation4 + $0x65] sm:$0x1]  ;;  %805 = vst [vmem:[#allocation2 + $0x13d] sm:$0x1] %v789_v23  ;;  %v1061_v14 = vmul.f32 0.26666668, %v1045_v24 }
 0x199   : > { %v1333_v39 = vsub.f32 %v1317_v38, %v1301_v37  ;;  %v1397_v40 = vld [vmem:[#allocation4 + $0x65] sm:$0x1]  ;;  %v1413_v15 = vld [vmem:[#allocation4 + $0x66] sm:$0x1]  ;;  %901 = vst [vmem:[#allocation2 + $0x13e] sm:$0x1] %v885_v29  ;;  %v981_v45 = vadd.f32 %v965_v36, %v917_v1 }
 0x19a   : > { %v1157_v46 = vmul.f32 0.73333335, %v1141_v34  ;;  %v1253_v47 = vmul.f32 0.2, %v1237_v35  ;;  %v1429_v50 = vsub.f32 %v1413_v15, %v1397_v40  ;;  %v1493_v21 = vld [vmem:[#allocation4 + $0x65] sm:$0x1]  ;;  %v1077_v55 = vadd.f32 %v1061_v14, %v1013_v5 }
 0x19b   : > { %v1898_v51 = vld [vmem:[#allocation2 + $0x129] sm:$0xff]  ;;  %v1349_v56 = vmul.f32 0.6666667, %v1333_v39  ;;  %v1509_v44 = vld [vmem:[#allocation4 + $0x66] sm:$0x1] }
 0x19c   : > { %v1826_v54 = vld [vmem:[#allocation2 + $0x128] sm:$0xff]  ;;  %v8320_v57 = vpack.c.bf16 %v1898_v51, %v1897_v20  ;;  %997 = vst [vmem:[#allocation2 + $0x13f] sm:$0x1] %v981_v45  ;;  %v1173_v59 = vadd.f32 %v1157_v46, %v1109_v19  ;;  %v1269_v60 = vadd.f32 %v1253_v47, %v1205_v26  ;;  %v1589_v63 = vld [vmem:[#allocation4 + $0x66] sm:$0x1]  ;;  %v1525_v4 = vsub.f32 %v1509_v44, %v1493_v21 }
 0x19d   : > { %v8322_v58 = vpack.c.bf16 %v1826_v54, %v1825_v22  ;;  %v1605_v0 = vld [vmem:[#allocation4 + $0x67] sm:$0x1]  ;;  %v1685_v27 = vld [vmem:[#allocation4 + $0x66] sm:$0x1]  ;;  %1093 = vst [vmem:[#allocation2 + $0x140] sm:$0x1] %v1077_v55  ;;  %v1365_v1 = vadd.f32 %v1349_v56, %v1301_v37 }
 0x19e   : > { %v1445_v3 = vmul.f32 0.13333334, %v1429_v50  ;;  %v1621_v2 = vsub.f32 %v1605_v0, %v1589_v63  ;;  %v1701_v8 = vld [vmem:[#allocation4 + $0x67] sm:$0x1]  ;;  %2474 = vmatprep.mubr.bf16.mxu0 %v8320_v57  ;;  %1189 = vst [vmem:[#allocation2 + $0x141] sm:$0x1] %v1173_v59  ;;  %2948 = vmatprep.mubr.bf16.mxu1 %v8320_v57 }
 0x19f   : > { %v1781_v9 = vld [vmem:[#allocation4 + $0x67] sm:$0x1]  ;;  %1285 = vst [vmem:[#allocation2 + $0x142] sm:$0x1] %v1269_v60  ;;  %v1717_v5 = vsub.f32 %v1701_v8, %v1685_v27  ;;  %v405_v18 = vld [vmem:[#allocation4 + $0x68] sm:$0x1]  ;;  %2475 = vmatmul.mubr.bf16.gmra.mrb[44].mxu0 %v8322_v58  ;;  %2949 = vmatmul.mubr.bf16.gmra.mrb[48].mxu1 %v8322_v58 }
 0x1a0   : > { %1797 = vst [vmem:[#allocation2 + $0x148] sm:$0x1] %v1781_v9  ;;  %v438_v19 = vld [vmem:[#allocation4 + $0x68] sm:$0x1]  ;;  %v454_v20 = vld [vmem:[#allocation4 + $0x69] sm:$0x1]  ;;  %v1461_v22 = vadd.f32 %v1445_v3, %v1397_v40 }
 0x1a1   : > { %1381 = vst [vmem:[#allocation2 + $0x143] sm:$0x1] %v1365_v1  ;;  %v1541_v23 = vmul.f32 0.6, %v1525_v4  ;;  %v1637_v24 = vmul.f32 0.06666667, %v1621_v2  ;;  %v470_v25 = vsub.f32 %v454_v20, %v438_v19 }
 0x1a2   : > { %422 = vst [vmem:[#allocation2 + $0x151] sm:$0x1] %v405_v18  ;;  %v534_v26 = vld [vmem:[#allocation4 + $0x68] sm:$0x1]  ;;  %v1733_v28 = vmul.f32 0.53333336, %v1717_v5 }
 0x1a3   : > { %v550_v29 = vld [vmem:[#allocation4 + $0x69] sm:$0x1]  ;;  %1477 = vst [vmem:[#allocation2 + $0x144] sm:$0x1] %v1461_v22  ;;  %v1557_v34 = vadd.f32 %v1541_v23, %v1493_v21  ;;  %v1653_v35 = vadd.f32 %v1637_v24, %v1589_v63  ;;  %v486_v37 = vmul.f32 0.46666667, %v470_v25 }
 0x1a4   : > { %v630_v36 = vld [vmem:[#allocation4 + $0x69] sm:$0x1]  ;;  %v566_v38 = vsub.f32 %v550_v29, %v534_v26  ;;  %v646_v14 = vld [vmem:[#allocation4 + $0x6a] sm:$0x1]  ;;  %v1749_v15 = vadd.f32 %v1733_v28, %v1685_v27  ;;  %v838_v47 = vld [vmem:[#allocation4 + $0x6b] sm:$0x1] }
 0x1a5   : > { %v726_v39 = vld [vmem:[#allocation4 + $0x69] sm:$0x1]  ;;  %v662_v45 = vsub.f32 %v646_v14, %v630_v36  ;;  %v742_v40 = vld [vmem:[#allocation4 + $0x6a] sm:$0x1]  ;;  %1573 = vst [vmem:[#allocation2 + $0x145] sm:$0x1] %v1557_v34  ;;  %v502_v50 = vadd.f32 %v486_v37, %v438_v19 }
 0x1a6   : > { %v822_v46 = vld [vmem:[#allocation4 + $0x6a] sm:$0x1]  ;;  %1669 = vst [vmem:[#allocation2 + $0x146] sm:$0x1] %v1653_v35  ;;  %v582_v51 = vmul.f32 0.93333334, %v566_v38  ;;  %v758_v54 = vsub.f32 %v742_v40, %v726_v39 }
 0x1a7   : > { %v854_v55 = vsub.f32 %v838_v47, %v822_v46  ;;  %v918_v56 = vld [vmem:[#allocation4 + $0x6a] sm:$0x1]  ;;  %1765 = vst [vmem:[#allocation2 + $0x147] sm:$0x1] %v1749_v15  ;;  %v678_v44 = vmul.f32 0.4, %v662_v45 }
 0x1a8   : > { %v934_v21 = vld [vmem:[#allocation4 + $0x6b] sm:$0x1]  ;;  %518 = vst [vmem:[#allocation2 + $0x152] sm:$0x1] %v502_v50  ;;  %v598_v59 = vadd.f32 %v582_v51, %v534_v26  ;;  %v774_v60 = vmul.f32 0.8666667, %v758_v54 }
 0x1a9   : > { %v870_v63 = vmul.f32 0.33333334, %v854_v55  ;;  %v950_v0 = vsub.f32 %v934_v21, %v918_v56  ;;  %v1014_v27 = vld [vmem:[#allocation4 + $0x6b] sm:$0x1]  ;;  %v694_v1 = vadd.f32 %v678_v44, %v630_v36  ;;  %v1030_v3 = vld [vmem:[#allocation4 + $0x6c] sm:$0x1] }
 0x1aa   : > { %v1110_v4 = vld [vmem:[#allocation4 + $0x6b] sm:$0x1]  ;;  %v1126_v2 = vld [vmem:[#allocation4 + $0x6c] sm:$0x1]  ;;  %614 = vst [vmem:[#allocation2 + $0x153] sm:$0x1] %v598_v59  ;;  %v790_v5 = vadd.f32 %v774_v60, %v726_v39  ;;  %v1046_v20 = vsub.f32 %v1030_v3, %v1014_v27 }
 0x1ab   : > { %v1899_v8 = vld [vmem:[#allocation2 + $0x139] sm:$0xff]  ;;  %v886_v18 = vadd.f32 %v870_v63, %v822_v46  ;;  %v966_v19 = vmul.f32 0.8, %v950_v0  ;;  %710 = vst [vmem:[#allocation2 + $0x154] sm:$0x1] %v694_v1  ;;  %v1142_v24 = vsub.f32 %v1126_v2, %v1110_v4 }
 0x1ac   : > { %v1827_v9 = vld [vmem:[#allocation2 + $0x138] sm:$0xff]  ;;  %806 = vst [vmem:[#allocation2 + $0x155] sm:$0x1] %v790_v5  ;;  %v1062_v34 = vmul.f32 0.26666668, %v1046_v20 }
 0x1ad   : > { %v1206_v22 = vld [vmem:[#allocation4 + $0x6c] sm:$0x1]  ;;  %v1222_v23 = vld [vmem:[#allocation4 + $0x6d] sm:$0x1]  ;;  %902 = vst [vmem:[#allocation2 + $0x156] sm:$0x1] %v886_v18  ;;  %v982_v36 = vadd.f32 %v966_v19, %v918_v56 }
 0x1ae   : > { %v1238_v25 = vsub.f32 %v1222_v23, %v1206_v22  ;;  %v1302_v26 = vld [vmem:[#allocation4 + $0x6c] sm:$0x1]  ;;  %v1318_v28 = vld [vmem:[#allocation4 + $0x6d] sm:$0x1]  ;;  %v1414_v37 = vld [vmem:[#allocation4 + $0x6e] sm:$0x1]  ;;  %v1078_v47 = vadd.f32 %v1062_v34, %v1014_v27 }
 0x1af   : > { %v1398_v29 = vld [vmem:[#allocation4 + $0x6d] sm:$0x1]  ;;  %v1334_v35 = vsub.f32 %v1318_v28, %v1302_v26  ;;  %v1158_v14 = vmul.f32 0.73333335, %v1142_v24  ;;  %v1510_v45 = vld [vmem:[#allocation4 + $0x6e] sm:$0x1] }
 0x1b0   : > { %v1494_v38 = vld [vmem:[#allocation4 + $0x6d] sm:$0x1]  ;;  %v1254_v39 = vmul.f32 0.2, %v1238_v25  ;;  %v1430_v15 = vsub.f32 %v1414_v37, %v1398_v29  ;;  %v1900_v40 = vld [vmem:[#allocation2 + $0x141] sm:$0xff] }
 0x1b1   : > { %v1828_v46 = vld [vmem:[#allocation2 + $0x140] sm:$0xff]  ;;  %998 = vst [vmem:[#allocation2 + $0x157] sm:$0x1] %v982_v36  ;;  %v1350_v50 = vmul.f32 0.6666667, %v1334_v35  ;;  %v1526_v51 = vsub.f32 %v1510_v45, %v1494_v38  ;;  %v8328_v55 = vpack.c.bf16 %v1900_v40, %v1899_v8  ;;  %v1174_v56 = vadd.f32 %v1158_v14, %v1110_v4 }
 0x1b2   : > { %v1590_v54 = vld [vmem:[#allocation4 + $0x6e] sm:$0x1]  ;;  %v8330_v44 = vpack.c.bf16 %v1828_v46, %v1827_v9  ;;  %v1270_v21 = vadd.f32 %v1254_v39, %v1206_v22  ;;  %v1606_v59 = vld [vmem:[#allocation4 + $0x6f] sm:$0x1]  ;;  %1094 = vst [vmem:[#allocation2 + $0x158] sm:$0x1] %v1078_v47 }
 0x1b3   : > { %v1686_v60 = vld [vmem:[#allocation4 + $0x6e] sm:$0x1]  ;;  %v1702_v63 = vld [vmem:[#allocation4 + $0x6f] sm:$0x1]  ;;  %v1366_v0 = vadd.f32 %v1350_v50, %v1302_v26  ;;  %v1446_v1 = vmul.f32 0.13333334, %v1430_v15  ;;  %v1622_v2 = vsub.f32 %v1606_v59, %v1590_v54  ;;  %2482 = vmatprep.mubr.bf16.mxu0 %v8328_v55  ;;  %2956 = vmatprep.mubr.bf16.mxu1 %v8328_v55 }
 0x1b4   : > { %v1542_v3 = vmul.f32 0.6, %v1526_v51  ;;  %v1782_v5 = vld [vmem:[#allocation4 + $0x6f] sm:$0x1]  ;;  %1190 = vst [vmem:[#allocation2 + $0x159] sm:$0x1] %v1174_v56  ;;  %v1718_v27 = vsub.f32 %v1702_v63, %v1686_v60  ;;  %2483 = vmatmul.mubr.bf16.gmra.mrb[48].mxu0 %v8330_v44  ;;  %2957 = vmatmul.mubr.bf16.gmra.mrb[52].mxu1 %v8330_v44 }
 0x1b5   : > { %1286 = vst [vmem:[#allocation2 + $0x15a] sm:$0x1] %v1270_v21  ;;  %1798 = vst [vmem:[#allocation2 + $0x160] sm:$0x1] %v1782_v5  ;;  %v343_v4 = vmul.f32 0.53333336, %v8260_v43  ;;  %v1462_v18 = vadd.f32 %v1446_v1, %v1398_v29 }
 0x1b6   : > { %v407_v8 = vld [vmem:[#allocation4 + $0x78] sm:$0x1]  ;;  %1382 = vst [vmem:[#allocation2 + $0x15b] sm:$0x1] %v1366_v0  ;;  %v1558_v19 = vadd.f32 %v1542_v3, %v1494_v38  ;;  %v1638_v20 = vmul.f32 0.06666667, %v1622_v2 }
 0x1b7   : > { %v440_v9 = vld [vmem:[#allocation4 + $0x78] sm:$0x1]  ;;  %424 = vst [vmem:[#allocation2 + $0x181] sm:$0x1] %v407_v8  ;;  %v456_v22 = vld [vmem:[#allocation4 + $0x79] sm:$0x1] }
 0x1b8   : > { %v536_v23 = vld [vmem:[#allocation4 + $0x78] sm:$0x1]  ;;  %v1734_v24 = vmul.f32 0.53333336, %v1718_v27  ;;  %v7827_v25 = vld [vmem:[%s8144_s6 + $0x30] sm:$0xff]  ;;  %v472_v28 = vsub.f32 %v456_v22, %v440_v9  ;;  %v1654_v43 = vadd.f32 %v1638_v20, %v1590_v54  ;;  %v7730_v46 = vld [vmem:[#allocation7 + $0x1c0] sm:$0xff]  }
 0x1b9   : > { %v344_v26 = vadd.f32 %v7827_v25, %v343_v4  ;;  %v552_v36 = vld [vmem:[#allocation4 + $0x79] sm:$0x1]  ;;  %1478 = vst [vmem:[#allocation2 + $0x15c] sm:$0x1] %v1462_v18  ;;  %1574 = vst [vmem:[#allocation2 + $0x15d] sm:$0x1] %v1558_v19  ;;  %6464 = vmatprep.subr.bf16.mxu0 %v7730_v46 }
 0x1ba   : > { %v632_v34 = vld [vmem:[#allocation4 + $0x79] sm:$0x1]  ;;  %v568_v35 = vsub.f32 %v552_v36, %v536_v23  ;;  %v648_v37 = vld [vmem:[#allocation4 + $0x7a] sm:$0x1]  ;;  %v1750_v38 = vadd.f32 %v1734_v24, %v1686_v60  ;;  %v488_v39 = vmul.f32 0.46666667, %v472_v28 }
 0x1bb   : > { %v728_v14 = vld [vmem:[#allocation4 + $0x79] sm:$0x1]  ;;  %v744_v29 = vld [vmem:[#allocation4 + $0x7a] sm:$0x1]  ;;  %346 = vst [vmem:[#allocation4 + $0x70] sm:$0xff] %v344_v26  ;;  %v664_v15 = vsub.f32 %v648_v37, %v632_v34  ;;  %v1901_v8 = vld [vmem:[#allocation2 + $0x151] sm:$0xff] }
 0x1bc   : > { %v760_v45 = vsub.f32 %v744_v29, %v728_v14  ;;  %v824_v40 = vld [vmem:[#allocation4 + $0x7a] sm:$0x1]  ;;  %1670 = vst [vmem:[#allocation2 + $0x15e] sm:$0x1] %v1654_v43  ;;  %v584_v47 = vmul.f32 0.93333334, %v568_v35  ;;  %v504_v56 = vadd.f32 %v488_v39, %v440_v9 }
 0x1bd   : > { %v840_v50 = vld [vmem:[#allocation4 + $0x7b] sm:$0x1]  ;;  %v920_v51 = vld [vmem:[#allocation4 + $0x7a] sm:$0x1]  ;;  %1766 = vst [vmem:[#allocation2 + $0x15f] sm:$0x1] %v1750_v38 }
 0x1be   : > { %v680_v21 = vmul.f32 0.4, %v664_v15  ;;  %v776_v59 = vmul.f32 0.8666667, %v760_v45  ;;  %v856_v54 = vsub.f32 %v840_v50, %v824_v40  ;;  %v600_v63 = vadd.f32 %v584_v47, %v536_v23  ;;  %v936_v0 = vld [vmem:[#allocation4 + $0x7b] sm:$0x1] }
 0x1bf   : > { %v1016_v1 = vld [vmem:[#allocation4 + $0x7b] sm:$0x1]  ;;  %v1032_v60 = vld [vmem:[#allocation4 + $0x7c] sm:$0x1]  ;;  %520 = vst [vmem:[#allocation2 + $0x182] sm:$0x1] %v504_v56  ;;  %v952_v27 = vsub.f32 %v936_v0, %v920_v51 }
 0x1c0   : > { %v696_v3 = vadd.f32 %v680_v21, %v632_v34  ;;  %v792_v2 = vadd.f32 %v776_v59, %v728_v14  ;;  %v872_v5 = vmul.f32 0.33333334, %v856_v54  ;;  %616 = vst [vmem:[#allocation2 + $0x183] sm:$0x1] %v600_v63  ;;  %v1048_v4 = vsub.f32 %v1032_v60, %v1016_v1  ;;  %v1829_v18 = vld [vmem:[#allocation2 + $0x150] sm:$0xff] }
 0x1c1   : > { %v968_v19 = vmul.f32 0.8, %v952_v27  ;;  %v8344_v59 = vld [vmem:[#allocation4 + $0x7c] sm:$0x1] }
 0x1c2   : > { %712 = vst [vmem:[#allocation2 + $0x184] sm:$0x1] %v696_v3  ;;  %808 = vst [vmem:[#allocation2 + $0x185] sm:$0x1] %v792_v2  ;;  %v888_v9 = vadd.f32 %v872_v5, %v824_v40  ;;  %v406_v20 = vld [vmem:[#allocation4 + $0x70] sm:$0x1] }
 0x1c3   : > { %v439_v22 = vld [vmem:[#allocation4 + $0x70] sm:$0x1]  ;;  %v455_v24 = vld [vmem:[#allocation4 + $0x71] sm:$0x1]  ;;  %423 = vst [vmem:[#allocation2 + $0x169] sm:$0x1] %v406_v20  ;;  %v984_v36 = vadd.f32 %v968_v19, %v920_v51 }
 0x1c4   : > { %v471_v23 = vsub.f32 %v455_v24, %v439_v22  ;;  %v535_v25 = vld [vmem:[#allocation4 + $0x70] sm:$0x1]  ;;  %v551_v26 = vld [vmem:[#allocation4 + $0x71] sm:$0x1]  ;;  %904 = vst [vmem:[#allocation2 + $0x186] sm:$0x1] %v888_v9 }
 0x1c5   : > { %v631_v28 = vld [vmem:[#allocation4 + $0x71] sm:$0x1]  ;;  %v1902_v34 = vld [vmem:[#allocation2 + $0x159] sm:$0xff]  ;;  %v567_v35 = vsub.f32 %v551_v26, %v535_v25  ;;  %v647_v37 = vld [vmem:[#allocation4 + $0x72] sm:$0x1] }
 0x1c6   : > { %v1830_v43 = vld [vmem:[#allocation2 + $0x158] sm:$0xff]  ;;  %v1064_v14 = vmul.f32 0.26666668, %v1048_v4  ;;  %v8338_v29 = vpack.c.bf16 %v1902_v34, %v1901_v8  ;;  %v487_v39 = vmul.f32 0.46666667, %v471_v23  ;;  %v663_v15 = vsub.f32 %v647_v37, %v631_v28 }
 0x1c7   : > { %v8340_v38 = vpack.c.bf16 %v1830_v43, %v1829_v18  ;;  %v727_v45 = vld [vmem:[#allocation4 + $0x71] sm:$0x1]  ;;  %v743_v40 = vld [vmem:[#allocation4 + $0x72] sm:$0x1]  ;;  %1000 = vst [vmem:[#allocation2 + $0x187] sm:$0x1] %v984_v36 }
 0x1c8   : > { %v583_v46 = vmul.f32 0.93333334, %v567_v35  ;;  %v759_v47 = vsub.f32 %v743_v40, %v727_v45  ;;  %v823_v50 = vld [vmem:[#allocation4 + $0x72] sm:$0x1]  ;;  %v839_v56 = vld [vmem:[#allocation4 + $0x73] sm:$0x1]  ;;  %v1080_v21 = vadd.f32 %v1064_v14, %v1016_v1  ;;  %2490 = vmatprep.mubr.bf16.mxu0 %v8338_v29  ;;  %v503_v54 = vadd.f32 %v487_v39, %v439_v22  ;;  %2964 = vmatprep.mubr.bf16.mxu1 %v8338_v29 }
 0x1c9   : > { %v8342_v51 = vld [vmem:[#allocation4 + $0x7b] sm:$0x1]  ;;  %v679_v63 = vmul.f32 0.4, %v663_v15  ;;  %v855_v0 = vsub.f32 %v839_v56, %v823_v50  ;;  %v919_v60 = vld [vmem:[#allocation4 + $0x72] sm:$0x1]  ;;  %2491 = vmatmul.mubr.bf16.gmra.mrb[52].mxu0 %v8340_v38  ;;  %2965 = vmatmul.mubr.bf16.gmra.mrb[56].mxu1 %v8340_v38 }
 0x1ca   : > { %v935_v3 = vld [vmem:[#allocation4 + $0x73] sm:$0x1]  ;;  %v8348_v2 = vld [vmem:[#allocation4 + $0x7c] sm:$0x1]  ;;  %v8350_v5 = vld [vmem:[#allocation4 + $0x7d] sm:$0x1]  ;;  %v599_v1 = vadd.f32 %v583_v46, %v535_v25  ;;  %v1144_v46 = vsub.f32 %v8344_v59, %v8342_v51 }
 0x1cb   : > { %v775_v27 = vmul.f32 0.8666667, %v759_v47  ;;  %v951_v4 = vsub.f32 %v935_v3, %v919_v60  ;;  %v1015_v8 = vld [vmem:[#allocation4 + $0x73] sm:$0x1]  ;;  %v1031_v18 = vld [vmem:[#allocation4 + $0x74] sm:$0x1]  ;;  %v695_v20 = vadd.f32 %v679_v63, %v631_v28 }
 0x1cc   : > { %1096 = vst [vmem:[#allocation2 + $0x188] sm:$0x1] %v1080_v21  ;;  %v8354_v9 = vld [vmem:[#allocation4 + $0x7c] sm:$0x1]  ;;  %v1320_v19 = vld [vmem:[#allocation4 + $0x7d] sm:$0x1]  ;;  %v1047_v24 = vsub.f32 %v1031_v18, %v1015_v8 }
 0x1cd   : > { %519 = vst [vmem:[#allocation2 + $0x16a] sm:$0x1] %v503_v54  ;;  %v871_v22 = vmul.f32 0.33333334, %v855_v0  ;;  %v1111_v23 = vld [vmem:[#allocation4 + $0x73] sm:$0x1]  ;;  %v791_v36 = vadd.f32 %v775_v27, %v727_v45  ;;  %v1240_v45 = vsub.f32 %v8350_v5, %v8348_v2  ;;  %v1336_v27 = vsub.f32 %v1320_v19, %v8354_v9 }
 0x1ce   : > { %v1127_v26 = vld [vmem:[#allocation4 + $0x74] sm:$0x1]  ;;  %615 = vst [vmem:[#allocation2 + $0x16b] sm:$0x1] %v599_v1  ;;  %v967_v34 = vmul.f32 0.8, %v951_v4 }
 0x1cf   : > { %v1143_v25 = vsub.f32 %v1127_v26, %v1111_v23  ;;  %v1207_v43 = vld [vmem:[#allocation4 + $0x74] sm:$0x1]  ;;  %v1223_v35 = vld [vmem:[#allocation4 + $0x75] sm:$0x1]  ;;  %711 = vst [vmem:[#allocation2 + $0x16c] sm:$0x1] %v695_v20  ;;  %v887_v37 = vadd.f32 %v871_v22, %v823_v50 }
 0x1d0   : > { %v1063_v14 = vmul.f32 0.26666668, %v1047_v24  ;;  %v1239_v39 = vsub.f32 %v1223_v35, %v1207_v43  ;;  %v1303_v15 = vld [vmem:[#allocation4 + $0x74] sm:$0x1]  ;;  %v1319_v40 = vld [vmem:[#allocation4 + $0x75] sm:$0x1]  ;;  %v983_v28 = vadd.f32 %v967_v34, %v919_v60 }
 0x1d1   : > { %807 = vst [vmem:[#allocation2 + $0x16d] sm:$0x1] %v791_v36  ;;  %v1159_v47 = vmul.f32 0.73333335, %v1143_v25  ;;  %v1335_v56 = vsub.f32 %v1319_v40, %v1303_v15  ;;  %v1399_v21 = vld [vmem:[#allocation4 + $0x75] sm:$0x1] }
 0x1d2   : > { %v1415_v54 = vld [vmem:[#allocation4 + $0x76] sm:$0x1]  ;;  %903 = vst [vmem:[#allocation2 + $0x16e] sm:$0x1] %v887_v37  ;;  %v1079_v63 = vadd.f32 %v1063_v14, %v1015_v8  ;;  %v1255_v0 = vmul.f32 0.2, %v1239_v39 }
 0x1d3   : > { %v1431_v50 = vsub.f32 %v1415_v54, %v1399_v21  ;;  %v1495_v3 = vld [vmem:[#allocation4 + $0x75] sm:$0x1]  ;;  %v1511_v1 = vld [vmem:[#allocation4 + $0x76] sm:$0x1]  ;;  %999 = vst [vmem:[#allocation2 + $0x16f] sm:$0x1] %v983_v28  ;;  %v1175_v4 = vadd.f32 %v1159_v47, %v1111_v23 }
 0x1d4   : > { %v1351_v59 = vmul.f32 0.6666667, %v1335_v56  ;;  %v1527_v18 = vsub.f32 %v1511_v1, %v1495_v3  ;;  %v1591_v60 = vld [vmem:[#allocation4 + $0x76] sm:$0x1]  ;;  %v1607_v20 = vld [vmem:[#allocation4 + $0x77] sm:$0x1]  ;;  %v1271_v24 = vadd.f32 %v1255_v0, %v1207_v43 }
 0x1d5   : > { %v1400_v22 = vld [vmem:[#allocation4 + $0x7d] sm:$0x1]  ;;  %1095 = vst [vmem:[#allocation2 + $0x170] sm:$0x1] %v1079_v63  ;;  %v1447_v26 = vmul.f32 0.13333334, %v1431_v50  ;;  %v1623_v36 = vsub.f32 %v1607_v20, %v1591_v60 }
 0x1d6   : > { %v1687_v5 = vld [vmem:[#allocation4 + $0x76] sm:$0x1]  ;;  %v1703_v34 = vld [vmem:[#allocation4 + $0x77] sm:$0x1]  ;;  %1191 = vst [vmem:[#allocation2 + $0x171] sm:$0x1] %v1175_v4  ;;  %v1367_v8 = vadd.f32 %v1351_v59, %v1303_v15 }
 0x1d7   : > { %v1543_v25 = vmul.f32 0.6, %v1527_v18  ;;  %v1719_v35 = vsub.f32 %v1703_v34, %v1687_v5  ;;  %v1783_v37 = vld [vmem:[#allocation4 + $0x77] sm:$0x1]  ;;  %v1160_v14 = vmul.f32 0.73333335, %v1144_v46  ;;  %v1463_v19 = vadd.f32 %v1447_v26, %v1399_v21 }
 0x1d8   : > { %1287 = vst [vmem:[#allocation2 + $0x172] sm:$0x1] %v1271_v24  ;;  %v1639_v23 = vmul.f32 0.06666667, %v1623_v36  ;;  %1799 = vst [vmem:[#allocation2 + $0x178] sm:$0x1] %v1783_v37 }
 0x1d9   : > { %v1256_v39 = vmul.f32 0.2, %v1240_v45  ;;  %v1352_v40 = vmul.f32 0.6666667, %v1336_v27  ;;  %1383 = vst [vmem:[#allocation2 + $0x173] sm:$0x1] %v1367_v8  ;;  %v1559_v28 = vadd.f32 %v1543_v25, %v1495_v3  ;;  %v1176_v43 = vadd.f32 %v1160_v14, %v8342_v51 }
 0x1da   : > { %v1735_v47 = vmul.f32 0.53333336, %v1719_v35  ;;  %v1416_v56 = vld [vmem:[#allocation4 + $0x7e] sm:$0x1]  ;;  %v1496_v54 = vld [vmem:[#allocation4 + $0x7d] sm:$0x1]  ;;  %v1655_v63 = vadd.f32 %v1639_v23, %v1591_v60 }
 0x1db   : > { %1479 = vst [vmem:[#allocation2 + $0x174] sm:$0x1] %v1463_v19  ;;  %v1272_v15 = vadd.f32 %v1256_v39, %v8348_v2  ;;  %v1368_v0 = vadd.f32 %v1352_v40, %v8354_v9  ;;  %v1432_v46 = vsub.f32 %v1416_v56, %v1400_v22  ;;  %v1512_v50 = vld [vmem:[#allocation4 + $0x7e] sm:$0x1]  ;;  %v1608_v1 = vld [vmem:[#allocation4 + $0x7f] sm:$0x1] }
 0x1dc   : > { %v1592_v21 = vld [vmem:[#allocation4 + $0x7e] sm:$0x1]  ;;  %1575 = vst [vmem:[#allocation2 + $0x175] sm:$0x1] %v1559_v28  ;;  %v1751_v45 = vadd.f32 %v1735_v47, %v1687_v5  ;;  %1192 = vst [vmem:[#allocation2 + $0x189] sm:$0x1] %v1176_v43  ;;  %v1528_v27 = vsub.f32 %v1512_v50, %v1496_v54 }
 0x1dd   : > { %v1624_v3 = vsub.f32 %v1608_v1, %v1592_v21  ;;  %v1688_v4 = vld [vmem:[#allocation4 + $0x7e] sm:$0x1]  ;;  %v1704_v59 = vld [vmem:[#allocation4 + $0x7f] sm:$0x1]  ;;  %1671 = vst [vmem:[#allocation2 + $0x176] sm:$0x1] %v1655_v63 }
 0x1de   : > { %v1784_v51 = vld [vmem:[#allocation4 + $0x7f] sm:$0x1]  ;;  %1288 = vst [vmem:[#allocation2 + $0x18a] sm:$0x1] %v1272_v15  ;;  %1384 = vst [vmem:[#allocation2 + $0x18b] sm:$0x1] %v1368_v0  ;;  %v1720_v60 = vsub.f32 %v1704_v59, %v1688_v4 }
 0x1df   : > { %v1448_v18 = vmul.f32 0.13333334, %v1432_v46  ;;  %1800 = vst [vmem:[#allocation2 + $0x190] sm:$0x1] %v1784_v51  ;;  %v6208_v2 = vpop.f32.mrb[0].mxu0  ;;  %v1945_v8 = vld [vmem:[#allocation2 + $0x2] sm:$0xff] }
 0x1e0   : > { %1767 = vst [vmem:[#allocation2 + $0x177] sm:$0x1] %v1751_v45  ;;  %v1544_v9 = vmul.f32 0.6, %v1528_v27  ;;  %v1640_v20 = vmul.f32 0.06666667, %v1624_v3 }
 0x1e1   : > { %v1464_v24 = vadd.f32 %v1448_v18, %v1400_v22  ;;  %v1736_v26 = vmul.f32 0.53333336, %v1720_v60  ;;  %v6209_v25 = vpop.f32.mrb[1].mxu0  ;;  %v1831_v35 = vld [vmem:[#allocation2 + $0x168] sm:$0xff]  ;;  %v1833_v1 = vld [vmem:[#allocation2 + $0x180] sm:$0xff] }
 0x1e2   : > { %v1560_v36 = vadd.f32 %v1544_v9, %v1496_v54  ;;  %v1656_v5 = vadd.f32 %v1640_v20, %v1592_v21  ;;  %v1946_v37 = vld [vmem:[#allocation2 + $0xa] sm:$0xff]  ;;  %v6211_v14 = vpop.f32.mrb[2].mxu0  ;;  %v8364_v19 = vadd.f32 %v6209_v25, %v6208_v2  ;;  %v1905_v50 = vld [vmem:[#allocation2 + $0x181] sm:$0xff]  ;;  %v1949_v2 = vld [vmem:[#allocation2 + $0x32] sm:$0xff] }
 0x1e3   : > { %1480 = vst [vmem:[#allocation2 + $0x18c] sm:$0x1] %v1464_v24  ;;  %v1752_v34 = vadd.f32 %v1736_v26, %v1688_v4  ;;  %v1903_v23 = vld [vmem:[#allocation2 + $0x169] sm:$0xff]  ;;  %v6212_v39 = vpop.f32.mrb[3].mxu0  ;;  %v1981_v63 = vpack.c.bf16 %v1946_v37, %v1945_v8  ;;  %v1947_v45 = vld [vmem:[#allocation2 + $0x1a] sm:$0xff]  ;;  %v1952_v37 = vld [vmem:[#allocation2 + $0x52] sm:$0xff] }
 0x1e4   : > { %1576 = vst [vmem:[#allocation2 + $0x18d] sm:$0x1] %v1560_v36  ;;  %1672 = vst [vmem:[#allocation2 + $0x18e] sm:$0x1] %v1656_v5  ;;  %v6214_v40 = vpop.f32.mrb[4].mxu0  ;;  %v8366_v28 = vadd.f32 %v6212_v39, %v6211_v14  ;;  %v1948_v27 = vld [vmem:[#allocation2 + $0x22] sm:$0xff] }
 0x1e5   : > { %1768 = vst [vmem:[#allocation2 + $0x18f] sm:$0x1] %v1752_v34  ;;  %v6215_v43 = vpop.f32.mrb[5].mxu0  ;;  %v1982_v60 = vpack.c.bf16 %v1948_v27, %v1947_v45  ;;  %v1950_v9 = vld [vmem:[#allocation2 + $0x3a] sm:$0xff]  ;;  %v7740_v34 = vld [vmem:[#allocation7 + $0x200] sm:$0xff]   ;;  %v1953_v39 = vld [vmem:[#allocation2 + $0x62] sm:$0xff] }
 0x1e6   : > { %9605 = vst [vmem:[#allocation12_spill] sm:$0xff] %v8366_v28  ;;  %v6217_v15 = vpop.f32.mrb[6].mxu0  ;;  %v8372_v0 = vadd.f32 %v6215_v43, %v6214_v40  ;;  %v8387_v5 = vpack.c.bf16 %v1950_v9, %v1949_v2  ;;  %v7741_v25 = vld [vmem:[#allocation7 + $0x208] sm:$0xff]   ;;  %7104 = vmatprep.subr.bf16.mxu1 %v7740_v34  ;;  %v7731_v14 = vld [vmem:[#allocation7 + $0x180] sm:$0xff]  }
 0x1e7   : > { %v1904_v22 = vld [vmem:[#allocation2 + $0x171] sm:$0xff]  ;;  %v6218_v46 = vpop.f32.mrb[7].mxu0  ;;  %v1955_v43 = vld [vmem:[#allocation2 + $0x7a] sm:$0xff] }
 0x1e8   : > { %v1832_v47 = vld [vmem:[#allocation2 + $0x170] sm:$0xff]  ;;  %v8368_v56 = vpack.c.bf16 %v1904_v22, %v1903_v23  ;;  %v8376_v21 = vadd.f32 %v6218_v46, %v6217_v15  ;;  %v6220_v51 = vpop.f32.mrb[8].mxu0  ;;  %v7732_v22 = vld [vmem:[#allocation7 + $0x1c8] sm:$0xff]   ;;  %v1956_v46 = vld [vmem:[#allocation2 + $0x82] sm:$0xff] }
 0x1e9   : > { %v8370_v54 = vpack.c.bf16 %v1832_v47, %v1831_v35  ;;  %v6221_v20 = vpop.f32.mrb[9].mxu0  ;;  %v1951_v35 = vld [vmem:[#allocation2 + $0x4a] sm:$0xff]  ;;  %v7733_v47 = vld [vmem:[#allocation7 + $0x188] sm:$0xff]   ;;  %v8401_v27 = vpack.c.bf16 %v1956_v46, %v1955_v43 }
 0x1ea   : > { %2498 = vmatprep.mubr.bf16.mxu0 %v8368_v56  ;;  %2972 = vmatprep.mubr.bf16.mxu1 %v8368_v56  ;;  %v6223_v24 = vpop.f32.mrb[10].mxu0  ;;  %v8385_v26 = vadd.f32 %v6221_v20, %v6220_v51  ;;  %v8393_v23 = vpack.c.bf16 %v1952_v37, %v1951_v35  ;;  %v1954_v40 = vld [vmem:[#allocation2 + $0x6a] sm:$0xff]  ;;  %v7742_v46 = vld [vmem:[#allocation7 + $0x1e8] sm:$0xff]  }
 0x1eb   : > { %2499 = vmatmul.mubr.bf16.gmra.mrb[56].mxu0 %v8370_v54  ;;  %2973 = vmatmul.mubr.bf16.gmra.mrb[60].mxu1 %v8370_v54  ;;  %v6224_v36 = vpop.f32.mrb[11].mxu0  ;;  %v8396_v15 = vpack.c.bf16 %v1954_v40, %v1953_v39  ;;  %v7736_v20 = vld [vmem:[#allocation7 + $0x1d8] sm:$0xff]   ;;  %v7748_v37 = vld [vmem:[#allocation7 + $0x220] sm:$0xff]  }
 0x1ec   : > { %v1906_v3 = vld [vmem:[#allocation2 + $0x189] sm:$0xff]  ;;  %7072 = vmatprep.mubr.bf16.mxu1 %v1981_v63  ;;  %9606 = vst [vmem:[#allocation13_spill] sm:$0xff] %v8385_v26  ;;  %v8389_v8 = vadd.f32 %v6224_v36, %v6223_v24  ;;  %v7744_v63 = vld [vmem:[#allocation7 + $0x210] sm:$0xff]   ;;  %v6226_v45 = vpop.f32.mrb[12].mxu0 }
 0x1ed   : > { %v1834_v4 = vld [vmem:[#allocation2 + $0x188] sm:$0xff]  ;;  %v8380_v59 = vpack.c.bf16 %v1906_v3, %v1905_v50  ;;  %v1957_v3 = vld [vmem:[#allocation2 + $0x92] sm:$0xff]  ;;  %v6227_v51 = vpop.f32.mrb[13].mxu0 }
 0x1ee   : > { %v8383_v18 = vpack.c.bf16 %v1834_v4, %v1833_v1  ;;  %9607 = vst [vmem:[#allocation14_spill] sm:$0xff] %v8389_v8  ;;  %v7745_v50 = vld [vmem:[#allocation7 + $0x218] sm:$0xff]   ;;  %v7734_v1 = vld [vmem:[#allocation7 + $0x1d0] sm:$0xff]   ;;  %v6229_v2 = vpop.f32.mrb[14].mxu0  ;;  %v8403_v9 = vadd.f32 %v6227_v51, %v6226_v45  ;;  %v7738_v39 = vld [vmem:[#allocation7 + $0x1e0] sm:$0xff]  }
 0x1ef   : > { %2506 = vmatprep.mubr.bf16.mxu0 %v8380_v59  ;;  %v1958_v4 = vld [vmem:[#allocation2 + $0x9a] sm:$0xff]  ;;  %v6230_v24 = vpop.f32.mrb[15].mxu0  ;;  %v1959_v36 = vld [vmem:[#allocation2 + $0xaa] sm:$0xff]  ;;  %v1961_v40 = vld [vmem:[#allocation2 + $0xc2] sm:$0xff] }
 0x1f0   : > { %9608 = vst [vmem:[#allocation15_spill] sm:$0xff] %v8403_v9  ;;  %v8408_v35 = vpack.c.bf16 %v1958_v4, %v1957_v3  ;;  %v7739_v43 = vld [vmem:[#allocation7 + $0x1a0] sm:$0xff]   ;;  %v1963_v45 = vld [vmem:[#allocation2 + $0xda] sm:$0xff]  ;;  %v1964_v3 = vld [vmem:[#allocation2 + $0xe2] sm:$0xff] }
 0x1f1   : > { %v7743_v4 = vld [vmem:[#allocation7 + $0x1a8] sm:$0xff]   ;;  %v7752_v51 = vld [vmem:[#allocation7 + $0x230] sm:$0xff]   ;;  %v7750_v9 = vld [vmem:[#allocation7 + $0x1f8] sm:$0xff]  }
 0x1f3   : > { %2507 = vmatmul.mubr.bf16.gmra.mrb[60].mxu0 %v8383_v18  ;;  %7073 = vmatmul.mubr.bf16.vlgmr.msra.gmra.mrb[64].mxu1 %v1982_v60 }
 0x1f4   : > { %7024 = vmatprep.mubr.bf16.mxu0 %v1982_v60  ;;  %7076 = vmatprep.mubr.bf16.mxu1 %v8387_v5  ;;  %v7735_v60 = vld [vmem:[#allocation7 + $0x190] sm:$0xff]  }
 0x1f5   : > { %7105 = vmatpush3.bf16.msra.mxu1 %v7740_v34  ;;  %v1960_v34 = vld [vmem:[#allocation2 + $0xb2] sm:$0xff] }
 0x1f6   : > { %7106 = vmatprep.subr.bf16.mxu1 %v7741_v25 }
 0x1f9   : > { %7107 = vmatpush3.bf16.msra.mxu1 %v7741_v25  ;;  %v8405_v25 = vadd.f32 %v6230_v24, %v6229_v2  ;;  %v1966_v24 = vld [vmem:[#allocation2 + $0xfa] sm:$0xff] }
 0x1fa   : > { %7108 = vmatprep.subr.bf16.mxu1 %v7744_v63 }
 0x1fb   : > { %7025 = vmatmul.mubr.bf16.vlgmr.msra.gmra.mrb[64].mxu0 %v8387_v5  ;;  %7077 = vmatmul.mubr.bf16.gmra.mrb[68].mxu1 %v8393_v23  ;;  %9609 = vst [vmem:[#allocation16_spill] sm:$0xff] %v8405_v25 }
 0x1fc   : > { %6465 = vmatpush3.bf16.msra.mxu0 %v7731_v14  ;;  %7028 = vmatprep.mubr.bf16.mxu0 %v8393_v23  ;;  %v7737_v14 = vld [vmem:[#allocation7 + $0x198] sm:$0xff]  }
 0x1fd   : > { %6466 = vmatprep.subr.bf16.mxu0 %v7732_v22  ;;  %7080 = vmatprep.mubr.bf16.mxu1 %v8396_v15  ;;  %v1962_v22 = vld [vmem:[#allocation2 + $0xca] sm:$0xff] }
 0x1fe   : > { %7109 = vmatpush3.bf16.msra.mxu1 %v7744_v63  ;;  %v7749_v63 = vld [vmem:[#allocation7 + $0x228] sm:$0xff]  }
 0x1ff   : > { %7110 = vmatprep.subr.bf16.mxu1 %v7745_v50 }
 0x200   : > { %6467 = vmatpush3.bf16.msra.mxu0 %v7733_v47  ;;  %v8413_v47 = vpack.c.bf16 %v1960_v34, %v1959_v36  ;;  %v6232_v36 = vpop.f32.mrb[16].mxu0 }
 0x201   : > { %6468 = vmatprep.subr.bf16.mxu0 %v7734_v1  ;;  %v8415_v1 = vpack.c.bf16 %v1962_v22, %v1961_v40  ;;  %v8423_v40 = vpack.c.bf16 %v1964_v3, %v1963_v45  ;;  %v7747_v22 = vld [vmem:[#allocation7 + $0x1b0] sm:$0xff]   ;;  %v1968_v45 = vld [vmem:[#allocation2 + $0x112] sm:$0xff] }
 0x202   : > { %7111 = vmatpush3.bf16.msra.mxu1 %v7745_v50  ;;  %v6344_v50 = vpop.f32.mrb[0].mxu1 }
 0x203   : > { %7029 = vmatmul.mubr.bf16.gmra.mrb[68].mxu0 %v8396_v15  ;;  %7081 = vmatmul.mubr.bf16.gmra.mrb[72].mxu1 %v8401_v27  ;;  %v6345_v2 = vpop.f32.mrb[1].mxu1 }
 0x204   : > { %7032 = vmatprep.mubr.bf16.mxu0 %v8401_v27  ;;  %6469 = vmatpush3.bf16.msra.mxu0 %v7735_v60  ;;  %v7746_v60 = vld [vmem:[#allocation7 + $0x1f0] sm:$0xff]   ;;  %v8421_v34 = vadd.f32 %v6345_v2, %v6344_v50 }
 0x205   : > { %7084 = vmatprep.mubr.bf16.mxu1 %v8408_v35  ;;  %6470 = vmatprep.subr.bf16.mxu0 %v7736_v20  ;;  %v1965_v20 = vld [vmem:[#allocation2 + $0xf2] sm:$0xff] }
 0x206   : > { %7112 = vmatprep.subr.bf16.mxu1 %v7748_v37  ;;  %v8431_v2 = vpack.c.bf16 %v1966_v24, %v1965_v20 }
 0x207   : > { %7113 = vmatpush3.bf16.msra.mxu1 %v7748_v37  ;;  %v6347_v37 = vpop.f32.mrb[2].mxu1 }
 0x208   : > { %6471 = vmatpush3.bf16.msra.mxu0 %v7737_v14  ;;  %7114 = vmatprep.subr.bf16.mxu1 %v7749_v63  ;;  %v6233_v14 = vpop.f32.mrb[17].mxu0 }
 0x209   : > { %6472 = vmatprep.subr.bf16.mxu0 %v7738_v39  ;;  %v6348_v39 = vpop.f32.mrb[3].mxu1  ;;  %v6235_v8 = vpop.f32.mrb[18].mxu0  ;;  %v8427_v26 = vadd.f32 %v6233_v14, %v6232_v36  ;;  %v1969_v36 = vld [vmem:[#allocation2 + $0x122] sm:$0xff]  ;;  %v1971_v14 = vld [vmem:[#allocation2 + $0x13a] sm:$0xff] }
 0x20a   : > { %v8425_v25 = vadd.f32 %v6348_v39, %v6347_v37  ;;  %v6236_v28 = vpop.f32.mrb[19].mxu0 }
 0x20b   : > { %7033 = vmatmul.mubr.bf16.gmra.mrb[72].mxu0 %v8408_v35  ;;  %7085 = vmatmul.mubr.bf16.gmra.mrb[76].mxu1 %v8413_v47  ;;  %9611 = vst [vmem:[#allocation18_spill] sm:$0xff] %v8427_v26  ;;  %v8429_v50 = vadd.f32 %v6236_v28, %v6235_v8  ;;  %v7751_v28 = vld [vmem:[#allocation7 + $0x1b8] sm:$0xff]  }
 0x20c   : > { %7036 = vmatprep.mubr.bf16.mxu0 %v8413_v47  ;;  %7088 = vmatprep.mubr.bf16.mxu1 %v8415_v1  ;;  %9610 = vst [vmem:[#allocation17_spill] sm:$0xff] %v8425_v25  ;;  %v1977_v25 = vld [vmem:[#allocation2 + $0x182] sm:$0xff] }
 0x20d   : > { %6473 = vmatpush3.bf16.msra.mxu0 %v7739_v43  ;;  %7115 = vmatpush3.bf16.msra.mxu1 %v7749_v63  ;;  %v7753_v43 = vld [vmem:[#allocation7 + $0x238] sm:$0xff]   ;;  %9612 = vst [vmem:[#allocation19_spill] sm:$0xff] %v8429_v50  ;;  %v1976_v50 = vld [vmem:[#allocation2 + $0x172] sm:$0xff] }
 0x20e   : > { %6474 = vmatprep.subr.bf16.mxu0 %v7742_v46  ;;  %7116 = vmatprep.subr.bf16.mxu1 %v7752_v51  ;;  %v1967_v63 = vld [vmem:[#allocation2 + $0x10a] sm:$0xff]  ;;  %v6350_v46 = vpop.f32.mrb[4].mxu1 }
 0x20f   : > { %v6351_v3 = vpop.f32.mrb[5].mxu1  ;;  %v8439_v20 = vpack.c.bf16 %v1968_v45, %v1967_v63  ;;  %v1974_v45 = vld [vmem:[#allocation2 + $0x15a] sm:$0xff] }
 0x210   : > { %v8437_v8 = vadd.f32 %v6351_v3, %v6350_v46 }
 0x211   : > { %6475 = vmatpush3.bf16.msra.mxu0 %v7743_v4  ;;  %7117 = vmatpush3.bf16.msra.mxu1 %v7752_v51  ;;  %v6353_v4 = vpop.f32.mrb[6].mxu1  ;;  %v1970_v51 = vld [vmem:[#allocation2 + $0x12a] sm:$0xff] }
 0x212   : > { %6476 = vmatprep.subr.bf16.mxu0 %v7746_v60  ;;  %7118 = vmatprep.subr.bf16.mxu1 %v7753_v43  ;;  %v6354_v60 = vpop.f32.mrb[7].mxu1  ;;  %v8443_v37 = vpack.c.bf16 %v1970_v51, %v1969_v36  ;;  %v1975_v51 = vld [vmem:[#allocation2 + $0x16a] sm:$0xff] }
 0x213   : > { %7037 = vmatmul.mubr.bf16.gmra.mrb[76].mxu0 %v8415_v1  ;;  %7089 = vmatmul.mubr.bf16.gmra.mrb[80].mxu1 %v8423_v40  ;;  %v8441_v24 = vadd.f32 %v6354_v60, %v6353_v4  ;;  %v6356_v39 = vpop.f32.mrb[8].mxu1 }
 0x214   : > { %7040 = vmatprep.mubr.bf16.mxu0 %v8423_v40  ;;  %7092 = vmatprep.mubr.bf16.mxu1 %v8431_v2 }
 0x215   : > { %6477 = vmatpush3.bf16.msra.mxu0 %v7747_v22  ;;  %7119 = vmatpush3.bf16.msra.mxu1 %v7753_v43  ;;  %9613 = vst [vmem:[#allocation20_spill] sm:$0xff] %v8441_v24  ;;  %v1972_v22 = vld [vmem:[#allocation2 + $0x142] sm:$0xff]  ;;  %v1973_v43 = vld [vmem:[#allocation2 + $0x152] sm:$0xff] }
 0x216   : > { %6478 = vmatprep.subr.bf16.mxu0 %v7750_v9  ;;  %v6357_v9 = vpop.f32.mrb[9].mxu1  ;;  %v8451_v36 = vpack.c.bf16 %v1972_v22, %v1971_v14  ;;  %v8455_v4 = vpack.c.bf16 %v1974_v45, %v1973_v43  ;;  %v6238_v43 = vpop.f32.mrb[20].mxu0 }
 0x217   : > { %v8449_v63 = vadd.f32 %v6357_v9, %v6356_v39  ;;  %v6359_v46 = vpop.f32.mrb[10].mxu1 }
 0x218   : > { %v6360_v3 = vpop.f32.mrb[11].mxu1 }
 0x219   : > { %6479 = vmatpush3.bf16.msra.mxu0 %v7751_v28  ;;  %9614 = vst [vmem:[#allocation21_spill] sm:$0xff] %v8449_v63  ;;  %v8453_v28 = vadd.f32 %v6360_v3, %v6359_v46  ;;  %v6362_v60 = vpop.f32.mrb[12].mxu1  ;;  %v8463_v46 = vpack.c.bf16 %v1976_v50, %v1975_v51  ;;  %v6239_v3 = vpop.f32.mrb[21].mxu0  ;;  %v1978_v50 = vld [vmem:[#allocation2 + $0x18a] sm:$0xff] }
 0x21a   : > { %v6363_v39 = vpop.f32.mrb[13].mxu1  ;;  %v6241_v26 = vpop.f32.mrb[22].mxu0 }
 0x21b   : > { %7041 = vmatmul.mubr.bf16.gmra.mrb[80].mxu0 %v8431_v2  ;;  %7093 = vmatmul.mubr.bf16.gmra.mrb[84].mxu1 %v8439_v20  ;;  %9615 = vst [vmem:[#allocation22_spill] sm:$0xff] %v8453_v28  ;;  %v8461_v9 = vadd.f32 %v6363_v39, %v6362_v60  ;;  %v6365_v14 = vpop.f32.mrb[14].mxu1  ;;  %v8467_v28 = vadd.f32 %v6239_v3, %v6238_v43  ;;  %v6242_v63 = vpop.f32.mrb[23].mxu0 }
 0x21c   : > { %7044 = vmatprep.mubr.bf16.mxu0 %v8439_v20  ;;  %7096 = vmatprep.mubr.bf16.mxu1 %v8443_v37  ;;  %v6366_v22 = vpop.f32.mrb[15].mxu1  ;;  %v8471_v60 = vadd.f32 %v6242_v63, %v6241_v26  ;;  %v8477_v43 = vpack.c.bf16 %v1978_v50, %v1977_v25 }
 0x21d   : > { %v8465_v45 = vadd.f32 %v6366_v22, %v6365_v14  ;;  %v6368_v24 = vpop.f32.mrb[16].mxu1 }
 0x21e   : > { %9616 = vst [vmem:[#allocation23_spill] sm:$0xff] %v8471_v60  ;;  %v6369_v51 = vpop.f32.mrb[17].mxu1 }
 0x21f   : > { %v8475_v39 = vadd.f32 %v6369_v51, %v6368_v24  ;;  %v6371_v14 = vpop.f32.mrb[18].mxu1 }
 0x220   : > { %v6372_v22 = vpop.f32.mrb[19].mxu1 }
 0x221   : > { %9617 = vst [vmem:[#allocation24_spill] sm:$0xff] %v8475_v39  ;;  %v8479_v3 = vadd.f32 %v6372_v22, %v6371_v14  ;;  %v6374_v26 = vpop.f32.mrb[20].mxu1  ;;  %v6244_v39 = vpop.f32.mrb[24].mxu0 }
 0x222   : > { %v6375_v63 = vpop.f32.mrb[21].mxu1  ;;  %v6245_v25 = vpop.f32.mrb[25].mxu0 }
 0x223   : > { %7045 = vmatmul.mubr.bf16.gmra.mrb[84].mxu0 %v8443_v37  ;;  %7097 = vmatmul.mubr.bf16.gmra.mrb[88].mxu1 %v8451_v36  ;;  %v6377_v24 = vpop.f32.mrb[22].mxu1  ;;  %v6247_v50 = vpop.f32.mrb[26].mxu0  ;;  %v8489_v14 = vadd.f32 %v6245_v25, %v6244_v39 }
 0x224   : > { %7048 = vmatprep.mubr.bf16.mxu0 %v8451_v36  ;;  %7100 = vmatprep.mubr.bf16.mxu1 %v8455_v4  ;;  %v6378_v51 = vpop.f32.mrb[23].mxu1  ;;  %v6248_v22 = vpop.f32.mrb[27].mxu0 }
 0x225   : > { %v8487_v60 = vadd.f32 %v6378_v51, %v6377_v24 }
 0x22b   : > { %7049 = vmatmul.mubr.bf16.gmra.mrb[88].mxu0 %v8455_v4  ;;  %7101 = vmatmul.mubr.bf16.gmra.mrb[92].mxu1 %v8463_v46 }
 0x22c   : > { %7052 = vmatprep.mubr.bf16.mxu0 %v8463_v46  ;;  %7120 = vmatprep.mubr.bf16.mxu1 %v8387_v5  ;;  %v8485_v5 = vadd.f32 %v6375_v63, %v6374_v26 }
 0x233   : > { %7053 = vmatmul.mubr.bf16.gmra.mrb[92].mxu0 %v8477_v43  ;;  %7121 = vmatmul.mubr.bf16.vlgmr.msra.gmra.mrb[64].mxu1 %v8393_v23  ;;  %v6380_v23 = vpop.f32.mrb[24].mxu1 }
 0x234   : > { %3415 = vmatprep.mubr.bf16.mxu0 %v8207_v11  ;;  %7124 = vmatprep.mubr.bf16.mxu1 %v8396_v15  ;;  %v8493_v11 = vadd.f32 %v6248_v22, %v6247_v50  ;;  %v6381_v15 = vpop.f32.mrb[25].mxu1 }
 0x235   : > { %v8497_v26 = vadd.f32 %v6381_v15, %v6380_v23  ;;  %v6383_v63 = vpop.f32.mrb[26].mxu1 }
 0x236   : > { %v6384_v24 = vpop.f32.mrb[27].mxu1 }
 0x237   : > { %v8499_v51 = vadd.f32 %v6384_v24, %v6383_v63 }
 0x23b   : > { %3416 = vmatmul.mubr.bf16.vlgmr.msra.gmra.mrb[96].mxu0 %v8209_v12  ;;  %7125 = vmatmul.mubr.bf16.gmra.mrb[68].mxu1 %v8401_v27  ;;  %v6386_v12 = vpop.f32.mrb[28].mxu1 }
 0x23c   : > { %3423 = vmatprep.mubr.bf16.mxu0 %v8215_v32  ;;  %7128 = vmatprep.mubr.bf16.mxu1 %v8408_v35  ;;  %v6250_v32 = vpop.f32.mrb[28].mxu0  ;;  %v6387_v27 = vpop.f32.mrb[29].mxu1 }
 0x23d   : > { %v6251_v35 = vpop.f32.mrb[29].mxu0  ;;  %v8505_v39 = vadd.f32 %v6387_v27, %v6386_v12  ;;  %v6389_v25 = vpop.f32.mrb[30].mxu1 }
 0x23e   : > { %v6253_v50 = vpop.f32.mrb[30].mxu0  ;;  %v6390_v22 = vpop.f32.mrb[31].mxu1  ;;  %v8507_v23 = vadd.f32 %v6251_v35, %v6250_v32 }
 0x23f   : > { %v6254_v15 = vpop.f32.mrb[31].mxu0  ;;  %v8509_v63 = vadd.f32 %v6390_v22, %v6389_v25 }
 0x243   : > { %3424 = vmatmul.mubr.bf16.gmra.mrb[100].mxu0 %v8217_v33  ;;  %7129 = vmatmul.mubr.bf16.gmra.mrb[72].mxu1 %v8413_v47  ;;  %v8513_v33 = vadd.f32 %v6254_v15, %v6253_v50 }
 0x244   : > { %3431 = vmatprep.mubr.bf16.mxu0 %v8243_v61  ;;  %7132 = vmatprep.mubr.bf16.mxu1 %v8415_v1  ;;  %v6392_v61 = vpop.f32.mrb[32].mxu1 }
 0x245   : > { %v6393_v47 = vpop.f32.mrb[33].mxu1 }
 0x246   : > { %v6395_v1 = vpop.f32.mrb[34].mxu1  ;;  %v8517_v12 = vadd.f32 %v6393_v47, %v6392_v61 }
 0x247   : > { %v6396_v24 = vpop.f32.mrb[35].mxu1 }
 0x248   : > { %v8519_v32 = vadd.f32 %v6396_v24, %v6395_v1 }
 0x24b   : > { %3432 = vmatmul.mubr.bf16.gmra.mrb[104].mxu0 %v8245_v62  ;;  %7133 = vmatmul.mubr.bf16.gmra.mrb[76].mxu1 %v8423_v40  ;;  %v6256_v62 = vpop.f32.mrb[32].mxu0 }
 0x24c   : > { %3439 = vmatprep.mubr.bf16.mxu0 %v8264_v52  ;;  %7136 = vmatprep.mubr.bf16.mxu1 %v8431_v2  ;;  %v6398_v52 = vpop.f32.mrb[36].mxu1  ;;  %v6257_v40 = vpop.f32.mrb[33].mxu0 }
 0x24d   : > { %v6399_v2 = vpop.f32.mrb[37].mxu1  ;;  %v8525_v27 = vadd.f32 %v6257_v40, %v6256_v62  ;;  %v6259_v35 = vpop.f32.mrb[34].mxu0 }
 0x24e   : > { %v6401_v25 = vpop.f32.mrb[38].mxu1  ;;  %v6260_v50 = vpop.f32.mrb[35].mxu0  ;;  %v8529_v61 = vadd.f32 %v6399_v2, %v6398_v52 }
 0x24f   : > { %v6402_v22 = vpop.f32.mrb[39].mxu1  ;;  %v8527_v15 = vadd.f32 %v6260_v50, %v6259_v35 }
 0x250   : > { %v6404_v47 = vpop.f32.mrb[40].mxu1 }
 0x251   : > { %v6405_v24 = vpop.f32.mrb[41].mxu1 }
 0x252   : > { %v8543_v62 = vadd.f32 %v6405_v24, %v6404_v47 }
 0x253   : > { %3440 = vmatmul.mubr.bf16.gmra.mrb[108].mxu0 %v8266_v53  ;;  %7137 = vmatmul.mubr.bf16.gmra.mrb[80].mxu1 %v8439_v20  ;;  %v8531_v53 = vadd.f32 %v6402_v22, %v6401_v25  ;;  %v1980_v20 = vld [vmem:[#allocation2 + $0x1a2] sm:$0xff] }
 0x254   : > { %3447 = vmatprep.mubr.bf16.mxu0 %v8272_v6  ;;  %7140 = vmatprep.mubr.bf16.mxu1 %v8443_v37  ;;  %v1979_v6 = vld [vmem:[#allocation2 + $0x19a] sm:$0xff]  ;;  %v6262_v37 = vpop.f32.mrb[36].mxu0 }
 0x255   : > { %v1998_v1 = vpack.c.bf16 %v1980_v20, %v1979_v6 }
 0x25b   : > { %3448 = vmatmul.mubr.bf16.gmra.mrb[112].mxu0 %v8274_v7  ;;  %7141 = vmatmul.mubr.bf16.gmra.mrb[84].mxu1 %v8451_v36  ;;  %v6263_v7 = vpop.f32.mrb[37].mxu0 }
 0x25c   : > { %3455 = vmatprep.mubr.bf16.mxu0 %v8280_v41  ;;  %7144 = vmatprep.mubr.bf16.mxu1 %v8455_v4  ;;  %v8541_v36 = vadd.f32 %v6263_v7, %v6262_v37  ;;  %v6265_v41 = vpop.f32.mrb[38].mxu0  ;;  %v6407_v4 = vpop.f32.mrb[42].mxu1 }
 0x25d   : > { %v6408_v52 = vpop.f32.mrb[43].mxu1 }
 0x25e   : > { %v6410_v40 = vpop.f32.mrb[44].mxu1 }
 0x25f   : > { %v6411_v35 = vpop.f32.mrb[45].mxu1 }
 0x260   : > { %v8555_v22 = vadd.f32 %v6411_v35, %v6410_v40  ;;  %v6413_v6 = vpop.f32.mrb[46].mxu1  ;;  %v7757_v40 = vld [vmem:[#allocation9 + $0xc8] sm:$0xff]   ;;  %v7759_v35 = vld [vmem:[#allocation9 + $0x110] sm:$0xff]  }
 0x261   : > { %v6414_v37 = vpop.f32.mrb[47].mxu1 }
 0x262   : > { %v8559_v47 = vadd.f32 %v6414_v37, %v6413_v6  ;;  %v7761_v6 = vld [vmem:[#allocation9 + $0x148] sm:$0xff]   ;;  %v7763_v37 = vld [vmem:[#allocation9 + $0xd8] sm:$0xff]  }
 0x263   : > { %3456 = vmatmul.mubr.bf16.gmra.mrb[116].mxu0 %v8282_v42  ;;  %7145 = vmatmul.mubr.bf16.gmra.mrb[88].mxu1 %v8463_v46  ;;  %v6266_v42 = vpop.f32.mrb[39].mxu0 }
 0x264   : > { %3463 = vmatprep.mubr.bf16.mxu0 %v8288_v13  ;;  %7148 = vmatprep.mubr.bf16.mxu1 %v8477_v43  ;;  %v8545_v46 = vadd.f32 %v6266_v42, %v6265_v41  ;;  %v8547_v13 = vadd.f32 %v6408_v52, %v6407_v4  ;;  %v6268_v43 = vpop.f32.mrb[40].mxu0 }
 0x265   : > { %v6269_v2 = vpop.f32.mrb[41].mxu0 }
 0x266   : > { %v8553_v25 = vadd.f32 %v6269_v2, %v6268_v43  ;;  %v6271_v50 = vpop.f32.mrb[42].mxu0  ;;  %v7756_v43 = vld [vmem:[#allocation9 + $0x108] sm:$0xff]   ;;  %v7758_v2 = vld [vmem:[#allocation9 + $0x140] sm:$0xff]  }
 0x267   : > { %v6272_v20 = vpop.f32.mrb[43].mxu0  ;;  %7152 = vmatprep.subr.bf16.mxu1 %v7758_v2 }
 0x268   : > { %7153 = vmatpush3.bf16.msra.mxu1 %v7758_v2 }
 0x269   : > { %7154 = vmatprep.subr.bf16.mxu1 %v7761_v6 }
 0x26b   : > { %3464 = vmatmul.mubr.bf16.gmra.mrb[120].mxu0 %v8290_v16  ;;  %7149 = vmatmul.mubr.bf16.gmra.mrb[92].mxu1 %v1998_v1  ;;  %v8557_v16 = vadd.f32 %v6272_v20, %v6271_v50  ;;  %v7755_v1 = vld [vmem:[#allocation9 + $0xc0] sm:$0xff]   ;;  %v7760_v50 = vld [vmem:[#allocation9 + $0xd0] sm:$0xff]   ;;  %v7762_v20 = vld [vmem:[#allocation9 + $0x118] sm:$0xff]  }
 0x26c   : > { %3471 = vmatprep.mubr.bf16.mxu0 %v8296_v48  ;;  %v7754_v48 = vld [vmem:[#allocation9 + $0x100] sm:$0xff]   ;;  %7155 = vmatpush3.bf16.msra.mxu1 %v7761_v6  ;;  %v7771_v6 = vld [vmem:[#allocation9 + $0x130] sm:$0xff]  }
 0x26d   : > { %6600 = vmatprep.subr.bf16.mxu0 %v7754_v48 }
 0x26e   : > { %6601 = vmatpush3.bf16.msra.mxu0 %v7755_v1 }
 0x26f   : > { %6602 = vmatprep.subr.bf16.mxu0 %v7756_v43  ;;  %v7768_v43 = vld [vmem:[#allocation9 + $0x128] sm:$0xff]  }
 0x272   : > { %6603 = vmatpush3.bf16.msra.mxu0 %v7757_v40 }
 0x273   : > { %3472 = vmatmul.mubr.bf16.gmra.mrb[124].mxu0 %v8298_v49  ;;  %v6274_v49 = vpop.f32.mrb[44].mxu0  ;;  %6604 = vmatprep.subr.bf16.mxu0 %v7759_v35  ;;  %v7769_v35 = vld [vmem:[#allocation9 + $0xe8] sm:$0xff]  }
 0x274   : > { %3479 = vmatprep.mubr.bf16.mxu0 %v8304_v30  ;;  %v6416_v30 = vpop.f32.mrb[48].mxu1  ;;  %v6275_v7 = vpop.f32.mrb[45].mxu0 }
 0x275   : > { %v6417_v24 = vpop.f32.mrb[49].mxu1  ;;  %v8565_v41 = vadd.f32 %v6275_v7, %v6274_v49  ;;  %v6277_v4 = vpop.f32.mrb[46].mxu0 }
 0x276   : > { %v8567_v42 = vadd.f32 %v6417_v24, %v6416_v30  ;;  %v6419_v52 = vpop.f32.mrb[50].mxu1  ;;  %6605 = vmatpush3.bf16.msra.mxu0 %v7760_v50  ;;  %v7766_v30 = vld [vmem:[#allocation9 + $0xe0] sm:$0xff]  }
 0x277   : > { %6606 = vmatprep.subr.bf16.mxu0 %v7762_v20  ;;  %v7770_v50 = vld [vmem:[#allocation9 + $0x160] sm:$0xff]   ;;  %v7772_v20 = vld [vmem:[#allocation9 + $0xf0] sm:$0xff]  }
 0x27a   : > { %6607 = vmatpush3.bf16.msra.mxu0 %v7763_v37  ;;  %v7773_v37 = vld [vmem:[#allocation9 + $0x168] sm:$0xff]  }
 0x27b   : > { %3480 = vmatmul.mubr.bf16.gmra.mrb[128].mxu0 %v8306_v31  ;;  %v6278_v31 = vpop.f32.mrb[47].mxu0 }
 0x27c   : > { %3487 = vmatprep.mubr.bf16.mxu0 %v8312_v10  ;;  %v6420_v10 = vpop.f32.mrb[51].mxu1 }
 0x283   : > { %3488 = vmatmul.mubr.bf16.gmra.mrb[132].mxu0 %v8314_v17  ;;  %v8569_v17 = vadd.f32 %v6278_v31, %v6277_v4 }
 0x284   : > { %3495 = vmatprep.mubr.bf16.mxu0 %v8320_v57  ;;  %v8571_v57 = vadd.f32 %v6420_v10, %v6419_v52 }
 0x287   : > { %v6280_v48 = vpop.f32.mrb[48].mxu0  ;;  %v6422_v49 = vpop.f32.mrb[52].mxu1 }
 0x288   : > { %v6281_v1 = vpop.f32.mrb[49].mxu0  ;;  %v6423_v7 = vpop.f32.mrb[53].mxu1 }
 0x289   : > { %v8577_v24 = vadd.f32 %v6281_v1, %v6280_v48  ;;  %v6283_v4 = vpop.f32.mrb[50].mxu0  ;;  %v8579_v52 = vadd.f32 %v6423_v7, %v6422_v49  ;;  %v6425_v31 = vpop.f32.mrb[54].mxu1  ;;  %v1908_v48 = vld [vmem:[#allocation2 + $0x1a1] sm:$0xff] }
 0x28a   : > { %v6426_v10 = vpop.f32.mrb[55].mxu1 }
 0x28b   : > { %3496 = vmatmul.mubr.bf16.gmra.mrb[136].mxu0 %v8322_v58  ;;  %v7764_v58 = vld [vmem:[#allocation9 + $0x150] sm:$0xff]   ;;  %v8583_v2 = vadd.f32 %v6426_v10, %v6425_v31 }
 0x28c   : > { %3503 = vmatprep.mubr.bf16.mxu0 %v8328_v55  ;;  %v7765_v55 = vld [vmem:[#allocation9 + $0x120] sm:$0xff]   ;;  %7156 = vmatprep.subr.bf16.mxu1 %v7764_v58 }
 0x28d   : > { %6608 = vmatprep.subr.bf16.mxu0 %v7765_v55  ;;  %7157 = vmatpush3.bf16.msra.mxu1 %v7764_v58  ;;  %v7774_v58 = vld [vmem:[#allocation9 + $0x138] sm:$0xff]  }
 0x28e   : > { %6609 = vmatpush3.bf16.msra.mxu0 %v7766_v30  ;;  %v7775_v55 = vld [vmem:[#allocation9 + $0xf8] sm:$0xff]  }
 0x28f   : > { %6610 = vmatprep.subr.bf16.mxu0 %v7768_v43 }
 0x292   : > { %6611 = vmatpush3.bf16.msra.mxu0 %v7769_v35 }
 0x293   : > { %3504 = vmatmul.mubr.bf16.gmra.mrb[140].mxu0 %v8330_v44  ;;  %v6284_v44 = vpop.f32.mrb[51].mxu0  ;;  %6612 = vmatprep.subr.bf16.mxu0 %v7771_v6  ;;  %v1835_v6 = vld [vmem:[#allocation2 + $0x198] sm:$0xff] }
 0x294   : > { %3511 = vmatprep.mubr.bf16.mxu0 %v8338_v29  ;;  %v7767_v29 = vld [vmem:[#allocation9 + $0x158] sm:$0xff]   ;;  %v8581_v40 = vadd.f32 %v6284_v44, %v6283_v4 }
 0x295   : > { %7158 = vmatprep.subr.bf16.mxu1 %v7767_v29 }
 0x296   : > { %7159 = vmatpush3.bf16.msra.mxu1 %v7767_v29  ;;  %6613 = vmatpush3.bf16.msra.mxu0 %v7772_v20  ;;  %v7828_v20 = vld [vmem:[#allocation2 + $0x8] sm:$0xff] }
 0x297   : > { %7160 = vmatprep.subr.bf16.mxu1 %v7770_v50  ;;  %6614 = vmatprep.subr.bf16.mxu0 %v7774_v58 }
 0x29a   : > { %7161 = vmatpush3.bf16.msra.mxu1 %v7770_v50  ;;  %6615 = vmatpush3.bf16.msra.mxu0 %v7775_v55 }
 0x29b   : > { %3512 = vmatmul.mubr.bf16.gmra.mrb[144].mxu0 %v8340_v38  ;;  %7162 = vmatprep.subr.bf16.mxu1 %v7773_v37  ;;  %v7776_v38 = vld [vmem:[#allocation9 + $0x170] sm:$0xff]  }
 0x29c   : > { %3519 = vmatprep.mubr.bf16.mxu0 %v8368_v56  ;;  %v1907_v56 = vld [vmem:[#allocation2 + $0x199] sm:$0xff]  ;;  %v6286_v49 = vpop.f32.mrb[52].mxu0  ;;  %v6428_v30 = vpop.f32.mrb[56].mxu1 }
 0x29d   : > { %v6287_v1 = vpop.f32.mrb[53].mxu0  ;;  %v6429_v7 = vpop.f32.mrb[57].mxu1 }
 0x29e   : > { %7163 = vmatpush3.bf16.msra.mxu1 %v7773_v37  ;;  %v8589_v4 = vadd.f32 %v6287_v1, %v6286_v49  ;;  %v6289_v31 = vpop.f32.mrb[54].mxu0  ;;  %v8591_v44 = vadd.f32 %v6429_v7, %v6428_v30  ;;  %v6431_v10 = vpop.f32.mrb[58].mxu1  ;;  %v1854_v37 = vpack.c.bf16 %v7828_v20, %v1835_v6 }
 0x29f   : > { %7164 = vmatprep.subr.bf16.mxu1 %v7776_v38  ;;  %v6290_v29 = vpop.f32.mrb[55].mxu0  ;;  %v6432_v43 = vpop.f32.mrb[59].mxu1 }
 0x2a0   : > { %v8593_v35 = vadd.f32 %v6290_v29, %v6289_v31  ;;  %v8595_v50 = vadd.f32 %v6432_v43, %v6431_v10 }
 0x2a2   : > { %7165 = vmatpush3.bf16.msra.mxu1 %v7776_v38  ;;  %9618 = vst [vmem:[#allocation25_spill] sm:$0xff] %v8595_v50  ;;  %v9623_v50 = vld [vmem:[#allocation17_spill] sm:$0xff] }
 0x2a3   : > { %3520 = vmatmul.mubr.bf16.gmra.mrb[148].mxu0 %v8370_v54  ;;  %v1926_v54 = vpack.c.bf16 %v1908_v48, %v1907_v56 }
 0x2a4   : > { %3527 = vmatprep.mubr.bf16.mxu0 %v8380_v59  ;;  %v7777_v59 = vld [vmem:[#allocation9 + $0x178] sm:$0xff]  }
 0x2a5   : > { %7166 = vmatprep.subr.bf16.mxu1 %v7777_v59 }
 0x2a6   : > { %7167 = vmatpush3.bf16.msra.mxu1 %v7777_v59 }
 0x2ab   : > { %3528 = vmatmul.mubr.bf16.gmra.mrb[152].mxu0 %v8383_v18 }
 0x2ac   : > { %3535 = vmatprep.mubr.bf16.mxu0 %v1926_v54 }
 0x2b3   : > { %3536 = vmatmul.mubr.bf16.gmra.mrb[156].mxu0 %v1854_v37 }
 0x2be   : > { %v6292_v58 = vpop.f32.mrb[56].mxu0  ;;  %v6434_v55 = vpop.f32.mrb[60].mxu1 }
 0x2bf   : > { %v6293_v38 = vpop.f32.mrb[57].mxu0  ;;  %v6435_v56 = vpop.f32.mrb[61].mxu1 }
 0x2c0   : > { %v8598_v48 = vadd.f32 %v6293_v38, %v6292_v58  ;;  %v6295_v49 = vpop.f32.mrb[58].mxu0  ;;  %v8600_v30 = vadd.f32 %v6435_v56, %v6434_v55  ;;  %v6437_v1 = vpop.f32.mrb[62].mxu1 }
 0x2c1   : > { %v6296_v7 = vpop.f32.mrb[59].mxu0  ;;  %v6438_v31 = vpop.f32.mrb[63].mxu1 }
 0x2c2   : > { %v8602_v10 = vadd.f32 %v6296_v7, %v6295_v49  ;;  %v8604_v18 = vadd.f32 %v6438_v31, %v6437_v1 }
 0x2c4   : > { %9619 = vst [vmem:[#allocation26_spill] sm:$0xff] %v8604_v18 }
 0x2c6   : > { %v6298_v54 = vpop.f32.mrb[60].mxu0 }
 0x2c7   : > { %v6299_v29 = vpop.f32.mrb[61].mxu0 }
 0x2c8   : > { %v8606_v43 = vadd.f32 %v6299_v29, %v6298_v54  ;;  %v6301_v59 = vpop.f32.mrb[62].mxu0  ;;  %v9621_v54 = vld [vmem:[#allocation12_spill] sm:$0xff] }
 0x2c9   : > { %v6302_v6 = vpop.f32.mrb[63].mxu0 }
 0x2ca   : > { %v8608_v20 = vadd.f32 %v6302_v6, %v6301_v59  ;;  %v9622_v59 = vld [vmem:[#allocation20_spill] sm:$0xff] }
 0x2ce   : > { %v7026_v37 = vpop.f32.mrb[64].mxu0 }
 0x2cf   : > { %v2558_v58 = vadd.f32 %v7026_v37, %v8372_v0  ;;  %v2549_v55 = vpop.f32.mrb[65].mxu0 }
 0x2d0   : > { %v2550_v38 = vadd.f32 %v8364_v19, %v2549_v55  ;;  %v7027_v56 = vpop.f32.mrb[66].mxu0  ;;  %v9624_v19 = vld [vmem:[#allocation15_spill] sm:$0xff] }
 0x2d1   : > { %v8613_v49 = vadd.f32 %v8437_v8, %v2558_v58  ;;  %v2561_v1 = vadd.f32 %v7027_v56, %v8376_v21  ;;  %v2552_v7 = vpop.f32.mrb[67].mxu0  ;;  %v9625_v8 = vld [vmem:[#allocation13_spill] sm:$0xff] }
 0x2d2   : > { %v8617_v31 = vadd.f32 %v8421_v34, %v2550_v38  ;;  %v2553_v29 = vadd.f32 %v9621_v54, %v2552_v7  ;;  %v9627_v34 = vld [vmem:[#allocation16_spill] sm:$0xff]  ;;  %v9628_v7 = vld [vmem:[#allocation21_spill] sm:$0xff] }
 0x2d3   : > { %9620 = vst [vmem:[#allocation27_spill] sm:$0xff] %v8613_v49  ;;  %v8621_v6 = vadd.f32 %v9622_v59, %v2561_v1  ;;  %v9629_v1 = vld [vmem:[#allocation14_spill] sm:$0xff] }
 0x2d4   : > { %v8624_v0 = vadd.f32 %v9623_v50, %v2553_v29  ;;  %v9630_v29 = vld [vmem:[#allocation22_spill] sm:$0xff] }
 0x2d6   : > { %v7030_v37 = vpop.f32.mrb[68].mxu0 }
 0x2d7   : > { %v2574_v55 = vadd.f32 %v7030_v37, %v9624_v19  ;;  %v2565_v18 = vpop.f32.mrb[69].mxu0 }
 0x2d8   : > { %v2566_v58 = vadd.f32 %v9625_v8, %v2565_v18  ;;  %v7031_v49 = vpop.f32.mrb[70].mxu0 }
 0x2d9   : > { %v8629_v21 = vadd.f32 %v8461_v9, %v2574_v55  ;;  %v2577_v38 = vadd.f32 %v7031_v49, %v9627_v34  ;;  %v2568_v56 = vpop.f32.mrb[71].mxu0  ;;  %v9631_v9 = vld [vmem:[#allocation18_spill] sm:$0xff] }
 0x2da   : > { %v8633_v54 = vadd.f32 %v9628_v7, %v2566_v58  ;;  %v2569_v59 = vadd.f32 %v9629_v1, %v2568_v56  ;;  %v9632_v58 = vld [vmem:[#allocation23_spill] sm:$0xff]  ;;  %v9633_v56 = vld [vmem:[#allocation24_spill] sm:$0xff] }
 0x2db   : > { %9626 = vst [vmem:[#allocation12_spill] sm:$0xff] %v8629_v21  ;;  %v8637_v50 = vadd.f32 %v8465_v45, %v2577_v38  ;;  %v9634_v45 = vld [vmem:[#allocation19_spill] sm:$0xff] }
 0x2dc   : > { %v8640_v37 = vadd.f32 %v9630_v29, %v2569_v59 }
 0x2de   : > { %v7034_v19 = vpop.f32.mrb[72].mxu0 }
 0x2df   : > { %v2590_v18 = vadd.f32 %v7034_v19, %v8467_v28  ;;  %v2581_v8 = vpop.f32.mrb[73].mxu0 }
 0x2e0   : > { %v2582_v55 = vadd.f32 %v9631_v9, %v2581_v8  ;;  %v7035_v21 = vpop.f32.mrb[74].mxu0 }
 0x2e1   : > { %v8645_v49 = vadd.f32 %v8485_v5, %v2590_v18  ;;  %v2593_v34 = vadd.f32 %v7035_v21, %v9632_v58  ;;  %v2584_v7 = vpop.f32.mrb[75].mxu0 }
 0x2e2   : > { %v8649_v1 = vadd.f32 %v9633_v56, %v2582_v55  ;;  %v2585_v38 = vadd.f32 %v9634_v45, %v2584_v7 }
 0x2e3   : > { %v8653_v59 = vadd.f32 %v8487_v60, %v2593_v34  ;;  %v8674_v34 = vld [vmem:[#allocation9 + $0x80] sm:$0xff]  }
 0x2e4   : > { %v8656_v28 = vadd.f32 %v8479_v3, %v2585_v38  ;;  %7200 = vmatprep.subr.bf16.mxu1 %v8674_v34 }
 0x2e6   : > { %v7038_v29 = vpop.f32.mrb[76].mxu0 }
 0x2e7   : > { %v2606_v19 = vadd.f32 %v7038_v29, %v8507_v23  ;;  %v2597_v8 = vpop.f32.mrb[77].mxu0 }
 0x2e8   : > { %v2598_v5 = vadd.f32 %v8489_v14, %v2597_v8  ;;  %v7039_v18 = vpop.f32.mrb[78].mxu0 }
 0x2e9   : > { %v8661_v21 = vadd.f32 %v8505_v39, %v2606_v19  ;;  %v2609_v9 = vadd.f32 %v7039_v18, %v8513_v33  ;;  %v2600_v55 = vpop.f32.mrb[79].mxu0 }
 0x2ea   : > { %v8665_v58 = vadd.f32 %v8497_v26, %v2598_v5  ;;  %v2601_v60 = vadd.f32 %v8493_v11, %v2600_v55 }
 0x2eb   : > { %v8669_v3 = vadd.f32 %v8509_v63, %v2609_v9 }
 0x2ec   : > { %v8672_v23 = vadd.f32 %v8499_v51, %v2601_v60 }
 0x2ee   : > { %v7042_v14 = vpop.f32.mrb[80].mxu0 }
 0x2ef   : > { %v2622_v39 = vadd.f32 %v7042_v14, %v8541_v36  ;;  %v2613_v33 = vpop.f32.mrb[81].mxu0  ;;  %v7783_v14 = vld [vmem:[#allocation9 + $0x40] sm:$0xff]  }
 0x2f0   : > { %v2614_v7 = vadd.f32 %v8525_v27, %v2613_v33  ;;  %v7043_v26 = vpop.f32.mrb[82].mxu0  ;;  %6736 = vmatprep.subr.bf16.mxu0 %v7783_v14 }
 0x2f1   : > { %v8680_v56 = vadd.f32 %v8529_v61, %v2622_v39  ;;  %v2625_v11 = vadd.f32 %v7043_v26, %v8545_v46  ;;  %v2616_v63 = vpop.f32.mrb[83].mxu0 }
 0x2f2   : > { %v8684_v51 = vadd.f32 %v8517_v12, %v2614_v7  ;;  %v2617_v45 = vadd.f32 %v8527_v15, %v2616_v63 }
 0x2f3   : > { %v8688_v38 = vadd.f32 %v8531_v53, %v2625_v11 }
 0x2f4   : > { %v8691_v36 = vadd.f32 %v8519_v32, %v2617_v45 }
 0x2f6   : > { %v7046_v29 = vpop.f32.mrb[84].mxu0 }
 0x2f7   : > { %v2638_v27 = vadd.f32 %v7046_v29, %v8565_v41  ;;  %v2629_v19 = vpop.f32.mrb[85].mxu0 }
 0x2f8   : > { %v2630_v61 = vadd.f32 %v8553_v25, %v2629_v19  ;;  %v7047_v8 = vpop.f32.mrb[86].mxu0 }
 0x2f9   : > { %v8696_v46 = vadd.f32 %v8555_v22, %v2638_v27  ;;  %v2641_v12 = vadd.f32 %v7047_v8, %v8569_v17  ;;  %v2632_v5 = vpop.f32.mrb[87].mxu0  ;;  %v9636_v27 = vld [vmem:[#allocation25_spill] sm:$0xff] }
 0x2fa   : > { %v8700_v15 = vadd.f32 %v8543_v62, %v2630_v61  ;;  %v2633_v53 = vadd.f32 %v8557_v16, %v2632_v5 }
 0x2fb   : > { %v8704_v32 = vadd.f32 %v8559_v47, %v2641_v12 }
 0x2fc   : > { %v8707_v41 = vadd.f32 %v8547_v13, %v2633_v53 }
 0x2fe   : > { %v7050_v18 = vpop.f32.mrb[88].mxu0 }
 0x2ff   : > { %v2654_v25 = vadd.f32 %v7050_v18, %v8589_v4  ;;  %v2645_v9 = vpop.f32.mrb[89].mxu0 }
 0x300   : > { %v2646_v22 = vadd.f32 %v8577_v24, %v2645_v9  ;;  %v7051_v55 = vpop.f32.mrb[90].mxu0 }
 0x301   : > { %v8712_v17 = vadd.f32 %v8579_v52, %v2654_v25  ;;  %v2657_v62 = vadd.f32 %v7051_v55, %v8593_v35  ;;  %v2648_v60 = vpop.f32.mrb[91].mxu0  ;;  %v8749_v25 = vld [vmem:[%s9570_s2] ss:$0 sm:$0xff] }
 0x302   : > { %v8716_v16 = vadd.f32 %v8567_v42, %v2646_v22  ;;  %v2649_v47 = vadd.f32 %v8581_v40, %v2648_v60 }
 0x303   : > { %v8720_v13 = vadd.f32 %v8583_v2, %v2657_v62 }
 0x304   : > { %v8723_v4 = vadd.f32 %v8571_v57, %v2649_v47 }
 0x306   : > { %v7054_v24 = vpop.f32.mrb[92].mxu0  ;;  %v7122_v39 = vpop.f32.mrb[64].mxu1 }
 0x307   : > { %v2670_v52 = vadd.f32 %v7054_v24, %v8606_v43  ;;  %v2661_v33 = vpop.f32.mrb[93].mxu0  ;;  %v3578_v7 = vpop.f32.mrb[65].mxu1  ;;  %v9635_v43 = vld [vmem:[#allocation26_spill] sm:$0xff] }
 0x308   : > { %v2662_v35 = vadd.f32 %v8598_v48, %v2661_v33  ;;  %v7055_v42 = vpop.f32.mrb[94].mxu0  ;;  %v7123_v26 = vpop.f32.mrb[66].mxu1 }
 0x309   : > { %v8728_v40 = vadd.f32 %v8600_v30, %v2670_v52  ;;  %v2673_v2 = vadd.f32 %v7055_v42, %v8608_v20  ;;  %v2664_v11 = vpop.f32.mrb[95].mxu0  ;;  %v3581_v57 = vpop.f32.mrb[67].mxu1 }
 0x30a   : > { %v8732_v63 = vadd.f32 %v8591_v44, %v2662_v35  ;;  %v2665_v45 = vadd.f32 %v8602_v10, %v2664_v11  ;;  %v9637_v11 = vld [vmem:[#allocation27_spill] sm:$0xff] }
 0x30b   : > { %v8736_v29 = vadd.f32 %v9635_v43, %v2673_v2 }
 0x30c   : > { %v8739_v19 = vadd.f32 %v9636_v27, %v2665_v45 }
 0x30e   : > { %v6480_v48 = vpop.f32.mrb[96].mxu0  ;;  %v8741_v61 = vpop.f32.mrb[68].mxu1 }
 0x30f   : > { %v6481_v30 = vpop.f32.mrb[97].mxu0  ;;  %v3594_v8 = vpop.f32.mrb[69].mxu1 }
 0x310   : > { %v6482_v12 = vadd.f32 %v6481_v30, %v6480_v48  ;;  %v6483_v20 = vpop.f32.mrb[98].mxu0  ;;  %v8743_v5 = vpop.f32.mrb[70].mxu1 }
 0x311   : > { %v6484_v53 = vpop.f32.mrb[99].mxu0  ;;  %v3597_v44 = vpop.f32.mrb[71].mxu1 }
 0x312   : > { %v7302_v18 = vadd.f32 %v6482_v12, %v8617_v31  ;;  %v6485_v10 = vadd.f32 %v6484_v53, %v6483_v20 }
 0x314   : > { %v7303_v9 = vadd.f32 %v7302_v18, %v3578_v7  ;;  %v7310_v22 = vadd.f32 %v6485_v10, %v8624_v0 }
 0x316   : > { %v3744_v55 = vadd.f32 %v7303_v9, %v8749_v25  ;;  %v7311_v62 = vadd.f32 %v7310_v22, %v3581_v57  ;;  %v6486_v60 = vpop.f32.mrb[100].mxu0  ;;  %v8753_v47 = vpop.f32.mrb[72].mxu1 }
 0x317   : > { %v6487_v14 = vpop.f32.mrb[101].mxu0  ;;  %v8755_v24 = vpop.f32.mrb[73].mxu1 }
 0x318   : > { %v3776_v52 = vmax.f32 %v3744_v55, 0.0  ;;  %v3745_v31 = vadd.f32 %v7311_v62, %v8749_v25  ;;  %v6488_v33 = vadd.f32 %v6487_v14, %v6486_v60  ;;  %v6489_v35 = vpop.f32.mrb[102].mxu0  ;;  %v8758_v42 = vpop.f32.mrb[74].mxu1 }
 0x319   : > { %v6490_v2 = vpop.f32.mrb[103].mxu0  ;;  %v8760_v7 = vpop.f32.mrb[75].mxu1 }
 0x31a   : > { %3808 = vst [vmem:[#allocation2 + $0x19] sm:$0xff] %v3776_v52  ;;  %v3777_v0 = vmax.f32 %v3745_v31, 0.0  ;;  %v7298_v57 = vadd.f32 %v6488_v33, %v9637_v11  ;;  %v6491_v45 = vadd.f32 %v6490_v2, %v6489_v35  ;;  %v7784_v33 = vld [vmem:[#allocation9] sm:$0xff]  }
 0x31c   : > { %3809 = vst [vmem:[#allocation2 + $0x21] sm:$0xff] %v3777_v0  ;;  %v7299_v43 = vadd.f32 %v7298_v57, %v7122_v39  ;;  %v7306_v27 = vadd.f32 %v6491_v45, %v8621_v6  ;;  %v8764_v48 = vpack.c.bf16 %v3777_v0, %v3776_v52 }
 0x31e   : > { %9638 = vst [vmem:[#allocation20_spill] sm:$0xff] %v8764_v48  ;;  %v3746_v30 = vadd.f32 %v7299_v43, %v8749_v25  ;;  %v7307_v12 = vadd.f32 %v7306_v27, %v7123_v26  ;;  %v6492_v20 = vpop.f32.mrb[104].mxu0  ;;  %4424 = vmatprep.mubr.bf16.mxu0 %v8764_v48  ;;  %v8768_v53 = vpop.f32.mrb[76].mxu1  ;;  %v7785_v27 = vld [vmem:[#allocation9 + $0x48] sm:$0xff]  }
 0x31f   : > { %v6493_v18 = vpop.f32.mrb[105].mxu0  ;;  %v8770_v10 = vpop.f32.mrb[77].mxu1 }
 0x320   : > { %v3778_v9 = vmax.f32 %v3746_v30, 0.0  ;;  %v3747_v22 = vadd.f32 %v7307_v12, %v8749_v25  ;;  %v6494_v55 = vadd.f32 %v6493_v18, %v6492_v20  ;;  %v6495_v39 = vpop.f32.mrb[106].mxu0  ;;  %v8773_v62 = vpop.f32.mrb[78].mxu1 }
 0x321   : > { %v6496_v6 = vpop.f32.mrb[107].mxu0  ;;  %v8775_v60 = vpop.f32.mrb[79].mxu1  ;;  %v3842_v31 = vld [vmem:[#allocation2 + $0x18] sm:$0xff] }
 0x322   : > { %3810 = vst [vmem:[#allocation2 + $0x31] sm:$0xff] %v3778_v9  ;;  %v3779_v26 = vmax.f32 %v3747_v22, 0.0  ;;  %v7318_v14 = vadd.f32 %v6494_v55, %v8633_v54  ;;  %v6497_v52 = vadd.f32 %v6496_v6, %v6495_v39  ;;  %v7786_v22 = vld [vmem:[#allocation9 + $0x8] sm:$0xff]  }
 0x323   : > { %v3986_v35 = vld [vmem:[#allocation2 + $0x1a] sm:$0xff]  ;;  %v3987_v2 = vld [vmem:[#allocation2 + $0x22] sm:$0xff] }
 0x324   : > { %v3843_v0 = vld [vmem:[#allocation2 + $0x20] sm:$0xff]  ;;  %3811 = vst [vmem:[#allocation2 + $0x39] sm:$0xff] %v3779_v26  ;;  %v7319_v11 = vadd.f32 %v7318_v14, %v3594_v8  ;;  %v7326_v57 = vadd.f32 %v6497_v52, %v8640_v37  ;;  %v8779_v45 = vpack.c.bf16 %v3987_v2, %v3986_v35  ;;  %v8783_v30 = vpack.c.bf16 %v3779_v26, %v3778_v9  ;;  %v9641_v35 = vld [vmem:[#allocation12_spill] sm:$0xff] }
 0x325   : > { %v8781_v43 = vpack.c.bf16 %v3843_v0, %v3842_v31  ;;  %v7788_v26 = vld [vmem:[#allocation9 + $0x50] sm:$0xff]  }
 0x326   : > { %9640 = vst [vmem:[#allocation15_spill] sm:$0xff] %v8783_v30  ;;  %v3748_v12 = vadd.f32 %v7319_v11, %v8749_v25  ;;  %v7327_v54 = vadd.f32 %v7326_v57, %v3597_v44  ;;  %v6498_v20 = vpop.f32.mrb[108].mxu0  ;;  %7168 = vmatprep.mubr.bf16.mxu1 %v8779_v45  ;;  %v8788_v18 = vpop.f32.mrb[80].mxu1 }
 0x327   : > { %9639 = vst [vmem:[#allocation17_spill] sm:$0xff] %v8781_v43  ;;  %4425 = vmatmul.mubr.bf16.vlgmr.msra.gmra.mrb[160].mxu0 %v8781_v43  ;;  %v6499_v8 = vpop.f32.mrb[109].mxu0  ;;  %v8791_v37 = vpop.f32.mrb[81].mxu1 }
 0x328   : > { %4432 = vmatprep.mubr.bf16.mxu0 %v8783_v30  ;;  %6737 = vmatpush3.bf16.msra.mxu0 %v7784_v33  ;;  %v3780_v55 = vmax.f32 %v3748_v12, 0.0  ;;  %v3749_v9 = vadd.f32 %v7327_v54, %v8749_v25  ;;  %v6500_v39 = vadd.f32 %v6499_v8, %v6498_v20  ;;  %v6501_v6 = vpop.f32.mrb[110].mxu0  ;;  %v8794_v44 = vpop.f32.mrb[82].mxu1  ;;  %v7779_v30 = vld [vmem:[#allocation9 + $0x88] sm:$0xff]  }
 0x329   : > { %6738 = vmatprep.subr.bf16.mxu0 %v7785_v27  ;;  %v6502_v14 = vpop.f32.mrb[111].mxu0  ;;  %v8796_v52 = vpop.f32.mrb[83].mxu1  ;;  %v3844_v11 = vld [vmem:[#allocation2 + $0x30] sm:$0xff] }
 0x32a   : > { %3812 = vst [vmem:[#allocation2 + $0x49] sm:$0xff] %v3780_v55  ;;  %v3781_v31 = vmax.f32 %v3749_v9, 0.0  ;;  %v7314_v2 = vadd.f32 %v6500_v39, %v9641_v35  ;;  %v6503_v0 = vadd.f32 %v6502_v14, %v6501_v6  ;;  %v7789_v9 = vld [vmem:[#allocation9 + $0x10] sm:$0xff]   ;;  %v7790_v39 = vld [vmem:[#allocation9 + $0x58] sm:$0xff]  }
 0x32b   : > { %v3988_v33 = vld [vmem:[#allocation2 + $0x32] sm:$0xff]  ;;  %v3989_v57 = vld [vmem:[#allocation2 + $0x3a] sm:$0xff] }
 0x32c   : > { %v3845_v12 = vld [vmem:[#allocation2 + $0x38] sm:$0xff]  ;;  %6739 = vmatpush3.bf16.msra.mxu0 %v7786_v22  ;;  %3813 = vst [vmem:[#allocation2 + $0x51] sm:$0xff] %v3781_v31  ;;  %v7315_v54 = vadd.f32 %v7314_v2, %v8741_v61  ;;  %v7322_v20 = vadd.f32 %v6503_v0, %v8637_v50  ;;  %v8801_v27 = vpack.c.bf16 %v3989_v57, %v3988_v33  ;;  %v7780_v0 = vld [vmem:[#allocation9 + $0x90] sm:$0xff]   ;;  %v7791_v57 = vld [vmem:[#allocation9 + $0x18] sm:$0xff]  }
 0x32d   : > { %v8803_v8 = vpack.c.bf16 %v3845_v12, %v3844_v11  ;;  %6740 = vmatprep.subr.bf16.mxu0 %v7788_v26  ;;  %v8805_v43 = vpack.c.bf16 %v3781_v31, %v3780_v55 }
 0x32e   : > { %v3750_v6 = vadd.f32 %v7315_v54, %v8749_v25  ;;  %v7323_v14 = vadd.f32 %v7322_v20, %v8743_v5  ;;  %v6504_v22 = vpop.f32.mrb[112].mxu0  ;;  %7169 = vmatmul.mubr.bf16.vlgmr.msra.gmra.mrb[96].mxu1 %v8801_v27  ;;  %v8811_v50 = vpop.f32.mrb[84].mxu1 }
 0x32f   : > { %9642 = vst [vmem:[#allocation13_spill] sm:$0xff] %v8803_v8  ;;  %9643 = vst [vmem:[#allocation16_spill] sm:$0xff] %v8805_v43  ;;  %4433 = vmatmul.mubr.bf16.gmra.mrb[164].mxu0 %v8803_v8  ;;  %v6505_v61 = vpop.f32.mrb[113].mxu0  ;;  %v8814_v35 = vpop.f32.mrb[85].mxu1  ;;  %7201 = vmatpush3.bf16.msra.mxu1 %v8674_v34 }
 0x330   : > { %4440 = vmatprep.mubr.bf16.mxu0 %v8805_v43  ;;  %v3782_v55 = vmax.f32 %v3750_v6, 0.0  ;;  %v3751_v26 = vadd.f32 %v7323_v14, %v8749_v25  ;;  %v6506_v31 = vadd.f32 %v6505_v61, %v6504_v22  ;;  %v6507_v2 = vpop.f32.mrb[114].mxu0  ;;  %v8818_v5 = vpop.f32.mrb[86].mxu1  ;;  %7202 = vmatprep.subr.bf16.mxu1 %v7779_v30 }
 0x331   : > { %6741 = vmatpush3.bf16.msra.mxu0 %v7789_v9  ;;  %v6508_v11 = vpop.f32.mrb[115].mxu0  ;;  %v8820_v33 = vpop.f32.mrb[87].mxu1  ;;  %v3846_v20 = vld [vmem:[#allocation2 + $0x48] sm:$0xff] }
 0x332   : > { %6742 = vmatprep.subr.bf16.mxu0 %v7790_v39  ;;  %3814 = vst [vmem:[#allocation2 + $0x61] sm:$0xff] %v3782_v55  ;;  %v3783_v12 = vmax.f32 %v3751_v26, 0.0  ;;  %v7334_v54 = vadd.f32 %v6506_v31, %v8649_v1  ;;  %v6509_v34 = vadd.f32 %v6508_v11, %v6507_v2  ;;  %v7781_v39 = vld [vmem:[#allocation9 + $0x98] sm:$0xff]   ;;  %v7793_v26 = vld [vmem:[#allocation9 + $0x60] sm:$0xff]  }
 0x333   : > { %v3990_v6 = vld [vmem:[#allocation2 + $0x4a] sm:$0xff]  ;;  %v3991_v14 = vld [vmem:[#allocation2 + $0x52] sm:$0xff]  ;;  %7203 = vmatpush3.bf16.msra.mxu1 %v7779_v30 }
 0x334   : > { %v3847_v22 = vld [vmem:[#allocation2 + $0x50] sm:$0xff]  ;;  %3815 = vst [vmem:[#allocation2 + $0x69] sm:$0xff] %v3783_v12  ;;  %v7335_v61 = vadd.f32 %v7334_v54, %v8755_v24  ;;  %v7342_v9 = vadd.f32 %v6509_v34, %v8656_v28  ;;  %v8825_v43 = vpack.c.bf16 %v3991_v14, %v3990_v6  ;;  %7204 = vmatprep.subr.bf16.mxu1 %v7780_v0  ;;  %v7795_v24 = vld [vmem:[#allocation9 + $0x68] sm:$0xff]  }
 0x335   : > { %v8827_v8 = vpack.c.bf16 %v3847_v22, %v3846_v20  ;;  %v8829_v48 = vpack.c.bf16 %v3783_v12, %v3782_v55  ;;  %6743 = vmatpush3.bf16.msra.mxu0 %v7791_v57  ;;  %v7794_v1 = vld [vmem:[#allocation9 + $0x20] sm:$0xff]   ;;  %v7796_v22 = vld [vmem:[#allocation9 + $0x28] sm:$0xff]  }
 0x336   : > { %9644 = vst [vmem:[#allocation21_spill] sm:$0xff] %v8825_v43  ;;  %v3752_v31 = vadd.f32 %v7335_v61, %v8749_v25  ;;  %v7343_v30 = vadd.f32 %v7342_v9, %v8760_v7  ;;  %v6510_v2 = vpop.f32.mrb[116].mxu0  ;;  %7172 = vmatprep.mubr.bf16.mxu1 %v8825_v43  ;;  %v8835_v28 = vpop.f32.mrb[88].mxu1  ;;  %v7782_v20 = vld [vmem:[#allocation9 + $0xa0] sm:$0xff]   ;;  %6744 = vmatprep.subr.bf16.mxu0 %v7793_v26  ;;  %v7798_v43 = vld [vmem:[#allocation9 + $0x70] sm:$0xff]  }
 0x337   : > { %9645 = vst [vmem:[#allocation14_spill] sm:$0xff] %v8827_v8  ;;  %9646 = vst [vmem:[#allocation22_spill] sm:$0xff] %v8829_v48  ;;  %4441 = vmatmul.mubr.bf16.gmra.mrb[168].mxu0 %v8827_v8  ;;  %v6511_v11 = vpop.f32.mrb[117].mxu0  ;;  %v8838_v54 = vpop.f32.mrb[89].mxu1  ;;  %7205 = vmatpush3.bf16.msra.mxu1 %v7780_v0 }
 0x338   : > { %4448 = vmatprep.mubr.bf16.mxu0 %v8829_v48  ;;  %v3784_v55 = vmax.f32 %v3752_v31, 0.0  ;;  %v3753_v57 = vadd.f32 %v7343_v30, %v8749_v25  ;;  %v6512_v12 = vadd.f32 %v6511_v11, %v6510_v2  ;;  %v6513_v34 = vpop.f32.mrb[118].mxu0  ;;  %v8841_v7 = vpop.f32.mrb[90].mxu1  ;;  %7206 = vmatprep.subr.bf16.mxu1 %v7781_v39 }
 0x339   : > { %v6514_v6 = vpop.f32.mrb[119].mxu0  ;;  %v8843_v14 = vpop.f32.mrb[91].mxu1  ;;  %6745 = vmatpush3.bf16.msra.mxu0 %v7794_v1  ;;  %v3848_v31 = vld [vmem:[#allocation2 + $0x60] sm:$0xff] }
 0x33a   : > { %3816 = vst [vmem:[#allocation2 + $0x79] sm:$0xff] %v3784_v55  ;;  %v3785_v61 = vmax.f32 %v3753_v57, 0.0  ;;  %v7330_v9 = vadd.f32 %v6512_v12, %v8645_v49  ;;  %v6515_v0 = vadd.f32 %v6514_v6, %v6513_v34  ;;  %6746 = vmatprep.subr.bf16.mxu0 %v7795_v24  ;;  %v7787_v57 = vld [vmem:[#allocation9 + $0xa8] sm:$0xff]   ;;  %v7799_v24 = vld [vmem:[#allocation9 + $0x30] sm:$0xff]  }
 0x33b   : > { %v3992_v30 = vld [vmem:[#allocation2 + $0x62] sm:$0xff]  ;;  %v3993_v2 = vld [vmem:[#allocation2 + $0x6a] sm:$0xff]  ;;  %7207 = vmatpush3.bf16.msra.mxu1 %v7781_v39 }
 0x33c   : > { %v3849_v11 = vld [vmem:[#allocation2 + $0x68] sm:$0xff]  ;;  %3817 = vst [vmem:[#allocation2 + $0x81] sm:$0xff] %v3785_v61  ;;  %v7331_v48 = vadd.f32 %v7330_v9, %v8753_v47  ;;  %v7338_v26 = vadd.f32 %v6515_v0, %v8653_v59  ;;  %v8848_v8 = vpack.c.bf16 %v3993_v2, %v3992_v30  ;;  %7208 = vmatprep.subr.bf16.mxu1 %v7782_v20  ;;  %v7792_v0 = vld [vmem:[#allocation9 + $0xb0] sm:$0xff]  }
 0x33d   : > { %v8850_v1 = vpack.c.bf16 %v3849_v11, %v3848_v31  ;;  %v8852_v49 = vpack.c.bf16 %v3785_v61, %v3784_v55  ;;  %6747 = vmatpush3.bf16.msra.mxu0 %v7796_v22  ;;  %v7800_v47 = vld [vmem:[#allocation9 + $0x78] sm:$0xff]  }
 0x33e   : > { %9647 = vst [vmem:[#allocation18_spill] sm:$0xff] %v8848_v8  ;;  %v3754_v12 = vadd.f32 %v7331_v48, %v8749_v25  ;;  %v7339_v39 = vadd.f32 %v7338_v26, %v8758_v42  ;;  %v6516_v34 = vpop.f32.mrb[120].mxu0  ;;  %7173 = vmatmul.mubr.bf16.gmra.mrb[100].mxu1 %v8848_v8  ;;  %v8858_v59 = vpop.f32.mrb[92].mxu1  ;;  %6748 = vmatprep.subr.bf16.mxu0 %v7798_v43  ;;  %v7801_v2 = vld [vmem:[#allocation9 + $0x38] sm:$0xff]  }
 0x33f   : > { %9648 = vst [vmem:[#allocation23_spill] sm:$0xff] %v8850_v1  ;;  %9649 = vst [vmem:[#allocation24_spill] sm:$0xff] %v8852_v49  ;;  %4449 = vmatmul.mubr.bf16.gmra.mrb[172].mxu0 %v8850_v1  ;;  %v6517_v6 = vpop.f32.mrb[121].mxu0  ;;  %v8861_v9 = vpop.f32.mrb[93].mxu1  ;;  %7209 = vmatpush3.bf16.msra.mxu1 %v7782_v20 }
 0x340   : > { %4456 = vmatprep.mubr.bf16.mxu0 %v8852_v49  ;;  %v3786_v55 = vmax.f32 %v3754_v12, 0.0  ;;  %v3755_v22 = vadd.f32 %v7339_v39, %v8749_v25  ;;  %v6518_v48 = vadd.f32 %v6517_v6, %v6516_v34  ;;  %v6519_v61 = vpop.f32.mrb[122].mxu0  ;;  %v8864_v42 = vpop.f32.mrb[94].mxu1  ;;  %7210 = vmatprep.subr.bf16.mxu1 %v7787_v57 }
 0x341   : > { %v6520_v31 = vpop.f32.mrb[123].mxu0  ;;  %v8866_v30 = vpop.f32.mrb[95].mxu1  ;;  %6749 = vmatpush3.bf16.msra.mxu0 %v7799_v24  ;;  %v3850_v12 = vld [vmem:[#allocation2 + $0x78] sm:$0xff] }
 0x342   : > { %3818 = vst [vmem:[#allocation2 + $0x91] sm:$0xff] %v3786_v55  ;;  %v3787_v11 = vmax.f32 %v3755_v22, 0.0  ;;  %v7350_v26 = vadd.f32 %v6518_v48, %v8665_v58  ;;  %v6521_v20 = vadd.f32 %v6520_v31, %v6519_v61  ;;  %6750 = vmatprep.subr.bf16.mxu0 %v7800_v47  ;;  %v7797_v22 = vld [vmem:[#allocation9 + $0xb8] sm:$0xff]   ;;  %v7802_v31 = vld [vmem:[#allocation9 + $0x1c0] sm:$0xff]  }
 0x343   : > { %v3994_v39 = vld [vmem:[#allocation2 + $0x7a] sm:$0xff]  ;;  %v3995_v34 = vld [vmem:[#allocation2 + $0x82] sm:$0xff]  ;;  %7211 = vmatpush3.bf16.msra.mxu1 %v7787_v57 }
 0x344   : > { %v3851_v6 = vld [vmem:[#allocation2 + $0x80] sm:$0xff]  ;;  %3819 = vst [vmem:[#allocation2 + $0x99] sm:$0xff] %v3787_v11  ;;  %v7351_v49 = vadd.f32 %v7350_v26, %v8770_v10  ;;  %v7358_v43 = vadd.f32 %v6521_v20, %v8672_v23  ;;  %v8871_v1 = vpack.c.bf16 %v3995_v34, %v3994_v39  ;;  %7212 = vmatprep.subr.bf16.mxu1 %v7792_v0 }
 0x345   : > { %v8873_v24 = vpack.c.bf16 %v3851_v6, %v3850_v12  ;;  %v8875_v8 = vpack.c.bf16 %v3787_v11, %v3786_v55  ;;  %6751 = vmatpush3.bf16.msra.mxu0 %v7801_v2 }
 0x346   : > { %v3756_v58 = vadd.f32 %v7351_v49, %v8749_v25  ;;  %v7359_v47 = vadd.f32 %v7358_v43, %v8775_v60  ;;  %v6522_v48 = vpop.f32.mrb[124].mxu0  ;;  %7176 = vmatprep.mubr.bf16.mxu1 %v8871_v1 }
 0x347   : > { %4457 = vmatmul.mubr.bf16.gmra.mrb[176].mxu0 %v8873_v24  ;;  %v6523_v10 = vpop.f32.mrb[125].mxu0  ;;  %7213 = vmatpush3.bf16.msra.mxu1 %v7792_v0 }
 0x348   : > { %4464 = vmatprep.mubr.bf16.mxu0 %v8875_v8  ;;  %v3788_v23 = vmax.f32 %v3756_v58, 0.0  ;;  %v3757_v57 = vadd.f32 %v7359_v47, %v8749_v25  ;;  %v6524_v61 = vadd.f32 %v6523_v10, %v6522_v48  ;;  %v6525_v55 = vpop.f32.mrb[126].mxu0  ;;  %7214 = vmatprep.subr.bf16.mxu1 %v7797_v22 }
 0x349   : > { %v6526_v2 = vpop.f32.mrb[127].mxu0  ;;  %v3852_v26 = vld [vmem:[#allocation2 + $0x90] sm:$0xff] }
 0x34a   : > { %3820 = vst [vmem:[#allocation2 + $0xa9] sm:$0xff] %v3788_v23  ;;  %v3789_v49 = vmax.f32 %v3757_v57, 0.0  ;;  %v7346_v60 = vadd.f32 %v6524_v61, %v8661_v21  ;;  %v6527_v11 = vadd.f32 %v6526_v2, %v6525_v55 }
 0x34b   : > { %v3996_v20 = vld [vmem:[#allocation2 + $0x92] sm:$0xff]  ;;  %v3997_v12 = vld [vmem:[#allocation2 + $0x9a] sm:$0xff]  ;;  %7215 = vmatpush3.bf16.msra.mxu1 %v7797_v22 }
 0x34c   : > { %v3853_v39 = vld [vmem:[#allocation2 + $0x98] sm:$0xff]  ;;  %3821 = vst [vmem:[#allocation2 + $0xb1] sm:$0xff] %v3789_v49  ;;  %v7347_v0 = vadd.f32 %v7346_v60, %v8768_v53  ;;  %v7354_v34 = vadd.f32 %v6527_v11, %v8669_v3  ;;  %v8886_v6 = vpack.c.bf16 %v3997_v12, %v3996_v20  ;;  %6872 = vmatprep.subr.bf16.mxu1 %v7802_v31 }
 0x34d   : > { %v8888_v43 = vpack.c.bf16 %v3853_v39, %v3852_v26  ;;  %v8890_v58 = vpack.c.bf16 %v3789_v49, %v3788_v23 }
 0x34e   : > { %v3758_v21 = vadd.f32 %v7347_v0, %v8749_v25  ;;  %v7355_v47 = vadd.f32 %v7354_v34, %v8773_v62  ;;  %v6528_v48 = vpop.f32.mrb[128].mxu0  ;;  %7177 = vmatmul.mubr.bf16.gmra.mrb[104].mxu1 %v8886_v6 }
 0x34f   : > { %4465 = vmatmul.mubr.bf16.gmra.mrb[180].mxu0 %v8888_v43  ;;  %v6529_v22 = vpop.f32.mrb[129].mxu0 }
 0x350   : > { %4472 = vmatprep.mubr.bf16.mxu0 %v8890_v58  ;;  %v3790_v3 = vmax.f32 %v3758_v21, 0.0  ;;  %v3759_v53 = vadd.f32 %v7355_v47, %v8749_v25  ;;  %v6530_v10 = vadd.f32 %v6529_v22, %v6528_v48  ;;  %v6531_v57 = vpop.f32.mrb[130].mxu0 }
 0x351   : > { %v6532_v61 = vpop.f32.mrb[131].mxu0  ;;  %v3854_v62 = vld [vmem:[#allocation2 + $0xa8] sm:$0xff] }
 0x352   : > { %3822 = vst [vmem:[#allocation2 + $0xc1] sm:$0xff] %v3790_v3  ;;  %v3791_v23 = vmax.f32 %v3759_v53, 0.0  ;;  %v7366_v55 = vadd.f32 %v6530_v10, %v8684_v51  ;;  %v6533_v31 = vadd.f32 %v6532_v61, %v6531_v57 }
 0x353   : > { %v3998_v2 = vld [vmem:[#allocation2 + $0xaa] sm:$0xff]  ;;  %v3999_v49 = vld [vmem:[#allocation2 + $0xb2] sm:$0xff] }
 0x354   : > { %v3855_v60 = vld [vmem:[#allocation2 + $0xb0] sm:$0xff]  ;;  %3823 = vst [vmem:[#allocation2 + $0xc9] sm:$0xff] %v3791_v23  ;;  %v7367_v11 = vadd.f32 %v7366_v55, %v8791_v37  ;;  %v7374_v26 = vadd.f32 %v6533_v31, %v8691_v36  ;;  %v8901_v20 = vpack.c.bf16 %v3999_v49, %v3998_v2  ;;  %v8905_v39 = vpack.c.bf16 %v3791_v23, %v3790_v3 }
 0x355   : > { %v8903_v12 = vpack.c.bf16 %v3855_v60, %v3854_v62 }
 0x356   : > { %v3760_v0 = vadd.f32 %v7367_v11, %v8749_v25  ;;  %v7375_v51 = vadd.f32 %v7374_v26, %v8796_v52  ;;  %v6534_v34 = vpop.f32.mrb[132].mxu0  ;;  %7180 = vmatprep.mubr.bf16.mxu1 %v8901_v20 }
 0x357   : > { %4473 = vmatmul.mubr.bf16.gmra.mrb[184].mxu0 %v8903_v12  ;;  %v6535_v21 = vpop.f32.mrb[133].mxu0 }
 0x358   : > { %4480 = vmatprep.mubr.bf16.mxu0 %v8905_v39  ;;  %v3792_v37 = vmax.f32 %v3760_v0, 0.0  ;;  %v3761_v36 = vadd.f32 %v7375_v51, %v8749_v25  ;;  %v6536_v47 = vadd.f32 %v6535_v21, %v6534_v34  ;;  %v6537_v48 = vpop.f32.mrb[134].mxu0 }
 0x359   : > { %v6538_v22 = vpop.f32.mrb[135].mxu0  ;;  %v3856_v52 = vld [vmem:[#allocation2 + $0xc0] sm:$0xff] }
 0x35a   : > { %3824 = vst [vmem:[#allocation2 + $0xd9] sm:$0xff] %v3792_v37  ;;  %v3793_v3 = vmax.f32 %v3761_v36, 0.0  ;;  %v7362_v53 = vadd.f32 %v6536_v47, %v8680_v56  ;;  %v6539_v10 = vadd.f32 %v6538_v22, %v6537_v48 }
 0x35b   : > { %v4000_v57 = vld [vmem:[#allocation2 + $0xc2] sm:$0xff]  ;;  %v4001_v61 = vld [vmem:[#allocation2 + $0xca] sm:$0xff] }
 0x35c   : > { %v3857_v23 = vld [vmem:[#allocation2 + $0xc8] sm:$0xff]  ;;  %3825 = vst [vmem:[#allocation2 + $0xe1] sm:$0xff] %v3793_v3  ;;  %v7363_v55 = vadd.f32 %v7362_v53, %v8788_v18  ;;  %v7370_v31 = vadd.f32 %v6539_v10, %v8688_v38  ;;  %v8916_v62 = vpack.c.bf16 %v4001_v61, %v4000_v57  ;;  %v8920_v49 = vpack.c.bf16 %v3793_v3, %v3792_v37 }
 0x35d   : > { %v8918_v2 = vpack.c.bf16 %v3857_v23, %v3856_v52 }
 0x35e   : > { %v3762_v60 = vadd.f32 %v7363_v55, %v8749_v25  ;;  %v7371_v56 = vadd.f32 %v7370_v31, %v8794_v44  ;;  %v6540_v11 = vpop.f32.mrb[136].mxu0  ;;  %7181 = vmatmul.mubr.bf16.gmra.mrb[108].mxu1 %v8916_v62 }
 0x35f   : > { %4481 = vmatmul.mubr.bf16.gmra.mrb[188].mxu0 %v8918_v2  ;;  %v6541_v26 = vpop.f32.mrb[137].mxu0 }
 0x360   : > { %4488 = vmatprep.mubr.bf16.mxu0 %v8920_v49  ;;  %v3794_v18 = vmax.f32 %v3762_v60, 0.0  ;;  %v3763_v38 = vadd.f32 %v7371_v56, %v8749_v25  ;;  %v6542_v0 = vadd.f32 %v6541_v26, %v6540_v11  ;;  %v6543_v51 = vpop.f32.mrb[138].mxu0 }
 0x361   : > { %v6544_v34 = vpop.f32.mrb[139].mxu0  ;;  %v3858_v44 = vld [vmem:[#allocation2 + $0xd8] sm:$0xff] }
 0x362   : > { %3826 = vst [vmem:[#allocation2 + $0xf1] sm:$0xff] %v3794_v18  ;;  %v3795_v21 = vmax.f32 %v3763_v38, 0.0  ;;  %v7382_v37 = vadd.f32 %v6542_v0, %v8700_v15  ;;  %v6545_v36 = vadd.f32 %v6544_v34, %v6543_v51 }
 0x363   : > { %v4002_v47 = vld [vmem:[#allocation2 + $0xda] sm:$0xff]  ;;  %v4003_v48 = vld [vmem:[#allocation2 + $0xe2] sm:$0xff] }
 0x364   : > { %v3859_v22 = vld [vmem:[#allocation2 + $0xe0] sm:$0xff]  ;;  %3827 = vst [vmem:[#allocation2 + $0xf9] sm:$0xff] %v3795_v21  ;;  %v7383_v3 = vadd.f32 %v7382_v37, %v8814_v35  ;;  %v7390_v53 = vadd.f32 %v6545_v36, %v8707_v41  ;;  %v8931_v10 = vpack.c.bf16 %v4003_v48, %v4002_v47  ;;  %v8935_v57 = vpack.c.bf16 %v3795_v21, %v3794_v18 }
 0x365   : > { %v8933_v52 = vpack.c.bf16 %v3859_v22, %v3858_v44 }
 0x366   : > { %v3764_v61 = vadd.f32 %v7383_v3, %v8749_v25  ;;  %v7391_v15 = vadd.f32 %v7390_v53, %v8820_v33  ;;  %v6546_v23 = vpop.f32.mrb[140].mxu0  ;;  %7184 = vmatprep.mubr.bf16.mxu1 %v8931_v10 }
 0x367   : > { %4489 = vmatmul.mubr.bf16.gmra.mrb[192].mxu0 %v8933_v52  ;;  %v6547_v55 = vpop.f32.mrb[141].mxu0 }
 0x368   : > { %4496 = vmatprep.mubr.bf16.mxu0 %v8935_v57  ;;  %v3796_v35 = vmax.f32 %v3764_v61, 0.0  ;;  %v3765_v41 = vadd.f32 %v7391_v15, %v8749_v25  ;;  %v6548_v31 = vadd.f32 %v6547_v55, %v6546_v23  ;;  %v6549_v60 = vpop.f32.mrb[142].mxu0 }
 0x369   : > { %v6550_v56 = vpop.f32.mrb[143].mxu0  ;;  %v3860_v33 = vld [vmem:[#allocation2 + $0xf0] sm:$0xff] }
 0x36a   : > { %3828 = vst [vmem:[#allocation2 + $0x109] sm:$0xff] %v3796_v35  ;;  %v3797_v11 = vmax.f32 %v3765_v41, 0.0  ;;  %v7378_v26 = vadd.f32 %v6548_v31, %v8696_v46  ;;  %v6551_v18 = vadd.f32 %v6550_v56, %v6549_v60 }
 0x36b   : > { %v4004_v38 = vld [vmem:[#allocation2 + $0xf2] sm:$0xff]  ;;  %v4005_v0 = vld [vmem:[#allocation2 + $0xfa] sm:$0xff] }
 0x36c   : > { %v3861_v51 = vld [vmem:[#allocation2 + $0xf8] sm:$0xff]  ;;  %3829 = vst [vmem:[#allocation2 + $0x111] sm:$0xff] %v3797_v11  ;;  %v7379_v34 = vadd.f32 %v7378_v26, %v8811_v50  ;;  %v7386_v21 = vadd.f32 %v6551_v18, %v8704_v32  ;;  %v8946_v37 = vpack.c.bf16 %v4005_v0, %v4004_v38  ;;  %v8950_v44 = vpack.c.bf16 %v3797_v11, %v3796_v35 }
 0x36d   : > { %v8948_v36 = vpack.c.bf16 %v3861_v51, %v3860_v33 }
 0x36e   : > { %v3766_v47 = vadd.f32 %v7379_v34, %v8749_v25  ;;  %v7387_v46 = vadd.f32 %v7386_v21, %v8818_v5  ;;  %v6552_v48 = vpop.f32.mrb[144].mxu0  ;;  %7185 = vmatmul.mubr.bf16.gmra.mrb[112].mxu1 %v8946_v37 }
 0x36f   : > { %4497 = vmatmul.mubr.bf16.gmra.mrb[196].mxu0 %v8948_v36  ;;  %v6553_v22 = vpop.f32.mrb[145].mxu0 }
 0x370   : > { %4504 = vmatprep.mubr.bf16.mxu0 %v8950_v44  ;;  %v3798_v50 = vmax.f32 %v3766_v47, 0.0  ;;  %v3767_v32 = vadd.f32 %v7387_v46, %v8749_v25  ;;  %v6554_v3 = vadd.f32 %v6553_v22, %v6552_v48  ;;  %v6555_v53 = vpop.f32.mrb[146].mxu0 }
 0x371   : > { %v6556_v61 = vpop.f32.mrb[147].mxu0  ;;  %v3862_v5 = vld [vmem:[#allocation2 + $0x108] sm:$0xff] }
 0x372   : > { %3830 = vst [vmem:[#allocation2 + $0x121] sm:$0xff] %v3798_v50  ;;  %v3799_v15 = vmax.f32 %v3767_v32, 0.0  ;;  %v7398_v23 = vadd.f32 %v6554_v3, %v8716_v16  ;;  %v6557_v55 = vadd.f32 %v6556_v61, %v6555_v53 }
 0x373   : > { %v4006_v35 = vld [vmem:[#allocation2 + $0x10a] sm:$0xff]  ;;  %v4007_v41 = vld [vmem:[#allocation2 + $0x112] sm:$0xff] }
 0x374   : > { %v3863_v31 = vld [vmem:[#allocation2 + $0x110] sm:$0xff]  ;;  %3831 = vst [vmem:[#allocation2 + $0x129] sm:$0xff] %v3799_v15  ;;  %v7399_v60 = vadd.f32 %v7398_v23, %v8838_v54  ;;  %v7406_v56 = vadd.f32 %v6557_v55, %v8723_v4  ;;  %v8961_v11 = vpack.c.bf16 %v4007_v41, %v4006_v35  ;;  %v8965_v18 = vpack.c.bf16 %v3799_v15, %v3798_v50 }
 0x375   : > { %v8963_v26 = vpack.c.bf16 %v3863_v31, %v3862_v5 }
 0x376   : > { %v3768_v33 = vadd.f32 %v7399_v60, %v8749_v25  ;;  %v7407_v16 = vadd.f32 %v7406_v56, %v8843_v14  ;;  %v6558_v38 = vpop.f32.mrb[148].mxu0  ;;  %7188 = vmatprep.mubr.bf16.mxu1 %v8961_v11 }
 0x377   : > { %4505 = vmatmul.mubr.bf16.gmra.mrb[200].mxu0 %v8963_v26  ;;  %v6559_v0 = vpop.f32.mrb[149].mxu0 }
 0x378   : > { %4512 = vmatprep.mubr.bf16.mxu0 %v8965_v18  ;;  %v3800_v54 = vmax.f32 %v3768_v33, 0.0  ;;  %v3769_v4 = vadd.f32 %v7407_v16, %v8749_v25  ;;  %v6560_v51 = vadd.f32 %v6559_v0, %v6558_v38  ;;  %v6561_v34 = vpop.f32.mrb[150].mxu0 }
 0x379   : > { %v6562_v21 = vpop.f32.mrb[151].mxu0  ;;  %v3864_v14 = vld [vmem:[#allocation2 + $0x120] sm:$0xff] }
 0x37a   : > { %3832 = vst [vmem:[#allocation2 + $0x139] sm:$0xff] %v3800_v54  ;;  %v3801_v47 = vmax.f32 %v3769_v4, 0.0  ;;  %v7394_v46 = vadd.f32 %v6560_v51, %v8712_v17  ;;  %v6563_v48 = vadd.f32 %v6562_v21, %v6561_v34 }
 0x37b   : > { %v4008_v22 = vld [vmem:[#allocation2 + $0x122] sm:$0xff]  ;;  %v4009_v50 = vld [vmem:[#allocation2 + $0x12a] sm:$0xff] }
 0x37c   : > { %v3865_v32 = vld [vmem:[#allocation2 + $0x128] sm:$0xff]  ;;  %3833 = vst [vmem:[#allocation2 + $0x141] sm:$0xff] %v3801_v47  ;;  %v7395_v3 = vadd.f32 %v7394_v46, %v8835_v28  ;;  %v7402_v53 = vadd.f32 %v6563_v48, %v8720_v13  ;;  %v8976_v61 = vpack.c.bf16 %v4009_v50, %v4008_v22  ;;  %v8980_v23 = vpack.c.bf16 %v3801_v47, %v3800_v54 }
 0x37d   : > { %v8978_v15 = vpack.c.bf16 %v3865_v32, %v3864_v14 }
 0x37e   : > { %v3770_v55 = vadd.f32 %v7395_v3, %v8749_v25  ;;  %v7403_v17 = vadd.f32 %v7402_v53, %v8841_v7  ;;  %v6564_v5 = vpop.f32.mrb[152].mxu0  ;;  %7189 = vmatmul.mubr.bf16.gmra.mrb[116].mxu1 %v8976_v61 }
 0x37f   : > { %4513 = vmatmul.mubr.bf16.gmra.mrb[204].mxu0 %v8978_v15  ;;  %v6565_v35 = vpop.f32.mrb[153].mxu0 }
 0x380   : > { %4520 = vmatprep.mubr.bf16.mxu0 %v8980_v23  ;;  %v3802_v28 = vmax.f32 %v3770_v55, 0.0  ;;  %v3771_v13 = vadd.f32 %v7403_v17, %v8749_v25  ;;  %v6566_v41 = vadd.f32 %v6565_v35, %v6564_v5  ;;  %v6567_v31 = vpop.f32.mrb[154].mxu0 }
 0x381   : > { %v6568_v60 = vpop.f32.mrb[155].mxu0  ;;  %v3866_v7 = vld [vmem:[#allocation2 + $0x138] sm:$0xff] }
 0x382   : > { %3834 = vst [vmem:[#allocation2 + $0x151] sm:$0xff] %v3802_v28  ;;  %v3803_v56 = vmax.f32 %v3771_v13, 0.0  ;;  %v7414_v33 = vadd.f32 %v6566_v41, %v8732_v63  ;;  %v6569_v16 = vadd.f32 %v6568_v60, %v6567_v31 }
 0x383   : > { %v4010_v38 = vld [vmem:[#allocation2 + $0x13a] sm:$0xff]  ;;  %v4011_v0 = vld [vmem:[#allocation2 + $0x142] sm:$0xff] }
 0x384   : > { %v3867_v54 = vld [vmem:[#allocation2 + $0x140] sm:$0xff]  ;;  %3835 = vst [vmem:[#allocation2 + $0x159] sm:$0xff] %v3803_v56  ;;  %v7415_v4 = vadd.f32 %v7414_v33, %v8861_v9  ;;  %v7422_v51 = vadd.f32 %v6569_v16, %v8739_v19  ;;  %v8991_v34 = vpack.c.bf16 %v4011_v0, %v4010_v38  ;;  %v8995_v47 = vpack.c.bf16 %v3803_v56, %v3802_v28 }
 0x385   : > { %v8993_v21 = vpack.c.bf16 %v3867_v54, %v3866_v7 }
 0x386   : > { %v3772_v46 = vadd.f32 %v7415_v4, %v8749_v25  ;;  %v7423_v63 = vadd.f32 %v7422_v51, %v8866_v30  ;;  %v6570_v48 = vpop.f32.mrb[156].mxu0  ;;  %7192 = vmatprep.mubr.bf16.mxu1 %v8991_v34  ;;  %v3985_v51 = vld [vmem:[#allocation2 + $0xa] sm:$0xff] }
 0x387   : > { %4521 = vmatmul.mubr.bf16.gmra.mrb[208].mxu0 %v8993_v21  ;;  %v6571_v14 = vpop.f32.mrb[157].mxu0 }
 0x388   : > { %4528 = vmatprep.mubr.bf16.mxu0 %v8995_v47  ;;  %v3804_v9 = vmax.f32 %v3772_v46, 0.0  ;;  %v3773_v19 = vadd.f32 %v7423_v63, %v8749_v25  ;;  %v6572_v22 = vadd.f32 %v6571_v14, %v6570_v48  ;;  %v6573_v50 = vpop.f32.mrb[158].mxu0  ;;  %v3912_v46 = vld [vmem:[#allocation2 + $0x1] sm:$0xff]  ;;  %v3913_v63 = vld [vmem:[#allocation2 + $0x9] sm:$0xff] }
 0x389   : > { %v6574_v32 = vpop.f32.mrb[159].mxu0  ;;  %v3868_v30 = vld [vmem:[#allocation2 + $0x150] sm:$0xff] }
 0x38a   : > { %3836 = vst [vmem:[#allocation2 + $0x169] sm:$0xff] %v3804_v9  ;;  %v3805_v3 = vmax.f32 %v3773_v19, 0.0  ;;  %v7410_v53 = vadd.f32 %v6572_v22, %v8728_v40  ;;  %v6575_v55 = vadd.f32 %v6574_v32, %v6573_v50  ;;  %v3948_v50 = vpack.c.bf16 %v3913_v63, %v3912_v46  ;;  %v7813_v46 = vld [vmem:[#allocation9 + $0x1a8] sm:$0xff]   ;;  %v7814_v63 = vld [vmem:[#allocation9 + $0x1f0] sm:$0xff]  }
 0x38b   : > { %v4012_v17 = vld [vmem:[#allocation2 + $0x152] sm:$0xff]  ;;  %v4013_v5 = vld [vmem:[#allocation2 + $0x15a] sm:$0xff] }
 0x38c   : > { %v3869_v35 = vld [vmem:[#allocation2 + $0x158] sm:$0xff]  ;;  %3837 = vst [vmem:[#allocation2 + $0x171] sm:$0xff] %v3805_v3  ;;  %v7411_v28 = vadd.f32 %v7410_v53, %v8858_v59  ;;  %v7418_v13 = vadd.f32 %v6575_v55, %v8736_v29  ;;  %v9006_v41 = vpack.c.bf16 %v4013_v5, %v4012_v17  ;;  %v9010_v60 = vpack.c.bf16 %v3805_v3, %v3804_v9  ;;  %v3840_v53 = vld [vmem:[#allocation2] sm:$0xff]  ;;  %v9033_v55 = vld [vmem:[#allocation2 + $0x8] sm:$0xff] }
 0x38d   : > { %v9008_v31 = vpack.c.bf16 %v3869_v35, %v3868_v30  ;;  %v3876_v30 = vpack.c.bf16 %v9033_v55, %v3840_v53  ;;  %v7803_v17 = vld [vmem:[#allocation9 + $0x180] sm:$0xff]   ;;  %v7804_v5 = vld [vmem:[#allocation9 + $0x1c8] sm:$0xff]   ;;  %v9659_v53 = vld [vmem:[#allocation23_spill] sm:$0xff] }
 0x38e   : > { %v3774_v56 = vadd.f32 %v7411_v28, %v8749_v25  ;;  %v7419_v40 = vadd.f32 %v7418_v13, %v8864_v42  ;;  %7193 = vmatmul.mubr.bf16.gmra.mrb[120].mxu1 %v9006_v41  ;;  %v7805_v35 = vld [vmem:[#allocation9 + $0x188] sm:$0xff]   ;;  %v9650_v28 = vld [vmem:[#allocation20_spill] sm:$0xff]  ;;  %v7806_v13 = vld [vmem:[#allocation9 + $0x1d0] sm:$0xff]  }
 0x38f   : > { %4529 = vmatmul.mubr.bf16.gmra.mrb[212].mxu0 %v9008_v31 }
 0x390   : > { %4536 = vmatprep.mubr.bf16.mxu0 %v9010_v60  ;;  %v3806_v33 = vmax.f32 %v3774_v56, 0.0  ;;  %v3775_v59 = vadd.f32 %v7419_v40, %v8749_v25  ;;  %v3984_v25 = vld [vmem:[#allocation2 + $0x2] sm:$0xff] }
 0x391   : > { %v3870_v16 = vld [vmem:[#allocation2 + $0x168] sm:$0xff]  ;;  %v4020_v22 = vpack.c.bf16 %v3985_v51, %v3984_v25  ;;  %v7807_v56 = vld [vmem:[#allocation9 + $0x190] sm:$0xff]   ;;  %v9655_v25 = vld [vmem:[#allocation13_spill] sm:$0xff] }
 0x392   : > { %3838 = vst [vmem:[#allocation2 + $0x181] sm:$0xff] %v3806_v33  ;;  %v3807_v29 = vmax.f32 %v3775_v59, 0.0  ;;  %v7808_v40 = vld [vmem:[#allocation9 + $0x1d8] sm:$0xff]   ;;  %v9652_v59 = vld [vmem:[#allocation17_spill] sm:$0xff]  ;;  %v9656_v51 = vld [vmem:[#allocation16_spill] sm:$0xff] }
 0x393   : > { %v4014_v7 = vld [vmem:[#allocation2 + $0x16a] sm:$0xff]  ;;  %v4015_v38 = vld [vmem:[#allocation2 + $0x172] sm:$0xff] }
 0x394   : > { %v3871_v0 = vld [vmem:[#allocation2 + $0x170] sm:$0xff]  ;;  %3839 = vst [vmem:[#allocation2 + $0x189] sm:$0xff] %v3807_v29  ;;  %v9018_v54 = vpack.c.bf16 %v4015_v38, %v4014_v7  ;;  %v9022_v42 = vpack.c.bf16 %v3807_v29, %v3806_v33  ;;  %v9651_v33 = vld [vmem:[#allocation21_spill] sm:$0xff]  ;;  %v9653_v29 = vld [vmem:[#allocation18_spill] sm:$0xff] }
 0x395   : > { %v9020_v4 = vpack.c.bf16 %v3871_v0, %v3870_v16  ;;  %v7809_v16 = vld [vmem:[#allocation9 + $0x198] sm:$0xff]   ;;  %v7810_v7 = vld [vmem:[#allocation9 + $0x1e0] sm:$0xff]   ;;  %v7812_v0 = vld [vmem:[#allocation9 + $0x1e8] sm:$0xff]  }
 0x396   : > { %7196 = vmatprep.mubr.bf16.mxu1 %v9018_v54  ;;  %v7811_v38 = vld [vmem:[#allocation9 + $0x1a0] sm:$0xff]  }
 0x397   : > { %4537 = vmatmul.mubr.bf16.gmra.mrb[216].mxu0 %v9020_v4 }
 0x398   : > { %4544 = vmatprep.mubr.bf16.mxu0 %v9022_v42 }
 0x399   : > { %v3872_v48 = vld [vmem:[#allocation2 + $0x180] sm:$0xff] }
 0x39b   : > { %v4016_v14 = vld [vmem:[#allocation2 + $0x182] sm:$0xff]  ;;  %v4017_v9 = vld [vmem:[#allocation2 + $0x18a] sm:$0xff] }
 0x39c   : > { %v3873_v19 = vld [vmem:[#allocation2 + $0x188] sm:$0xff]  ;;  %v9027_v32 = vpack.c.bf16 %v4017_v9, %v4016_v14  ;;  %v9657_v9 = vld [vmem:[#allocation14_spill] sm:$0xff] }
 0x39d   : > { %v9029_v3 = vpack.c.bf16 %v3873_v19, %v3872_v48  ;;  %v7815_v48 = vld [vmem:[#allocation9 + $0x1b0] sm:$0xff]   ;;  %v7816_v14 = vld [vmem:[#allocation9 + $0x1f8] sm:$0xff]  }
 0x39e   : > { %7197 = vmatmul.mubr.bf16.gmra.mrb[124].mxu1 %v9027_v32  ;;  %v9658_v19 = vld [vmem:[#allocation22_spill] sm:$0xff] }
 0x39f   : > { %4545 = vmatmul.mubr.bf16.gmra.mrb[220].mxu0 %v9029_v3  ;;  %7216 = vmatprep.mubr.bf16.mxu1 %v4020_v22  ;;  %v7817_v22 = vld [vmem:[#allocation9 + $0x1b8] sm:$0xff]  }
 0x3a0   : > { %4890 = vmatprep.mubr.bf16.mxu0 %v3948_v50  ;;  %v7818_v50 = vld [vmem:[#allocation9 + $0x200] sm:$0xff]  }
 0x3a6   : > { %7217 = vmatmul.mubr.bf16.vlgmr.msra.gmra.mrb[96].mxu1 %v8779_v45  ;;  %v9654_v45 = vld [vmem:[#allocation15_spill] sm:$0xff] }
 0x3a7   : > { %4891 = vmatmul.mubr.bf16.vlgmr.msra.gmra.mrb[224].mxu0 %v3876_v30  ;;  %7220 = vmatprep.mubr.bf16.mxu1 %v8801_v27  ;;  %v9660_v30 = vld [vmem:[#allocation24_spill] sm:$0xff] }
 0x3a8   : > { %6873 = vmatpush3.bf16.msra.mxu1 %v7803_v17  ;;  %4898 = vmatprep.mubr.bf16.mxu0 %v9650_v28  ;;  %v7819_v17 = vld [vmem:[#allocation9 + $0x208] sm:$0xff]   ;;  %v7822_v28 = vld [vmem:[#allocation9 + $0x220] sm:$0xff]  }
 0x3a9   : > { %6874 = vmatprep.subr.bf16.mxu1 %v7804_v5  ;;  %v7820_v5 = vld [vmem:[#allocation9 + $0x210] sm:$0xff]  }
 0x3ac   : > { %6875 = vmatpush3.bf16.msra.mxu1 %v7805_v35  ;;  %v7821_v35 = vld [vmem:[#allocation9 + $0x218] sm:$0xff]  }
 0x3ad   : > { %6876 = vmatprep.subr.bf16.mxu1 %v7806_v13  ;;  %v7823_v13 = vld [vmem:[#allocation9 + $0x228] sm:$0xff]  }
 0x3ae   : > { %7221 = vmatmul.mubr.bf16.gmra.mrb[100].mxu1 %v9651_v33 }
 0x3af   : > { %4899 = vmatmul.mubr.bf16.gmra.mrb[228].mxu0 %v9652_v59  ;;  %7224 = vmatprep.mubr.bf16.mxu1 %v9653_v29 }
 0x3b0   : > { %4906 = vmatprep.mubr.bf16.mxu0 %v9654_v45  ;;  %6877 = vmatpush3.bf16.msra.mxu1 %v7807_v56 }
 0x3b1   : > { %6878 = vmatprep.subr.bf16.mxu1 %v7808_v40  ;;  %v7824_v40 = vld [vmem:[#allocation9 + $0x230] sm:$0xff]  }
 0x3b4   : > { %6879 = vmatpush3.bf16.msra.mxu1 %v7809_v16 }
 0x3b5   : > { %6880 = vmatprep.subr.bf16.mxu1 %v7810_v7 }
 0x3b6   : > { %7225 = vmatmul.mubr.bf16.gmra.mrb[104].mxu1 %v8871_v1 }
 0x3b7   : > { %4907 = vmatmul.mubr.bf16.gmra.mrb[232].mxu0 %v9655_v25  ;;  %7228 = vmatprep.mubr.bf16.mxu1 %v8886_v6 }
 0x3b8   : > { %4914 = vmatprep.mubr.bf16.mxu0 %v9656_v51  ;;  %6881 = vmatpush3.bf16.msra.mxu1 %v7811_v38 }
 0x3b9   : > { %6882 = vmatprep.subr.bf16.mxu1 %v7812_v0  ;;  %v7825_v0 = vld [vmem:[#allocation9 + $0x238] sm:$0xff]  }
 0x3bc   : > { %6883 = vmatpush3.bf16.msra.mxu1 %v7813_v46 }
 0x3bd   : > { %6884 = vmatprep.subr.bf16.mxu1 %v7814_v63 }
 0x3be   : > { %7229 = vmatmul.mubr.bf16.gmra.mrb[108].mxu1 %v8901_v20 }
 0x3bf   : > { %4915 = vmatmul.mubr.bf16.gmra.mrb[236].mxu0 %v9657_v9  ;;  %7232 = vmatprep.mubr.bf16.mxu1 %v8916_v62 }
 0x3c0   : > { %4922 = vmatprep.mubr.bf16.mxu0 %v9658_v19  ;;  %6885 = vmatpush3.bf16.msra.mxu1 %v7815_v48 }
 0x3c1   : > { %6886 = vmatprep.subr.bf16.mxu1 %v7816_v14 }
 0x3c4   : > { %6887 = vmatpush3.bf16.msra.mxu1 %v7817_v22 }
 0x3c5   : > { %7248 = vmatprep.subr.bf16.mxu1 %v7818_v50 }
 0x3c6   : > { %7233 = vmatmul.mubr.bf16.gmra.mrb[112].mxu1 %v8931_v10 }
 0x3c7   : > { %4923 = vmatmul.mubr.bf16.gmra.mrb[240].mxu0 %v9659_v53  ;;  %7236 = vmatprep.mubr.bf16.mxu1 %v8946_v37 }
 0x3c8   : > { %4930 = vmatprep.mubr.bf16.mxu0 %v9660_v30 }
 0x3ce   : > { %7237 = vmatmul.mubr.bf16.gmra.mrb[116].mxu1 %v8961_v11 }
 0x3cf   : > { %4931 = vmatmul.mubr.bf16.gmra.mrb[244].mxu0 %v8873_v24  ;;  %7240 = vmatprep.mubr.bf16.mxu1 %v8976_v61 }
 0x3d0   : > { %4938 = vmatprep.mubr.bf16.mxu0 %v8875_v8 }
 0x3d6   : > { %7241 = vmatmul.mubr.bf16.gmra.mrb[120].mxu1 %v8991_v34 }
 0x3d7   : > { %4939 = vmatmul.mubr.bf16.gmra.mrb[248].mxu0 %v8888_v43  ;;  %7244 = vmatprep.mubr.bf16.mxu1 %v9006_v41 }
 0x3d8   : > { %4946 = vmatprep.mubr.bf16.mxu0 %v8890_v58 }
 0x3de   : > { %7245 = vmatmul.mubr.bf16.gmra.mrb[124].mxu1 %v9018_v54 }
 0x3df   : > { %4947 = vmatmul.mubr.bf16.gmra.mrb[252].mxu0 %v8903_v12  ;;  %5452 = vmatprep.mubr.bf16.mxu1 %v9654_v45 }
 0x3e0   : > { %4954 = vmatprep.mubr.bf16.mxu0 %v8905_v39 }
 0x3e6   : > { %5453 = vmatmul.mubr.bf16.vlgmr.msra.gmra.mrb[128].mxu1 %v9655_v25 }
 0x3e7   : > { %4955 = vmatmul.mubr.bf16.gmra.mrb[0].mxu0 %v8918_v2  ;;  %5460 = vmatprep.mubr.bf16.mxu1 %v9656_v51 }
 0x3e8   : > { %7249 = vmatpush3.bf16.msra.mxu1 %v7818_v50  ;;  %4962 = vmatprep.mubr.bf16.mxu0 %v8920_v49 }
 0x3e9   : > { %7250 = vmatprep.subr.bf16.mxu1 %v7819_v17 }
 0x3ec   : > { %7251 = vmatpush3.bf16.msra.mxu1 %v7819_v17 }
 0x3ed   : > { %7252 = vmatprep.subr.bf16.mxu1 %v7820_v5 }
 0x3ee   : > { %5461 = vmatmul.mubr.bf16.gmra.mrb[132].mxu1 %v9657_v9 }
 0x3ef   : > { %4963 = vmatmul.mubr.bf16.gmra.mrb[4].mxu0 %v8933_v52  ;;  %5468 = vmatprep.mubr.bf16.mxu1 %v9658_v19 }
 0x3f0   : > { %4970 = vmatprep.mubr.bf16.mxu0 %v8935_v57  ;;  %7253 = vmatpush3.bf16.msra.mxu1 %v7820_v5 }
 0x3f1   : > { %7254 = vmatprep.subr.bf16.mxu1 %v7821_v35 }
 0x3f4   : > { %7255 = vmatpush3.bf16.msra.mxu1 %v7821_v35 }
 0x3f5   : > { %7256 = vmatprep.subr.bf16.mxu1 %v7822_v28 }
 0x3f6   : > { %5469 = vmatmul.mubr.bf16.gmra.mrb[136].mxu1 %v9659_v53 }
 0x3f7   : > { %4971 = vmatmul.mubr.bf16.gmra.mrb[8].mxu0 %v8948_v36  ;;  %5476 = vmatprep.mubr.bf16.mxu1 %v9660_v30 }
 0x3f8   : > { %4978 = vmatprep.mubr.bf16.mxu0 %v8950_v44  ;;  %7257 = vmatpush3.bf16.msra.mxu1 %v7822_v28 }
 0x3f9   : > { %7258 = vmatprep.subr.bf16.mxu1 %v7823_v13 }
 0x3fa   : > { %v6616_v56 = vpop.f32.mrb[160].mxu0 }
 0x3fb   : > { %v6617_v59 = vpop.f32.mrb[161].mxu0 }
 0x3fc   : > { %v9079_v45 = vadd.f32 %v6617_v59, %v6616_v56  ;;  %v6619_v16 = vpop.f32.mrb[162].mxu0  ;;  %7259 = vmatpush3.bf16.msra.mxu1 %v7823_v13 }
 0x3fd   : > { %v6620_v7 = vpop.f32.mrb[163].mxu0  ;;  %7260 = vmatprep.subr.bf16.mxu1 %v7824_v40 }
 0x3fe   : > { %v9081_v38 = vadd.f32 %v6620_v7, %v6619_v16  ;;  %5477 = vmatmul.mubr.bf16.gmra.mrb[140].mxu1 %v8873_v24 }
 0x3ff   : > { %4979 = vmatmul.mubr.bf16.gmra.mrb[12].mxu0 %v8963_v26  ;;  %5484 = vmatprep.mubr.bf16.mxu1 %v8875_v8 }
 0x400   : > { %4986 = vmatprep.mubr.bf16.mxu0 %v8965_v18  ;;  %7261 = vmatpush3.bf16.msra.mxu1 %v7824_v40 }
 0x401   : > { %7262 = vmatprep.subr.bf16.mxu1 %v7825_v0 }
 0x402   : > { %v6622_v25 = vpop.f32.mrb[164].mxu0 }
 0x403   : > { %v6623_v51 = vpop.f32.mrb[165].mxu0 }
 0x404   : > { %v9087_v46 = vadd.f32 %v6623_v51, %v6622_v25  ;;  %v6625_v63 = vpop.f32.mrb[166].mxu0  ;;  %7263 = vmatpush3.bf16.msra.mxu1 %v7825_v0 }
 0x405   : > { %v6626_v48 = vpop.f32.mrb[167].mxu0 }
 0x406   : > { %v9089_v14 = vadd.f32 %v6626_v48, %v6625_v63  ;;  %5485 = vmatmul.mubr.bf16.gmra.mrb[144].mxu1 %v8888_v43 }
 0x407   : > { %4987 = vmatmul.mubr.bf16.gmra.mrb[16].mxu0 %v8978_v15  ;;  %5492 = vmatprep.mubr.bf16.mxu1 %v8890_v58 }
 0x408   : > { %4994 = vmatprep.mubr.bf16.mxu0 %v8980_v23 }
 0x40a   : > { %v6628_v8 = vpop.f32.mrb[168].mxu0 }
 0x40b   : > { %v6629_v24 = vpop.f32.mrb[169].mxu0 }
 0x40c   : > { %v9095_v9 = vadd.f32 %v6629_v24, %v6628_v8  ;;  %v6631_v19 = vpop.f32.mrb[170].mxu0 }
 0x40d   : > { %v6632_v22 = vpop.f32.mrb[171].mxu0 }
 0x40e   : > { %v9097_v50 = vadd.f32 %v6632_v22, %v6631_v19  ;;  %5493 = vmatmul.mubr.bf16.gmra.mrb[148].mxu1 %v8903_v12 }
 0x40f   : > { %4995 = vmatmul.mubr.bf16.gmra.mrb[20].mxu0 %v8993_v21  ;;  %5500 = vmatprep.mubr.bf16.mxu1 %v8905_v39 }
 0x410   : > { %5002 = vmatprep.mubr.bf16.mxu0 %v8995_v47 }
 0x412   : > { %v6634_v43 = vpop.f32.mrb[172].mxu0 }
 0x413   : > { %v6635_v58 = vpop.f32.mrb[173].mxu0 }
 0x414   : > { %v9103_v53 = vadd.f32 %v6635_v58, %v6634_v43  ;;  %v6637_v30 = vpop.f32.mrb[174].mxu0 }
 0x415   : > { %v6638_v17 = vpop.f32.mrb[175].mxu0 }
 0x416   : > { %v9105_v5 = vadd.f32 %v6638_v17, %v6637_v30  ;;  %5501 = vmatmul.mubr.bf16.gmra.mrb[152].mxu1 %v8918_v2 }
 0x417   : > { %5003 = vmatmul.mubr.bf16.gmra.mrb[24].mxu0 %v9008_v31  ;;  %5508 = vmatprep.mubr.bf16.mxu1 %v8920_v49 }
 0x418   : > { %5010 = vmatprep.mubr.bf16.mxu0 %v9010_v60 }
 0x41a   : > { %v6640_v12 = vpop.f32.mrb[176].mxu0 }
 0x41b   : > { %v6641_v39 = vpop.f32.mrb[177].mxu0 }
 0x41c   : > { %v9111_v35 = vadd.f32 %v6641_v39, %v6640_v12  ;;  %v6643_v28 = vpop.f32.mrb[178].mxu0 }
 0x41d   : > { %v6644_v13 = vpop.f32.mrb[179].mxu0 }
 0x41e   : > { %v9113_v56 = vadd.f32 %v6644_v13, %v6643_v28  ;;  %5509 = vmatmul.mubr.bf16.gmra.mrb[156].mxu1 %v8933_v52 }
 0x41f   : > { %5011 = vmatmul.mubr.bf16.gmra.mrb[28].mxu0 %v9020_v4  ;;  %5516 = vmatprep.mubr.bf16.mxu1 %v8935_v57 }
 0x422   : > { %v6646_v2 = vpop.f32.mrb[180].mxu0 }
 0x423   : > { %v6647_v40 = vpop.f32.mrb[181].mxu0 }
 0x424   : > { %v9118_v59 = vadd.f32 %v6647_v40, %v6646_v2  ;;  %v6649_v49 = vpop.f32.mrb[182].mxu0 }
 0x425   : > { %v6650_v16 = vpop.f32.mrb[183].mxu0 }
 0x426   : > { %v9120_v7 = vadd.f32 %v6650_v16, %v6649_v49  ;;  %5517 = vmatmul.mubr.bf16.gmra.mrb[160].mxu1 %v8948_v36 }
 0x427   : > { %5524 = vmatprep.mubr.bf16.mxu1 %v8950_v44 }
 0x42a   : > { %v6652_v0 = vpop.f32.mrb[184].mxu0 }
 0x42b   : > { %v6653_v25 = vpop.f32.mrb[185].mxu0 }
 0x42c   : > { %v9124_v51 = vadd.f32 %v6653_v25, %v6652_v0  ;;  %v6655_v52 = vpop.f32.mrb[186].mxu0  ;;  %v3947_v0 = vld [vmem:[#allocation2 + $0x1a1] sm:$0xff] }
 0x42d   : > { %v6656_v63 = vpop.f32.mrb[187].mxu0 }
 0x42e   : > { %v9126_v48 = vadd.f32 %v6656_v63, %v6655_v52  ;;  %5525 = vmatmul.mubr.bf16.gmra.mrb[164].mxu1 %v8963_v26 }
 0x42f   : > { %5532 = vmatprep.mubr.bf16.mxu1 %v8965_v18 }
 0x432   : > { %v6658_v57 = vpop.f32.mrb[188].mxu0 }
 0x433   : > { %v6659_v8 = vpop.f32.mrb[189].mxu0 }
 0x434   : > { %v9130_v24 = vadd.f32 %v6659_v8, %v6658_v57  ;;  %v6661_v19 = vpop.f32.mrb[190].mxu0 }
 0x435   : > { %v6662_v36 = vpop.f32.mrb[191].mxu0 }
 0x436   : > { %v9132_v22 = vadd.f32 %v6662_v36, %v6661_v19  ;;  %5533 = vmatmul.mubr.bf16.gmra.mrb[168].mxu1 %v8978_v15  ;;  %v3874_v19 = vld [vmem:[#allocation2 + $0x198] sm:$0xff] }
 0x437   : > { %5540 = vmatprep.mubr.bf16.mxu1 %v8980_v23 }
 0x43a   : > { %v6664_v44 = vpop.f32.mrb[192].mxu0 }
 0x43b   : > { %v6665_v43 = vpop.f32.mrb[193].mxu0 }
 0x43c   : > { %v9136_v58 = vadd.f32 %v6665_v43, %v6664_v44  ;;  %v6667_v30 = vpop.f32.mrb[194].mxu0 }
 0x43d   : > { %v6668_v26 = vpop.f32.mrb[195].mxu0 }
 0x43e   : > { %v9138_v17 = vadd.f32 %v6668_v26, %v6667_v30  ;;  %5541 = vmatmul.mubr.bf16.gmra.mrb[172].mxu1 %v8993_v21 }
 0x43f   : > { %5548 = vmatprep.mubr.bf16.mxu1 %v8995_v47  ;;  %v3946_v47 = vld [vmem:[#allocation2 + $0x199] sm:$0xff] }
 0x442   : > { %v6670_v18 = vpop.f32.mrb[196].mxu0 }
 0x443   : > { %v6671_v12 = vpop.f32.mrb[197].mxu0 }
 0x444   : > { %v9142_v39 = vadd.f32 %v6671_v12, %v6670_v18  ;;  %v6673_v28 = vpop.f32.mrb[198].mxu0 }
 0x445   : > { %v6674_v15 = vpop.f32.mrb[199].mxu0 }
 0x446   : > { %v9144_v13 = vadd.f32 %v6674_v15, %v6673_v28  ;;  %5549 = vmatmul.mubr.bf16.gmra.mrb[176].mxu1 %v9008_v31 }
 0x447   : > { %5556 = vmatprep.mubr.bf16.mxu1 %v9010_v60  ;;  %v3965_v60 = vpack.c.bf16 %v3947_v0, %v3946_v47 }
 0x44a   : > { %v6676_v23 = vpop.f32.mrb[200].mxu0 }
 0x44b   : > { %v6677_v2 = vpop.f32.mrb[201].mxu0 }
 0x44c   : > { %v9148_v40 = vadd.f32 %v6677_v2, %v6676_v23  ;;  %v6679_v49 = vpop.f32.mrb[202].mxu0 }
 0x44d   : > { %v6680_v21 = vpop.f32.mrb[203].mxu0 }
 0x44e   : > { %v9150_v16 = vadd.f32 %v6680_v21, %v6679_v49  ;;  %5557 = vmatmul.mubr.bf16.gmra.mrb[180].mxu1 %v9020_v4  ;;  %v3893_v4 = vpack.c.bf16 %v9033_v55, %v3874_v19 }
 0x44f   : > { %5564 = vmatprep.mubr.bf16.mxu1 %v9022_v42 }
 0x452   : > { %v6682_v25 = vpop.f32.mrb[204].mxu0 }
 0x453   : > { %v6683_v52 = vpop.f32.mrb[205].mxu0 }
 0x454   : > { %v9154_v63 = vadd.f32 %v6683_v52, %v6682_v25  ;;  %v6685_v31 = vpop.f32.mrb[206].mxu0 }
 0x455   : > { %v6686_v57 = vpop.f32.mrb[207].mxu0 }
 0x456   : > { %v9156_v8 = vadd.f32 %v6686_v57, %v6685_v31  ;;  %5565 = vmatmul.mubr.bf16.gmra.mrb[184].mxu1 %v9029_v3 }
 0x457   : > { %5572 = vmatprep.mubr.bf16.mxu1 %v3965_v60 }
 0x45a   : > { %v6688_v36 = vpop.f32.mrb[208].mxu0 }
 0x45b   : > { %v6689_v44 = vpop.f32.mrb[209].mxu0 }
 0x45c   : > { %v9160_v42 = vadd.f32 %v6689_v44, %v6688_v36  ;;  %v6691_v43 = vpop.f32.mrb[210].mxu0 }
 0x45d   : > { %v6692_v30 = vpop.f32.mrb[211].mxu0 }
 0x45e   : > { %v9162_v26 = vadd.f32 %v6692_v30, %v6691_v43  ;;  %5573 = vmatmul.mubr.bf16.gmra.mrb[188].mxu1 %v3893_v4 }
 0x45f   : > { %7264 = vmatprep.mubr.bf16.mxu1 %v8801_v27 }
 0x462   : > { %v6694_v18 = vpop.f32.mrb[212].mxu0 }
 0x463   : > { %v6695_v12 = vpop.f32.mrb[213].mxu0 }
 0x464   : > { %v9165_v28 = vadd.f32 %v6695_v12, %v6694_v18  ;;  %v6697_v3 = vpop.f32.mrb[214].mxu0 }
 0x465   : > { %v6698_v15 = vpop.f32.mrb[215].mxu0 }
 0x466   : > { %v9167_v23 = vadd.f32 %v6698_v15, %v6697_v3  ;;  %7265 = vmatmul.mubr.bf16.vlgmr.msra.gmra.mrb[96].mxu1 %v9651_v33 }
 0x467   : > { %7268 = vmatprep.mubr.bf16.mxu1 %v9653_v29 }
 0x46a   : > { %v6700_v55 = vpop.f32.mrb[216].mxu0 }
 0x46b   : > { %v6701_v2 = vpop.f32.mrb[217].mxu0 }
 0x46c   : > { %v9171_v49 = vadd.f32 %v6701_v2, %v6700_v55  ;;  %v6703_v21 = vpop.f32.mrb[218].mxu0 }
 0x46d   : > { %v6704_v47 = vpop.f32.mrb[219].mxu0 }
 0x46e   : > { %v9173_v0 = vadd.f32 %v6704_v47, %v6703_v21  ;;  %7269 = vmatmul.mubr.bf16.gmra.mrb[100].mxu1 %v8871_v1 }
 0x46f   : > { %7272 = vmatprep.mubr.bf16.mxu1 %v8886_v6 }
 0x472   : > { %v6706_v27 = vpop.f32.mrb[220].mxu0 }
 0x473   : > { %v6707_v25 = vpop.f32.mrb[221].mxu0 }
 0x474   : > { %v9177_v52 = vadd.f32 %v6707_v25, %v6706_v27  ;;  %v6709_v31 = vpop.f32.mrb[222].mxu0 }
 0x475   : > { %v6710_v33 = vpop.f32.mrb[223].mxu0 }
 0x476   : > { %v9179_v60 = vadd.f32 %v6710_v33, %v6709_v31  ;;  %7273 = vmatmul.mubr.bf16.gmra.mrb[104].mxu1 %v8901_v20 }
 0x477   : > { %7276 = vmatprep.mubr.bf16.mxu1 %v8916_v62 }
 0x47a   : > { %v6752_v29 = vpop.f32.mrb[224].mxu0 }
 0x47b   : > { %v6753_v57 = vpop.f32.mrb[225].mxu0 }
 0x47c   : > { %v6754_v19 = vadd.f32 %v6753_v57, %v6752_v29  ;;  %v6755_v36 = vpop.f32.mrb[226].mxu0 }
 0x47d   : > { %v6756_v44 = vpop.f32.mrb[227].mxu0 }
 0x47e   : > { %v9184_v1 = vadd.f32 %v6754_v19, %v9079_v45  ;;  %v6757_v6 = vadd.f32 %v6756_v44, %v6755_v36  ;;  %7277 = vmatmul.mubr.bf16.gmra.mrb[108].mxu1 %v8931_v10 }
 0x47f   : > { %7280 = vmatprep.mubr.bf16.mxu1 %v8946_v37 }
 0x480   : > { %v9188_v4 = vadd.f32 %v6757_v6, %v9081_v38 }
 0x482   : > { %v6758_v43 = vpop.f32.mrb[228].mxu0 }
 0x483   : > { %v6759_v20 = vpop.f32.mrb[229].mxu0 }
 0x484   : > { %v6760_v30 = vadd.f32 %v6759_v20, %v6758_v43  ;;  %v6761_v62 = vpop.f32.mrb[230].mxu0 }
 0x485   : > { %v6762_v18 = vpop.f32.mrb[231].mxu0 }
 0x486   : > { %v9192_v12 = vadd.f32 %v6760_v30, %v9087_v46  ;;  %v6763_v3 = vadd.f32 %v6762_v18, %v6761_v62  ;;  %7281 = vmatmul.mubr.bf16.gmra.mrb[112].mxu1 %v8961_v11 }
 0x487   : > { %7284 = vmatprep.mubr.bf16.mxu1 %v8976_v61 }
 0x488   : > { %v9196_v45 = vadd.f32 %v6763_v3, %v9089_v14 }
 0x48a   : > { %v6764_v10 = vpop.f32.mrb[232].mxu0 }
 0x48b   : > { %v6765_v38 = vpop.f32.mrb[233].mxu0 }
 0x48c   : > { %v6766_v15 = vadd.f32 %v6765_v38, %v6764_v10  ;;  %v6767_v37 = vpop.f32.mrb[234].mxu0 }
 0x48d   : > { %v6768_v55 = vpop.f32.mrb[235].mxu0 }
 0x48e   : > { %v9200_v2 = vadd.f32 %v6766_v15, %v9095_v9  ;;  %v6769_v21 = vadd.f32 %v6768_v55, %v6767_v37  ;;  %7285 = vmatmul.mubr.bf16.gmra.mrb[116].mxu1 %v8991_v34  ;;  %v4018_v34 = vld [vmem:[#allocation2 + $0x19a] sm:$0xff] }
 0x48f   : > { %7288 = vmatprep.mubr.bf16.mxu1 %v9006_v41 }
 0x490   : > { %v9204_v46 = vadd.f32 %v6769_v21, %v9097_v50  ;;  %v4019_v50 = vld [vmem:[#allocation2 + $0x1a2] sm:$0xff] }
 0x491   : > { %v4037_v29 = vpack.c.bf16 %v4019_v50, %v4018_v34 }
 0x492   : > { %v6770_v11 = vpop.f32.mrb[236].mxu0 }
 0x493   : > { %v6771_v14 = vpop.f32.mrb[237].mxu0 }
 0x494   : > { %v6772_v47 = vadd.f32 %v6771_v14, %v6770_v11  ;;  %v6773_v61 = vpop.f32.mrb[238].mxu0 }
 0x495   : > { %v6774_v27 = vpop.f32.mrb[239].mxu0 }
 0x496   : > { %v9208_v25 = vadd.f32 %v6772_v47, %v9103_v53  ;;  %v6775_v31 = vadd.f32 %v6774_v27, %v6773_v61  ;;  %7289 = vmatmul.mubr.bf16.gmra.mrb[120].mxu1 %v9018_v54 }
 0x497   : > { %7292 = vmatprep.mubr.bf16.mxu1 %v9027_v32 }
 0x498   : > { %v9212_v9 = vadd.f32 %v6775_v31, %v9105_v5 }
 0x49a   : > { %v6776_v33 = vpop.f32.mrb[240].mxu0 }
 0x49b   : > { %v6777_v41 = vpop.f32.mrb[241].mxu0 }
 0x49c   : > { %v6778_v57 = vadd.f32 %v6777_v41, %v6776_v33  ;;  %v6779_v19 = vpop.f32.mrb[242].mxu0 }
 0x49d   : > { %v6780_v36 = vpop.f32.mrb[243].mxu0 }
 0x49e   : > { %v9216_v44 = vadd.f32 %v6778_v57, %v9111_v35  ;;  %v6781_v53 = vadd.f32 %v6780_v36, %v6779_v19  ;;  %7293 = vmatmul.mubr.bf16.gmra.mrb[124].mxu1 %v4037_v29 }
 0x4a0   : > { %v9219_v54 = vadd.f32 %v6781_v53, %v9113_v56 }
 0x4a2   : > { %v6782_v5 = vpop.f32.mrb[244].mxu0 }
 0x4a3   : > { %v6783_v6 = vpop.f32.mrb[245].mxu0 }
 0x4a4   : > { %v6784_v43 = vadd.f32 %v6783_v6, %v6782_v5  ;;  %v6785_v32 = vpop.f32.mrb[246].mxu0 }
 0x4a5   : > { %v6786_v20 = vpop.f32.mrb[247].mxu0 }
 0x4a6   : > { %v9222_v30 = vadd.f32 %v6784_v43, %v9118_v59  ;;  %v6787_v62 = vadd.f32 %v6786_v20, %v6785_v32 }
 0x4a8   : > { %v9225_v18 = vadd.f32 %v6787_v62, %v9120_v7 }
 0x4aa   : > { %v6788_v3 = vpop.f32.mrb[248].mxu0 }
 0x4ab   : > { %v6789_v35 = vpop.f32.mrb[249].mxu0 }
 0x4ac   : > { %v6790_v10 = vadd.f32 %v6789_v35, %v6788_v3  ;;  %v6791_v38 = vpop.f32.mrb[250].mxu0 }
 0x4ad   : > { %v6792_v15 = vpop.f32.mrb[251].mxu0 }
 0x4ae   : > { %v9228_v56 = vadd.f32 %v6790_v10, %v9124_v51  ;;  %v6793_v37 = vadd.f32 %v6792_v15, %v6791_v38 }
 0x4b0   : > { %v9231_v55 = vadd.f32 %v6793_v37, %v9126_v48 }
 0x4b2   : > { %v6794_v21 = vpop.f32.mrb[252].mxu0 }
 0x4b3   : > { %v6795_v11 = vpop.f32.mrb[253].mxu0 }
 0x4b4   : > { %v6796_v59 = vadd.f32 %v6795_v11, %v6794_v21  ;;  %v6797_v14 = vpop.f32.mrb[254].mxu0 }
 0x4b5   : > { %v6798_v47 = vpop.f32.mrb[255].mxu0 }
 0x4b6   : > { %v9234_v7 = vadd.f32 %v6796_v59, %v9130_v24  ;;  %v6799_v61 = vadd.f32 %v6798_v47, %v6797_v14 }
 0x4b8   : > { %v9237_v27 = vadd.f32 %v6799_v61, %v9132_v22 }
 0x4b9   : > { %v6888_v31 = vpop.f32.mrb[128].mxu1 }
 0x4ba   : > { %v6800_v34 = vpop.f32.mrb[0].mxu0  ;;  %v6889_v51 = vpop.f32.mrb[129].mxu1 }
 0x4bb   : > { %v6801_v50 = vpop.f32.mrb[1].mxu0  ;;  %v6890_v33 = vadd.f32 %v6889_v51, %v6888_v31  ;;  %v6891_v48 = vpop.f32.mrb[130].mxu1 }
 0x4bc   : > { %v6802_v41 = vadd.f32 %v6801_v50, %v6800_v34  ;;  %v6803_v29 = vpop.f32.mrb[2].mxu0  ;;  %v6892_v57 = vpop.f32.mrb[131].mxu1 }
 0x4bd   : > { %v6804_v19 = vpop.f32.mrb[3].mxu0  ;;  %v6893_v53 = vadd.f32 %v6892_v57, %v6891_v48  ;;  %v9243_v5 = vadd.f32 %v9184_v1, %v6890_v33 }
 0x4be   : > { %v9240_v36 = vadd.f32 %v6802_v41, %v9136_v58  ;;  %v6805_v24 = vadd.f32 %v6804_v19, %v6803_v29 }
 0x4bf   : > { %v9249_v6 = vadd.f32 %v9188_v4, %v6893_v53 }
 0x4c0   : > { %v9246_v22 = vadd.f32 %v6805_v24, %v9138_v17 }
 0x4c1   : > { %v6894_v43 = vpop.f32.mrb[132].mxu1 }
 0x4c2   : > { %v6806_v32 = vpop.f32.mrb[4].mxu0  ;;  %v6895_v20 = vpop.f32.mrb[133].mxu1 }
 0x4c3   : > { %v6807_v62 = vpop.f32.mrb[5].mxu0  ;;  %v6896_v3 = vadd.f32 %v6895_v20, %v6894_v43  ;;  %v6897_v10 = vpop.f32.mrb[134].mxu1 }
 0x4c4   : > { %v6808_v35 = vadd.f32 %v6807_v62, %v6806_v32  ;;  %v6809_v58 = vpop.f32.mrb[6].mxu0  ;;  %v6898_v38 = vpop.f32.mrb[135].mxu1 }
 0x4c5   : > { %v6810_v15 = vpop.f32.mrb[7].mxu0  ;;  %v6899_v1 = vadd.f32 %v6898_v38, %v6897_v10  ;;  %v9255_v17 = vadd.f32 %v9192_v12, %v6896_v3 }
 0x4c6   : > { %v9252_v37 = vadd.f32 %v6808_v35, %v9142_v39  ;;  %v6811_v21 = vadd.f32 %v6810_v15, %v6809_v58 }
 0x4c7   : > { %v9261_v11 = vadd.f32 %v9196_v45, %v6899_v1 }
 0x4c8   : > { %v9258_v4 = vadd.f32 %v6811_v21, %v9144_v13 }
 0x4c9   : > { %v6900_v59 = vpop.f32.mrb[136].mxu1 }
 0x4ca   : > { %v6812_v14 = vpop.f32.mrb[8].mxu0  ;;  %v6901_v47 = vpop.f32.mrb[137].mxu1 }
 0x4cb   : > { %v6813_v61 = vpop.f32.mrb[9].mxu0  ;;  %v6902_v31 = vadd.f32 %v6901_v47, %v6900_v59  ;;  %v6903_v51 = vpop.f32.mrb[138].mxu1 }
 0x4cc   : > { %v6814_v34 = vadd.f32 %v6813_v61, %v6812_v14  ;;  %v6815_v39 = vpop.f32.mrb[10].mxu0  ;;  %v6904_v50 = vpop.f32.mrb[139].mxu1 }
 0x4cd   : > { %v6816_v33 = vpop.f32.mrb[11].mxu0  ;;  %v6905_v12 = vadd.f32 %v6904_v50, %v6903_v51  ;;  %v9267_v13 = vadd.f32 %v9200_v2, %v6902_v31 }
 0x4ce   : > { %v9264_v41 = vadd.f32 %v6814_v34, %v9148_v40  ;;  %v6817_v48 = vadd.f32 %v6816_v33, %v6815_v39 }
 0x4cf   : > { %v9273_v29 = vadd.f32 %v9204_v46, %v6905_v12 }
 0x4d0   : > { %v9270_v45 = vadd.f32 %v6817_v48, %v9150_v16 }
 0x4d1   : > { %v6906_v57 = vpop.f32.mrb[140].mxu1 }
 0x4d2   : > { %v6818_v19 = vpop.f32.mrb[12].mxu0  ;;  %v6907_v53 = vpop.f32.mrb[141].mxu1 }
 0x4d3   : > { %v6819_v24 = vpop.f32.mrb[13].mxu0  ;;  %v6908_v43 = vadd.f32 %v6907_v53, %v6906_v57  ;;  %v6909_v20 = vpop.f32.mrb[142].mxu1 }
 0x4d4   : > { %v6820_v32 = vadd.f32 %v6819_v24, %v6818_v19  ;;  %v6821_v40 = vpop.f32.mrb[14].mxu0  ;;  %v6910_v62 = vpop.f32.mrb[143].mxu1 }
 0x4d5   : > { %v6822_v3 = vpop.f32.mrb[15].mxu0  ;;  %v6911_v2 = vadd.f32 %v6910_v62, %v6909_v20  ;;  %v9279_v16 = vadd.f32 %v9208_v25, %v6908_v43 }
 0x4d6   : > { %v9276_v35 = vadd.f32 %v6820_v32, %v9154_v63  ;;  %v6823_v10 = vadd.f32 %v6822_v3, %v6821_v40 }
 0x4d7   : > { %v9285_v58 = vadd.f32 %v9212_v9, %v6911_v2 }
 0x4d8   : > { %v9282_v46 = vadd.f32 %v6823_v10, %v9156_v8 }
 0x4d9   : > { %v6912_v38 = vpop.f32.mrb[144].mxu1 }
 0x4da   : > { %v6824_v15 = vpop.f32.mrb[16].mxu0  ;;  %v6913_v1 = vpop.f32.mrb[145].mxu1 }
 0x4db   : > { %v6825_v21 = vpop.f32.mrb[17].mxu0  ;;  %v6914_v59 = vadd.f32 %v6913_v1, %v6912_v38  ;;  %v6915_v47 = vpop.f32.mrb[146].mxu1 }
 0x4dc   : > { %v6826_v14 = vadd.f32 %v6825_v21, %v6824_v15  ;;  %v6827_v63 = vpop.f32.mrb[18].mxu0  ;;  %v6916_v61 = vpop.f32.mrb[147].mxu1 }
 0x4dd   : > { %v6828_v31 = vpop.f32.mrb[19].mxu0  ;;  %v6917_v25 = vadd.f32 %v6916_v61, %v6915_v47  ;;  %v9291_v8 = vadd.f32 %v9216_v44, %v6914_v59 }
 0x4de   : > { %v9288_v34 = vadd.f32 %v6826_v14, %v9160_v42  ;;  %v6829_v51 = vadd.f32 %v6828_v31, %v6827_v63 }
 0x4df   : > { %v9297_v39 = vadd.f32 %v9219_v54, %v6917_v25 }
 0x4e0   : > { %v9294_v9 = vadd.f32 %v6829_v51, %v9162_v26 }
 0x4e1   : > { %v6918_v50 = vpop.f32.mrb[148].mxu1 }
 0x4e2   : > { %v6830_v33 = vpop.f32.mrb[20].mxu0  ;;  %v6919_v12 = vpop.f32.mrb[149].mxu1 }
 0x4e3   : > { %v6831_v48 = vpop.f32.mrb[21].mxu0  ;;  %v6920_v57 = vadd.f32 %v6919_v12, %v6918_v50  ;;  %v6921_v53 = vpop.f32.mrb[150].mxu1 }
 0x4e4   : > { %v6832_v19 = vadd.f32 %v6831_v48, %v6830_v33  ;;  %v6833_v42 = vpop.f32.mrb[22].mxu0  ;;  %v6922_v24 = vpop.f32.mrb[151].mxu1 }
 0x4e5   : > { %v6834_v43 = vpop.f32.mrb[23].mxu0  ;;  %v6923_v44 = vadd.f32 %v6922_v24, %v6921_v53  ;;  %v9303_v26 = vadd.f32 %v9222_v30, %v6920_v57 }
 0x4e6   : > { %v9300_v32 = vadd.f32 %v6832_v19, %v9165_v28  ;;  %v6835_v20 = vadd.f32 %v6834_v43, %v6833_v42 }
 0x4e7   : > { %v9309_v40 = vadd.f32 %v9225_v18, %v6923_v44 }
 0x4e8   : > { %v9306_v54 = vadd.f32 %v6835_v20, %v9167_v23 }
 0x4e9   : > { %v6924_v62 = vpop.f32.mrb[152].mxu1 }
 0x4ea   : > { %v6836_v3 = vpop.f32.mrb[24].mxu0  ;;  %v6925_v2 = vpop.f32.mrb[153].mxu1 }
 0x4eb   : > { %v6837_v10 = vpop.f32.mrb[25].mxu0  ;;  %v6926_v38 = vadd.f32 %v6925_v2, %v6924_v62  ;;  %v6927_v1 = vpop.f32.mrb[154].mxu1 }
 0x4ec   : > { %v6838_v15 = vadd.f32 %v6837_v10, %v6836_v3  ;;  %v6839_v28 = vpop.f32.mrb[26].mxu0  ;;  %v6928_v21 = vpop.f32.mrb[155].mxu1 }
 0x4ed   : > { %v6840_v59 = vpop.f32.mrb[27].mxu0  ;;  %v6929_v30 = vadd.f32 %v6928_v21, %v6927_v1  ;;  %v9315_v23 = vadd.f32 %v9228_v56, %v6926_v38 }
 0x4ee   : > { %v9312_v14 = vadd.f32 %v6838_v15, %v9171_v49  ;;  %v6841_v47 = vadd.f32 %v6840_v59, %v6839_v28 }
 0x4ef   : > { %v9321_v63 = vadd.f32 %v9231_v55, %v6929_v30 }
 0x4f0   : > { %v9318_v18 = vadd.f32 %v6841_v47, %v9173_v0 }
 0x4f1   : > { %v6930_v61 = vpop.f32.mrb[156].mxu1 }
 0x4f2   : > { %v6842_v31 = vpop.f32.mrb[28].mxu0  ;;  %v6931_v25 = vpop.f32.mrb[157].mxu1 }
 0x4f3   : > { %v6843_v51 = vpop.f32.mrb[29].mxu0  ;;  %v6932_v50 = vadd.f32 %v6931_v25, %v6930_v61  ;;  %v6933_v12 = vpop.f32.mrb[158].mxu1 }
 0x4f4   : > { %v6844_v33 = vadd.f32 %v6843_v51, %v6842_v31  ;;  %v6845_v49 = vpop.f32.mrb[30].mxu0  ;;  %v6934_v48 = vpop.f32.mrb[159].mxu1 }
 0x4f5   : > { %v6846_v57 = vpop.f32.mrb[31].mxu0  ;;  %v6935_v56 = vadd.f32 %v6934_v48, %v6933_v12  ;;  %v9327_v0 = vadd.f32 %v9234_v7, %v6932_v50 }
 0x4f6   : > { %v9324_v19 = vadd.f32 %v6844_v33, %v9177_v52  ;;  %v6847_v53 = vadd.f32 %v6846_v57, %v6845_v49 }
 0x4f7   : > { %v9333_v42 = vadd.f32 %v9237_v27, %v6935_v56 }
 0x4f8   : > { %v9330_v55 = vadd.f32 %v6847_v53, %v9179_v60 }
 0x4f9   : > { %v6936_v24 = vpop.f32.mrb[160].mxu1 }
 0x4fa   : > { %v6937_v43 = vpop.f32.mrb[161].mxu1 }
 0x4fb   : > { %v6938_v44 = vadd.f32 %v6937_v43, %v6936_v24  ;;  %v6939_v20 = vpop.f32.mrb[162].mxu1 }
 0x4fc   : > { %v6940_v62 = vpop.f32.mrb[163].mxu1 }
 0x4fd   : > { %v6941_v3 = vadd.f32 %v6940_v62, %v6939_v20  ;;  %v9336_v52 = vadd.f32 %v9240_v36, %v6938_v44 }
 0x4ff   : > { %v9339_v2 = vadd.f32 %v9246_v22, %v6941_v3 }
 0x501   : > { %v6942_v7 = vpop.f32.mrb[164].mxu1 }
 0x502   : > { %v6943_v10 = vpop.f32.mrb[165].mxu1 }
 0x503   : > { %v6944_v38 = vadd.f32 %v6943_v10, %v6942_v7  ;;  %v6945_v60 = vpop.f32.mrb[166].mxu1 }
 0x504   : > { %v6946_v15 = vpop.f32.mrb[167].mxu1 }
 0x505   : > { %v6947_v1 = vadd.f32 %v6946_v15, %v6945_v60  ;;  %v9342_v27 = vadd.f32 %v9252_v37, %v6944_v38 }
 0x507   : > { %v9345_v28 = vadd.f32 %v9258_v4, %v6947_v1 }
 0x509   : > { %v6948_v21 = vpop.f32.mrb[168].mxu1 }
 0x50a   : > { %v6949_v59 = vpop.f32.mrb[169].mxu1 }
 0x50b   : > { %v6950_v30 = vadd.f32 %v6949_v59, %v6948_v21  ;;  %v6951_v36 = vpop.f32.mrb[170].mxu1 }
 0x50c   : > { %v6952_v47 = vpop.f32.mrb[171].mxu1 }
 0x50d   : > { %v6953_v61 = vadd.f32 %v6952_v47, %v6951_v36  ;;  %v9348_v22 = vadd.f32 %v9264_v41, %v6950_v30 }
 0x50f   : > { %v9351_v31 = vadd.f32 %v9270_v45, %v6953_v61 }
 0x511   : > { %v6954_v25 = vpop.f32.mrb[172].mxu1 }
 0x512   : > { %v6955_v51 = vpop.f32.mrb[173].mxu1 }
 0x513   : > { %v6956_v50 = vadd.f32 %v6955_v51, %v6954_v25  ;;  %v6957_v37 = vpop.f32.mrb[174].mxu1 }
 0x514   : > { %v6958_v33 = vpop.f32.mrb[175].mxu1 }
 0x515   : > { %v6959_v12 = vadd.f32 %v6958_v33, %v6957_v37  ;;  %v9354_v4 = vadd.f32 %v9276_v35, %v6956_v50 }
 0x517   : > { %v9357_v49 = vadd.f32 %v9282_v46, %v6959_v12 }
 0x519   : > { %v6960_v48 = vpop.f32.mrb[176].mxu1 }
 0x51a   : > { %v6961_v57 = vpop.f32.mrb[177].mxu1 }
 0x51b   : > { %v6962_v56 = vadd.f32 %v6961_v57, %v6960_v48  ;;  %v6963_v41 = vpop.f32.mrb[178].mxu1 }
 0x51c   : > { %v6964_v53 = vpop.f32.mrb[179].mxu1 }
 0x51d   : > { %v6965_v24 = vadd.f32 %v6964_v53, %v6963_v41  ;;  %v9360_v45 = vadd.f32 %v9288_v34, %v6962_v56 }
 0x51f   : > { %v9363_v43 = vadd.f32 %v9294_v9, %v6965_v24 }
 0x521   : > { %v6966_v44 = vpop.f32.mrb[180].mxu1 }
 0x522   : > { %v6967_v20 = vpop.f32.mrb[181].mxu1 }
 0x523   : > { %v6968_v62 = vadd.f32 %v6967_v20, %v6966_v44  ;;  %v6969_v35 = vpop.f32.mrb[182].mxu1 }
 0x524   : > { %v6970_v3 = vpop.f32.mrb[183].mxu1 }
 0x525   : > { %v6971_v7 = vadd.f32 %v6970_v3, %v6969_v35  ;;  %v9366_v46 = vadd.f32 %v9300_v32, %v6968_v62 }
 0x527   : > { %v9369_v10 = vadd.f32 %v9306_v54, %v6971_v7 }
 0x529   : > { %v6972_v38 = vpop.f32.mrb[184].mxu1 }
 0x52a   : > { %v6973_v60 = vpop.f32.mrb[185].mxu1 }
 0x52b   : > { %v6974_v15 = vadd.f32 %v6973_v60, %v6972_v38  ;;  %v6975_v34 = vpop.f32.mrb[186].mxu1 }
 0x52c   : > { %v6976_v1 = vpop.f32.mrb[187].mxu1 }
 0x52d   : > { %v6977_v21 = vadd.f32 %v6976_v1, %v6975_v34  ;;  %v9372_v9 = vadd.f32 %v9312_v14, %v6974_v15  ;;  %v9386_v14 = vld [vmem:[%s9572_s4] ss:$0 sm:$0xff] }
 0x52f   : > { %v9375_v59 = vadd.f32 %v9318_v18, %v6977_v21 }
 0x531   : > { %v6978_v30 = vpop.f32.mrb[188].mxu1 }
 0x532   : > { %v6979_v36 = vpop.f32.mrb[189].mxu1 }
 0x533   : > { %v6980_v47 = vadd.f32 %v6979_v36, %v6978_v30  ;;  %v6981_v32 = vpop.f32.mrb[190].mxu1 }
 0x534   : > { %v6982_v61 = vpop.f32.mrb[191].mxu1 }
 0x535   : > { %v6983_v25 = vadd.f32 %v6982_v61, %v6981_v32  ;;  %v9378_v54 = vadd.f32 %v9324_v19, %v6980_v47 }
 0x537   : > { %v9381_v51 = vadd.f32 %v9330_v55, %v6983_v25 }
 0x539   : > { %v7266_v50 = vpop.f32.mrb[96].mxu1 }
 0x53a   : > { %v7426_v18 = vadd.f32 %v9255_v17, %v7266_v50  ;;  %v5615_v37 = vpop.f32.mrb[97].mxu1 }
 0x53b   : > { %v7429_v33 = vadd.f32 %v9243_v5, %v5615_v37  ;;  %v7267_v12 = vpop.f32.mrb[98].mxu1 }
 0x53c   : > { %v9391_v48 = vadd.f32 %v7426_v18, %v9386_v14  ;;  %v7432_v19 = vadd.f32 %v9261_v11, %v7267_v12  ;;  %v5618_v57 = vpop.f32.mrb[99].mxu1 }
 0x53d   : > { %v9395_v55 = vadd.f32 %v7429_v33, %v9386_v14  ;;  %v7435_v56 = vadd.f32 %v9249_v6, %v5618_v57 }
 0x53e   : > { %v9399_v41 = vadd.f32 %v7432_v19, %v9386_v14 }
 0x53f   : > { %v9402_v17 = vadd.f32 %v7435_v56, %v9386_v14 }
 0x541   : > { %v7270_v53 = vpop.f32.mrb[100].mxu1 }
 0x542   : > { %v7438_v5 = vadd.f32 %v9279_v16, %v7270_v53  ;;  %v5631_v24 = vpop.f32.mrb[101].mxu1 }
 0x543   : > { %v7441_v44 = vadd.f32 %v9267_v13, %v5631_v24  ;;  %v7271_v20 = vpop.f32.mrb[102].mxu1 }
 0x544   : > { %v9407_v11 = vadd.f32 %v7438_v5, %v9386_v14  ;;  %v7444_v62 = vadd.f32 %v9285_v58, %v7271_v20  ;;  %v5634_v35 = vpop.f32.mrb[103].mxu1 }
 0x545   : > { %v9411_v6 = vadd.f32 %v7441_v44, %v9386_v14  ;;  %v7447_v3 = vadd.f32 %v9273_v29, %v5634_v35 }
 0x546   : > { %v9415_v7 = vadd.f32 %v7444_v62, %v9386_v14 }
 0x547   : > { %v9418_v16 = vadd.f32 %v7447_v3, %v9386_v14 }
 0x549   : > { %v7274_v38 = vpop.f32.mrb[104].mxu1 }
 0x54a   : > { %v7450_v13 = vadd.f32 %v9303_v26, %v7274_v38  ;;  %v5647_v60 = vpop.f32.mrb[105].mxu1 }
 0x54b   : > { %v7453_v15 = vadd.f32 %v9291_v8, %v5647_v60  ;;  %v7275_v34 = vpop.f32.mrb[106].mxu1 }
 0x54c   : > { %v9423_v58 = vadd.f32 %v7450_v13, %v9386_v14  ;;  %v7456_v1 = vadd.f32 %v9309_v40, %v7275_v34  ;;  %v5650_v21 = vpop.f32.mrb[107].mxu1 }
 0x54d   : > { %v9427_v29 = vadd.f32 %v7453_v15, %v9386_v14  ;;  %v7459_v30 = vadd.f32 %v9297_v39, %v5650_v21 }
 0x54e   : > { %v9431_v36 = vadd.f32 %v7456_v1, %v9386_v14 }
 0x54f   : > { %v9434_v26 = vadd.f32 %v7459_v30, %v9386_v14 }
 0x551   : > { %v7278_v47 = vpop.f32.mrb[108].mxu1 }
 0x552   : > { %v7462_v8 = vadd.f32 %v9327_v0, %v7278_v47  ;;  %v5663_v32 = vpop.f32.mrb[109].mxu1 }
 0x553   : > { %v7465_v61 = vadd.f32 %v9315_v23, %v5663_v32  ;;  %v7279_v25 = vpop.f32.mrb[110].mxu1 }
 0x554   : > { %v9439_v40 = vadd.f32 %v7462_v8, %v9386_v14  ;;  %v7468_v50 = vadd.f32 %v9333_v42, %v7279_v25  ;;  %v5666_v18 = vpop.f32.mrb[111].mxu1 }
 0x555   : > { %v9443_v39 = vadd.f32 %v7465_v61, %v9386_v14  ;;  %v7471_v37 = vadd.f32 %v9321_v63, %v5666_v18 }
 0x556   : > { %v9447_v33 = vadd.f32 %v7468_v50, %v9386_v14 }
 0x557   : > { %v9450_v0 = vadd.f32 %v7471_v37, %v9386_v14 }
 0x559   : > { %v7282_v12 = vpop.f32.mrb[112].mxu1 }
 0x55a   : > { %v7474_v23 = vadd.f32 %v9342_v27, %v7282_v12  ;;  %v5679_v19 = vpop.f32.mrb[113].mxu1 }
 0x55b   : > { %v7477_v57 = vadd.f32 %v9336_v52, %v5679_v19  ;;  %v7283_v56 = vpop.f32.mrb[114].mxu1 }
 0x55c   : > { %v7480_v42 = vadd.f32 %v9345_v28, %v7283_v56  ;;  %v5682_v53 = vpop.f32.mrb[115].mxu1  ;;  %v5799_v5 = vadd.f32 %v7474_v23, %v9386_v14 }
 0x55d   : > { %v7483_v63 = vadd.f32 %v9339_v2, %v5682_v53  ;;  %v5797_v24 = vadd.f32 %v7477_v57, %v9386_v14 }
 0x55e   : > { %v5800_v44 = vadd.f32 %v7480_v42, %v9386_v14  ;;  %v5831_v20 = vmax.f32 %v5799_v5, 0.0 }
 0x55f   : > { %v5798_v62 = vadd.f32 %v7483_v63, %v9386_v14  ;;  %v5829_v35 = vmax.f32 %v5797_v24, 0.0 }
 0x560   : > { %5865 = vrot.lane.b32.xlu1 %v5831_v20, %s7964_s14  ;;  %v5832_v27 = vmax.f32 %v5800_v44, 0.0 }
 0x561   : > { %v7286_v52 = vpop.f32.mrb[116].mxu1  ;;  %5861 = vrot.lane.b32.xlu0 %v5829_v35, %s7964_s14  ;;  %v5830_v38 = vmax.f32 %v5798_v62, 0.0 }
 0x562   : > { %v7486_v28 = vadd.f32 %v9354_v4, %v7286_v52  ;;  %v5695_v3 = vpop.f32.mrb[117].mxu1 }
 0x563   : > { %v7489_v2 = vadd.f32 %v9348_v22, %v5695_v3  ;;  %v7287_v13 = vpop.f32.mrb[118].mxu1 }
 0x564   : > { %v5803_v60 = vadd.f32 %v7486_v28, %v9386_v14  ;;  %v7492_v15 = vadd.f32 %v9357_v49, %v7287_v13  ;;  %v5698_v34 = vpop.f32.mrb[119].mxu1  ;;  %5867 = vrot.lane.b32.xlu1 %v5832_v27, %s7964_s14 }
 0x565   : > { %v7495_v1 = vadd.f32 %v9351_v31, %v5698_v34  ;;  %5863 = vrot.lane.b32.xlu0 %v5830_v38, %s7964_s14  ;;  %v5801_v4 = vadd.f32 %v7489_v2, %v9386_v14 }
 0x566   : > { %v5835_v21 = vmax.f32 %v5803_v60, 0.0  ;;  %v5804_v30 = vadd.f32 %v7492_v15, %v9386_v14  ;;  %v5814_v15 = vmax.f32 %v9402_v17, 0.0 }
 0x567   : > { %v5802_v22 = vadd.f32 %v7495_v1, %v9386_v14  ;;  %v5833_v61 = vmax.f32 %v5801_v4, 0.0  ;;  %v5820_v4 = vmax.f32 %v9415_v7, 0.0 }
 0x568   : > { %v5836_v47 = vmax.f32 %v5804_v30, 0.0  ;;  %v5819_v30 = vmax.f32 %v9407_v11, 0.0 }
 0x569   : > { %v7290_v8 = vpop.f32.mrb[120].mxu1  ;;  %5873 = vrot.lane.b32.xlu0 %v5835_v21, %s7964_s14  ;;  %v5834_v50 = vmax.f32 %v5802_v22, 0.0 }
 0x56a   : > { %v7498_v49 = vadd.f32 %v9366_v46, %v7290_v8  ;;  %v5711_v32 = vpop.f32.mrb[121].mxu1  ;;  %5875 = vrot.lane.b32.xlu1 %v5836_v47, %s7964_s14  ;;  %v5817_v8 = vmax.f32 %v9411_v6, 0.0 }
 0x56b   : > { %v7501_v31 = vadd.f32 %v9360_v45, %v5711_v32  ;;  %v7291_v25 = vpop.f32.mrb[122].mxu1 }
 0x56c   : > { %v5807_v18 = vadd.f32 %v7498_v49, %v9386_v14  ;;  %v7504_v37 = vadd.f32 %v9369_v10, %v7291_v25  ;;  %v5714_v12 = vpop.f32.mrb[123].mxu1  ;;  %v5818_v49 = vmax.f32 %v9418_v16, 0.0  ;;  %v5824_v25 = vmax.f32 %v9431_v36, 0.0 }
 0x56d   : > { %v7507_v23 = vadd.f32 %v9363_v43, %v5714_v12  ;;  %5869 = vrot.lane.b32.xlu0 %v5833_v61, %s7964_s14  ;;  %v5805_v57 = vadd.f32 %v7501_v31, %v9386_v14  ;;  %v5823_v31 = vmax.f32 %v9423_v58, 0.0  ;;  %v5822_v12 = vmax.f32 %v9434_v26, 0.0 }
 0x56e   : > { %v5839_v19 = vmax.f32 %v5807_v18, 0.0  ;;  %v5808_v46 = vadd.f32 %v7504_v37, %v9386_v14  ;;  %5871 = vrot.lane.b32.xlu1 %v5834_v50, %s7964_s14  ;;  %v5821_v37 = vmax.f32 %v9427_v29, 0.0  ;;  %v5827_v26 = vmax.f32 %v9439_v40, 0.0 }
 0x56f   : > { %v5806_v45 = vadd.f32 %v7507_v23, %v9386_v14  ;;  %v5837_v43 = vmax.f32 %v5805_v57, 0.0 }
 0x570   : > { %v5840_v56 = vmax.f32 %v5808_v46, 0.0  ;;  %v5825_v46 = vmax.f32 %v9443_v39, 0.0 }
 0x571   : > { %v7294_v42 = vpop.f32.mrb[124].mxu1  ;;  %5881 = vrot.lane.b32.xlu0 %v5839_v19, %s7964_s14  ;;  %v5838_v24 = vmax.f32 %v5806_v45, 0.0 }
 0x572   : > { %v7510_v10 = vadd.f32 %v9378_v54, %v7294_v42  ;;  %v5727_v53 = vpop.f32.mrb[125].mxu1  ;;  %5883 = vrot.lane.b32.xlu1 %v5840_v56, %s7964_s14  ;;  %v5826_v56 = vmax.f32 %v9450_v0, 0.0 }
 0x573   : > { %v7513_v5 = vadd.f32 %v9372_v9, %v5727_v53  ;;  %v7295_v63 = vpop.f32.mrb[126].mxu1  ;;  %v5828_v53 = vmax.f32 %v9447_v33, 0.0 }
 0x574   : > { %v7516_v44 = vadd.f32 %v9381_v51, %v7295_v63  ;;  %v5730_v20 = vpop.f32.mrb[127].mxu1  ;;  %v5811_v54 = vadd.f32 %v7510_v10, %v9386_v14 }
 0x575   : > { %v5809_v62 = vadd.f32 %v7513_v5, %v9386_v14  ;;  %v7519_v35 = vadd.f32 %v9375_v59, %v5730_v20  ;;  %5877 = vrot.lane.b32.xlu0 %v5837_v43, %s7964_s14  ;;  %v5815_v59 = vmax.f32 %v9391_v48, 0.0  ;;  %v5816_v48 = vmax.f32 %v9399_v41, 0.0 }
 0x576   : > { %5879 = vrot.lane.b32.xlu1 %v5838_v24, %s7964_s14  ;;  %v5812_v27 = vadd.f32 %v7516_v44, %v9386_v14  ;;  %v5843_v51 = vmax.f32 %v5811_v54, 0.0 }
 0x577   : > { %v5841_v52 = vmax.f32 %v5809_v62, 0.0  ;;  %v5810_v9 = vadd.f32 %v7519_v35, %v9386_v14  ;;  %v5813_v14 = vmax.f32 %v9395_v55, 0.0 }
 0x578   : > { %v5844_v3 = vmax.f32 %v5812_v27, 0.0 }
 0x579   : > { %v5842_v28 = vmax.f32 %v5810_v9, 0.0  ;;  %5885 = vrot.lane.b32.xlu0 %v5841_v52, %s7964_s14 }
 0x57b   : > { %5887 = vrot.lane.b32.xlu1 %v5842_v28, %s7964_s14 }
 0x57d   : > { %5889 = vrot.lane.b32.xlu0 %v5843_v51, %s7964_s14 }
 0x57f   : > { %5891 = vrot.lane.b32.xlu1 %v5844_v3, %s7964_s14 }
 0x5d2   : > { %v5866_v38 = vpop.permute.xlu1 %5865 }
 0x5d3   : > { %v5912_v2 = vsel %vm5909_vm0, %v5815_v59, %v5866_v38  ;;  %v5862_v13 = vpop.permute.xlu0 %5861 }
 0x5d4   : > { %5928 = vst [vmem:[%s9506_s8 + $0x10] sm:$0xff] %v5912_v2  ;;  %v5910_v60 = vsel %vm5909_vm0, %v5813_v14, %v5862_v13 }
 0x5d5   : > { %5926 = vst [vmem:[%s9506_s8] sm:$0xff] %v5910_v60 }
 0x5d6   : > { %v5868_v34 = vpop.permute.xlu1 %5867 }
 0x5d7   : > { %v5913_v1 = vsel %vm5909_vm0, %v5816_v48, %v5868_v34  ;;  %v5864_v21 = vpop.permute.xlu0 %5863 }
 0x5d8   : > { %5929 = vst [vmem:[%s9506_s8 + $0x18] sm:$0xff] %v5913_v1  ;;  %v5911_v55 = vsel %vm5909_vm0, %v5814_v15, %v5864_v21 }
 0x5d9   : > { %5927 = vst [vmem:[%s9506_s8 + $0x8] sm:$0xff] %v5911_v55 }
 0x5db   : > { %v5874_v47 = vpop.permute.xlu0 %5873 }
 0x5dc   : > { %v5916_v41 = vsel %vm5909_vm0, %v5819_v30, %v5874_v47  ;;  %v5876_v22 = vpop.permute.xlu1 %5875 }
 0x5dd   : > { %5932 = vst [vmem:[%s9506_s8 + $0x30] sm:$0xff] %v5916_v41  ;;  %v5917_v17 = vsel %vm5909_vm0, %v5820_v4, %v5876_v22 }
 0x5de   : > { %5933 = vst [vmem:[%s9506_s8 + $0x38] sm:$0xff] %v5917_v17 }
 0x5df   : > { %v5870_v32 = vpop.permute.xlu0 %5869 }
 0x5e0   : > { %v5914_v11 = vsel %vm5909_vm0, %v5817_v8, %v5870_v32  ;;  %v5872_v61 = vpop.permute.xlu1 %5871 }
 0x5e1   : > { %5930 = vst [vmem:[%s9506_s8 + $0x20] sm:$0xff] %v5914_v11  ;;  %v5915_v7 = vsel %vm5909_vm0, %v5818_v49, %v5872_v61 }
 0x5e2   : > { %5931 = vst [vmem:[%s9506_s8 + $0x28] sm:$0xff] %v5915_v7 }
 0x5e3   : > { %v5882_v50 = vpop.permute.xlu0 %5881 }
 0x5e4   : > { %v5920_v6 = vsel %vm5909_vm0, %v5823_v31, %v5882_v50  ;;  %v5884_v18 = vpop.permute.xlu1 %5883 }
 0x5e5   : > { %5936 = vst [vmem:[%s9506_s8 + $0x50] sm:$0xff] %v5920_v6  ;;  %v5921_v16 = vsel %vm5909_vm0, %v5824_v25, %v5884_v18 }
 0x5e6   : > { %5937 = vst [vmem:[%s9506_s8 + $0x58] sm:$0xff] %v5921_v16 }
 0x5e7   : > { %v5878_v23 = vpop.permute.xlu0 %5877 }
 0x5e8   : > { %v5918_v58 = vsel %vm5909_vm0, %v5821_v37, %v5878_v23  ;;  %v5880_v19 = vpop.permute.xlu1 %5879 }
 0x5e9   : > { %5934 = vst [vmem:[%s9506_s8 + $0x40] sm:$0xff] %v5918_v58  ;;  %v5919_v36 = vsel %vm5909_vm0, %v5822_v12, %v5880_v19 }
 0x5ea   : > { %5935 = vst [vmem:[%s9506_s8 + $0x48] sm:$0xff] %v5919_v36 }
 0x5eb   : > { %v5886_v57 = vpop.permute.xlu0 %5885 }
 0x5ec   : > { %v5922_v29 = vsel %vm5909_vm0, %v5825_v46, %v5886_v57 }
 0x5ed   : > { %5938 = vst [vmem:[%s9506_s8 + $0x60] sm:$0xff] %v5922_v29  ;;  %v5888_v45 = vpop.permute.xlu1 %5887 }
 0x5ee   : > { %v5923_v42 = vsel %vm5909_vm0, %v5826_v56, %v5888_v45 }
 0x5ef   : > { %5939 = vst [vmem:[%s9506_s8 + $0x68] sm:$0xff] %v5923_v42  ;;  %v5890_v10 = vpop.permute.xlu0 %5889 }
 0x5f0   : > { %v5924_v43 = vsel %vm5909_vm0, %v5827_v26, %v5890_v10 }
 0x5f1   : > { %5940 = vst [vmem:[%s9506_s8 + $0x70] sm:$0xff] %v5924_v43  ;;  %v5892_v39 = vpop.permute.xlu1 %5891 }
 0x5f2   : > { %v5925_v5 = vsel %vm5909_vm0, %v5828_v53, %v5892_v39 }
 0x5f3   : > { %5941 = vst [vmem:[%s9506_s8 + $0x78] sm:$0xff] %v5925_v5 }
 0x5f4 PF: > { %p16_p9 = scmp.ge.s32.totalorder %s8088_s10, 4   ;;  %s9661_s18 = smov %s7946_s19 }
 0x5f5   : > { %s9662_s19 = smov %s7950_s20  ;;  %s9663_s20 = smov %s8099_s15 }
 0x5f6   : > { %s9664_s21 = smov %s8088_s10  ;;  %18 = sbr.rel (!%p16_p9) target bundleno = 4 (0x4), region = 107 }
 0x5fd   :  { %5963 = vsyncpa [#allocation6], 1 }
 0x5fe   :  { %5965 = vsyncpa [#allocation6 + $0x1], 1 }
 0x5ff   :  { %5966 = vsyncpa [#allocation8], 1 }

</bundles_post_ra>
